<compile_context>
chip_gen: v6e
topology: v6e:2x2x1
jax: 0.10.0
libtpu: 0.0.40
codegen_flags: <defaults>
</compile_context>

<pallas_src>
import jax
import jax.numpy as jnp
from jax.experimental import pallas as pl
from jax.experimental.pallas import tpu as pltpu

LOW_DIM = 128
N_HIDDEN = 256
OUTPUT_DIM = 1024
C_OUT = 64
KH = KW = 7
K_IM2COL = KH * KW          # 49, left unpadded (full-array block)
STRIDE = 2
PAD = 3
H_IN = W_IN = 32
H_OUT = W_OUT = 16
IN_FEAT = C_OUT * H_OUT * W_OUT   # 16384
BN_EPS = 1e-5
L2_EPS = 1e-12
TK = 8192                   # K tile of the 16384 -> 128 linear (2 grid steps)


def _conv_bn_relu_kernel(p_ref, w_ref, gamma_ref, beta_ref, o_ref):
    # p_ref: [B*H_OUT*W_OUT, 49], w_ref: [49, C_OUT]
    y = jnp.dot(p_ref[...], w_ref[...], preferred_element_type=jnp.float32)
    # BatchNorm2d, training-mode semantics (biased batch stats over N, H, W),
    # computed in a single pass: var = E[y^2] - mu^2.
    inv_n = 1.0 / y.shape[0]
    mu = jnp.sum(y, axis=0, keepdims=True) * inv_n
    var = jnp.maximum(jnp.sum(y * y, axis=0, keepdims=True) * inv_n - mu * mu,
                      0.0)                                   # cancellation guard
    y_hat = (y - mu) * jax.lax.rsqrt(var + BN_EPS)           # rsqrt -> EUP slot
    o_ref[...] = jnp.maximum(y_hat * gamma_ref[...] + beta_ref[...], 0.0)


def _encode_decode_kernel(x_ref, w1_ref, b1_ref, w2_ref, b2_ref, w3_ref, b3_ref,
                          lat_ref, out_ref):
    # grid axis = K tiles of the 16384 -> 128 linear (reduction axis).
    k = pl.program_id(0)

    @pl.when(k == 0)
    def _():
        lat_ref[...] = jnp.zeros_like(lat_ref)

    # bf16 weight stream, f32 accumulation on the MXU.
    lat_ref[...] += jnp.dot(x_ref[...].astype(jnp.bfloat16), w1_ref[...],
                            preferred_element_type=jnp.float32)

    @pl.when(k == pl.num_programs(0) - 1)
    def _():
        # finish linear, L2-normalize latent (Normalize(2))
        z = lat_ref[...] + b1_ref[...]
        z = z * jax.lax.rsqrt(jnp.sum(z * z, axis=1, keepdims=True) + L2_EPS)
        lat_ref[...] = z
        # decoder: Linear -> ReLU -> Linear -> Sigmoid, then L2 normalize
        h = jnp.maximum(
            jnp.dot(z, w2_ref[...], preferred_element_type=jnp.float32)
            + b2_ref[...], 0.0)
        y = jnp.dot(h.astype(jnp.bfloat16), w3_ref[...],
                    preferred_element_type=jnp.float32) + b3_ref[...]
        y = jax.nn.sigmoid(y)
        out_ref[...] = y * jax.lax.rsqrt(
            jnp.sum(y * y, axis=1, keepdims=True) + L2_EPS)


def _extract_patches(x):
    # x: [B, 1, 32, 32] NCHW.  Single XLA patch-extraction op; the reshapes
    # around it are pure metadata (channel dim is 1 / row-major collapses).
    B = x.shape[0]
    x_nhwc = x.reshape(B, H_IN, W_IN, 1)
    patches = jax.lax.conv_general_dilated_patches(
        x_nhwc, filter_shape=(KH, KW), window_strides=(STRIDE, STRIDE),
        padding=((PAD, PAD), (PAD, PAD)),
        dimension_numbers=("NHWC", "HWIO", "NHWC"))       # [B, 16, 16, 49]
    return patches.reshape(B * H_OUT * W_OUT, K_IM2COL)   # no lane padding


def chaosdonkey06_ae_forward(x, params, *, single_buffer_consts=True):
    B = x.shape[0]
    patches = _extract_patches(x)                         # [B*256, 49]
    n_rows = patches.shape[0]

    conv_out = pl.pallas_call(
        _conv_bn_relu_kernel,
        out_shape=jax.ShapeDtypeStruct((n_rows, C_OUT), jnp.float32),
        grid=(1,),
        in_specs=[
            pl.BlockSpec((n_rows, K_IM2COL), lambda i: (0, 0)),
            pl.BlockSpec((K_IM2COL, C_OUT), lambda i: (0, 0)),
            pl.BlockSpec((1, C_OUT), lambda i: (0, 0)),
            pl.BlockSpec((1, C_OUT), lambda i: (0, 0)),
        ],
        out_specs=pl.BlockSpec((n_rows, C_OUT), lambda i: (0, 0)),
        compiler_params=pltpu.CompilerParams(dimension_semantics=("arbitrary",)),
    )(patches, params["w_conv"], params["bn_gamma"], params["bn_beta"])

    # torch's x.view(B, -1) NCHW permutation is folded into w1's rows (see
    # init_params), so this is a free row-major metadata reshape:
    # x_flat[b, hw*64 + c] = conv_out[b*256 + hw, c].
    x_flat = conv_out.reshape(B, IN_FEAT)                 # [B, 16384]

    grid_k = IN_FEAT // TK                                # 2 reduction steps

    def const_spec(shape):
        # Operand whose index_map is constant across the reduction grid axis:
        # single-buffer it (double-buffering only wastes VMEM).  Fallback
        # without the hint is selected by the caller if this build rejects it.
        if single_buffer_consts:
            return pl.BlockSpec(shape, lambda k: (0, 0),
                                pipeline_mode=pl.Buffered(1))
        return pl.BlockSpec(shape, lambda k: (0, 0))

    latent, out = pl.pallas_call(
        _encode_decode_kernel,
        out_shape=(jax.ShapeDtypeStruct((B, LOW_DIM), jnp.float32),
                   jax.ShapeDtypeStruct((B, OUTPUT_DIM), jnp.float32)),
        grid=(grid_k,),
        in_specs=[
            pl.BlockSpec((B, TK), lambda k: (0, k)),
            pl.BlockSpec((TK, LOW_DIM), lambda k: (k, 0)),
            const_spec((1, LOW_DIM)),
            const_spec((LOW_DIM, N_HIDDEN)),
            const_spec((1, N_HIDDEN)),
            const_spec((N_HIDDEN, OUTPUT_DIM)),
            const_spec((1, OUTPUT_DIM)),
        ],
        out_specs=(pl.BlockSpec((B, LOW_DIM), lambda k: (0, 0)),
                   pl.BlockSpec((B, OUTPUT_DIM), lambda k: (0, 0))),
        compiler_params=pltpu.CompilerParams(
            dimension_semantics=("arbitrary",),
            vmem_limit_bytes=32 * 1024 * 1024),
    )(x_flat, params["w1"], params["b1"], params["w2"], params["b2"],
      params["w3"], params["b3"])

    return latent, out


def init_params(key):
    ks = jax.random.split(key, 7)

    def nrm(k, shape, scale):
        return jax.random.normal(k, shape, dtype=jnp.float32) * scale

    # torch Conv2d weight is [64, 1, 7, 7] (bias=False); stored here as
    # [49, 64] with row index kh*7 + kw (matching the channel order of
    # conv_general_dilated_patches with C_in=1).  No lane padding.
    w_conv = nrm(ks[0], (C_OUT, KH * KW), 0.05).T                  # [49, 64]

    # torch Linear(16384, 128) weight^T with rows in torch's NCHW-flatten
    # order (c*256 + hw) ...
    w1_torch_t = nrm(ks[1], (IN_FEAT, LOW_DIM), IN_FEAT ** -0.5)
    # ... permuted so row r matches this pipeline's conv-output flatten order
    # (hw*64 + c).  This replaces the runtime NCHW transpose entirely.
    r = jnp.arange(IN_FEAT)
    perm = (r % C_OUT) * (H_OUT * W_OUT) + (r // C_OUT)
    w1 = w1_torch_t[perm].astype(jnp.bfloat16)     # bf16 stream, f32 accumulation

    return {
        "w_conv": w_conv,
        "bn_gamma": jnp.ones((1, C_OUT), jnp.float32),
        "bn_beta": jnp.zeros((1, C_OUT), jnp.float32),
        "w1": w1,
        "b1": nrm(ks[2], (1, LOW_DIM), 0.01),
        "w2": nrm(ks[3], (LOW_DIM, N_HIDDEN), LOW_DIM ** -0.5),
        "b2": nrm(ks[4], (1, N_HIDDEN), 0.01),
        "w3": nrm(ks[5], (N_HIDDEN, OUTPUT_DIM),
                  N_HIDDEN ** -0.5).astype(jnp.bfloat16),
        "b3": nrm(ks[6], (1, OUTPUT_DIM), 0.01),
    }


if __name__ == "__main__":
    key = jax.random.PRNGKey(0)
    kp, kx = jax.random.split(key)
    params = init_params(kp)
    # Input spatial size implied by Linear(64 * 16**2, ...): 32x32, 1 channel.
    x = jax.random.normal(kx, (2, 1, H_IN, W_IN), dtype=jnp.float32)

    fwd = jax.jit(chaosdonkey06_ae_forward,
                  static_argnames=("single_buffer_consts",))
    try:
        latent, out = fwd(x, params, single_buffer_consts=True)
        jax.block_until_ready((latent, out))
    except Exception:
        # pipeline_mode=pl.Buffered(1) not supported by this jax build:
        # retry with default (double-buffered) constant operands.
        latent, out = fwd(x, params, single_buffer_consts=False)
        jax.block_until_ready((latent, out))

    assert latent.shape == (2, LOW_DIM) and out.shape == (2, OUTPUT_DIM)
    assert latent.dtype == jnp.float32 and out.dtype == jnp.float32
    assert bool(jnp.all(jnp.isfinite(latent))) and bool(jnp.all(jnp.isfinite(out)))
    print("KERNEL_OK")
</pallas_src>

<mosaic_0001>
module attributes {stable_mosaic.version = 11 : i64} {
  func.func @_conv_bn_relu_kernel(%arg0: i32, %arg1: memref<512x49xf32, #tpu.memory_space<vmem>>, %arg2: memref<49x64xf32, #tpu.memory_space<vmem>>, %arg3: memref<1x64xf32, #tpu.memory_space<vmem>>, %arg4: memref<1x64xf32, #tpu.memory_space<vmem>>, %arg5: memref<512x64xf32, #tpu.memory_space<vmem>>) attributes {dimension_semantics = [#tpu.dimension_semantics<arbitrary>], iteration_bounds = array<i64: 1>, scalar_prefetch = 0 : i64, scratch_operands = 0 : i64, tpu.core_type = #tpu.core_type<tc>, window_params = [{pipeline_mode = #tpu.pipeline_mode<synchronous>, transform_indices = @transform_0, window_bounds = array<i64: 512, 49>}, {pipeline_mode = #tpu.pipeline_mode<synchronous>, transform_indices = @transform_1, window_bounds = array<i64: 49, 64>}, {pipeline_mode = #tpu.pipeline_mode<synchronous>, transform_indices = @transform_2, window_bounds = array<i64: 1, 64>}, {pipeline_mode = #tpu.pipeline_mode<synchronous>, transform_indices = @transform_3, window_bounds = array<i64: 1, 64>}, {pipeline_mode = #tpu.pipeline_mode<synchronous>, transform_indices = @transform_4, window_bounds = array<i64: 512, 64>}]} {
    %c0 = arith.constant 0 : index
    %c0_0 = arith.constant 0 : index
    %0 = vector.load %arg1[%c0, %c0_0] : memref<512x49xf32, #tpu.memory_space<vmem>>, vector<512x49xf32>
    %c0_1 = arith.constant 0 : index
    %c0_2 = arith.constant 0 : index
    %1 = vector.load %arg2[%c0_1, %c0_2] : memref<49x64xf32, #tpu.memory_space<vmem>>, vector<49x64xf32>
    %cst = arith.constant dense<0.000000e+00> : vector<512x64xf32>
    %2 = tpu.matmul %0, %1, %cst {dimension_numbers = #tpu.dot_dimension_numbers<[1], [0], [0], [1], [0, 0, 1, 1], [], []>} : vector<512x49xf32>, vector<49x64xf32>, vector<512x64xf32> -> vector<512x64xf32>
    %cst_3 = arith.constant dense<0.000000e+00> : vector<64xf32>
    %3 = vector.multi_reduction <add>, %2, %cst_3 [0] : vector<512x64xf32> to vector<64xf32>
    %4 = vector.shape_cast %3 : vector<64xf32> to vector<1x64xf32>
    %cst_4 = arith.constant 0.001953125 : f32
    %5 = vector.broadcast %cst_4 : f32 to vector<1x64xf32>
    %6 = arith.mulf %4, %5 : vector<1x64xf32>
    %7 = arith.mulf %2, %2 : vector<512x64xf32>
    %cst_5 = arith.constant dense<0.000000e+00> : vector<64xf32>
    %8 = vector.multi_reduction <add>, %7, %cst_5 [0] : vector<512x64xf32> to vector<64xf32>
    %9 = vector.shape_cast %8 : vector<64xf32> to vector<1x64xf32>
    %cst_6 = arith.constant 0.001953125 : f32
    %10 = vector.broadcast %cst_6 : f32 to vector<1x64xf32>
    %11 = arith.mulf %9, %10 : vector<1x64xf32>
    %12 = arith.mulf %6, %6 : vector<1x64xf32>
    %13 = arith.subf %11, %12 : vector<1x64xf32>
    %cst_7 = arith.constant 0.000000e+00 : f32
    %14 = vector.broadcast %cst_7 : f32 to vector<1x64xf32>
    %15 = arith.maximumf %13, %14 : vector<1x64xf32>
    %16 = vector.broadcast %6 : vector<1x64xf32> to vector<512x64xf32>
    %17 = arith.subf %2, %16 : vector<512x64xf32>
    %cst_8 = arith.constant 9.99999974E-6 : f32
    %18 = vector.broadcast %cst_8 : f32 to vector<1x64xf32>
    %19 = arith.addf %15, %18 : vector<1x64xf32>
    %20 = math.rsqrt %19 : vector<1x64xf32>
    %21 = vector.broadcast %20 : vector<1x64xf32> to vector<512x64xf32>
    %22 = arith.mulf %17, %21 : vector<512x64xf32>
    %c0_9 = arith.constant 0 : index
    %c0_10 = arith.constant 0 : index
    %23 = vector.load %arg3[%c0_9, %c0_10] : memref<1x64xf32, #tpu.memory_space<vmem>>, vector<1x64xf32>
    %24 = vector.broadcast %23 : vector<1x64xf32> to vector<512x64xf32>
    %25 = arith.mulf %22, %24 : vector<512x64xf32>
    %c0_11 = arith.constant 0 : index
    %c0_12 = arith.constant 0 : index
    %26 = vector.load %arg4[%c0_11, %c0_12] : memref<1x64xf32, #tpu.memory_space<vmem>>, vector<1x64xf32>
    %27 = vector.broadcast %26 : vector<1x64xf32> to vector<512x64xf32>
    %28 = arith.addf %25, %27 : vector<512x64xf32>
    %cst_13 = arith.constant 0.000000e+00 : f32
    %29 = vector.broadcast %cst_13 : f32 to vector<512x64xf32>
    %30 = arith.maximumf %28, %29 : vector<512x64xf32>
    %c0_14 = arith.constant 0 : index
    %c0_15 = arith.constant 0 : index
    %31 = vector.load %arg5[%c0_14, %c0_15] : memref<512x64xf32, #tpu.memory_space<vmem>>, vector<512x64xf32>
    tpu.vector_store %arg5[%c0_14, %c0_15], %30 {strides = array<i32>} : memref<512x64xf32, #tpu.memory_space<vmem>>, vector<512x64xf32>,
    return
  }
  func.func @transform_0(%arg0: i32) -> (i32, i32) {
    %c0_i32 = arith.constant 0 : i32
    %c0_i32_0 = arith.constant 0 : i32
    %c0_i32_1 = arith.constant 0 : i32
    return %c0_i32, %c0_i32_0 : i32, i32
  }
  func.func @transform_1(%arg0: i32) -> (i32, i32) {
    %c0_i32 = arith.constant 0 : i32
    %c0_i32_0 = arith.constant 0 : i32
    %c0_i32_1 = arith.constant 0 : i32
    return %c0_i32, %c0_i32_0 : i32, i32
  }
  func.func @transform_2(%arg0: i32) -> (i32, i32) {
    %c0_i32 = arith.constant 0 : i32
    %c0_i32_0 = arith.constant 0 : i32
    %c0_i32_1 = arith.constant 0 : i32
    return %c0_i32, %c0_i32_0 : i32, i32
  }
  func.func @transform_3(%arg0: i32) -> (i32, i32) {
    %c0_i32 = arith.constant 0 : i32
    %c0_i32_0 = arith.constant 0 : i32
    %c0_i32_1 = arith.constant 0 : i32
    return %c0_i32, %c0_i32_0 : i32, i32
  }
  func.func @transform_4(%arg0: i32) -> (i32, i32) {
    %c0_i32 = arith.constant 0 : i32
    %c0_i32_0 = arith.constant 0 : i32
    %c0_i32_1 = arith.constant 0 : i32
    return %c0_i32, %c0_i32_0 : i32, i32
  }
}

module attributes {stable_mosaic.version = 11 : i64} {
  func.func @_encode_decode_kernel(%arg0: i32, %arg1: memref<2x8192xf32, #tpu.memory_space<vmem>>, %arg2: memref<8192x128xbf16, #tpu.memory_space<vmem>>, %arg3: memref<1x128xf32, #tpu.memory_space<vmem>>, %arg4: memref<128x256xf32, #tpu.memory_space<vmem>>, %arg5: memref<1x256xf32, #tpu.memory_space<vmem>>, %arg6: memref<256x1024xbf16, #tpu.memory_space<vmem>>, %arg7: memref<1x1024xf32, #tpu.memory_space<vmem>>, %arg8: memref<2x128xf32, #tpu.memory_space<vmem>>, %arg9: memref<2x1024xf32, #tpu.memory_space<vmem>>) attributes {dimension_semantics = [#tpu.dimension_semantics<arbitrary>], iteration_bounds = array<i64: 2>, scalar_prefetch = 0 : i64, scratch_operands = 0 : i64, tpu.core_type = #tpu.core_type<tc>, window_params = [{transform_indices = @transform_0, window_bounds = array<i64: 2, 8192>}, {transform_indices = @transform_1, window_bounds = array<i64: 8192, 128>}, {pipeline_mode = #tpu.pipeline_mode<synchronous>, transform_indices = @transform_2, window_bounds = array<i64: 1, 128>}, {pipeline_mode = #tpu.pipeline_mode<synchronous>, transform_indices = @transform_3, window_bounds = array<i64: 128, 256>}, {pipeline_mode = #tpu.pipeline_mode<synchronous>, transform_indices = @transform_4, window_bounds = array<i64: 1, 256>}, {pipeline_mode = #tpu.pipeline_mode<synchronous>, transform_indices = @transform_5, window_bounds = array<i64: 256, 1024>}, {pipeline_mode = #tpu.pipeline_mode<synchronous>, transform_indices = @transform_6, window_bounds = array<i64: 1, 1024>}, {pipeline_mode = #tpu.pipeline_mode<synchronous>, transform_indices = @transform_7, window_bounds = array<i64: 2, 128>}, {pipeline_mode = #tpu.pipeline_mode<synchronous>, transform_indices = @transform_8, window_bounds = array<i64: 2, 1024>}]} {
    %c0_i32 = arith.constant 0 : i32
    %0 = arith.cmpi eq, %arg0, %c0_i32 : i32
    %1 = arith.extui %0 : i1 to i32
    %c0_i32_0 = arith.constant 0 : i32
    %2 = arith.cmpi ne, %1, %c0_i32_0 : i32
    scf.if %2 {
      %cst_9 = arith.constant 0.000000e+00 : f32
      %13 = vector.broadcast %cst_9 : f32 to vector<2x128xf32>
      %c0_10 = arith.constant 0 : index
      %c0_11 = arith.constant 0 : index
      %14 = vector.load %arg8[%c0_10, %c0_11] : memref<2x128xf32, #tpu.memory_space<vmem>>, vector<2x128xf32>
      tpu.vector_store %arg8[%c0_10, %c0_11], %13 {strides = array<i32>} : memref<2x128xf32, #tpu.memory_space<vmem>>, vector<2x128xf32>,
    } else {
    }
    %c0 = arith.constant 0 : index
    %c0_1 = arith.constant 0 : index
    %3 = vector.load %arg8[%c0, %c0_1] : memref<2x128xf32, #tpu.memory_space<vmem>>, vector<2x128xf32>
    %c0_2 = arith.constant 0 : index
    %c0_3 = arith.constant 0 : index
    %4 = vector.load %arg1[%c0_2, %c0_3] : memref<2x8192xf32, #tpu.memory_space<vmem>>, vector<2x8192xf32>
    %5 = arith.truncf %4 : vector<2x8192xf32> to vector<2x8192xbf16>
    %c0_4 = arith.constant 0 : index
    %c0_5 = arith.constant 0 : index
    %6 = vector.load %arg2[%c0_4, %c0_5] : memref<8192x128xbf16, #tpu.memory_space<vmem>>, vector<8192x128xbf16>
    %cst = arith.constant dense<0.000000e+00> : vector<2x128xf32>
    %7 = tpu.matmul %5, %6, %cst {dimension_numbers = #tpu.dot_dimension_numbers<[1], [0], [0], [1], [0, 0, 1, 1], [], []>} : vector<2x8192xbf16>, vector<8192x128xbf16>, vector<2x128xf32> -> vector<2x128xf32>
    %8 = arith.addf %3, %7 : vector<2x128xf32>
    %c0_6 = arith.constant 0 : index
    %c0_7 = arith.constant 0 : index
    %9 = vector.load %arg8[%c0_6, %c0_7] : memref<2x128xf32, #tpu.memory_space<vmem>>, vector<2x128xf32>
    tpu.vector_store %arg8[%c0_6, %c0_7], %8 {strides = array<i32>} : memref<2x128xf32, #tpu.memory_space<vmem>>, vector<2x128xf32>,
    %c1_i32 = arith.constant 1 : i32
    %10 = arith.cmpi eq, %arg0, %c1_i32 : i32
    %11 = arith.extui %10 : i1 to i32
    %c0_i32_8 = arith.constant 0 : i32
    %12 = arith.cmpi ne, %11, %c0_i32_8 : i32
    scf.if %12 {
      %c0_9 = arith.constant 0 : index
      %c0_10 = arith.constant 0 : index
      %13 = vector.load %arg8[%c0_9, %c0_10] : memref<2x128xf32, #tpu.memory_space<vmem>>, vector<2x128xf32>
      %c0_11 = arith.constant 0 : index
      %c0_12 = arith.constant 0 : index
      %14 = vector.load %arg3[%c0_11, %c0_12] : memref<1x128xf32, #tpu.memory_space<vmem>>, vector<1x128xf32>
      %15 = vector.broadcast %14 : vector<1x128xf32> to vector<2x128xf32>
      %16 = arith.addf %13, %15 : vector<2x128xf32>
      %17 = arith.mulf %16, %16 : vector<2x128xf32>
      %cst_13 = arith.constant dense<0.000000e+00> : vector<2xf32>
      %18 = vector.multi_reduction <add>, %17, %cst_13 [1] : vector<2x128xf32> to vector<2xf32>
      %19 = vector.shape_cast %18 : vector<2xf32> to vector<2x1xf32>
      %cst_14 = arith.constant 9.99999996E-13 : f32
      %20 = vector.broadcast %cst_14 : f32 to vector<2x1xf32>
      %21 = arith.addf %19, %20 : vector<2x1xf32>
      %22 = math.rsqrt %21 : vector<2x1xf32>
      %23 = vector.broadcast %22 : vector<2x1xf32> to vector<2x128xf32>
      %24 = arith.mulf %16, %23 : vector<2x128xf32>
      %c0_15 = arith.constant 0 : index
      %c0_16 = arith.constant 0 : index
      %25 = vector.load %arg8[%c0_15, %c0_16] : memref<2x128xf32, #tpu.memory_space<vmem>>, vector<2x128xf32>
      tpu.vector_store %arg8[%c0_15, %c0_16], %24 {strides = array<i32>} : memref<2x128xf32, #tpu.memory_space<vmem>>, vector<2x128xf32>,
      %c0_17 = arith.constant 0 : index
      %c0_18 = arith.constant 0 : index
      %26 = vector.load %arg4[%c0_17, %c0_18] : memref<128x256xf32, #tpu.memory_space<vmem>>, vector<128x256xf32>
      %cst_19 = arith.constant dense<0.000000e+00> : vector<2x256xf32>
      %27 = tpu.matmul %24, %26, %cst_19 {dimension_numbers = #tpu.dot_dimension_numbers<[1], [0], [0], [1], [0, 0, 1, 1], [], []>} : vector<2x128xf32>, vector<128x256xf32>, vector<2x256xf32> -> vector<2x256xf32>
      %c0_20 = arith.constant 0 : index
      %c0_21 = arith.constant 0 : index
      %28 = vector.load %arg5[%c0_20, %c0_21] : memref<1x256xf32, #tpu.memory_space<vmem>>, vector<1x256xf32>
      %29 = vector.broadcast %28 : vector<1x256xf32> to vector<2x256xf32>
      %30 = arith.addf %27, %29 : vector<2x256xf32>
      %cst_22 = arith.constant 0.000000e+00 : f32
      %31 = vector.broadcast %cst_22 : f32 to vector<2x256xf32>
      %32 = arith.maximumf %30, %31 : vector<2x256xf32>
      %33 = arith.truncf %32 : vector<2x256xf32> to vector<2x256xbf16>
      %c0_23 = arith.constant 0 : index
      %c0_24 = arith.constant 0 : index
      %34 = vector.load %arg6[%c0_23, %c0_24] : memref<256x1024xbf16, #tpu.memory_space<vmem>>, vector<256x1024xbf16>
      %cst_25 = arith.constant dense<0.000000e+00> : vector<2x1024xf32>
      %35 = tpu.matmul %33, %34, %cst_25 {dimension_numbers = #tpu.dot_dimension_numbers<[1], [0], [0], [1], [0, 0, 1, 1], [], []>} : vector<2x256xbf16>, vector<256x1024xbf16>, vector<2x1024xf32> -> vector<2x1024xf32>
      %c0_26 = arith.constant 0 : index
      %c0_27 = arith.constant 0 : index
      %36 = vector.load %arg7[%c0_26, %c0_27] : memref<1x1024xf32, #tpu.memory_space<vmem>>, vector<1x1024xf32>
      %37 = vector.broadcast %36 : vector<1x1024xf32> to vector<2x1024xf32>
      %38 = arith.addf %35, %37 : vector<2x1024xf32>
      %39 = arith.negf %38 : vector<2x1024xf32>
      %40 = math.exp %39 : vector<2x1024xf32>
      %cst_28 = arith.constant 1.000000e+00 : f32
      %41 = vector.broadcast %cst_28 : f32 to vector<2x1024xf32>
      %42 = arith.addf %41, %40 : vector<2x1024xf32>
      %43 = arith.divf %41, %42 : vector<2x1024xf32>
      %44 = arith.mulf %43, %43 : vector<2x1024xf32>
      %cst_29 = arith.constant dense<0.000000e+00> : vector<2xf32>
      %45 = vector.multi_reduction <add>, %44, %cst_29 [1] : vector<2x1024xf32> to vector<2xf32>
      %46 = vector.shape_cast %45 : vector<2xf32> to vector<2x1xf32>
      %cst_30 = arith.constant 9.99999996E-13 : f32
      %47 = vector.broadcast %cst_30 : f32 to vector<2x1xf32>
      %48 = arith.addf %46, %47 : vector<2x1xf32>
      %49 = math.rsqrt %48 : vector<2x1xf32>
      %50 = vector.broadcast %49 : vector<2x1xf32> to vector<2x1024xf32>
      %51 = arith.mulf %43, %50 : vector<2x1024xf32>
      %c0_31 = arith.constant 0 : index
      %c0_32 = arith.constant 0 : index
      %52 = vector.load %arg9[%c0_31, %c0_32] : memref<2x1024xf32, #tpu.memory_space<vmem>>, vector<2x1024xf32>
      tpu.vector_store %arg9[%c0_31, %c0_32], %51 {strides = array<i32>} : memref<2x1024xf32, #tpu.memory_space<vmem>>, vector<2x1024xf32>,
    } else {
    }
    return
  }
  func.func @transform_0(%arg0: i32) -> (i32, i32) {
    %c0_i32 = arith.constant 0 : i32
    %c0_i32_0 = arith.constant 0 : i32
    return %c0_i32, %arg0 : i32, i32
  }
  func.func @transform_1(%arg0: i32) -> (i32, i32) {
    %c0_i32 = arith.constant 0 : i32
    %c0_i32_0 = arith.constant 0 : i32
    return %arg0, %c0_i32 : i32, i32
  }
  func.func @transform_2(%arg0: i32) -> (i32, i32) {
    %c0_i32 = arith.constant 0 : i32
    %c0_i32_0 = arith.constant 0 : i32
    %c0_i32_1 = arith.constant 0 : i32
    return %c0_i32, %c0_i32_0 : i32, i32
  }
  func.func @transform_3(%arg0: i32) -> (i32, i32) {
    %c0_i32 = arith.constant 0 : i32
    %c0_i32_0 = arith.constant 0 : i32
    %c0_i32_1 = arith.constant 0 : i32
    return %c0_i32, %c0_i32_0 : i32, i32
  }
  func.func @transform_4(%arg0: i32) -> (i32, i32) {
    %c0_i32 = arith.constant 0 : i32
    %c0_i32_0 = arith.constant 0 : i32
    %c0_i32_1 = arith.constant 0 : i32
    return %c0_i32, %c0_i32_0 : i32, i32
  }
  func.func @transform_5(%arg0: i32) -> (i32, i32) {
    %c0_i32 = arith.constant 0 : i32
    %c0_i32_0 = arith.constant 0 : i32
    %c0_i32_1 = arith.constant 0 : i32
    return %c0_i32, %c0_i32_0 : i32, i32
  }
  func.func @transform_6(%arg0: i32) -> (i32, i32) {
    %c0_i32 = arith.constant 0 : i32
    %c0_i32_0 = arith.constant 0 : i32
    %c0_i32_1 = arith.constant 0 : i32
    return %c0_i32, %c0_i32_0 : i32, i32
  }
  func.func @transform_7(%arg0: i32) -> (i32, i32) {
    %c0_i32 = arith.constant 0 : i32
    %c0_i32_0 = arith.constant 0 : i32
    %c0_i32_1 = arith.constant 0 : i32
    return %c0_i32, %c0_i32_0 : i32, i32
  }
  func.func @transform_8(%arg0: i32) -> (i32, i32) {
    %c0_i32 = arith.constant 0 : i32
    %c0_i32_0 = arith.constant 0 : i32
    %c0_i32_1 = arith.constant 0 : i32
    return %c0_i32, %c0_i32_0 : i32, i32
  }
}

module attributes {stable_mosaic.version = 11 : i64} {
  func.func @_conv_bn_relu_kernel(%arg0: i32, %arg1: memref<512x49xf32, #tpu.memory_space<vmem>>, %arg2: memref<49x64xf32, #tpu.memory_space<vmem>>, %arg3: memref<1x64xf32, #tpu.memory_space<vmem>>, %arg4: memref<1x64xf32, #tpu.memory_space<vmem>>, %arg5: memref<512x64xf32, #tpu.memory_space<vmem>>) attributes {dimension_semantics = [#tpu.dimension_semantics<arbitrary>], iteration_bounds = array<i64: 1>, scalar_prefetch = 0 : i64, scratch_operands = 0 : i64, tpu.core_type = #tpu.core_type<tc>, window_params = [{pipeline_mode = #tpu.pipeline_mode<synchronous>, transform_indices = @transform_0, window_bounds = array<i64: 512, 49>}, {pipeline_mode = #tpu.pipeline_mode<synchronous>, transform_indices = @transform_1, window_bounds = array<i64: 49, 64>}, {pipeline_mode = #tpu.pipeline_mode<synchronous>, transform_indices = @transform_2, window_bounds = array<i64: 1, 64>}, {pipeline_mode = #tpu.pipeline_mode<synchronous>, transform_indices = @transform_3, window_bounds = array<i64: 1, 64>}, {pipeline_mode = #tpu.pipeline_mode<synchronous>, transform_indices = @transform_4, window_bounds = array<i64: 512, 64>}]} {
    %c0 = arith.constant 0 : index
    %c0_0 = arith.constant 0 : index
    %0 = vector.load %arg1[%c0, %c0_0] : memref<512x49xf32, #tpu.memory_space<vmem>>, vector<512x49xf32>
    %c0_1 = arith.constant 0 : index
    %c0_2 = arith.constant 0 : index
    %1 = vector.load %arg2[%c0_1, %c0_2] : memref<49x64xf32, #tpu.memory_space<vmem>>, vector<49x64xf32>
    %cst = arith.constant dense<0.000000e+00> : vector<512x64xf32>
    %2 = tpu.matmul %0, %1, %cst {dimension_numbers = #tpu.dot_dimension_numbers<[1], [0], [0], [1], [0, 0, 1, 1], [], []>} : vector<512x49xf32>, vector<49x64xf32>, vector<512x64xf32> -> vector<512x64xf32>
    %cst_3 = arith.constant dense<0.000000e+00> : vector<64xf32>
    %3 = vector.multi_reduction <add>, %2, %cst_3 [0] : vector<512x64xf32> to vector<64xf32>
    %4 = vector.shape_cast %3 : vector<64xf32> to vector<1x64xf32>
    %cst_4 = arith.constant 0.001953125 : f32
    %5 = vector.broadcast %cst_4 : f32 to vector<1x64xf32>
    %6 = arith.mulf %4, %5 : vector<1x64xf32>
    %7 = arith.mulf %2, %2 : vector<512x64xf32>
    %cst_5 = arith.constant dense<0.000000e+00> : vector<64xf32>
    %8 = vector.multi_reduction <add>, %7, %cst_5 [0] : vector<512x64xf32> to vector<64xf32>
    %9 = vector.shape_cast %8 : vector<64xf32> to vector<1x64xf32>
    %cst_6 = arith.constant 0.001953125 : f32
    %10 = vector.broadcast %cst_6 : f32 to vector<1x64xf32>
    %11 = arith.mulf %9, %10 : vector<1x64xf32>
    %12 = arith.mulf %6, %6 : vector<1x64xf32>
    %13 = arith.subf %11, %12 : vector<1x64xf32>
    %cst_7 = arith.constant 0.000000e+00 : f32
    %14 = vector.broadcast %cst_7 : f32 to vector<1x64xf32>
    %15 = arith.maximumf %13, %14 : vector<1x64xf32>
    %16 = vector.broadcast %6 : vector<1x64xf32> to vector<512x64xf32>
    %17 = arith.subf %2, %16 : vector<512x64xf32>
    %cst_8 = arith.constant 9.99999974E-6 : f32
    %18 = vector.broadcast %cst_8 : f32 to vector<1x64xf32>
    %19 = arith.addf %15, %18 : vector<1x64xf32>
    %20 = math.rsqrt %19 : vector<1x64xf32>
    %21 = vector.broadcast %20 : vector<1x64xf32> to vector<512x64xf32>
    %22 = arith.mulf %17, %21 : vector<512x64xf32>
    %c0_9 = arith.constant 0 : index
    %c0_10 = arith.constant 0 : index
    %23 = vector.load %arg3[%c0_9, %c0_10] : memref<1x64xf32, #tpu.memory_space<vmem>>, vector<1x64xf32>
    %24 = vector.broadcast %23 : vector<1x64xf32> to vector<512x64xf32>
    %25 = arith.mulf %22, %24 : vector<512x64xf32>
    %c0_11 = arith.constant 0 : index
    %c0_12 = arith.constant 0 : index
    %26 = vector.load %arg4[%c0_11, %c0_12] : memref<1x64xf32, #tpu.memory_space<vmem>>, vector<1x64xf32>
    %27 = vector.broadcast %26 : vector<1x64xf32> to vector<512x64xf32>
    %28 = arith.addf %25, %27 : vector<512x64xf32>
    %cst_13 = arith.constant 0.000000e+00 : f32
    %29 = vector.broadcast %cst_13 : f32 to vector<512x64xf32>
    %30 = arith.maximumf %28, %29 : vector<512x64xf32>
    %c0_14 = arith.constant 0 : index
    %c0_15 = arith.constant 0 : index
    %31 = vector.load %arg5[%c0_14, %c0_15] : memref<512x64xf32, #tpu.memory_space<vmem>>, vector<512x64xf32>
    tpu.vector_store %arg5[%c0_14, %c0_15], %30 {strides = array<i32>} : memref<512x64xf32, #tpu.memory_space<vmem>>, vector<512x64xf32>,
    return
  }
  func.func @transform_0(%arg0: i32) -> (i32, i32) {
    %c0_i32 = arith.constant 0 : i32
    %c0_i32_0 = arith.constant 0 : i32
    %c0_i32_1 = arith.constant 0 : i32
    return %c0_i32, %c0_i32_0 : i32, i32
  }
  func.func @transform_1(%arg0: i32) -> (i32, i32) {
    %c0_i32 = arith.constant 0 : i32
    %c0_i32_0 = arith.constant 0 : i32
    %c0_i32_1 = arith.constant 0 : i32
    return %c0_i32, %c0_i32_0 : i32, i32
  }
  func.func @transform_2(%arg0: i32) -> (i32, i32) {
    %c0_i32 = arith.constant 0 : i32
    %c0_i32_0 = arith.constant 0 : i32
    %c0_i32_1 = arith.constant 0 : i32
    return %c0_i32, %c0_i32_0 : i32, i32
  }
  func.func @transform_3(%arg0: i32) -> (i32, i32) {
    %c0_i32 = arith.constant 0 : i32
    %c0_i32_0 = arith.constant 0 : i32
    %c0_i32_1 = arith.constant 0 : i32
    return %c0_i32, %c0_i32_0 : i32, i32
  }
  func.func @transform_4(%arg0: i32) -> (i32, i32) {
    %c0_i32 = arith.constant 0 : i32
    %c0_i32_0 = arith.constant 0 : i32
    %c0_i32_1 = arith.constant 0 : i32
    return %c0_i32, %c0_i32_0 : i32, i32
  }
}

module attributes {stable_mosaic.version = 11 : i64} {
  func.func @_encode_decode_kernel(%arg0: i32, %arg1: memref<2x8192xf32, #tpu.memory_space<vmem>>, %arg2: memref<8192x128xbf16, #tpu.memory_space<vmem>>, %arg3: memref<1x128xf32, #tpu.memory_space<vmem>>, %arg4: memref<128x256xf32, #tpu.memory_space<vmem>>, %arg5: memref<1x256xf32, #tpu.memory_space<vmem>>, %arg6: memref<256x1024xbf16, #tpu.memory_space<vmem>>, %arg7: memref<1x1024xf32, #tpu.memory_space<vmem>>, %arg8: memref<2x128xf32, #tpu.memory_space<vmem>>, %arg9: memref<2x1024xf32, #tpu.memory_space<vmem>>) attributes {dimension_semantics = [#tpu.dimension_semantics<arbitrary>], iteration_bounds = array<i64: 2>, scalar_prefetch = 0 : i64, scratch_operands = 0 : i64, tpu.core_type = #tpu.core_type<tc>, window_params = [{transform_indices = @transform_0, window_bounds = array<i64: 2, 8192>}, {transform_indices = @transform_1, window_bounds = array<i64: 8192, 128>}, {pipeline_mode = #tpu.pipeline_mode<synchronous>, transform_indices = @transform_2, window_bounds = array<i64: 1, 128>}, {pipeline_mode = #tpu.pipeline_mode<synchronous>, transform_indices = @transform_3, window_bounds = array<i64: 128, 256>}, {pipeline_mode = #tpu.pipeline_mode<synchronous>, transform_indices = @transform_4, window_bounds = array<i64: 1, 256>}, {pipeline_mode = #tpu.pipeline_mode<synchronous>, transform_indices = @transform_5, window_bounds = array<i64: 256, 1024>}, {pipeline_mode = #tpu.pipeline_mode<synchronous>, transform_indices = @transform_6, window_bounds = array<i64: 1, 1024>}, {pipeline_mode = #tpu.pipeline_mode<synchronous>, transform_indices = @transform_7, window_bounds = array<i64: 2, 128>}, {pipeline_mode = #tpu.pipeline_mode<synchronous>, transform_indices = @transform_8, window_bounds = array<i64: 2, 1024>}]} {
    %c0_i32 = arith.constant 0 : i32
    %0 = arith.cmpi eq, %arg0, %c0_i32 : i32
    %1 = arith.extui %0 : i1 to i32
    %c0_i32_0 = arith.constant 0 : i32
    %2 = arith.cmpi ne, %1, %c0_i32_0 : i32
    scf.if %2 {
      %cst_9 = arith.constant 0.000000e+00 : f32
      %13 = vector.broadcast %cst_9 : f32 to vector<2x128xf32>
      %c0_10 = arith.constant 0 : index
      %c0_11 = arith.constant 0 : index
      %14 = vector.load %arg8[%c0_10, %c0_11] : memref<2x128xf32, #tpu.memory_space<vmem>>, vector<2x128xf32>
      tpu.vector_store %arg8[%c0_10, %c0_11], %13 {strides = array<i32>} : memref<2x128xf32, #tpu.memory_space<vmem>>, vector<2x128xf32>,
    } else {
    }
    %c0 = arith.constant 0 : index
    %c0_1 = arith.constant 0 : index
    %3 = vector.load %arg8[%c0, %c0_1] : memref<2x128xf32, #tpu.memory_space<vmem>>, vector<2x128xf32>
    %c0_2 = arith.constant 0 : index
    %c0_3 = arith.constant 0 : index
    %4 = vector.load %arg1[%c0_2, %c0_3] : memref<2x8192xf32, #tpu.memory_space<vmem>>, vector<2x8192xf32>
    %5 = arith.truncf %4 : vector<2x8192xf32> to vector<2x8192xbf16>
    %c0_4 = arith.constant 0 : index
    %c0_5 = arith.constant 0 : index
    %6 = vector.load %arg2[%c0_4, %c0_5] : memref<8192x128xbf16, #tpu.memory_space<vmem>>, vector<8192x128xbf16>
    %cst = arith.constant dense<0.000000e+00> : vector<2x128xf32>
    %7 = tpu.matmul %5, %6, %cst {dimension_numbers = #tpu.dot_dimension_numbers<[1], [0], [0], [1], [0, 0, 1, 1], [], []>} : vector<2x8192xbf16>, vector<8192x128xbf16>, vector<2x128xf32> -> vector<2x128xf32>
    %8 = arith.addf %3, %7 : vector<2x128xf32>
    %c0_6 = arith.constant 0 : index
    %c0_7 = arith.constant 0 : index
    %9 = vector.load %arg8[%c0_6, %c0_7] : memref<2x128xf32, #tpu.memory_space<vmem>>, vector<2x128xf32>
    tpu.vector_store %arg8[%c0_6, %c0_7], %8 {strides = array<i32>} : memref<2x128xf32, #tpu.memory_space<vmem>>, vector<2x128xf32>,
    %c1_i32 = arith.constant 1 : i32
    %10 = arith.cmpi eq, %arg0, %c1_i32 : i32
    %11 = arith.extui %10 : i1 to i32
    %c0_i32_8 = arith.constant 0 : i32
    %12 = arith.cmpi ne, %11, %c0_i32_8 : i32
    scf.if %12 {
      %c0_9 = arith.constant 0 : index
      %c0_10 = arith.constant 0 : index
      %13 = vector.load %arg8[%c0_9, %c0_10] : memref<2x128xf32, #tpu.memory_space<vmem>>, vector<2x128xf32>
      %c0_11 = arith.constant 0 : index
      %c0_12 = arith.constant 0 : index
      %14 = vector.load %arg3[%c0_11, %c0_12] : memref<1x128xf32, #tpu.memory_space<vmem>>, vector<1x128xf32>
      %15 = vector.broadcast %14 : vector<1x128xf32> to vector<2x128xf32>
      %16 = arith.addf %13, %15 : vector<2x128xf32>
      %17 = arith.mulf %16, %16 : vector<2x128xf32>
      %cst_13 = arith.constant dense<0.000000e+00> : vector<2xf32>
      %18 = vector.multi_reduction <add>, %17, %cst_13 [1] : vector<2x128xf32> to vector<2xf32>
      %19 = vector.shape_cast %18 : vector<2xf32> to vector<2x1xf32>
      %cst_14 = arith.constant 9.99999996E-13 : f32
      %20 = vector.broadcast %cst_14 : f32 to vector<2x1xf32>
      %21 = arith.addf %19, %20 : vector<2x1xf32>
      %22 = math.rsqrt %21 : vector<2x1xf32>
      %23 = vector.broadcast %22 : vector<2x1xf32> to vector<2x128xf32>
      %24 = arith.mulf %16, %23 : vector<2x128xf32>
      %c0_15 = arith.constant 0 : index
      %c0_16 = arith.constant 0 : index
      %25 = vector.load %arg8[%c0_15, %c0_16] : memref<2x128xf32, #tpu.memory_space<vmem>>, vector<2x128xf32>
      tpu.vector_store %arg8[%c0_15, %c0_16], %24 {strides = array<i32>} : memref<2x128xf32, #tpu.memory_space<vmem>>, vector<2x128xf32>,
      %c0_17 = arith.constant 0 : index
      %c0_18 = arith.constant 0 : index
      %26 = vector.load %arg4[%c0_17, %c0_18] : memref<128x256xf32, #tpu.memory_space<vmem>>, vector<128x256xf32>
      %cst_19 = arith.constant dense<0.000000e+00> : vector<2x256xf32>
      %27 = tpu.matmul %24, %26, %cst_19 {dimension_numbers = #tpu.dot_dimension_numbers<[1], [0], [0], [1], [0, 0, 1, 1], [], []>} : vector<2x128xf32>, vector<128x256xf32>, vector<2x256xf32> -> vector<2x256xf32>
      %c0_20 = arith.constant 0 : index
      %c0_21 = arith.constant 0 : index
      %28 = vector.load %arg5[%c0_20, %c0_21] : memref<1x256xf32, #tpu.memory_space<vmem>>, vector<1x256xf32>
      %29 = vector.broadcast %28 : vector<1x256xf32> to vector<2x256xf32>
      %30 = arith.addf %27, %29 : vector<2x256xf32>
      %cst_22 = arith.constant 0.000000e+00 : f32
      %31 = vector.broadcast %cst_22 : f32 to vector<2x256xf32>
      %32 = arith.maximumf %30, %31 : vector<2x256xf32>
      %33 = arith.truncf %32 : vector<2x256xf32> to vector<2x256xbf16>
      %c0_23 = arith.constant 0 : index
      %c0_24 = arith.constant 0 : index
      %34 = vector.load %arg6[%c0_23, %c0_24] : memref<256x1024xbf16, #tpu.memory_space<vmem>>, vector<256x1024xbf16>
      %cst_25 = arith.constant dense<0.000000e+00> : vector<2x1024xf32>
      %35 = tpu.matmul %33, %34, %cst_25 {dimension_numbers = #tpu.dot_dimension_numbers<[1], [0], [0], [1], [0, 0, 1, 1], [], []>} : vector<2x256xbf16>, vector<256x1024xbf16>, vector<2x1024xf32> -> vector<2x1024xf32>
      %c0_26 = arith.constant 0 : index
      %c0_27 = arith.constant 0 : index
      %36 = vector.load %arg7[%c0_26, %c0_27] : memref<1x1024xf32, #tpu.memory_space<vmem>>, vector<1x1024xf32>
      %37 = vector.broadcast %36 : vector<1x1024xf32> to vector<2x1024xf32>
      %38 = arith.addf %35, %37 : vector<2x1024xf32>
      %39 = arith.negf %38 : vector<2x1024xf32>
      %40 = math.exp %39 : vector<2x1024xf32>
      %cst_28 = arith.constant 1.000000e+00 : f32
      %41 = vector.broadcast %cst_28 : f32 to vector<2x1024xf32>
      %42 = arith.addf %41, %40 : vector<2x1024xf32>
      %43 = arith.divf %41, %42 : vector<2x1024xf32>
      %44 = arith.mulf %43, %43 : vector<2x1024xf32>
      %cst_29 = arith.constant dense<0.000000e+00> : vector<2xf32>
      %45 = vector.multi_reduction <add>, %44, %cst_29 [1] : vector<2x1024xf32> to vector<2xf32>
      %46 = vector.shape_cast %45 : vector<2xf32> to vector<2x1xf32>
      %cst_30 = arith.constant 9.99999996E-13 : f32
      %47 = vector.broadcast %cst_30 : f32 to vector<2x1xf32>
      %48 = arith.addf %46, %47 : vector<2x1xf32>
      %49 = math.rsqrt %48 : vector<2x1xf32>
      %50 = vector.broadcast %49 : vector<2x1xf32> to vector<2x1024xf32>
      %51 = arith.mulf %43, %50 : vector<2x1024xf32>
      %c0_31 = arith.constant 0 : index
      %c0_32 = arith.constant 0 : index
      %52 = vector.load %arg9[%c0_31, %c0_32] : memref<2x1024xf32, #tpu.memory_space<vmem>>, vector<2x1024xf32>
      tpu.vector_store %arg9[%c0_31, %c0_32], %51 {strides = array<i32>} : memref<2x1024xf32, #tpu.memory_space<vmem>>, vector<2x1024xf32>,
    } else {
    }
    return
  }
  func.func @transform_0(%arg0: i32) -> (i32, i32) {
    %c0_i32 = arith.constant 0 : i32
    %c0_i32_0 = arith.constant 0 : i32
    return %c0_i32, %arg0 : i32, i32
  }
  func.func @transform_1(%arg0: i32) -> (i32, i32) {
    %c0_i32 = arith.constant 0 : i32
    %c0_i32_0 = arith.constant 0 : i32
    return %arg0, %c0_i32 : i32, i32
  }
  func.func @transform_2(%arg0: i32) -> (i32, i32) {
    %c0_i32 = arith.constant 0 : i32
    %c0_i32_0 = arith.constant 0 : i32
    %c0_i32_1 = arith.constant 0 : i32
    return %c0_i32, %c0_i32_0 : i32, i32
  }
  func.func @transform_3(%arg0: i32) -> (i32, i32) {
    %c0_i32 = arith.constant 0 : i32
    %c0_i32_0 = arith.constant 0 : i32
    %c0_i32_1 = arith.constant 0 : i32
    return %c0_i32, %c0_i32_0 : i32, i32
  }
  func.func @transform_4(%arg0: i32) -> (i32, i32) {
    %c0_i32 = arith.constant 0 : i32
    %c0_i32_0 = arith.constant 0 : i32
    %c0_i32_1 = arith.constant 0 : i32
    return %c0_i32, %c0_i32_0 : i32, i32
  }
  func.func @transform_5(%arg0: i32) -> (i32, i32) {
    %c0_i32 = arith.constant 0 : i32
    %c0_i32_0 = arith.constant 0 : i32
    %c0_i32_1 = arith.constant 0 : i32
    return %c0_i32, %c0_i32_0 : i32, i32
  }
  func.func @transform_6(%arg0: i32) -> (i32, i32) {
    %c0_i32 = arith.constant 0 : i32
    %c0_i32_0 = arith.constant 0 : i32
    %c0_i32_1 = arith.constant 0 : i32
    return %c0_i32, %c0_i32_0 : i32, i32
  }
  func.func @transform_7(%arg0: i32) -> (i32, i32) {
    %c0_i32 = arith.constant 0 : i32
    %c0_i32_0 = arith.constant 0 : i32
    %c0_i32_1 = arith.constant 0 : i32
    return %c0_i32, %c0_i32_0 : i32, i32
  }
  func.func @transform_8(%arg0: i32) -> (i32, i32) {
    %c0_i32 = arith.constant 0 : i32
    %c0_i32_0 = arith.constant 0 : i32
    %c0_i32_1 = arith.constant 0 : i32
    return %c0_i32, %c0_i32_0 : i32, i32
  }
}

</mosaic_0001>

<bundles_post_ra>
// kernel: chaosdonkey06_ae_forward.2
= control target key start
LH: loop header
LB: loop body
LE: loop exit
PB: predicated region body
PF: predicated region fallthrough
CT: control target
= control target key end

     0   :  { %9 = vsyncpa [#allocation3], 0  ;;  %s3879_s0 = inlined_call_operand.vmem [shape: f32[512,49], index: 0, kind: input, shape index: {}]   ;;  %s3880_s1 = inlined_call_operand.hbm [shape: f32[49,64], index: 1, kind: input, shape index: {}]   ;;  %s3881_s2 = inlined_call_operand.hbm [shape: f32[1,64], index: 2, kind: input, shape index: {}]   ;;  %s3882_s3 = inlined_call_operand.hbm [shape: f32[1,64], index: 3, kind: input, shape index: {}]   ;;  %s3883_s4 = inlined_call_operand.vmem [shape: f32[512,64], index: 4, kind: output, shape index: {}]  }
   0x1   :  { %10 = vsyncpa [#allocation5], 0  ;;  %s1782_s15 = smov [#allocation4]   ;;  %s1783_s17 = smov [#allocation2]  }
   0x2   :  { %s31_s16 = sshll.u32 %s1782_s15, 4  ;;  %s18_s18 = sshll.u32 %s1783_s17, 4  ;;  %s32_s16 = int_to_ptr.vmem [resolvable:$true] %s31_s16  ;;  %s19_s18 = int_to_ptr.vmem [resolvable:$true] %s18_s18 }
   0x3   :  { %s1726_s19 = scalar_lea.vmem %s32_s16, 16  ;;  %s1730_s20 = scalar_lea.vmem %s32_s16, 32 }
   0x4   :  { %p1727_p0 = scmp.ne.s32.totalorder %s32_s16, %s1726_s19  ;;  %p1731_p1 = scmp.lt.s32.totalorder %s32_s16, %s32_s16 }
   0x5   :  { %p1732_p2 = scmp.lt.s32.totalorder %s1730_s20, %s1726_s19 }
   0x7   :  { %p1733_p3 = por %p1732_p2, %p1731_p1 }
   0x9   :  { %p1734_p4 = pnand %p1733_p3, %p1727_p0 }
   0xb   :  { %1737 = shalt.err (!%p1734_p4)
}
   0xc   :  { %34 = dma.hbm_to_vmem [thread:$0]  %s3881_s2, 16, %s32_s16, [#allocation5]  }
   0xd   :  { %s1746_s23 = scalar_lea.vmem %s19_s18, 896  ;;  %p1751_p6 = scmp.lt.s32.totalorder %s19_s18, %s19_s18 }
   0xe   :  { %p1747_p5 = scmp.ne.s32.totalorder %s19_s18, %s1746_s23  ;;  %p1752_p7 = scmp.lt.s32.totalorder %s1746_s23, %s1746_s23 }
  0x10   :  { %p1753_p8 = por %p1752_p7, %p1751_p6 }
  0x12   :  { %p1754_p9 = pnand %p1753_p8, %p1747_p5 }
  0x14   :  { %1757 = shalt.err (!%p1754_p9)
}
  0x15   :  { %s1784_s24 = smov 128   ;;  %s1785_s25 = smov 8  }
  0x16   :  { %24 = dma.hbm_to_vmem [thread:$0]  %s3880_s1, 896, %s19_s18, [#allocation3], %s1784_s24, %s1784_s24, %s1785_s25  }
  0x17   :  { %s1786_s28 = smov [#allocation6]  }
  0x18   :  { %s41_s29 = sshll.u32 %s1786_s28, 4  ;;  %s42_s29 = int_to_ptr.vmem [resolvable:$true] %s41_s29 }
  0x19   :  { %s1766_s30 = scalar_lea.vmem %s42_s29, 16  ;;  %s1770_s5 = scalar_lea.vmem %s42_s29, 32 }
  0x1a   :  { %p1767_p10 = scmp.ne.s32.totalorder %s42_s29, %s1766_s30  ;;  %p1771_p11 = scmp.lt.s32.totalorder %s42_s29, %s42_s29 }
  0x1b   :  { %p1772_p12 = scmp.lt.s32.totalorder %s1770_s5, %s1766_s30 }
  0x1d   :  { %p1773_p13 = por %p1772_p12, %p1771_p11 }
  0x1f   :  { %p1774_p0 = pnand %p1773_p13, %p1767_p10 }
  0x21   :  { %1777 = shalt.err (!%p1774_p0)
}
  0x22   :  { %44 = dma.hbm_to_vmem [thread:$0]  %s3882_s3, 16, %s42_s29, [#allocation5]  }
  0x23   :  { %1778 = dma.done.wait [#allocation3], 896  }
  0x24   :  { %1779 = vsyncadd [#allocation3], 4294966400 }
  0x25   :  { %1780 = dma.done.wait [#allocation5], 32  }
  0x26   :  { %1781 = vsyncadd [#allocation5], 4294967264  ;;  %vm318_vm0 = vcmask 1040384   ;;  %v124_v0 = vld [vmem:[#allocation2 + $0x30] sm:$0x1]  ;;  %v123_v1 = vld [vmem:[#allocation2 + $0x28] sm:$0xff] }
  0x27   :  { %vm125_vm1 = vcmask 400384   ;;  %1587 = vmatprep.subr.msk.mxu0 %vm318_vm0, %v124_v0  ;;  %1697 = vmatprep.subr.msk.mxu1 %vm318_vm0, %v124_v0  ;;  %v122_v2 = vld [vmem:[#allocation2 + $0x20] sm:$0xff]  ;;  %v121_v4 = vld [vmem:[#allocation2 + $0x18] sm:$0xff]  ;;  %v120_v5 = vld [vmem:[#allocation2 + $0x10] sm:$0xff]  ;;  %vm707_vm2 = vcmask 523264  }
  0x28   :  { %1588 = vmatpush3.msk.msra.mxu0 %vm318_vm0, %v124_v0  ;;  %v54_v3 = vld [vmem:[%s3879_s0] sm:$0xff]  ;;  %1704 = vmatpush3.msk.msra.mxu1 %vm318_vm0, %v124_v0  ;;  %v119_v6 = vld [vmem:[#allocation2 + $0x8] sm:$0xff]  ;;  %v56_v9 = vld [vmem:[%s3879_s0 + $0x10] sm:$0xff] }
  0x29   :  { %1589 = vmatprep.subr.mxu0 %v123_v1  ;;  %1601 = vmatprep.mubr.msk.f32.mxu0 %vm125_vm1, %v54_v3  ;;  %v118_v7 = vld [vmem:[#allocation2] sm:$0xff]  ;;  %v55_v8 = vld [vmem:[%s3879_s0 + $0x8] sm:$0xff]  ;;  %v88_v12 = vld [vmem:[%s3879_s0 + $0x110] sm:$0xff] }
  0x2a   :  { %1590 = vmatpush3.msra.mxu0 %v123_v1  ;;  %1698 = vmatprep.subr.mxu1 %v123_v1  ;;  %v86_v10 = vld [vmem:[%s3879_s0 + $0x100] sm:$0xff]  ;;  %v87_v11 = vld [vmem:[%s3879_s0 + $0x108] sm:$0xff]  ;;  %v57_v13 = vld [vmem:[%s3879_s0 + $0x18] sm:$0xff] }
  0x2b   :  { %1591 = vmatprep.subr.mxu0 %v122_v2  ;;  %1705 = vmatpush3.msra.mxu1 %v123_v1  ;;  %v58_v14 = vld [vmem:[%s3879_s0 + $0x20] sm:$0xff]  ;;  %v89_v15 = vld [vmem:[%s3879_s0 + $0x118] sm:$0xff]  ;;  %v59_v17 = vld [vmem:[%s3879_s0 + $0x28] sm:$0xff] }
  0x2c   :  { %1592 = vmatpush3.msra.mxu0 %v122_v2  ;;  %1699 = vmatprep.subr.mxu1 %v122_v2  ;;  %v90_v16 = vld [vmem:[%s3879_s0 + $0x120] sm:$0xff]  ;;  %v60_v18 = vld [vmem:[%s3879_s0 + $0x30] sm:$0xff]  ;;  %v91_v19 = vld [vmem:[%s3879_s0 + $0x128] sm:$0xff] }
  0x2d   :  { %1593 = vmatprep.subr.mxu0 %v121_v4  ;;  %1706 = vmatpush3.msra.mxu1 %v122_v2  ;;  %v92_v20 = vld [vmem:[%s3879_s0 + $0x130] sm:$0xff]  ;;  %v61_v21 = vld [vmem:[%s3879_s0 + $0x38] sm:$0xff]  ;;  %v62_v22 = vld [vmem:[%s3879_s0 + $0x40] sm:$0xff] }
  0x2e   :  { %1594 = vmatpush3.msra.mxu0 %v121_v4  ;;  %1700 = vmatprep.subr.mxu1 %v121_v4  ;;  %v93_v23 = vld [vmem:[%s3879_s0 + $0x138] sm:$0xff]  ;;  %v94_v24 = vld [vmem:[%s3879_s0 + $0x140] sm:$0xff]  ;;  %v63_v25 = vld [vmem:[%s3879_s0 + $0x48] sm:$0xff] }
  0x2f   :  { %1595 = vmatprep.subr.mxu0 %v120_v5  ;;  %1707 = vmatpush3.msra.mxu1 %v121_v4  ;;  %v64_v26 = vld [vmem:[%s3879_s0 + $0x50] sm:$0xff]  ;;  %v95_v27 = vld [vmem:[%s3879_s0 + $0x148] sm:$0xff]  ;;  %v65_v29 = vld [vmem:[%s3879_s0 + $0x58] sm:$0xff] }
  0x30   :  { %1596 = vmatpush3.msra.mxu0 %v120_v5  ;;  %1701 = vmatprep.subr.mxu1 %v120_v5  ;;  %v96_v28 = vld [vmem:[%s3879_s0 + $0x150] sm:$0xff]  ;;  %v66_v30 = vld [vmem:[%s3879_s0 + $0x60] sm:$0xff]  ;;  %v97_v31 = vld [vmem:[%s3879_s0 + $0x158] sm:$0xff] }
  0x31   :  { %1597 = vmatprep.subr.mxu0 %v119_v6  ;;  %1708 = vmatpush3.msra.mxu1 %v120_v5  ;;  %v98_v32 = vld [vmem:[%s3879_s0 + $0x160] sm:$0xff]  ;;  %v67_v33 = vld [vmem:[%s3879_s0 + $0x68] sm:$0xff]  ;;  %v68_v34 = vld [vmem:[%s3879_s0 + $0x70] sm:$0xff] }
  0x32   :  { %1598 = vmatpush3.msra.mxu0 %v119_v6  ;;  %1702 = vmatprep.subr.mxu1 %v119_v6  ;;  %v99_v35 = vld [vmem:[%s3879_s0 + $0x168] sm:$0xff]  ;;  %v100_v36 = vld [vmem:[%s3879_s0 + $0x170] sm:$0xff]  ;;  %v69_v37 = vld [vmem:[%s3879_s0 + $0x78] sm:$0xff] }
  0x33   :  { %1599 = vmatprep.subr.mxu0 %v118_v7  ;;  %1709 = vmatpush3.msra.mxu1 %v119_v6  ;;  %v70_v38 = vld [vmem:[%s3879_s0 + $0x80] sm:$0xff]  ;;  %v101_v39 = vld [vmem:[%s3879_s0 + $0x178] sm:$0xff]  ;;  %v71_v41 = vld [vmem:[%s3879_s0 + $0x88] sm:$0xff] }
  0x34   :  { %1600 = vmatpush3.msra.mxu0 %v118_v7  ;;  %1703 = vmatprep.subr.mxu1 %v118_v7  ;;  %v102_v40 = vld [vmem:[%s3879_s0 + $0x180] sm:$0xff]  ;;  %v72_v42 = vld [vmem:[%s3879_s0 + $0x90] sm:$0xff]  ;;  %v103_v43 = vld [vmem:[%s3879_s0 + $0x188] sm:$0xff] }
  0x35   :  { %1602 = vmatmul.mubr.msk.f32.vlgmr.msra.gmra.mxu0 %vm125_vm1, %v55_v8  ;;  %1710 = vmatpush3.msra.mxu1 %v118_v7  ;;  %v104_v44 = vld [vmem:[%s3879_s0 + $0x190] sm:$0xff]  ;;  %v73_v45 = vld [vmem:[%s3879_s0 + $0x98] sm:$0xff]  ;;  %v74_v46 = vld [vmem:[%s3879_s0 + $0xa0] sm:$0xff] }
  0x36   :  { %1604 = vmatprep.mubr.msk.f32.mxu0 %vm125_vm1, %v56_v9  ;;  %1649 = vmatprep.mubr.msk.f32.mxu1 %vm125_vm1, %v86_v10  ;;  %v105_v47 = vld [vmem:[%s3879_s0 + $0x198] sm:$0xff]  ;;  %v106_v48 = vld [vmem:[%s3879_s0 + $0x1a0] sm:$0xff]  ;;  %v75_v49 = vld [vmem:[%s3879_s0 + $0xa8] sm:$0xff] }
  0x37   :  { %1650 = vmatmul.mubr.msk.f32.vlgmr.msra.gmra.mxu1 %vm125_vm1, %v87_v11  ;;  %v76_v50 = vld [vmem:[%s3879_s0 + $0xb0] sm:$0xff]  ;;  %v107_v51 = vld [vmem:[%s3879_s0 + $0x1a8] sm:$0xff]  ;;  %v77_v53 = vld [vmem:[%s3879_s0 + $0xb8] sm:$0xff] }
  0x38   :  { %1652 = vmatprep.mubr.msk.f32.mxu1 %vm125_vm1, %v88_v12  ;;  %v108_v52 = vld [vmem:[%s3879_s0 + $0x1b0] sm:$0xff]  ;;  %v78_v54 = vld [vmem:[%s3879_s0 + $0xc0] sm:$0xff]  ;;  %v109_v55 = vld [vmem:[%s3879_s0 + $0x1b8] sm:$0xff] }
  0x39   :  { %1605 = vmatmul.mubr.msk.f32.gmra.mxu0 %vm125_vm1, %v57_v13  ;;  %v110_v56 = vld [vmem:[%s3879_s0 + $0x1c0] sm:$0xff]  ;;  %v79_v57 = vld [vmem:[%s3879_s0 + $0xc8] sm:$0xff]  ;;  %v80_v58 = vld [vmem:[%s3879_s0 + $0xd0] sm:$0xff] }
  0x3a   :  { %1607 = vmatprep.mubr.msk.f32.mxu0 %vm125_vm1, %v58_v14  ;;  %v111_v59 = vld [vmem:[%s3879_s0 + $0x1c8] sm:$0xff]  ;;  %v112_v60 = vld [vmem:[%s3879_s0 + $0x1d0] sm:$0xff]  ;;  %v81_v61 = vld [vmem:[%s3879_s0 + $0xd8] sm:$0xff] }
  0x3b   :  { %1653 = vmatmul.mubr.msk.f32.gmra.mxu1 %vm125_vm1, %v89_v15  ;;  %v82_v62 = vld [vmem:[%s3879_s0 + $0xe0] sm:$0xff]  ;;  %v113_v63 = vld [vmem:[%s3879_s0 + $0x1d8] sm:$0xff]  ;;  %v83_v1 = vld [vmem:[%s3879_s0 + $0xe8] sm:$0xff] }
  0x3c   :  { %1655 = vmatprep.mubr.msk.f32.mxu1 %vm125_vm1, %v90_v16  ;;  %v114_v0 = vld [vmem:[%s3879_s0 + $0x1e0] sm:$0xff]  ;;  %v84_v2 = vld [vmem:[%s3879_s0 + $0xf0] sm:$0xff]  ;;  %v115_v3 = vld [vmem:[%s3879_s0 + $0x1e8] sm:$0xff] }
  0x3d   :  { %1608 = vmatmul.mubr.msk.f32.gmra.mxu0 %vm125_vm1, %v59_v17  ;;  %v116_v4 = vld [vmem:[%s3879_s0 + $0x1f0] sm:$0xff]  ;;  %v85_v5 = vld [vmem:[%s3879_s0 + $0xf8] sm:$0xff] }
  0x3e   :  { %1610 = vmatprep.mubr.msk.f32.mxu0 %vm125_vm1, %v60_v18  ;;  %v117_v6 = vld [vmem:[%s3879_s0 + $0x1f8] sm:$0xff] }
  0x3f   :  { %1656 = vmatmul.mubr.msk.f32.gmra.mxu1 %vm125_vm1, %v91_v19 }
  0x40   :  { %1658 = vmatprep.mubr.msk.f32.mxu1 %vm125_vm1, %v92_v20 }
  0x41   :  { %1611 = vmatmul.mubr.msk.f32.gmra.mxu0 %vm125_vm1, %v61_v21 }
  0x42   :  { %1613 = vmatprep.mubr.msk.f32.mxu0 %vm125_vm1, %v62_v22 }
  0x43   :  { %1659 = vmatmul.mubr.msk.f32.gmra.mxu1 %vm125_vm1, %v93_v23 }
  0x44   :  { %1661 = vmatprep.mubr.msk.f32.mxu1 %vm125_vm1, %v94_v24 }
  0x45   :  { %1614 = vmatmul.mubr.msk.f32.gmra.mxu0 %vm125_vm1, %v63_v25 }
  0x46   :  { %1616 = vmatprep.mubr.msk.f32.mxu0 %vm125_vm1, %v64_v26 }
  0x47   :  { %1662 = vmatmul.mubr.msk.f32.gmra.mxu1 %vm125_vm1, %v95_v27 }
  0x48   :  { %1664 = vmatprep.mubr.msk.f32.mxu1 %vm125_vm1, %v96_v28 }
  0x49   :  { %1617 = vmatmul.mubr.msk.f32.gmra.mxu0 %vm125_vm1, %v65_v29 }
  0x4a   :  { %1619 = vmatprep.mubr.msk.f32.mxu0 %vm125_vm1, %v66_v30 }
  0x4b   :  { %1665 = vmatmul.mubr.msk.f32.gmra.mxu1 %vm125_vm1, %v97_v31 }
  0x4c   :  { %1667 = vmatprep.mubr.msk.f32.mxu1 %vm125_vm1, %v98_v32 }
  0x4d   :  { %1620 = vmatmul.mubr.msk.f32.gmra.mxu0 %vm125_vm1, %v67_v33 }
  0x4e   :  { %1622 = vmatprep.mubr.msk.f32.mxu0 %vm125_vm1, %v68_v34 }
  0x4f   :  { %1668 = vmatmul.mubr.msk.f32.gmra.mxu1 %vm125_vm1, %v99_v35 }
  0x50   :  { %1670 = vmatprep.mubr.msk.f32.mxu1 %vm125_vm1, %v100_v36 }
  0x51   :  { %1623 = vmatmul.mubr.msk.f32.gmra.mxu0 %vm125_vm1, %v69_v37 }
  0x52   :  { %1625 = vmatprep.mubr.msk.f32.mxu0 %vm125_vm1, %v70_v38 }
  0x53   :  { %1671 = vmatmul.mubr.msk.f32.gmra.mxu1 %vm125_vm1, %v101_v39 }
  0x54   :  { %1673 = vmatprep.mubr.msk.f32.mxu1 %vm125_vm1, %v102_v40 }
  0x55   :  { %1626 = vmatmul.mubr.msk.f32.gmra.mxu0 %vm125_vm1, %v71_v41 }
  0x56   :  { %1628 = vmatprep.mubr.msk.f32.mxu0 %vm125_vm1, %v72_v42 }
  0x57   :  { %1674 = vmatmul.mubr.msk.f32.gmra.mxu1 %vm125_vm1, %v103_v43 }
  0x58   :  { %1676 = vmatprep.mubr.msk.f32.mxu1 %vm125_vm1, %v104_v44 }
  0x59   :  { %1629 = vmatmul.mubr.msk.f32.gmra.mxu0 %vm125_vm1, %v73_v45 }
  0x5a   :  { %1631 = vmatprep.mubr.msk.f32.mxu0 %vm125_vm1, %v74_v46 }
  0x5b   :  { %1677 = vmatmul.mubr.msk.f32.gmra.mxu1 %vm125_vm1, %v105_v47 }
  0x5c   :  { %1679 = vmatprep.mubr.msk.f32.mxu1 %vm125_vm1, %v106_v48 }
  0x5d   :  { %1632 = vmatmul.mubr.msk.f32.gmra.mxu0 %vm125_vm1, %v75_v49 }
  0x5e   :  { %1634 = vmatprep.mubr.msk.f32.mxu0 %vm125_vm1, %v76_v50 }
  0x5f   :  { %1680 = vmatmul.mubr.msk.f32.gmra.mxu1 %vm125_vm1, %v107_v51 }
  0x60   :  { %1682 = vmatprep.mubr.msk.f32.mxu1 %vm125_vm1, %v108_v52 }
  0x61   :  { %1635 = vmatmul.mubr.msk.f32.gmra.mxu0 %vm125_vm1, %v77_v53 }
  0x62   :  { %1637 = vmatprep.mubr.msk.f32.mxu0 %vm125_vm1, %v78_v54 }
  0x63   :  { %1683 = vmatmul.mubr.msk.f32.gmra.mxu1 %vm125_vm1, %v109_v55 }
  0x64   :  { %1685 = vmatprep.mubr.msk.f32.mxu1 %vm125_vm1, %v110_v56 }
  0x65   :  { %1638 = vmatmul.mubr.msk.f32.gmra.mxu0 %vm125_vm1, %v79_v57 }
  0x66   :  { %1640 = vmatprep.mubr.msk.f32.mxu0 %vm125_vm1, %v80_v58 }
  0x67   :  { %1686 = vmatmul.mubr.msk.f32.gmra.mxu1 %vm125_vm1, %v111_v59 }
  0x68   :  { %1688 = vmatprep.mubr.msk.f32.mxu1 %vm125_vm1, %v112_v60 }
  0x69   :  { %1641 = vmatmul.mubr.msk.f32.gmra.mxu0 %vm125_vm1, %v81_v61 }
  0x6a   :  { %1643 = vmatprep.mubr.msk.f32.mxu0 %vm125_vm1, %v82_v62 }
  0x6b   :  { %1689 = vmatmul.mubr.msk.f32.gmra.mxu1 %vm125_vm1, %v113_v63 }
  0x6c   :  { %1691 = vmatprep.mubr.msk.f32.mxu1 %vm125_vm1, %v114_v0 }
  0x6d   :  { %1644 = vmatmul.mubr.msk.f32.gmra.mxu0 %vm125_vm1, %v83_v1 }
  0x6e   :  { %1646 = vmatprep.mubr.msk.f32.mxu0 %vm125_vm1, %v84_v2 }
  0x6f   :  { %1692 = vmatmul.mubr.msk.f32.gmra.mxu1 %vm125_vm1, %v115_v3 }
  0x70   :  { %1694 = vmatprep.mubr.msk.f32.mxu1 %vm125_vm1, %v116_v4 }
  0x71   :  { %1647 = vmatmul.mubr.msk.f32.gmra.mxu0 %vm125_vm1, %v85_v5 }
  0x73   :  { %1695 = vmatmul.mubr.msk.f32.gmra.mxu1 %vm125_vm1, %v117_v6 }
  0xf5   :  { %v2077_v7 = vpop.f32.mrf.mxu0 }
  0xf6   :  { %v843_v10 = vmul.f32 %v2077_v7, %v2077_v7  ;;  %v709_v15 = vsel %vm707_vm2, %v2077_v7, 0.0 }
  0xf7   :  { %v2079_v8 = vpop.f32.mrf.mxu0  ;;  %v2081_v9 = vpop.f32.mrf.mxu1 }
  0xf8   :  { %3933 = vst [vmem:[#allocation9_spill] sm:$0xff] %v2081_v9  ;;  %v708_v11 = vsel %vm707_vm2, %v2079_v8, 0.0  ;;  %v842_v12 = vmul.f32 %v2079_v8, %v2079_v8  ;;  %v907_v20 = vsel %vm707_vm2, %v843_v10, 0.0 }
  0xf9   :  { %v2089_v13 = vpop.f32.mrf.mxu0  ;;  %v2091_v14 = vpop.f32.mrf.mxu1  ;;  %v710_v17 = vadd.f32 %v709_v15, %v708_v11 }
  0xfa   :  { %v906_v16 = vsel %vm707_vm2, %v842_v12, 0.0  ;;  %v845_v21 = vmul.f32 %v2089_v13, %v2089_v13  ;;  %v713_v27 = vsel %vm707_vm2, %v2089_v13, 0.0 }
  0xfb   :  { %v2096_v18 = vpop.f32.mrf.mxu0  ;;  %v2098_v19 = vpop.f32.mrf.mxu1  ;;  %v908_v24 = vadd.f32 %v907_v20, %v906_v16 }
  0xfc   :  { %3934 = vst [vmem:[#allocation10_spill] sm:$0xff] %v2098_v19  ;;  %v711_v22 = vsel %vm707_vm2, %v2096_v18, 0.0  ;;  %v844_v23 = vmul.f32 %v2096_v18, %v2096_v18  ;;  %v911_v33 = vsel %vm707_vm2, %v845_v21, 0.0 }
  0xfd   :  { %v712_v25 = vadd.f32 %v711_v22, %v710_v17  ;;  %v2107_v26 = vpop.f32.mrf.mxu0  ;;  %v2114_v32 = vpop.f32.mrf.mxu1 }
  0xfe   :  { %v909_v28 = vsel %vm707_vm2, %v844_v23, 0.0  ;;  %v847_v34 = vmul.f32 %v2107_v26, %v2107_v26  ;;  %v717_v40 = vsel %vm707_vm2, %v2107_v26, 0.0 }
  0xff   :  { %v910_v29 = vadd.f32 %v909_v28, %v908_v24  ;;  %v2112_v30 = vpop.f32.mrf.mxu0  ;;  %v714_v31 = vadd.f32 %v713_v27, %v712_v25  ;;  %v2130_v45 = vpop.f32.mrf.mxu1 }
 0x100   :  { %v715_v35 = vsel %vm707_vm2, %v2112_v30, 0.0  ;;  %v846_v36 = vmul.f32 %v2112_v30, %v2112_v30  ;;  %3935 = vst [vmem:[#allocation11_spill] sm:$0xff] %v2130_v45  ;;  %v915_v46 = vsel %vm707_vm2, %v847_v34, 0.0 }
 0x101   :  { %v716_v37 = vadd.f32 %v715_v35, %v714_v31  ;;  %v912_v38 = vadd.f32 %v911_v33, %v910_v29  ;;  %v2123_v39 = vpop.f32.mrf.mxu0  ;;  %v2146_v58 = vpop.f32.mrf.mxu1 }
 0x102   :  { %v913_v41 = vsel %vm707_vm2, %v846_v36, 0.0  ;;  %v849_v47 = vmul.f32 %v2123_v39, %v2123_v39  ;;  %v721_v53 = vsel %vm707_vm2, %v2123_v39, 0.0 }
 0x103   :  { %v914_v42 = vadd.f32 %v913_v41, %v912_v38  ;;  %v2128_v43 = vpop.f32.mrf.mxu0  ;;  %v718_v44 = vadd.f32 %v717_v40, %v716_v37  ;;  %v2162_v10 = vpop.f32.mrf.mxu1 }
 0x104   :  { %v719_v48 = vsel %vm707_vm2, %v2128_v43, 0.0  ;;  %v848_v49 = vmul.f32 %v2128_v43, %v2128_v43  ;;  %v919_v59 = vsel %vm707_vm2, %v849_v47, 0.0  ;;  %3936 = vst [vmem:[#allocation12_spill] sm:$0xff] %v2162_v10 }
 0x105   :  { %v720_v50 = vadd.f32 %v719_v48, %v718_v44  ;;  %v916_v51 = vadd.f32 %v915_v46, %v914_v42  ;;  %v2139_v52 = vpop.f32.mrf.mxu0  ;;  %v2178_v28 = vpop.f32.mrf.mxu1 }
 0x106   :  { %v917_v54 = vsel %vm707_vm2, %v848_v49, 0.0  ;;  %v851_v60 = vmul.f32 %v2139_v52, %v2139_v52  ;;  %v725_v2 = vsel %vm707_vm2, %v2139_v52, 0.0 }
 0x107   :  { %v918_v55 = vadd.f32 %v917_v54, %v916_v51  ;;  %v2144_v56 = vpop.f32.mrf.mxu0  ;;  %v722_v57 = vadd.f32 %v721_v53, %v720_v50  ;;  %v2194_v46 = vpop.f32.mrf.mxu1 }
 0x108   :  { %v723_v61 = vsel %vm707_vm2, %v2144_v56, 0.0  ;;  %v850_v62 = vmul.f32 %v2144_v56, %v2144_v56  ;;  %v923_v11 = vsel %vm707_vm2, %v851_v60, 0.0  ;;  %3937 = vst [vmem:[#allocation13_spill] sm:$0xff] %v2194_v46 }
 0x109   :  { %v724_v63 = vadd.f32 %v723_v61, %v722_v57  ;;  %v920_v0 = vadd.f32 %v919_v59, %v918_v55  ;;  %v2155_v1 = vpop.f32.mrf.mxu0 }
 0x10a   :  { %v921_v3 = vsel %vm707_vm2, %v850_v62, 0.0  ;;  %v853_v12 = vmul.f32 %v2155_v1, %v2155_v1  ;;  %v729_v22 = vsel %vm707_vm2, %v2155_v1, 0.0  ;;  %v2210_v62 = vpop.f32.mrf.mxu1 }
 0x10b   :  { %v922_v4 = vadd.f32 %v921_v3, %v920_v0  ;;  %v2160_v5 = vpop.f32.mrf.mxu0  ;;  %v726_v6 = vadd.f32 %v725_v2, %v724_v63 }
 0x10c   :  { %v727_v15 = vsel %vm707_vm2, %v2160_v5, 0.0  ;;  %v852_v16 = vmul.f32 %v2160_v5, %v2160_v5  ;;  %v927_v29 = vsel %vm707_vm2, %v853_v12, 0.0 }
 0x10d   :  { %v728_v17 = vadd.f32 %v727_v15, %v726_v6  ;;  %v924_v20 = vadd.f32 %v923_v11, %v922_v4  ;;  %v2171_v21 = vpop.f32.mrf.mxu0 }
 0x10e   :  { %v925_v23 = vsel %vm707_vm2, %v852_v16, 0.0  ;;  %v855_v31 = vmul.f32 %v2171_v21, %v2171_v21  ;;  %v733_v38 = vsel %vm707_vm2, %v2171_v21, 0.0 }
 0x10f   :  { %v926_v24 = vadd.f32 %v925_v23, %v924_v20  ;;  %v2176_v25 = vpop.f32.mrf.mxu0  ;;  %v730_v27 = vadd.f32 %v729_v22, %v728_v17  ;;  %v2226_v22 = vpop.f32.mrf.mxu1 }
 0x110   :  { %v731_v33 = vsel %vm707_vm2, %v2176_v25, 0.0  ;;  %v854_v34 = vmul.f32 %v2176_v25, %v2176_v25  ;;  %v931_v47 = vsel %vm707_vm2, %v855_v31, 0.0  ;;  %3938 = vst [vmem:[#allocation14_spill] sm:$0xff] %v2226_v22 }
 0x111   :  { %v732_v35 = vadd.f32 %v731_v33, %v730_v27  ;;  %v928_v36 = vadd.f32 %v927_v29, %v926_v24  ;;  %v2187_v37 = vpop.f32.mrf.mxu0 }
 0x112   :  { %v929_v40 = vsel %vm707_vm2, %v854_v34, 0.0  ;;  %v857_v48 = vmul.f32 %v2187_v37, %v2187_v37  ;;  %v737_v55 = vsel %vm707_vm2, %v2187_v37, 0.0 }
 0x113   :  { %v930_v41 = vadd.f32 %v929_v40, %v928_v36  ;;  %v2192_v42 = vpop.f32.mrf.mxu0  ;;  %v734_v44 = vadd.f32 %v733_v38, %v732_v35 }
 0x114   :  { %v735_v49 = vsel %vm707_vm2, %v2192_v42, 0.0  ;;  %v856_v50 = vmul.f32 %v2192_v42, %v2192_v42  ;;  %v935_v63 = vsel %vm707_vm2, %v857_v48, 0.0 }
 0x115   :  { %v736_v51 = vadd.f32 %v735_v49, %v734_v44  ;;  %v932_v53 = vadd.f32 %v931_v47, %v930_v41  ;;  %v2203_v54 = vpop.f32.mrf.mxu0  ;;  %v2242_v44 = vpop.f32.mrf.mxu1 }
 0x116   :  { %v933_v57 = vsel %vm707_vm2, %v856_v50, 0.0  ;;  %v859_v0 = vmul.f32 %v2203_v54, %v2203_v54  ;;  %v741_v12 = vsel %vm707_vm2, %v2203_v54, 0.0 }
 0x117   :  { %v934_v59 = vadd.f32 %v933_v57, %v932_v53  ;;  %v2208_v60 = vpop.f32.mrf.mxu0  ;;  %v738_v61 = vadd.f32 %v737_v55, %v736_v51 }
 0x118   :  { %v739_v2 = vsel %vm707_vm2, %v2208_v60, 0.0  ;;  %v858_v3 = vmul.f32 %v2208_v60, %v2208_v60  ;;  %v939_v23 = vsel %vm707_vm2, %v859_v0, 0.0 }
 0x119   :  { %v740_v4 = vadd.f32 %v739_v2, %v738_v61  ;;  %v936_v6 = vadd.f32 %v935_v63, %v934_v59  ;;  %v2219_v11 = vpop.f32.mrf.mxu0  ;;  %v2258_v2 = vpop.f32.mrf.mxu1 }
 0x11a   :  { %v937_v15 = vsel %vm707_vm2, %v858_v3, 0.0  ;;  %v861_v24 = vmul.f32 %v2219_v11, %v2219_v11  ;;  %v745_v35 = vsel %vm707_vm2, %v2219_v11, 0.0  ;;  %3939 = vst [vmem:[#allocation15_spill] sm:$0xff] %v2258_v2 }
 0x11b   :  { %v938_v16 = vadd.f32 %v937_v15, %v936_v6  ;;  %v2224_v17 = vpop.f32.mrf.mxu0  ;;  %v742_v20 = vadd.f32 %v741_v12, %v740_v4 }
 0x11c   :  { %v743_v27 = vsel %vm707_vm2, %v2224_v17, 0.0  ;;  %v860_v29 = vmul.f32 %v2224_v17, %v2224_v17  ;;  %v943_v47 = vsel %vm707_vm2, %v861_v24, 0.0 }
 0x11d   :  { %v744_v31 = vadd.f32 %v743_v27, %v742_v20  ;;  %v940_v33 = vadd.f32 %v939_v23, %v938_v16  ;;  %v2235_v34 = vpop.f32.mrf.mxu0 }
 0x11e   :  { %v941_v36 = vsel %vm707_vm2, %v860_v29, 0.0  ;;  %v863_v48 = vmul.f32 %v2235_v34, %v2235_v34  ;;  %v749_v57 = vsel %vm707_vm2, %v2235_v34, 0.0 }
 0x11f   :  { %v942_v38 = vadd.f32 %v941_v36, %v940_v33  ;;  %v2240_v40 = vpop.f32.mrf.mxu0  ;;  %v746_v41 = vadd.f32 %v745_v35, %v744_v31  ;;  %v2274_v33 = vpop.f32.mrf.mxu1 }
 0x120   :  { %v747_v49 = vsel %vm707_vm2, %v2240_v40, 0.0  ;;  %v862_v50 = vmul.f32 %v2240_v40, %v2240_v40  ;;  %v947_v3 = vsel %vm707_vm2, %v863_v48, 0.0 }
 0x121   :  { %v748_v51 = vadd.f32 %v747_v49, %v746_v41  ;;  %v944_v53 = vadd.f32 %v943_v47, %v942_v38  ;;  %v2251_v55 = vpop.f32.mrf.mxu0 }
 0x122   :  { %v945_v59 = vsel %vm707_vm2, %v862_v50, 0.0  ;;  %v865_v4 = vmul.f32 %v2251_v55, %v2251_v55  ;;  %v753_v23 = vsel %vm707_vm2, %v2251_v55, 0.0 }
 0x123   :  { %v946_v61 = vadd.f32 %v945_v59, %v944_v53  ;;  %v2256_v63 = vpop.f32.mrf.mxu0  ;;  %v750_v0 = vadd.f32 %v749_v57, %v748_v51 }
 0x124   :  { %v751_v6 = vsel %vm707_vm2, %v2256_v63, 0.0  ;;  %v864_v12 = vmul.f32 %v2256_v63, %v2256_v63  ;;  %v951_v35 = vsel %vm707_vm2, %v865_v4, 0.0 }
 0x125   :  { %v752_v15 = vadd.f32 %v751_v6, %v750_v0  ;;  %v948_v16 = vadd.f32 %v947_v3, %v946_v61  ;;  %v2267_v20 = vpop.f32.mrf.mxu0  ;;  %v2290_v61 = vpop.f32.mrf.mxu1 }
 0x126   :  { %v949_v24 = vsel %vm707_vm2, %v864_v12, 0.0  ;;  %v867_v36 = vmul.f32 %v2267_v20, %v2267_v20  ;;  %v757_v50 = vsel %vm707_vm2, %v2267_v20, 0.0  ;;  %3940 = vst [vmem:[#allocation16_spill] sm:$0xff] %v2290_v61 }
 0x127   :  { %v950_v27 = vadd.f32 %v949_v24, %v948_v16  ;;  %v2272_v29 = vpop.f32.mrf.mxu0  ;;  %v754_v31 = vadd.f32 %v753_v23, %v752_v15 }
 0x128   :  { %v755_v38 = vsel %vm707_vm2, %v2272_v29, 0.0  ;;  %v866_v41 = vmul.f32 %v2272_v29, %v2272_v29  ;;  %v955_v0 = vsel %vm707_vm2, %v867_v36, 0.0  ;;  %v2306_v36 = vpop.f32.mrf.mxu1 }
 0x129   :  { %v756_v47 = vadd.f32 %v755_v38, %v754_v31  ;;  %v952_v48 = vadd.f32 %v951_v35, %v950_v27  ;;  %v2283_v49 = vpop.f32.mrf.mxu0 }
 0x12a   :  { %v953_v51 = vsel %vm707_vm2, %v866_v41, 0.0  ;;  %v869_v3 = vmul.f32 %v2283_v49, %v2283_v49  ;;  %v761_v23 = vsel %vm707_vm2, %v2283_v49, 0.0 }
 0x12b   :  { %v954_v53 = vadd.f32 %v953_v51, %v952_v48  ;;  %v2288_v57 = vpop.f32.mrf.mxu0  ;;  %v758_v59 = vadd.f32 %v757_v50, %v756_v47 }
 0x12c   :  { %v759_v4 = vsel %vm707_vm2, %v2288_v57, 0.0  ;;  %v868_v6 = vmul.f32 %v2288_v57, %v2288_v57  ;;  %v959_v38 = vsel %vm707_vm2, %v869_v3, 0.0 }
 0x12d   :  { %v760_v12 = vadd.f32 %v759_v4, %v758_v59  ;;  %v956_v15 = vadd.f32 %v955_v0, %v954_v53  ;;  %v2299_v16 = vpop.f32.mrf.mxu0 }
 0x12e   :  { %3941 = vst [vmem:[#allocation17_spill] sm:$0xff] %v2299_v16  ;;  %v957_v24 = vsel %vm707_vm2, %v868_v6, 0.0  ;;  %v871_v41 = vmul.f32 %v2299_v16, %v2299_v16  ;;  %v765_v59 = vsel %vm707_vm2, %v2299_v16, 0.0  ;;  %v875_v16 = vmul.f32 %v2081_v9, %v2081_v9 }
 0x12f   :  { %v958_v27 = vadd.f32 %v957_v24, %v956_v15  ;;  %v2304_v31 = vpop.f32.mrf.mxu0  ;;  %v762_v35 = vadd.f32 %v761_v23, %v760_v12  ;;  %v2322_v12 = vpop.f32.mrf.mxu1 }
 0x130   :  { %v763_v47 = vsel %vm707_vm2, %v2304_v31, 0.0  ;;  %v870_v48 = vmul.f32 %v2304_v31, %v2304_v31  ;;  %3943 = vst [vmem:[#allocation19_spill] sm:$0xff] %v2322_v12  ;;  %v963_v15 = vsel %vm707_vm2, %v871_v41, 0.0 }
 0x131   :  { %v764_v50 = vadd.f32 %v763_v47, %v762_v35  ;;  %v960_v51 = vadd.f32 %v959_v38, %v958_v27  ;;  %v2315_v53 = vpop.f32.mrf.mxu0 }
 0x132   :  { %3942 = vst [vmem:[#allocation18_spill] sm:$0xff] %v2315_v53  ;;  %v961_v0 = vsel %vm707_vm2, %v870_v48, 0.0  ;;  %v873_v23 = vmul.f32 %v2315_v53, %v2315_v53  ;;  %v769_v47 = vsel %vm707_vm2, %v2315_v53, 0.0  ;;  %v877_v53 = vmul.f32 %v2098_v19, %v2098_v19 }
 0x133   :  { %v962_v4 = vadd.f32 %v961_v0, %v960_v51  ;;  %v2320_v3 = vpop.f32.mrf.mxu0  ;;  %v766_v6 = vadd.f32 %v765_v59, %v764_v50  ;;  %v874_v50 = vmul.f32 %v2091_v14, %v2091_v14  ;;  %v2336_v59 = vpop.f32.mrf.mxu1 }
 0x134   :  { %v767_v24 = vsel %vm707_vm2, %v2320_v3, 0.0  ;;  %v872_v27 = vmul.f32 %v2320_v3, %v2320_v3  ;;  %3944 = vst [vmem:[#allocation20_spill] sm:$0xff] %v2336_v59  ;;  %v967_v0 = vsel %vm707_vm2, %v873_v23, 0.0  ;;  %v971_v23 = vsel %vm707_vm2, %v875_v16, 0.0 }
 0x135   :  { %v768_v35 = vadd.f32 %v767_v24, %v766_v6  ;;  %v964_v38 = vadd.f32 %v963_v15, %v962_v4  ;;  %v771_v4 = vsel %vm707_vm2, %v2091_v14, 0.0  ;;  %v773_v24 = vsel %vm707_vm2, %v2081_v9, 0.0 }
 0x136   :  { %v965_v48 = vsel %vm707_vm2, %v872_v27, 0.0  ;;  %v969_v27 = vsel %vm707_vm2, %v874_v50, 0.0  ;;  %v777_v50 = vsel %vm707_vm2, %v2098_v19, 0.0  ;;  %v975_v16 = vsel %vm707_vm2, %v877_v53, 0.0 }
 0x137   :  { %v770_v41 = vadd.f32 %v769_v47, %v768_v35  ;;  %v966_v51 = vadd.f32 %v965_v48, %v964_v38  ;;  %v876_v35 = vmul.f32 %v2114_v32, %v2114_v32  ;;  %v2348_v48 = vpop.f32.mrf.mxu1  ;;  %v879_v9 = vmul.f32 %v2130_v45, %v2130_v45 }
 0x138   :  { %3945 = vst [vmem:[#allocation21_spill] sm:$0xff] %v2348_v48  ;;  %v881_v19 = vmul.f32 %v2162_v10, %v2162_v10 }
 0x139   :  { %v968_v6 = vadd.f32 %v967_v0, %v966_v51  ;;  %v772_v15 = vadd.f32 %v771_v4, %v770_v41  ;;  %v775_v41 = vsel %vm707_vm2, %v2114_v32, 0.0  ;;  %v973_v4 = vsel %vm707_vm2, %v876_v35, 0.0 }
 0x13a   :  { %v781_v35 = vsel %vm707_vm2, %v2130_v45, 0.0  ;;  %v979_v53 = vsel %vm707_vm2, %v879_v9, 0.0  ;;  %v983_v9 = vsel %vm707_vm2, %v881_v19, 0.0  ;;  %v883_v45 = vmul.f32 %v2194_v46, %v2194_v46 }
 0x13b   :  { %v970_v38 = vadd.f32 %v969_v27, %v968_v6  ;;  %v774_v47 = vadd.f32 %v773_v24, %v772_v15  ;;  %v878_v6 = vmul.f32 %v2146_v58, %v2146_v58  ;;  %v2360_v27 = vpop.f32.mrf.mxu1 }
 0x13c   :  { %3946 = vst [vmem:[#allocation22_spill] sm:$0xff] %v2360_v27  ;;  %v987_v19 = vsel %vm707_vm2, %v883_v45, 0.0 }
 0x13d   :  { %v776_v51 = vadd.f32 %v775_v41, %v774_v47  ;;  %v972_v0 = vadd.f32 %v971_v23, %v970_v38  ;;  %v779_v38 = vsel %vm707_vm2, %v2146_v58, 0.0  ;;  %v977_v41 = vsel %vm707_vm2, %v878_v6, 0.0 }
 0x13e   :  { %v785_v6 = vsel %vm707_vm2, %v2162_v10, 0.0  ;;  %v885_v10 = vmul.f32 %v2226_v22, %v2226_v22 }
 0x13f   :  { %v974_v15 = vadd.f32 %v973_v4, %v972_v0  ;;  %v778_v24 = vadd.f32 %v777_v50, %v776_v51  ;;  %v880_v51 = vmul.f32 %v2178_v28, %v2178_v28  ;;  %v2372_v4 = vpop.f32.mrf.mxu1 }
 0x140   :  { %3947 = vst [vmem:[#allocation23_spill] sm:$0xff] %v2372_v4  ;;  %v991_v45 = vsel %vm707_vm2, %v885_v10, 0.0 }
 0x141   :  { %v780_v47 = vadd.f32 %v779_v38, %v778_v24  ;;  %v976_v23 = vadd.f32 %v975_v16, %v974_v15  ;;  %v783_v15 = vsel %vm707_vm2, %v2178_v28, 0.0  ;;  %v981_v38 = vsel %vm707_vm2, %v880_v51, 0.0 }
 0x142   :  { %v789_v51 = vsel %vm707_vm2, %v2194_v46, 0.0  ;;  %v887_v46 = vmul.f32 %v2258_v2, %v2258_v2 }
 0x143   :  { %v978_v0 = vadd.f32 %v977_v41, %v976_v23  ;;  %v782_v50 = vadd.f32 %v781_v35, %v780_v47  ;;  %v882_v47 = vmul.f32 %v2210_v62, %v2210_v62  ;;  %v2384_v41 = vpop.f32.mrf.mxu1 }
 0x144   :  { %3948 = vst [vmem:[#allocation24_spill] sm:$0xff] %v2384_v41  ;;  %v995_v10 = vsel %vm707_vm2, %v887_v46, 0.0 }
 0x145   :  { %v784_v24 = vadd.f32 %v783_v15, %v782_v50  ;;  %v980_v16 = vadd.f32 %v979_v53, %v978_v0  ;;  %v787_v0 = vsel %vm707_vm2, %v2210_v62, 0.0  ;;  %v985_v15 = vsel %vm707_vm2, %v882_v47, 0.0 }
 0x146   :  { %v793_v47 = vsel %vm707_vm2, %v2226_v22, 0.0  ;;  %v889_v22 = vmul.f32 %v2290_v61, %v2290_v61 }
 0x147   :  { %v982_v23 = vadd.f32 %v981_v38, %v980_v16  ;;  %v786_v35 = vadd.f32 %v785_v6, %v784_v24  ;;  %v884_v24 = vmul.f32 %v2242_v44, %v2242_v44  ;;  %v2396_v38 = vpop.f32.mrf.mxu1 }
 0x148   :  { %3949 = vst [vmem:[#allocation25_spill] sm:$0xff] %v2396_v38  ;;  %v999_v46 = vsel %vm707_vm2, %v889_v22, 0.0 }
 0x149   :  { %v788_v50 = vadd.f32 %v787_v0, %v786_v35  ;;  %v984_v53 = vadd.f32 %v983_v9, %v982_v23  ;;  %v791_v23 = vsel %vm707_vm2, %v2242_v44, 0.0  ;;  %v989_v0 = vsel %vm707_vm2, %v884_v24, 0.0 }
 0x14a   :  { %v797_v24 = vsel %vm707_vm2, %v2258_v2, 0.0  ;;  %v891_v2 = vmul.f32 %v2322_v12, %v2322_v12 }
 0x14b   :  { %v986_v16 = vadd.f32 %v985_v15, %v984_v53  ;;  %v790_v6 = vadd.f32 %v789_v51, %v788_v50  ;;  %v886_v50 = vmul.f32 %v2274_v33, %v2274_v33  ;;  %v2408_v15 = vpop.f32.mrf.mxu1 }
 0x14c   :  { %3950 = vst [vmem:[#allocation26_spill] sm:$0xff] %v2408_v15  ;;  %v1003_v22 = vsel %vm707_vm2, %v891_v2, 0.0 }
 0x14d   :  { %v792_v35 = vadd.f32 %v791_v23, %v790_v6  ;;  %v988_v9 = vadd.f32 %v987_v19, %v986_v16  ;;  %v795_v16 = vsel %vm707_vm2, %v2274_v33, 0.0  ;;  %v993_v23 = vsel %vm707_vm2, %v886_v50, 0.0 }
 0x14e   :  { %v801_v50 = vsel %vm707_vm2, %v2290_v61, 0.0  ;;  %v893_v61 = vmul.f32 %v2348_v48, %v2348_v48 }
 0x14f   :  { %v990_v53 = vadd.f32 %v989_v0, %v988_v9  ;;  %v794_v51 = vadd.f32 %v793_v47, %v792_v35  ;;  %v888_v35 = vmul.f32 %v2306_v36, %v2306_v36  ;;  %v2420_v0 = vpop.f32.mrf.mxu1 }
 0x150   :  { %3951 = vst [vmem:[#allocation27_spill] sm:$0xff] %v2420_v0  ;;  %v1007_v2 = vsel %vm707_vm2, %v893_v61, 0.0 }
 0x151   :  { %v796_v6 = vadd.f32 %v795_v16, %v794_v51  ;;  %v992_v19 = vadd.f32 %v991_v45, %v990_v53  ;;  %v799_v53 = vsel %vm707_vm2, %v2306_v36, 0.0  ;;  %v997_v16 = vsel %vm707_vm2, %v888_v35, 0.0 }
 0x152   :  { %v805_v35 = vsel %vm707_vm2, %v2322_v12, 0.0  ;;  %v895_v12 = vmul.f32 %v2372_v4, %v2372_v4 }
 0x153   :  { %v994_v9 = vadd.f32 %v993_v23, %v992_v19  ;;  %v798_v47 = vadd.f32 %v797_v24, %v796_v6  ;;  %v890_v6 = vmul.f32 %v2336_v59, %v2336_v59  ;;  %v2432_v23 = vpop.f32.mrf.mxu1 }
 0x154   :  { %3952 = vst [vmem:[#allocation28_spill] sm:$0xff] %v2432_v23  ;;  %v1011_v61 = vsel %vm707_vm2, %v895_v12, 0.0 }
 0x155   :  { %v800_v51 = vadd.f32 %v799_v53, %v798_v47  ;;  %v996_v45 = vadd.f32 %v995_v10, %v994_v9  ;;  %v803_v9 = vsel %vm707_vm2, %v2336_v59, 0.0  ;;  %v1001_v53 = vsel %vm707_vm2, %v890_v6, 0.0 }
 0x156   :  { %v809_v6 = vsel %vm707_vm2, %v2348_v48, 0.0  ;;  %v897_v48 = vmul.f32 %v2396_v38, %v2396_v38 }
 0x157   :  { %v998_v19 = vadd.f32 %v997_v16, %v996_v45  ;;  %v802_v24 = vadd.f32 %v801_v50, %v800_v51  ;;  %v892_v51 = vmul.f32 %v2360_v27, %v2360_v27  ;;  %v2444_v16 = vpop.f32.mrf.mxu1 }
 0x158   :  { %3953 = vst [vmem:[#allocation29_spill] sm:$0xff] %v2444_v16  ;;  %v1015_v12 = vsel %vm707_vm2, %v897_v48, 0.0 }
 0x159   :  { %v804_v47 = vadd.f32 %v803_v9, %v802_v24  ;;  %v1000_v10 = vadd.f32 %v999_v46, %v998_v19  ;;  %v807_v19 = vsel %vm707_vm2, %v2360_v27, 0.0  ;;  %v1005_v9 = vsel %vm707_vm2, %v892_v51, 0.0 }
 0x15a   :  { %v813_v51 = vsel %vm707_vm2, %v2372_v4, 0.0  ;;  %v899_v4 = vmul.f32 %v2420_v0, %v2420_v0 }
 0x15b   :  { %v1002_v45 = vadd.f32 %v1001_v53, %v1000_v10  ;;  %v806_v50 = vadd.f32 %v805_v35, %v804_v47  ;;  %v894_v47 = vmul.f32 %v2384_v41, %v2384_v41  ;;  %v2456_v53 = vpop.f32.mrf.mxu1 }
 0x15c   :  { %3954 = vst [vmem:[#allocation30_spill] sm:$0xff] %v2456_v53  ;;  %v1019_v48 = vsel %vm707_vm2, %v899_v4, 0.0 }
 0x15d   :  { %v808_v24 = vadd.f32 %v807_v19, %v806_v50  ;;  %v1004_v46 = vadd.f32 %v1003_v22, %v1002_v45  ;;  %v811_v45 = vsel %vm707_vm2, %v2384_v41, 0.0  ;;  %v1009_v19 = vsel %vm707_vm2, %v894_v47, 0.0 }
 0x15e   :  { %v817_v47 = vsel %vm707_vm2, %v2396_v38, 0.0  ;;  %v901_v38 = vmul.f32 %v2444_v16, %v2444_v16 }
 0x15f   :  { %v1006_v10 = vadd.f32 %v1005_v9, %v1004_v46  ;;  %v810_v35 = vadd.f32 %v809_v6, %v808_v24  ;;  %v896_v24 = vmul.f32 %v2408_v15, %v2408_v15  ;;  %v2468_v9 = vpop.f32.mrf.mxu1 }
 0x160   :  { %3955 = vst [vmem:[#allocation31_spill] sm:$0xff] %v2468_v9  ;;  %v1023_v4 = vsel %vm707_vm2, %v901_v38, 0.0 }
 0x161   :  { %v812_v50 = vadd.f32 %v811_v45, %v810_v35  ;;  %v1008_v22 = vadd.f32 %v1007_v2, %v1006_v10  ;;  %v815_v10 = vsel %vm707_vm2, %v2408_v15, 0.0  ;;  %v1013_v45 = vsel %vm707_vm2, %v896_v24, 0.0 }
 0x162   :  { %v821_v24 = vsel %vm707_vm2, %v2420_v0, 0.0  ;;  %v903_v0 = vmul.f32 %v2468_v9, %v2468_v9 }
 0x163   :  { %v1010_v46 = vadd.f32 %v1009_v19, %v1008_v22  ;;  %v814_v6 = vadd.f32 %v813_v51, %v812_v50  ;;  %v898_v50 = vmul.f32 %v2432_v23, %v2432_v23  ;;  %v2480_v19 = vpop.f32.mrf.mxu1 }
 0x164   :  { %3956 = vst [vmem:[#allocation32_spill] sm:$0xff] %v2480_v19  ;;  %v1027_v38 = vsel %vm707_vm2, %v903_v0, 0.0 }
 0x165   :  { %v816_v35 = vadd.f32 %v815_v10, %v814_v6  ;;  %v1012_v2 = vadd.f32 %v1011_v61, %v1010_v46  ;;  %v819_v46 = vsel %vm707_vm2, %v2432_v23, 0.0  ;;  %v1017_v10 = vsel %vm707_vm2, %v898_v50, 0.0 }
 0x166   :  { %v825_v50 = vsel %vm707_vm2, %v2444_v16, 0.0 }
 0x167   :  { %v1014_v22 = vadd.f32 %v1013_v45, %v1012_v2  ;;  %v818_v51 = vadd.f32 %v817_v47, %v816_v35  ;;  %v900_v35 = vmul.f32 %v2456_v53, %v2456_v53  ;;  %v2492_v45 = vpop.f32.mrf.mxu1 }
 0x168   :  { %3957 = vst [vmem:[#allocation33_spill] sm:$0xff] %v2492_v45 }
 0x169   :  { %v820_v6 = vadd.f32 %v819_v46, %v818_v51  ;;  %v1016_v61 = vadd.f32 %v1015_v12, %v1014_v22  ;;  %v823_v22 = vsel %vm707_vm2, %v2456_v53, 0.0  ;;  %v1021_v46 = vsel %vm707_vm2, %v900_v35, 0.0 }
 0x16a   :  { %v829_v35 = vsel %vm707_vm2, %v2468_v9, 0.0 }
 0x16b   :  { %v1018_v2 = vadd.f32 %v1017_v10, %v1016_v61  ;;  %v822_v47 = vadd.f32 %v821_v24, %v820_v6  ;;  %v902_v6 = vmul.f32 %v2480_v19, %v2480_v19  ;;  %v2504_v10 = vpop.f32.mrf.mxu1 }
 0x16c   :  { %3958 = vst [vmem:[#allocation34_spill] sm:$0xff] %v2504_v10 }
 0x16d   :  { %v824_v51 = vadd.f32 %v823_v22, %v822_v47  ;;  %v1020_v12 = vadd.f32 %v1019_v48, %v1018_v2  ;;  %v827_v2 = vsel %vm707_vm2, %v2480_v19, 0.0  ;;  %v1025_v22 = vsel %vm707_vm2, %v902_v6, 0.0 }
 0x16e   :  { %v831_v19 = vsel %vm707_vm2, %v2504_v10, 0.0 }
 0x16f   :  { %v1022_v61 = vadd.f32 %v1021_v46, %v1020_v12  ;;  %v826_v24 = vadd.f32 %v825_v50, %v824_v51  ;;  %v904_v51 = vmul.f32 %v2504_v10, %v2504_v10  ;;  %v905_v46 = vmul.f32 %v2492_v45, %v2492_v45 }
 0x171   :  { %v828_v47 = vadd.f32 %v827_v2, %v826_v24  ;;  %v1024_v48 = vadd.f32 %v1023_v4, %v1022_v61  ;;  %v833_v4 = vsel %vm707_vm2, %v2492_v45, 0.0  ;;  %v1029_v6 = vsel %vm707_vm2, %v904_v51, 0.0 }
 0x173   :  { %v1026_v12 = vadd.f32 %v1025_v22, %v1024_v48  ;;  %v830_v50 = vadd.f32 %v829_v35, %v828_v47  ;;  %v1031_v48 = vsel %vm707_vm2, %v905_v46, 0.0 }
 0x175   :  { %v832_v24 = vadd.f32 %v831_v19, %v830_v50  ;;  %v1028_v61 = vadd.f32 %v1027_v38, %v1026_v12 }
 0x177   :  { %v834_v2 = vadd.f32 %v833_v4, %v832_v24  ;;  %v1030_v9 = vadd.f32 %v1029_v6, %v1028_v61  ;;  %v3975_v6 = vld [vmem:[#allocation27_spill] sm:$0xff]  ;;  %v3977_v4 = vld [vmem:[#allocation29_spill] sm:$0xff] }
 0x179   :  { %v835_v47 = vrot.slane %v834_v2, 4  ;;  %v1032_v35 = vadd.f32 %v1031_v48, %v1030_v9  ;;  %v3971_v48 = vld [vmem:[#allocation23_spill] sm:$0xff] }
 0x17b   :  { %v836_v0 = vadd.f32 %v835_v47, %v834_v2  ;;  %v1033_v22 = vrot.slane %v1032_v35, 4  ;;  %v3980_v2 = vld [vmem:[#allocation34_spill] sm:$0xff] }
 0x17d   :  { %v837_v16 = vrot.slane %v836_v0, 2  ;;  %v1034_v53 = vadd.f32 %v1033_v22, %v1032_v35  ;;  %v3967_v22 = vld [vmem:[#allocation15_spill] sm:$0xff] }
 0x17f   :  { %v838_v23 = vadd.f32 %v837_v16, %v836_v0  ;;  %v1035_v15 = vrot.slane %v1034_v53, 2  ;;  %v3968_v0 = vld [vmem:[#allocation16_spill] sm:$0xff] }
 0x181   :  { %v839_v10 = vrot.slane %v838_v23, 1  ;;  %v1036_v19 = vadd.f32 %v1035_v15, %v1034_v53  ;;  %v3978_v15 = vld [vmem:[#allocation32_spill] sm:$0xff]  ;;  %v3981_v53 = vld [vmem:[#allocation33_spill] sm:$0xff] }
 0x183   :  { %v840_v12 = vadd.f32 %v839_v10, %v838_v23  ;;  %v1037_v50 = vrot.slane %v1036_v19, 1  ;;  %v3979_v10 = vld [vmem:[#allocation31_spill] sm:$0xff] }
 0x185   :  { %v2525_v38 = vmul.f32 0.001953125, %v840_v12  ;;  %v1038_v45 = vadd.f32 %v1037_v50, %v1036_v19  ;;  %v3959_v12 = vld [vmem:[#allocation17_spill] sm:$0xff]  ;;  %v3963_v50 = vld [vmem:[#allocation11_spill] sm:$0xff]  ;;  %v3966_v19 = vld [vmem:[#allocation14_spill] sm:$0xff] }
 0x187   :  { %v1039_v51 = vmul.f32 0.001953125, %v1038_v45  ;;  %v1040_v24 = vmul.f32 %v2525_v38, %v2525_v38  ;;  %v3982_v47 = vsub.f32 %v2079_v8, %v2525_v38  ;;  %v3983_v41 = vsub.f32 %v2077_v7, %v2525_v38 }
 0x188   :  { %v3984_v9 = vsub.f32 %v2096_v18, %v2525_v38  ;;  %v3985_v27 = vsub.f32 %v2089_v13, %v2525_v38 }
 0x189   :  { %v1041_v46 = vsub.f32 %v1039_v51, %v1040_v24  ;;  %v3960_v51 = vld [vmem:[#allocation18_spill] sm:$0xff]  ;;  %v3964_v24 = vld [vmem:[#allocation12_spill] sm:$0xff] }
 0x18b   :  { %v1042_v61 = vmax.f32 %v1041_v46, 0.0  ;;  %v3961_v46 = vld [vmem:[#allocation9_spill] sm:$0xff] }
 0x18d   :  { %v1107_v45 = vadd.f32 1e-05, %v1042_v61  ;;  %v3965_v61 = vld [vmem:[#allocation13_spill] sm:$0xff] }
 0x18f   :  { %1716 = vrsqrt.f32 %v1107_v45  ;;  %v3962_v45 = vld [vmem:[#allocation10_spill] sm:$0xff] }
 0x19c   :  { %v2649_v59 = vpop.eup %1716 }
 0x19d   :  { %v2663_v23 = vmul.f32 %v2649_v59, %v3982_v47  ;;  %v2669_v16 = vmul.f32 %v2649_v59, %v3983_v41  ;;  %v2675_v35 = vmul.f32 %v2649_v59, %v3984_v9  ;;  %v2681_v8 = vmul.f32 %v2649_v59, %v3985_v27 }
 0x19e   :  { %v3986_v47 = vsub.f32 %v2112_v30, %v2525_v38  ;;  %v3987_v41 = vsub.f32 %v2107_v26, %v2525_v38  ;;  %v3988_v9 = vsub.f32 %v2128_v43, %v2525_v38  ;;  %v3989_v27 = vsub.f32 %v2123_v39, %v2525_v38 }
 0x1a0   :  { %v2687_v7 = vmul.f32 %v2649_v59, %v3986_v47  ;;  %v2693_v18 = vmul.f32 %v2649_v59, %v3987_v41  ;;  %v2699_v13 = vmul.f32 %v2649_v59, %v3988_v9  ;;  %v2705_v30 = vmul.f32 %v2649_v59, %v3989_v27 }
 0x1a1   :  { %v3990_v47 = vsub.f32 %v2144_v56, %v2525_v38  ;;  %v3991_v41 = vsub.f32 %v2139_v52, %v2525_v38  ;;  %v3992_v9 = vsub.f32 %v2160_v5, %v2525_v38  ;;  %v3993_v27 = vsub.f32 %v2155_v1, %v2525_v38 }
 0x1a3   :  { %v2711_v26 = vmul.f32 %v2649_v59, %v3990_v47  ;;  %v2717_v43 = vmul.f32 %v2649_v59, %v3991_v41  ;;  %v2723_v39 = vmul.f32 %v2649_v59, %v3992_v9  ;;  %v2729_v56 = vmul.f32 %v2649_v59, %v3993_v27 }
 0x1a4   :  { %v3994_v47 = vsub.f32 %v2176_v25, %v2525_v38  ;;  %v3995_v41 = vsub.f32 %v2171_v21, %v2525_v38  ;;  %v3996_v9 = vsub.f32 %v2192_v42, %v2525_v38  ;;  %v3997_v27 = vsub.f32 %v2187_v37, %v2525_v38 }
 0x1a6   :  { %v2735_v52 = vmul.f32 %v2649_v59, %v3994_v47  ;;  %v2741_v5 = vmul.f32 %v2649_v59, %v3995_v41  ;;  %v2747_v1 = vmul.f32 %v2649_v59, %v3996_v9  ;;  %v2753_v25 = vmul.f32 %v2649_v59, %v3997_v27 }
 0x1a7   :  { %v3998_v47 = vsub.f32 %v2208_v60, %v2525_v38  ;;  %v3999_v41 = vsub.f32 %v2203_v54, %v2525_v38  ;;  %v4000_v9 = vsub.f32 %v2224_v17, %v2525_v38  ;;  %v4001_v27 = vsub.f32 %v2219_v11, %v2525_v38 }
 0x1a9   :  { %v2759_v21 = vmul.f32 %v2649_v59, %v3998_v47  ;;  %v2765_v42 = vmul.f32 %v2649_v59, %v3999_v41  ;;  %v2771_v37 = vmul.f32 %v2649_v59, %v4000_v9  ;;  %v2777_v60 = vmul.f32 %v2649_v59, %v4001_v27 }
 0x1aa   :  { %v4002_v47 = vsub.f32 %v2240_v40, %v2525_v38  ;;  %v4003_v41 = vsub.f32 %v2235_v34, %v2525_v38  ;;  %v4004_v9 = vsub.f32 %v2256_v63, %v2525_v38  ;;  %v4005_v27 = vsub.f32 %v2251_v55, %v2525_v38 }
 0x1ac   :  { %v2783_v54 = vmul.f32 %v2649_v59, %v4002_v47  ;;  %v2789_v17 = vmul.f32 %v2649_v59, %v4003_v41  ;;  %v2795_v11 = vmul.f32 %v2649_v59, %v4004_v9  ;;  %v2801_v40 = vmul.f32 %v2649_v59, %v4005_v27 }
 0x1ad   :  { %v4006_v47 = vsub.f32 %v2272_v29, %v2525_v38  ;;  %v4007_v41 = vsub.f32 %v2267_v20, %v2525_v38  ;;  %v4008_v9 = vsub.f32 %v2288_v57, %v2525_v38  ;;  %v4009_v27 = vsub.f32 %v2283_v49, %v2525_v38 }
 0x1af   :  { %v2807_v34 = vmul.f32 %v2649_v59, %v4006_v47  ;;  %v2813_v63 = vmul.f32 %v2649_v59, %v4007_v41  ;;  %v2819_v55 = vmul.f32 %v2649_v59, %v4008_v9  ;;  %v2825_v29 = vmul.f32 %v2649_v59, %v4009_v27 }
 0x1b0   :  { %v4010_v47 = vsub.f32 %v2304_v31, %v2525_v38  ;;  %v4011_v41 = vsub.f32 %v3959_v12, %v2525_v38  ;;  %v4012_v9 = vsub.f32 %v2320_v3, %v2525_v38  ;;  %v4013_v27 = vsub.f32 %v3960_v51, %v2525_v38 }
 0x1b2   :  { %v2831_v20 = vmul.f32 %v2649_v59, %v4010_v47  ;;  %v2837_v57 = vmul.f32 %v2649_v59, %v4011_v41  ;;  %v2843_v49 = vmul.f32 %v2649_v59, %v4012_v9  ;;  %v2849_v31 = vmul.f32 %v2649_v59, %v4013_v27 }
 0x1b3   :  { %v4014_v47 = vsub.f32 %v2091_v14, %v2525_v38  ;;  %v4015_v41 = vsub.f32 %v3961_v46, %v2525_v38  ;;  %v4016_v9 = vsub.f32 %v2114_v32, %v2525_v38  ;;  %v4017_v27 = vsub.f32 %v3962_v45, %v2525_v38 }
 0x1b5   :  { %v2855_v12 = vmul.f32 %v2649_v59, %v4014_v47  ;;  %v2861_v3 = vmul.f32 %v2649_v59, %v4015_v41  ;;  %v2867_v51 = vmul.f32 %v2649_v59, %v4016_v9  ;;  %v2873_v14 = vmul.f32 %v2649_v59, %v4017_v27 }
 0x1b6   :  { %v4018_v47 = vsub.f32 %v2146_v58, %v2525_v38  ;;  %v4019_v41 = vsub.f32 %v3963_v50, %v2525_v38  ;;  %v4020_v9 = vsub.f32 %v2178_v28, %v2525_v38  ;;  %v4021_v27 = vsub.f32 %v3964_v24, %v2525_v38 }
 0x1b8   :  { %v2879_v46 = vmul.f32 %v2649_v59, %v4018_v47  ;;  %v2885_v32 = vmul.f32 %v2649_v59, %v4019_v41  ;;  %v2891_v45 = vmul.f32 %v2649_v59, %v4020_v9  ;;  %v2897_v58 = vmul.f32 %v2649_v59, %v4021_v27 }
 0x1b9   :  { %v4022_v47 = vsub.f32 %v2210_v62, %v2525_v38  ;;  %v4023_v41 = vsub.f32 %v3965_v61, %v2525_v38  ;;  %v4024_v9 = vsub.f32 %v2242_v44, %v2525_v38  ;;  %v4025_v27 = vsub.f32 %v3966_v19, %v2525_v38 }
 0x1bb   :  { %v2903_v50 = vmul.f32 %v2649_v59, %v4022_v47  ;;  %v2909_v28 = vmul.f32 %v2649_v59, %v4023_v41  ;;  %v2915_v24 = vmul.f32 %v2649_v59, %v4024_v9  ;;  %v2921_v62 = vmul.f32 %v2649_v59, %v4025_v27 }
 0x1bc   :  { %v4026_v47 = vsub.f32 %v2274_v33, %v2525_v38  ;;  %v4028_v41 = vsub.f32 %v3967_v22, %v2525_v38  ;;  %v4030_v9 = vsub.f32 %v2306_v36, %v2525_v38  ;;  %v4032_v27 = vsub.f32 %v3968_v0, %v2525_v38 }
 0x1be   :  { %v2927_v61 = vmul.f32 %v2649_v59, %v4026_v47  ;;  %v2933_v44 = vmul.f32 %v2649_v59, %v4028_v41  ;;  %v2939_v19 = vmul.f32 %v2649_v59, %v4030_v9  ;;  %v2945_v33 = vmul.f32 %v2649_v59, %v4032_v27  ;;  %v4034_v47 = vld [vmem:[#allocation20_spill] sm:$0xff]  ;;  %v4037_v41 = vld [vmem:[#allocation19_spill] sm:$0xff]  ;;  %v4039_v9 = vld [vmem:[#allocation22_spill] sm:$0xff] }
 0x1bf   :  { %v4042_v27 = vld [vmem:[#allocation21_spill] sm:$0xff] }
 0x1c0   :  { %4027 = vst [vmem:[#allocation17_spill] sm:$0xff] %v2927_v61  ;;  %4029 = vst [vmem:[#allocation18_spill] sm:$0xff] %v2933_v44  ;;  %v4035_v61 = vsub.f32 %v4034_v47, %v2525_v38  ;;  %v4038_v44 = vsub.f32 %v4037_v41, %v2525_v38 }
 0x1c1   :  { %4031 = vst [vmem:[#allocation9_spill] sm:$0xff] %v2939_v19  ;;  %4033 = vst [vmem:[#allocation10_spill] sm:$0xff] %v2945_v33  ;;  %v4040_v19 = vsub.f32 %v4039_v9, %v2525_v38  ;;  %v4043_v33 = vsub.f32 %v4042_v27, %v2525_v38 }
 0x1c2   :  { %v2951_v22 = vmul.f32 %v2649_v59, %v4035_v61  ;;  %v2957_v36 = vmul.f32 %v2649_v59, %v4038_v44  ;;  %v4045_v61 = vld [vmem:[#allocation24_spill] sm:$0xff]  ;;  %v4048_v44 = vsub.f32 %v3971_v48, %v2525_v38 }
 0x1c3   :  { %v2963_v0 = vmul.f32 %v2649_v59, %v4040_v19  ;;  %v2969_v47 = vmul.f32 %v2649_v59, %v4043_v33  ;;  %v4049_v19 = vld [vmem:[#allocation26_spill] sm:$0xff]  ;;  %v4052_v33 = vld [vmem:[#allocation25_spill] sm:$0xff] }
 0x1c4   :  { %4036 = vst [vmem:[#allocation11_spill] sm:$0xff] %v2951_v22  ;;  %v4046_v22 = vsub.f32 %v4045_v61, %v2525_v38  ;;  %v2981_v9 = vmul.f32 %v2649_v59, %v4048_v44 }
 0x1c5   :  { %4041 = vst [vmem:[#allocation12_spill] sm:$0xff] %v2963_v0  ;;  %4044 = vst [vmem:[#allocation13_spill] sm:$0xff] %v2969_v47  ;;  %v4050_v0 = vsub.f32 %v4049_v19, %v2525_v38  ;;  %v4053_v47 = vsub.f32 %v4052_v33, %v2525_v38  ;;  %v4057_v19 = vsub.f32 %v3975_v6, %v2525_v38 }
 0x1c6   :  { %v2975_v41 = vmul.f32 %v2649_v59, %v4046_v22  ;;  %v2995_v22 = vld [vmem:[#allocation4] ss:$0 sm:$0xff] }
 0x1c7   :  { %v2987_v27 = vmul.f32 %v2649_v59, %v4050_v0  ;;  %v2993_v61 = vmul.f32 %v2649_v59, %v4053_v47  ;;  %v3007_v0 = vmul.f32 %v2649_v59, %v4057_v19  ;;  %v4062_v19 = vsub.f32 %v3979_v10, %v2525_v38 }
 0x1c8   :  { %4047 = vst [vmem:[#allocation14_spill] sm:$0xff] %v2975_v41  ;;  %v4055_v41 = vld [vmem:[#allocation28_spill] sm:$0xff]  ;;  %v3051_v10 = vmul.f32 %v2995_v22, %v2669_v16  ;;  %v3071_v16 = vmul.f32 %v2995_v22, %v2699_v13  ;;  %v3099_v13 = vmul.f32 %v2995_v22, %v2741_v5  ;;  %v3127_v5 = vmul.f32 %v2995_v22, %v2783_v54 }
 0x1c9   :  { %4051 = vst [vmem:[#allocation15_spill] sm:$0xff] %v2987_v27  ;;  %4054 = vst [vmem:[#allocation16_spill] sm:$0xff] %v2993_v61  ;;  %v4056_v48 = vsub.f32 %v4055_v41, %v2525_v38  ;;  %v4058_v27 = vld [vmem:[#allocation30_spill] sm:$0xff]  ;;  %v4060_v61 = vsub.f32 %v3977_v4, %v2525_v38  ;;  %v3155_v54 = vmul.f32 %v2995_v22, %v2825_v29 }
 0x1ca   :  { %v4059_v33 = vsub.f32 %v4058_v27, %v2525_v38  ;;  %v3031_v27 = vmul.f32 %v2649_v59, %v4062_v19  ;;  %v3059_v19 = vmul.f32 %v2995_v22, %v2681_v8  ;;  %v3087_v8 = vmul.f32 %v2995_v22, %v2723_v39 }
 0x1cb   :  { %v3001_v44 = vmul.f32 %v2649_v59, %v4056_v48  ;;  %v3019_v41 = vmul.f32 %v2649_v59, %v4060_v61  ;;  %v4061_v48 = vsub.f32 %v3978_v15, %v2525_v38  ;;  %v4064_v61 = vsub.f32 %v3981_v53, %v2525_v38 }
 0x1cc   :  { %v3013_v47 = vmul.f32 %v2649_v59, %v4059_v33  ;;  %v4063_v33 = vsub.f32 %v3980_v2, %v2525_v38  ;;  %v3055_v2 = vmul.f32 %v2995_v22, %v2675_v35  ;;  %v3067_v38 = vmul.f32 %v2995_v22, %v2693_v18 }
 0x1cd   :  { %v3025_v6 = vmul.f32 %v2649_v59, %v4061_v48  ;;  %v3043_v15 = vmul.f32 %v2649_v59, %v4064_v61  ;;  %v3047_v48 = vmul.f32 %v2995_v22, %v2663_v23  ;;  %v3075_v23 = vmul.f32 %v2995_v22, %v2705_v30  ;;  %v4072_v61 = vld [vmem:[#allocation10_spill] sm:$0xff] }
 0x1ce   :  { %v3037_v4 = vmul.f32 %v2649_v59, %v4063_v33  ;;  %v3063_v59 = vmul.f32 %v2995_v22, %v2687_v7  ;;  %v3079_v53 = vmul.f32 %v2995_v22, %v2711_v26  ;;  %v3083_v35 = vmul.f32 %v2995_v22, %v2717_v43  ;;  %v4070_v33 = vld [vmem:[#allocation9_spill] sm:$0xff] }
 0x1cf   :  { %v3091_v7 = vmul.f32 %v2995_v22, %v2729_v56  ;;  %v3095_v18 = vmul.f32 %v2995_v22, %v2735_v52  ;;  %v3103_v30 = vmul.f32 %v2995_v22, %v2747_v1  ;;  %v3107_v26 = vmul.f32 %v2995_v22, %v2753_v25 }
 0x1d0   :  { %v3111_v43 = vmul.f32 %v2995_v22, %v2759_v21  ;;  %v3115_v39 = vmul.f32 %v2995_v22, %v2765_v42  ;;  %v3119_v56 = vmul.f32 %v2995_v22, %v2771_v37  ;;  %v3123_v52 = vmul.f32 %v2995_v22, %v2777_v60 }
 0x1d1   :  { %v3131_v1 = vmul.f32 %v2995_v22, %v2789_v17  ;;  %v3135_v25 = vmul.f32 %v2995_v22, %v2795_v11  ;;  %v3139_v21 = vmul.f32 %v2995_v22, %v2801_v40  ;;  %v3143_v42 = vmul.f32 %v2995_v22, %v2807_v34 }
 0x1d2   :  { %v3147_v37 = vmul.f32 %v2995_v22, %v2813_v63  ;;  %v3151_v60 = vmul.f32 %v2995_v22, %v2819_v55  ;;  %v3159_v17 = vmul.f32 %v2995_v22, %v2831_v20  ;;  %v3163_v11 = vmul.f32 %v2995_v22, %v2837_v57 }
 0x1d3   :  { %v3167_v40 = vmul.f32 %v2995_v22, %v2843_v49  ;;  %v3171_v34 = vmul.f32 %v2995_v22, %v2849_v31  ;;  %v3175_v63 = vmul.f32 %v2995_v22, %v2855_v12  ;;  %v3179_v55 = vmul.f32 %v2995_v22, %v2861_v3 }
 0x1d4   :  { %v3183_v29 = vmul.f32 %v2995_v22, %v2867_v51  ;;  %v3187_v20 = vmul.f32 %v2995_v22, %v2873_v14  ;;  %v3191_v57 = vmul.f32 %v2995_v22, %v2879_v46  ;;  %v3195_v49 = vmul.f32 %v2995_v22, %v2885_v32  ;;  %v4066_v32 = vld [vmem:[#allocation17_spill] sm:$0xff] }
 0x1d5   :  { %v3199_v31 = vmul.f32 %v2995_v22, %v2891_v45  ;;  %v3203_v12 = vmul.f32 %v2995_v22, %v2897_v58  ;;  %v3207_v3 = vmul.f32 %v2995_v22, %v2903_v50  ;;  %v3211_v51 = vmul.f32 %v2995_v22, %v2909_v28  ;;  %v4068_v58 = vld [vmem:[#allocation18_spill] sm:$0xff] }
 0x1d6   :  { %v3215_v14 = vmul.f32 %v2995_v22, %v2915_v24  ;;  %v3219_v46 = vmul.f32 %v2995_v22, %v2921_v62  ;;  %v3223_v45 = vmul.f32 %v2995_v22, %v4066_v32  ;;  %v3227_v50 = vmul.f32 %v2995_v22, %v4068_v58 }
 0x1d7   :  { %v3231_v28 = vmul.f32 %v2995_v22, %v4070_v33  ;;  %v3235_v24 = vmul.f32 %v2995_v22, %v4072_v61  ;;  %v3243_v32 = vmul.f32 %v2995_v22, %v2957_v36 }
 0x1d8   :  { %4065 = vst [vmem:[#allocation23_spill] sm:$0xff] %v3215_v14  ;;  %4067 = vst [vmem:[#allocation27_spill] sm:$0xff] %v3223_v45  ;;  %v4073_v14 = vld [vmem:[#allocation11_spill] sm:$0xff]  ;;  %v4076_v45 = vld [vmem:[#allocation12_spill] sm:$0xff] }
 0x1d9   :  { %4069 = vst [vmem:[#allocation29_spill] sm:$0xff] %v3227_v50  ;;  %4071 = vst [vmem:[#allocation32_spill] sm:$0xff] %v3231_v28  ;;  %v3239_v62 = vmul.f32 %v2995_v22, %v4073_v14  ;;  %v3247_v58 = vmul.f32 %v2995_v22, %v4076_v45  ;;  %v4078_v50 = vld [vmem:[#allocation13_spill] sm:$0xff]  ;;  %v4079_v28 = vld [vmem:[#allocation14_spill] sm:$0xff]  ;;  %v3259_v14 = vmul.f32 %v2995_v22, %v2981_v9 }
 0x1da   :  { %4075 = vst [vmem:[#allocation34_spill] sm:$0xff] %v3243_v32  ;;  %v3251_v33 = vmul.f32 %v2995_v22, %v4078_v50  ;;  %v3255_v61 = vmul.f32 %v2995_v22, %v4079_v28  ;;  %v4081_v32 = vld [vmem:[#allocation16_spill] sm:$0xff]  ;;  %v3273_v50 = vmul.f32 %v2995_v22, %v3001_v44  ;;  %v3277_v28 = vmul.f32 %v2995_v22, %v3007_v0 }
 0x1db   :  { %4074 = vst [vmem:[#allocation31_spill] sm:$0xff] %v3239_v62  ;;  %4077 = vst [vmem:[#allocation33_spill] sm:$0xff] %v3247_v58  ;;  %v4080_v62 = vld [vmem:[#allocation15_spill] sm:$0xff]  ;;  %v3267_v45 = vmul.f32 %v2995_v22, %v4081_v32  ;;  %v3269_v58 = vld [vmem:[#allocation6] ss:$0 sm:$0xff]  ;;  %v3281_v9 = vmul.f32 %v2995_v22, %v3013_v47  ;;  %v3289_v32 = vmul.f32 %v2995_v22, %v3025_v6 }
 0x1dc   :  { %v3263_v36 = vmul.f32 %v2995_v22, %v4080_v62  ;;  %v3285_v62 = vmul.f32 %v2995_v22, %v3019_v41  ;;  %v3293_v44 = vmul.f32 %v2995_v22, %v3031_v27  ;;  %v3297_v0 = vmul.f32 %v2995_v22, %v3037_v4 }
 0x1dd   :  { %v3301_v47 = vmul.f32 %v2995_v22, %v3043_v15  ;;  %v3305_v41 = vadd.f32 %v3269_v58, %v3047_v48  ;;  %v3309_v6 = vadd.f32 %v3269_v58, %v3051_v10  ;;  %v3313_v27 = vadd.f32 %v3269_v58, %v3055_v2 }
 0x1de   :  { %v3317_v4 = vadd.f32 %v3269_v58, %v3059_v19  ;;  %v3321_v22 = vadd.f32 %v3269_v58, %v3063_v59  ;;  %v3325_v15 = vadd.f32 %v3269_v58, %v3067_v38  ;;  %v3329_v48 = vadd.f32 %v3269_v58, %v3071_v16 }
 0x1df   :  { %v3333_v10 = vadd.f32 %v3269_v58, %v3075_v23  ;;  %v3337_v2 = vadd.f32 %v3269_v58, %v3079_v53  ;;  %v3341_v19 = vadd.f32 %v3269_v58, %v3083_v35  ;;  %v3345_v59 = vadd.f32 %v3269_v58, %v3087_v8 }
 0x1e0   :  { %v3349_v38 = vadd.f32 %v3269_v58, %v3091_v7  ;;  %v3353_v16 = vadd.f32 %v3269_v58, %v3095_v18  ;;  %v3357_v23 = vadd.f32 %v3269_v58, %v3099_v13  ;;  %v3361_v53 = vadd.f32 %v3269_v58, %v3103_v30 }
 0x1e1   :  { %v3365_v35 = vadd.f32 %v3269_v58, %v3107_v26  ;;  %v3369_v8 = vadd.f32 %v3269_v58, %v3111_v43  ;;  %v3373_v7 = vadd.f32 %v3269_v58, %v3115_v39  ;;  %v3377_v18 = vadd.f32 %v3269_v58, %v3119_v56 }
 0x1e2   :  { %v3381_v13 = vadd.f32 %v3269_v58, %v3123_v52  ;;  %v3385_v30 = vadd.f32 %v3269_v58, %v3127_v5  ;;  %v3389_v26 = vadd.f32 %v3269_v58, %v3131_v1  ;;  %v3393_v43 = vadd.f32 %v3269_v58, %v3135_v25 }
 0x1e3   :  { %v3397_v39 = vadd.f32 %v3269_v58, %v3139_v21  ;;  %v3401_v56 = vadd.f32 %v3269_v58, %v3143_v42  ;;  %v3405_v52 = vadd.f32 %v3269_v58, %v3147_v37  ;;  %v3409_v5 = vadd.f32 %v3269_v58, %v3151_v60 }
 0x1e4   :  { %v3413_v1 = vadd.f32 %v3269_v58, %v3155_v54  ;;  %v3417_v25 = vadd.f32 %v3269_v58, %v3159_v17  ;;  %v3421_v21 = vadd.f32 %v3269_v58, %v3163_v11  ;;  %v3425_v42 = vadd.f32 %v3269_v58, %v3167_v40 }
 0x1e5   :  { %v3429_v37 = vadd.f32 %v3269_v58, %v3171_v34  ;;  %v3433_v60 = vadd.f32 %v3269_v58, %v3175_v63  ;;  %v3437_v54 = vadd.f32 %v3269_v58, %v3179_v55  ;;  %v3441_v17 = vadd.f32 %v3269_v58, %v3183_v29 }
 0x1e6   :  { %v3445_v11 = vadd.f32 %v3269_v58, %v3187_v20  ;;  %v3449_v40 = vadd.f32 %v3269_v58, %v3191_v57  ;;  %v3453_v34 = vadd.f32 %v3269_v58, %v3195_v49  ;;  %v3457_v63 = vadd.f32 %v3269_v58, %v3199_v31  ;;  %v4085_v57 = vld [vmem:[#allocation23_spill] sm:$0xff] }
 0x1e7   :  { %v3461_v55 = vadd.f32 %v3269_v58, %v3203_v12  ;;  %v3465_v29 = vadd.f32 %v3269_v58, %v3207_v3  ;;  %v3469_v20 = vadd.f32 %v3269_v58, %v3211_v51  ;;  %v3473_v49 = vadd.f32 %v3269_v58, %v4085_v57 }
 0x1e8   :  { %4082 = vst [vmem:[#allocation20_spill] sm:$0xff] %v3457_v63  ;;  %v3477_v31 = vadd.f32 %v3269_v58, %v3219_v46  ;;  %v4088_v63 = vld [vmem:[#allocation27_spill] sm:$0xff]  ;;  %v3493_v57 = vadd.f32 %v3269_v58, %v3235_v24  ;;  %v3513_v24 = vadd.f32 %v3269_v58, %v3255_v61  ;;  %v3533_v61 = vadd.f32 %v3269_v58, %v3277_v28 }
 0x1e9   :  { %4083 = vst [vmem:[#allocation19_spill] sm:$0xff] %v3461_v55  ;;  %4084 = vst [vmem:[#allocation22_spill] sm:$0xff] %v3465_v29  ;;  %v3481_v12 = vadd.f32 %v3269_v58, %v4088_v63  ;;  %v4090_v55 = vld [vmem:[#allocation29_spill] sm:$0xff]  ;;  %v4091_v29 = vld [vmem:[#allocation32_spill] sm:$0xff]  ;;  %v3553_v28 = vadd.f32 %v3269_v58, %v3297_v0  ;;  %v1322_v0 = vmax.f32 %v3333_v10, 0.0  ;;  %v1333_v10 = vmax.f32 %v3377_v18, 0.0 }
 0x1ea   :  { %4086 = vst [vmem:[#allocation21_spill] sm:$0xff] %v3473_v49  ;;  %4087 = vst [vmem:[#allocation24_spill] sm:$0xff] %v3477_v31  ;;  %v3485_v3 = vadd.f32 %v3269_v58, %v4090_v55  ;;  %v3489_v51 = vadd.f32 %v3269_v58, %v4091_v29  ;;  %v4092_v49 = vld [vmem:[#allocation31_spill] sm:$0xff]  ;;  %v4093_v31 = vld [vmem:[#allocation34_spill] sm:$0xff]  ;;  %v3509_v29 = vadd.f32 %v3269_v58, %v3251_v33  ;;  %v1344_v18 = vmax.f32 %v3421_v21, 0.0 }
 0x1eb   :  { %4089 = vst [vmem:[#allocation26_spill] sm:$0xff] %v3481_v12  ;;  %v3497_v46 = vadd.f32 %v3269_v58, %v4092_v49  ;;  %v3501_v63 = vadd.f32 %v3269_v58, %v4093_v31  ;;  %v4094_v12 = vld [vmem:[#allocation33_spill] sm:$0xff]  ;;  %v3517_v49 = vadd.f32 %v3269_v58, %v3259_v14  ;;  %v3521_v31 = vadd.f32 %v3269_v58, %v3263_v36 }
 0x1ec   :  { %v3505_v55 = vadd.f32 %v3269_v58, %v4094_v12  ;;  %v3525_v12 = vadd.f32 %v3269_v58, %v3267_v45  ;;  %v3529_v33 = vadd.f32 %v3269_v58, %v3273_v50  ;;  %v3537_v14 = vadd.f32 %v3269_v58, %v3281_v9  ;;  %4099 = vst [vmem:[#allocation18_spill] sm:$0xff] %v3553_v28 }
 0x1ed   :  { %v3541_v36 = vadd.f32 %v3269_v58, %v3285_v62  ;;  %v3545_v45 = vadd.f32 %v3269_v58, %v3289_v32  ;;  %v3549_v50 = vadd.f32 %v3269_v58, %v3293_v44  ;;  %v3557_v9 = vadd.f32 %v3269_v58, %v3301_v47  ;;  %1386 = vst.msk [vmem:[%s3883_s4 + $0x38] sm:$0xff] %vm707_vm2, %v1322_v0 }
 0x1ee   :  { %4095 = vst [vmem:[#allocation25_spill] sm:$0xff] %v3537_v14  ;;  %v1315_v14 = vmax.f32 %v3305_v41, 0.0  ;;  %v1316_v62 = vmax.f32 %v3309_v6, 0.0  ;;  %v1318_v32 = vmax.f32 %v3317_v4, 0.0  ;;  %v1320_v44 = vmax.f32 %v3325_v15, 0.0  ;;  %1397 = vst.msk [vmem:[%s3883_s4 + $0x90] sm:$0xff] %vm707_vm2, %v1333_v10 }
 0x1ef   :  { %4096 = vst [vmem:[#allocation28_spill] sm:$0xff] %v3541_v36  ;;  %4097 = vst [vmem:[#allocation30_spill] sm:$0xff] %v3545_v45  ;;  %v1317_v36 = vmax.f32 %v3313_v27, 0.0  ;;  %v1319_v45 = vmax.f32 %v3321_v22, 0.0  ;;  %v1323_v28 = vmax.f32 %v3337_v2, 0.0  ;;  %v1324_v58 = vmax.f32 %v3341_v19, 0.0 }
 0x1f0   :  { %4098 = vst [vmem:[#allocation17_spill] sm:$0xff] %v3549_v50  ;;  %v1321_v50 = vmax.f32 %v3329_v48, 0.0  ;;  %v1325_v47 = vmax.f32 %v3345_v59, 0.0  ;;  %v1326_v41 = vmax.f32 %v3349_v38, 0.0  ;;  %1379 = vst.msk [vmem:[%s3883_s4] sm:$0xff] %vm707_vm2, %v1315_v14  ;;  %v1327_v6 = vmax.f32 %v3353_v16, 0.0 }
 0x1f1   :  { %1380 = vst.msk [vmem:[%s3883_s4 + $0x8] sm:$0xff] %vm707_vm2, %v1316_v62  ;;  %1381 = vst.msk [vmem:[%s3883_s4 + $0x10] sm:$0xff] %vm707_vm2, %v1317_v36  ;;  %v1328_v27 = vmax.f32 %v3357_v23, 0.0  ;;  %v1329_v4 = vmax.f32 %v3361_v53, 0.0  ;;  %v1330_v22 = vmax.f32 %v3365_v35, 0.0  ;;  %v1331_v15 = vmax.f32 %v3369_v8, 0.0 }
 0x1f2   :  { %1382 = vst.msk [vmem:[%s3883_s4 + $0x18] sm:$0xff] %vm707_vm2, %v1318_v32  ;;  %1383 = vst.msk [vmem:[%s3883_s4 + $0x20] sm:$0xff] %vm707_vm2, %v1319_v45  ;;  %v1332_v48 = vmax.f32 %v3373_v7, 0.0  ;;  %v1334_v2 = vmax.f32 %v3381_v13, 0.0  ;;  %v1335_v19 = vmax.f32 %v3385_v30, 0.0  ;;  %v1336_v59 = vmax.f32 %v3389_v26, 0.0 }
 0x1f3   :  { %1384 = vst.msk [vmem:[%s3883_s4 + $0x28] sm:$0xff] %vm707_vm2, %v1320_v44  ;;  %1385 = vst.msk [vmem:[%s3883_s4 + $0x30] sm:$0xff] %vm707_vm2, %v1321_v50  ;;  %v1337_v38 = vmax.f32 %v3393_v43, 0.0  ;;  %v1338_v16 = vmax.f32 %v3397_v39, 0.0  ;;  %v1339_v23 = vmax.f32 %v3401_v56, 0.0  ;;  %v1340_v53 = vmax.f32 %v3405_v52, 0.0 }
 0x1f4   :  { %1387 = vst.msk [vmem:[%s3883_s4 + $0x40] sm:$0xff] %vm707_vm2, %v1323_v28  ;;  %1388 = vst.msk [vmem:[%s3883_s4 + $0x48] sm:$0xff] %vm707_vm2, %v1324_v58  ;;  %v1341_v35 = vmax.f32 %v3409_v5, 0.0  ;;  %v1342_v8 = vmax.f32 %v3413_v1, 0.0  ;;  %v1343_v7 = vmax.f32 %v3417_v25, 0.0  ;;  %v1345_v13 = vmax.f32 %v3425_v42, 0.0 }
 0x1f5   :  { %1389 = vst.msk [vmem:[%s3883_s4 + $0x50] sm:$0xff] %vm707_vm2, %v1325_v47  ;;  %1390 = vst.msk [vmem:[%s3883_s4 + $0x58] sm:$0xff] %vm707_vm2, %v1326_v41  ;;  %v1346_v30 = vmax.f32 %v3429_v37, 0.0  ;;  %v1347_v26 = vmax.f32 %v3433_v60, 0.0  ;;  %v1348_v43 = vmax.f32 %v3437_v54, 0.0  ;;  %v1349_v39 = vmax.f32 %v3441_v17, 0.0 }
 0x1f6   :  { %1391 = vst.msk [vmem:[%s3883_s4 + $0x60] sm:$0xff] %vm707_vm2, %v1327_v6  ;;  %1392 = vst.msk [vmem:[%s3883_s4 + $0x68] sm:$0xff] %vm707_vm2, %v1328_v27  ;;  %v1350_v56 = vmax.f32 %v3445_v11, 0.0  ;;  %v1351_v52 = vmax.f32 %v3449_v40, 0.0  ;;  %v1352_v5 = vmax.f32 %v3453_v34, 0.0  ;;  %v4100_v1 = vld [vmem:[#allocation20_spill] sm:$0xff] }
 0x1f7   :  { %1393 = vst.msk [vmem:[%s3883_s4 + $0x70] sm:$0xff] %vm707_vm2, %v1329_v4  ;;  %1394 = vst.msk [vmem:[%s3883_s4 + $0x78] sm:$0xff] %vm707_vm2, %v1330_v22  ;;  %v1353_v25 = vmax.f32 %v4100_v1, 0.0  ;;  %v4101_v21 = vld [vmem:[#allocation19_spill] sm:$0xff]  ;;  %v4102_v37 = vld [vmem:[#allocation22_spill] sm:$0xff]  ;;  %v1356_v54 = vmax.f32 %v3469_v20, 0.0 }
 0x1f8   :  { %1395 = vst.msk [vmem:[%s3883_s4 + $0x80] sm:$0xff] %vm707_vm2, %v1331_v15  ;;  %1396 = vst.msk [vmem:[%s3883_s4 + $0x88] sm:$0xff] %vm707_vm2, %v1332_v48  ;;  %v1354_v42 = vmax.f32 %v4101_v21, 0.0  ;;  %v1355_v60 = vmax.f32 %v4102_v37, 0.0  ;;  %v4103_v17 = vld [vmem:[#allocation21_spill] sm:$0xff]  ;;  %v4104_v40 = vld [vmem:[#allocation24_spill] sm:$0xff] }
 0x1f9   :  { %1398 = vst.msk [vmem:[%s3883_s4 + $0x98] sm:$0xff] %vm707_vm2, %v1334_v2  ;;  %1399 = vst.msk [vmem:[%s3883_s4 + $0xa0] sm:$0xff] %vm707_vm2, %v1335_v19  ;;  %v1357_v11 = vmax.f32 %v4103_v17, 0.0  ;;  %v1358_v34 = vmax.f32 %v4104_v40, 0.0  ;;  %v4105_v20 = vld [vmem:[#allocation26_spill] sm:$0xff]  ;;  %v1360_v36 = vmax.f32 %v3485_v3, 0.0 }
 0x1fa   :  { %1400 = vst.msk [vmem:[%s3883_s4 + $0xa8] sm:$0xff] %vm707_vm2, %v1336_v59  ;;  %1401 = vst.msk [vmem:[%s3883_s4 + $0xb0] sm:$0xff] %vm707_vm2, %v1337_v38  ;;  %v1359_v14 = vmax.f32 %v4105_v20, 0.0  ;;  %v1361_v45 = vmax.f32 %v3489_v51, 0.0  ;;  %v1362_v50 = vmax.f32 %v3493_v57, 0.0  ;;  %v1363_v3 = vmax.f32 %v3497_v46, 0.0 }
 0x1fb   :  { %1402 = vst.msk [vmem:[%s3883_s4 + $0xb8] sm:$0xff] %vm707_vm2, %v1338_v16  ;;  %1403 = vst.msk [vmem:[%s3883_s4 + $0xc0] sm:$0xff] %vm707_vm2, %v1339_v23  ;;  %v1364_v51 = vmax.f32 %v3501_v63, 0.0  ;;  %v1365_v57 = vmax.f32 %v3505_v55, 0.0  ;;  %v1366_v28 = vmax.f32 %v3509_v29, 0.0  ;;  %v1367_v46 = vmax.f32 %v3513_v24, 0.0 }
 0x1fc   :  { %1404 = vst.msk [vmem:[%s3883_s4 + $0xc8] sm:$0xff] %vm707_vm2, %v1340_v53  ;;  %1405 = vst.msk [vmem:[%s3883_s4 + $0xd0] sm:$0xff] %vm707_vm2, %v1341_v35  ;;  %v1368_v63 = vmax.f32 %v3517_v49, 0.0  ;;  %v1369_v55 = vmax.f32 %v3521_v31, 0.0  ;;  %v1370_v29 = vmax.f32 %v3525_v12, 0.0  ;;  %v1371_v24 = vmax.f32 %v3529_v33, 0.0 }
 0x1fd   :  { %1406 = vst.msk [vmem:[%s3883_s4 + $0xd8] sm:$0xff] %vm707_vm2, %v1342_v8  ;;  %1407 = vst.msk [vmem:[%s3883_s4 + $0xe0] sm:$0xff] %vm707_vm2, %v1343_v7  ;;  %v1372_v49 = vmax.f32 %v3533_v61, 0.0  ;;  %v4106_v31 = vld [vmem:[#allocation25_spill] sm:$0xff]  ;;  %v4107_v62 = vld [vmem:[#allocation28_spill] sm:$0xff]  ;;  %v1378_v41 = vmax.f32 %v3557_v9, 0.0 }
 0x1fe   :  { %1408 = vst.msk [vmem:[%s3883_s4 + $0xe8] sm:$0xff] %vm707_vm2, %v1344_v18  ;;  %1409 = vst.msk [vmem:[%s3883_s4 + $0xf0] sm:$0xff] %vm707_vm2, %v1345_v13  ;;  %v1373_v12 = vmax.f32 %v4106_v31, 0.0  ;;  %v1374_v32 = vmax.f32 %v4107_v62, 0.0  ;;  %v4108_v33 = vld [vmem:[#allocation30_spill] sm:$0xff]  ;;  %v4109_v44 = vld [vmem:[#allocation17_spill] sm:$0xff] }
 0x1ff   :  { %1410 = vst.msk [vmem:[%s3883_s4 + $0xf8] sm:$0xff] %vm707_vm2, %v1346_v30  ;;  %1411 = vst.msk [vmem:[%s3883_s4 + $0x100] sm:$0xff] %vm707_vm2, %v1347_v26  ;;  %v1375_v61 = vmax.f32 %v4108_v33, 0.0  ;;  %v1376_v0 = vmax.f32 %v4109_v44, 0.0  ;;  %v4110_v58 = vld [vmem:[#allocation18_spill] sm:$0xff] }
 0x200   :  { %1412 = vst.msk [vmem:[%s3883_s4 + $0x108] sm:$0xff] %vm707_vm2, %v1348_v43  ;;  %1413 = vst.msk [vmem:[%s3883_s4 + $0x110] sm:$0xff] %vm707_vm2, %v1349_v39  ;;  %v1377_v47 = vmax.f32 %v4110_v58, 0.0 }
 0x201   :  { %1414 = vst.msk [vmem:[%s3883_s4 + $0x118] sm:$0xff] %vm707_vm2, %v1350_v56  ;;  %1415 = vst.msk [vmem:[%s3883_s4 + $0x120] sm:$0xff] %vm707_vm2, %v1351_v52 }
 0x202   :  { %1416 = vst.msk [vmem:[%s3883_s4 + $0x128] sm:$0xff] %vm707_vm2, %v1352_v5  ;;  %1417 = vst.msk [vmem:[%s3883_s4 + $0x130] sm:$0xff] %vm707_vm2, %v1353_v25 }
 0x203   :  { %1418 = vst.msk [vmem:[%s3883_s4 + $0x138] sm:$0xff] %vm707_vm2, %v1354_v42  ;;  %1419 = vst.msk [vmem:[%s3883_s4 + $0x140] sm:$0xff] %vm707_vm2, %v1355_v60 }
 0x204   :  { %1420 = vst.msk [vmem:[%s3883_s4 + $0x148] sm:$0xff] %vm707_vm2, %v1356_v54  ;;  %1421 = vst.msk [vmem:[%s3883_s4 + $0x150] sm:$0xff] %vm707_vm2, %v1357_v11 }
 0x205   :  { %1422 = vst.msk [vmem:[%s3883_s4 + $0x158] sm:$0xff] %vm707_vm2, %v1358_v34  ;;  %1423 = vst.msk [vmem:[%s3883_s4 + $0x160] sm:$0xff] %vm707_vm2, %v1359_v14 }
 0x206   :  { %1424 = vst.msk [vmem:[%s3883_s4 + $0x168] sm:$0xff] %vm707_vm2, %v1360_v36  ;;  %1425 = vst.msk [vmem:[%s3883_s4 + $0x170] sm:$0xff] %vm707_vm2, %v1361_v45 }
 0x207   :  { %1426 = vst.msk [vmem:[%s3883_s4 + $0x178] sm:$0xff] %vm707_vm2, %v1362_v50  ;;  %1427 = vst.msk [vmem:[%s3883_s4 + $0x180] sm:$0xff] %vm707_vm2, %v1363_v3 }
 0x208   :  { %1428 = vst.msk [vmem:[%s3883_s4 + $0x188] sm:$0xff] %vm707_vm2, %v1364_v51  ;;  %1429 = vst.msk [vmem:[%s3883_s4 + $0x190] sm:$0xff] %vm707_vm2, %v1365_v57 }
 0x209   :  { %1430 = vst.msk [vmem:[%s3883_s4 + $0x198] sm:$0xff] %vm707_vm2, %v1366_v28  ;;  %1431 = vst.msk [vmem:[%s3883_s4 + $0x1a0] sm:$0xff] %vm707_vm2, %v1367_v46 }
 0x20a   :  { %1432 = vst.msk [vmem:[%s3883_s4 + $0x1a8] sm:$0xff] %vm707_vm2, %v1368_v63  ;;  %1433 = vst.msk [vmem:[%s3883_s4 + $0x1b0] sm:$0xff] %vm707_vm2, %v1369_v55 }
 0x20b   :  { %1434 = vst.msk [vmem:[%s3883_s4 + $0x1b8] sm:$0xff] %vm707_vm2, %v1370_v29  ;;  %1435 = vst.msk [vmem:[%s3883_s4 + $0x1c0] sm:$0xff] %vm707_vm2, %v1371_v24 }
 0x20c   :  { %1436 = vst.msk [vmem:[%s3883_s4 + $0x1c8] sm:$0xff] %vm707_vm2, %v1372_v49  ;;  %1437 = vst.msk [vmem:[%s3883_s4 + $0x1d0] sm:$0xff] %vm707_vm2, %v1373_v12 }
 0x20d   :  { %1438 = vst.msk [vmem:[%s3883_s4 + $0x1d8] sm:$0xff] %vm707_vm2, %v1374_v32  ;;  %1439 = vst.msk [vmem:[%s3883_s4 + $0x1e0] sm:$0xff] %vm707_vm2, %v1375_v61 }
 0x20e   :  { %1440 = vst.msk [vmem:[%s3883_s4 + $0x1e8] sm:$0xff] %vm707_vm2, %v1376_v0  ;;  %1441 = vst.msk [vmem:[%s3883_s4 + $0x1f0] sm:$0xff] %vm707_vm2, %v1377_v47 }
 0x20f   :  { %1442 = vst.msk [vmem:[%s3883_s4 + $0x1f8] sm:$0xff] %vm707_vm2, %v1378_v41 }
 0x210   :  { %1447 = vsyncpa [#allocation3], 1 }
 0x211   :  { %1448 = vsyncpa [#allocation5], 1 }

// kernel: chaosdonkey06_ae_forward.3
= control target key start
LH: loop header
LB: loop body
LE: loop exit
PB: predicated region body
PF: predicated region fallthrough
CT: control target
= control target key end

     0   :  { %14 = vsyncpa [#allocation3], 0  ;;  %s10835_s0 = inlined_call_operand.vmem [shape: f32[2,16384], index: 0, kind: input, shape index: {}]   ;;  %s10836_s1 = inlined_call_operand.hbm [shape: bf16[16384,128], index: 1, kind: input, shape index: {}]   ;;  %s10837_s2 = inlined_call_operand.hbm [shape: f32[1,128], index: 2, kind: input, shape index: {}]   ;;  %s10838_s3 = inlined_call_operand.hbm [shape: f32[128,256], index: 3, kind: input, shape index: {}]   ;;  %s10839_s4 = inlined_call_operand.hbm [shape: f32[1,256], index: 4, kind: input, shape index: {}]   ;;  %s10840_s5 = inlined_call_operand.hbm [shape: bf16[256,1024], index: 5, kind: input, shape index: {}]   ;;  %s10841_s6 = inlined_call_operand.hbm [shape: f32[1,1024], index: 6, kind: input, shape index: {}]   ;;  %s10842_s7 = inlined_call_operand.hbm [shape: f32[2,128], index: 7, kind: output, shape index: {0}]   ;;  %s10843_s8 = inlined_call_operand.hbm [shape: f32[2,1024], index: 8, kind: output, shape index: {1}]  }
   0x1   :  { %16 = vsyncpa [#allocation3 + $0x1], 0 }
   0x2   :  { %17 = vsyncpa [#allocation6], 0 }
   0x3   :  { %18 = vsyncpa [#allocation9], 0 }
   0x4   :  { %19 = vsyncpa [#allocation12], 0 }
   0x5   :  { %20 = vsyncpa [#allocation4], 0 }
   0x6   :  { %21 = vsyncpa [#allocation15], 0  ;;  %s9984_s27 = smov 0   ;;  %s9986_s28 = smov 0  }
   0x7   :  { %s9988_s29 = smov 0   ;;  %s9990_s30 = smov 0  }
   0x8 LB: > { %s9922_s9 = smov [#allocation5]   ;;  %s10005_s11 = sadd.s32 4294967295, %s9920_s30   ;;  %s9920_s30 = sphi %s9990_s30, %s10865_s30   ;;  %s9916_s29 = sphi %s9988_s29, %s10864_s29   ;;  %s9912_s28 = sphi %s9986_s28, %s10863_s28   ;;  %s9908_s27 = sphi %s9984_s27, %s10862_s27  }
   0x9   : > { %s244_s10 = sshll.u32 %s9922_s9, 4  ;;  %p7602_p0 = scmp.ge.s32.totalorder %s9920_s30, 1  ;;  %s245_s10 = int_to_ptr.vmem [resolvable:$true] %s244_s10 }
   0xa   : > { %p10844_p1 = scmp.eq.s32.totalorder %s10005_s11, 0  ;;  %p231_p2 = scmp.lt.s32.totalorder %s9920_s30, 3 }
   0xb   : > { %s9923_s13 = smov [#allocation8]   ;;  %s9924_s15 = smov [#allocation7]  }
   0xc   : > { %p10011_p4 = pnand %p7602_p0, %p231_p2  ;;  %s268_s14 = sshll.u32 %s9923_s13, 4  ;;  %s269_s14 = int_to_ptr.vmem [resolvable:$true] %s268_s14 }
   0xd   : > { %s254_s16 = sshll.u32 %s9924_s15, 4  ;;  %s9671_s19 = scalar_lea.vmem %s245_s10, 16  ;;  %s10023_s16 = int_to_ptr.vmem [resolvable:$true] %s254_s16 }
   0xe   : > { %s10847_s12 = scalar_select %p10011_p4, 1, 0 }
   0xf   : > { %p9013_p5 = pneg %p10011_p4  ;;  %p9672_p8 = scmp.ne.s32.totalorder %s245_s10, %s9671_s19 }
  0x10   : > { %s9678_s20 = scalar_lea.vmem %s245_s10, 32  ;;  %p9679_p11 = scmp.lt.s32.totalorder %s245_s10, %s245_s10 }
  0x11   : > { %p10019_p6 = pnand %p9013_p5, %p10844_p1  ;;  %p9680_p12 = scmp.lt.s32.totalorder %s9678_s20, %s9671_s19 }
  0x13   : > { %p10027_p7 = pneg %p10019_p6  ;;  %p9681_p13 = por %p9680_p12, %p9679_p11 }
  0x15   : > { %p9674_p9 = pnand %p9672_p8, %p10027_p7 }
  0x17   : > { %p9675_p10 = pneg %p9674_p9 }
  0x19   : > { %p9682_p0 = pnand %p9681_p13, %p9675_p10 }
  0x1b   : > { %9685 = shalt.err (!%p9682_p0)
}
  0x1c   : > { %9016 = dma.hbm_to_vmem [thread:$0]  (!%p10019_p6), %s10837_s2, 16, %s245_s10, [#allocation6]  }
  0x1d   : > { %s9697_s23 = scalar_lea.vmem %s269_s14, 32  ;;  %p9705_p8 = scmp.lt.s32.totalorder %s269_s14, %s269_s14 }
  0x1e   : > { %p9698_p2 = scmp.ne.s32.totalorder %s269_s14, %s9697_s23  ;;  %p9706_p9 = scmp.lt.s32.totalorder %s9697_s23, %s9697_s23 }
  0x20   : > { %p9700_p5 = pnand %p9698_p2, %p10027_p7  ;;  %p9707_p1 = por %p9706_p9, %p9705_p8 }
  0x22   : > { %p9701_p3 = pneg %p9700_p5 }
  0x24   : > { %p9708_p4 = pnand %p9707_p1, %p9701_p3 }
  0x26   : > { %9711 = shalt.err (!%p9708_p4)
}
  0x27   : > { %9022 = dma.hbm_to_vmem [thread:$0]  (!%p10019_p6), %s10839_s4, 32, %s269_s14, [#allocation9]  }
  0x28   : > { %s9723_s26 = scalar_lea.vmem %s10023_s16, 4096  ;;  %p9731_p13 = scmp.lt.s32.totalorder %s10023_s16, %s10023_s16 }
  0x29   : > { %p9724_p10 = scmp.ne.s32.totalorder %s10023_s16, %s9723_s26  ;;  %p9732_p0 = scmp.lt.s32.totalorder %s9723_s26, %s9723_s26 }
  0x2b   : > { %p9726_p11 = pnand %p9724_p10, %p10027_p7  ;;  %p9733_p1 = por %p9732_p0, %p9731_p13 }
  0x2d   : > { %p9727_p12 = pneg %p9726_p11 }
  0x2f   : > { %p9734_p3 = pnand %p9733_p1, %p9727_p12 }
  0x31   : > { %9737 = shalt.err (!%p9734_p3)
}
  0x32   : > { %s9925_s9 = smov 256   ;;  %s9926_s10 = smov 16  }
  0x33   : > { %9019 = dma.hbm_to_vmem [thread:$0]  (!%p10019_p6), %s10838_s3, 4096, %s10023_s16, [#allocation6], %s9925_s9, %s9925_s9, %s9926_s10  }
  0x34   : > { %s9927_s14 = smov [#allocation10]  }
  0x35   : > { %s278_s19 = sshll.u32 %s9927_s14, 4  ;;  %s279_s19 = int_to_ptr.vmem [resolvable:$true] %s278_s19 }
  0x36   : > { %s9749_s20 = scalar_lea.vmem %s279_s19, 16384  ;;  %p9757_p8 = scmp.lt.s32.totalorder %s279_s19, %s279_s19 }
  0x37   : > { %p9750_p4 = scmp.ne.s32.totalorder %s279_s19, %s9749_s20  ;;  %p9758_p9 = scmp.lt.s32.totalorder %s9749_s20, %s9749_s20 }
  0x39   : > { %p9752_p2 = pnand %p9750_p4, %p10027_p7  ;;  %p9759_p10 = por %p9758_p9, %p9757_p8 }
  0x3b   : > { %p9753_p5 = pneg %p9752_p2 }
  0x3d   : > { %p9760_p11 = pnand %p9759_p10, %p9753_p5 }
  0x3f   : > { %9763 = shalt.err (!%p9760_p11)
}
  0x40   : > { %s9928_s21 = smov 512   ;;  %s9929_s22 = smov 32  }
  0x41   : > { %9025 = dma.hbm_to_vmem [thread:$0]  (!%p10019_p6), %s10840_s5, 16384, %s279_s19, [#allocation9], %s9928_s21, %s9928_s21, %s9929_s22  }
  0x42   : > { %s9930_s24 = smov [#allocation11]  }
  0x43   : > { %s292_s25 = sshll.u32 %s9930_s24, 4  ;;  %s293_s25 = int_to_ptr.vmem [resolvable:$true] %s292_s25 }
  0x44   : > { %s9775_s26 = scalar_lea.vmem %s293_s25, 128  ;;  %p9783_p1 = scmp.lt.s32.totalorder %s293_s25, %s293_s25 }
  0x45   : > { %p9776_p12 = scmp.ne.s32.totalorder %s293_s25, %s9775_s26  ;;  %p9784_p3 = scmp.lt.s32.totalorder %s9775_s26, %s9775_s26 }
  0x47   : > { %p9778_p13 = pnand %p9776_p12, %p10027_p7  ;;  %p9785_p4 = por %p9784_p3, %p9783_p1 }
  0x49   : > { %p9779_p0 = pneg %p9778_p13 }
  0x4b   : > { %p9786_p2 = pnand %p9785_p4, %p9779_p0 }
  0x4d   : > { %9789 = shalt.err (!%p9786_p2)
}
  0x4e   : > { %9028 = dma.hbm_to_vmem [thread:$0]  (!%p10019_p6), %s10841_s6, 128, %s293_s25, [#allocation12]  }
  0x4f   : > { %s10072_s18 = sadd.s32 1, %s9920_s30   ;;  %s60_s13 = sadd.s32 1, %s9916_s29 }
  0x50   : > { %s57_s17 = ssub.s32 %s9920_s30, %s10072_s18  ;;  %p67_p5 = scmp.ne.s32.totalorder %s9916_s29, %s9912_s28 }
  0x51   : > { %p58_p7 = scmp.eq.s32.totalorder %s57_s17, 0  ;;  %p68_p8 = scmp.eq.s32.totalorder %s9920_s30, 0 }
  0x52   : > { %p73_p9 = scmp.ne.s32.totalorder %s9912_s28, %s9908_s27  ;;  %p10850_p11 = scmp.eq.s32.totalorder %s10005_s11, 0 }
  0x53   : > { %s10083_s15 = scalar_select %p58_p7, %s9916_s29, %s60_s13  }
  0x54   : > { %p69_p10 = por %p68_p8, %p67_p5  ;;  %p10087_p12 = por %p10850_p11, %p73_p9 }
  0x55   : > { %p9038_p13 = scmp.lt.s32.totalorder %s9920_s30, 2  ;;  %s312_s19 = sand.u32 1, %s9916_s29  }
  0x56   : > { %s10851_s14 = scalar_select %p10087_p12, 1, 0 }
  0x57   : > { %s7609_s20 = sshll.u32 %s312_s19, 12  ;;  %s8278_s21 = sshll.u32 %s9920_s30, 16 }
  0x58   : > { %s10097_s16 = scalar_lea.hbm %s10836_s1, %s8278_s21  ;;  %s316_s27 = scalar_lea.vmem [#allocation2], %s7609_s20 }
  0x59   : > { %s323_s24 = sshll.u32 %s316_s27, 4  ;;  %p10101_p6 = pnand %p9038_p13, %p69_p10  ;;  %s10099_s24 = int_to_ptr.vmem [resolvable:$true] %s323_s24 }
  0x5a   : > { %s10105_s26 = scalar_lea.sflag [#allocation3], %s312_s19  ;;  %s9790_s30 = scalar_lea.hbm %s10097_s16, 65536 }
  0x5b   : > { %p9791_p0 = scmp.ne.s32.totalorder %s10097_s16, %s9790_s30  ;;  %p9792_p1 = pneg %p10101_p6 }
  0x5c   : > { %s9795_s17 = scalar_lea.hbm %s10836_s1, 131072  ;;  %p9796_p2 = scmp.lt.s32.totalorder %s10097_s16, %s10836_s1 }
  0x5d   : > { %p9793_p3 = pnand %p9792_p1, %p9791_p0  ;;  %p9797_p7 = scmp.lt.s32.totalorder %s9795_s17, %s9790_s30 }
  0x5f   : > { %p9794_p4 = pneg %p9793_p3  ;;  %p9798_p5 = por %p9797_p7, %p9796_p2 }
  0x61   : > { %p9799_p8 = pnand %p9798_p5, %p9794_p4 }
  0x63   : > { %9802 = shalt.err (!%p9799_p8)
}
  0x64   : > { %s9803_s19 = scalar_lea.vmem %s10099_s24, 65536  ;;  %s9931_s21 = smov [#allocation2]  }
  0x65   : > { %p9804_p9 = scmp.ne.s32.totalorder %s10099_s24, %s9803_s19  ;;  %s9808_s22 = sshll.u32 %s9931_s21, 4  ;;  %s9809_s22 = int_to_ptr.vmem [resolvable:$false] %s9808_s22 }
  0x66   : > { %s9810_s23 = scalar_lea.vmem %s9809_s22, 131072  ;;  %p9811_p13 = scmp.lt.s32.totalorder %s10099_s24, %s9809_s22 }
  0x67   : > { %p9806_p10 = pnand %p9804_p9, %p9792_p1  ;;  %p9812_p0 = scmp.lt.s32.totalorder %s9810_s23, %s9803_s19 }
  0x69   : > { %p9807_p11 = pneg %p9806_p10  ;;  %p9813_p3 = por %p9812_p0, %p9811_p13 }
  0x6b   : > { %p9814_p12 = pnand %p9813_p3, %p9807_p11 }
  0x6d   : > { %9817 = shalt.err (!%p9814_p12)
}
  0x6e   : > { %s9932_s27 = smov 64   ;;  %s9933_s30 = smov 4  }
  0x6f   : > { %9032 = dma.hbm_to_vmem [thread:$0]  (!%p10101_p6), %s10097_s16, 65536, %s10099_s24, %s10105_s26, %s9932_s27, %s9932_s27, %s9933_s30  }
  0x70   : > { %p10853_p1 = scmp.ne.s32.totalorder %s10847_s12, 0 }
  0x71   : > { %s337_s9 = sand.u32 (!%p10853_p1), 1, %s9912_s28   ;;  %p10854_p4 = scmp.ne.s32.totalorder (!%p10853_p1), %s10851_s14, 0 }
  0x72   : > { %335 = sbr.rel (%p10853_p1) target bundleno = 1721 (0x6b9), region = 48  ;;  %s7613_s10 = sshll.u32 (!%p10853_p1), %s337_s9, 12 }
  0x73   : > { %s338_s17 = scalar_lea.sflag (!%p10853_p1), [#allocation3], %s337_s9  ;;  %s10129_s13 = scalar_lea.vmem (!%p10853_p1), [#allocation2], %s7613_s10 }
  0x77   : > { %9883 = dma.done.wait (%p10854_p4), %s338_s17, 65536  }
  0x78   : > { %9885 = vsyncadd (%p10854_p4), %s338_s17, 4294901760  ;;  %p10855_p12 = scmp.eq.s32.totalorder %s10005_s11, 0 }
  0x7a   : > { %9887 = dma.done.wait (%p10855_p12), [#allocation6], 4112   ;;  %p10856_p6 = pmov %p10855_p12 }
  0x7c   : > { %9889 = vsyncadd (%p10856_p6), [#allocation6], 4294963184  ;;  %p10857_p2 = pmov %p10856_p6 }
  0x7e   : > { %9891 = dma.done.wait (%p10857_p2), [#allocation9], 16416   ;;  %p10858_p7 = pmov %p10857_p2 }
  0x7f   : > { %p10859_p5 = pmov %p10857_p2 }
  0x80   : > { %9893 = vsyncadd (%p10858_p7), [#allocation9], 4294950880 }
  0x81   : > { %9895 = dma.done.wait (%p10859_p5), [#allocation12], 128   ;;  %p10860_p8 = pmov %p10857_p2 }
  0x82   : > { %s7619_s12 = sshll.u32 %s10005_s11, 6  ;;  %p10861_p10 = scmp.ne.s32.totalorder %s10005_s11, 0 }
  0x83   : > { %9897 = vsyncadd (%p10860_p8), [#allocation12], 4294967168  ;;  %p395_p9 = scmp.lt.s32.totalorder %s7619_s12, 127 }
  0x84   : > { %405 = sbr.rel (%p10861_p10) target bundleno = 139 (0x8b), region = 76 }
  0x85   : > { %s10867_s12 = smov (!%p395_p9, %s7619_s12), 127 }
  0x86   : > { %s7620_s14 = sshll.u32 %s10867_s12, 1 }
  0x87   : > { %s10151_s25 = scalar_lea.vmem %s10835_s0, %s7620_s14 }
  0x89   : > { %v9934_v0 = vmov 0.0  }
  0x8a   : > { %406 = vst [vmem:[#allocation13] sm:$0x3] %v9934_v0 }
  0x8b PF: > { %v9096_v1 = vld [vmem:[%s10129_s13 + $0x78] sm:$0xff]   ;;  %v9100_v5 = vld [vmem:[%s10129_s13 + $0x70] sm:$0xff]   ;;  %v9104_v9 = vld [vmem:[%s10129_s13 + $0x68] sm:$0xff]   ;;  %v444_v29 = vlaneseq  ;;  %v9935_v37 = vmov 1983009808   ;;  %p8134_p11 = scmp.ne.s32.totalorder %s10005_s11, 1 }
  0x8c   : > { %v9097_v2 = vld [vmem:[%s10129_s13 + $0xf8] sm:$0xff]   ;;  %8279 = vmatprep.subr.bf16.mxu0 %v9096_v1  ;;  %v9101_v6 = vld [vmem:[%s10129_s13 + $0xf0] sm:$0xff]   ;;  %v9105_v10 = vld [vmem:[%s10129_s13 + $0xe8] sm:$0xff]   ;;  %v442_v38 = vunpack.c.l.s4 %v9935_v37 }
  0x8d   : > { %v9098_v3 = vld [vmem:[%s10129_s13 + $0x38] sm:$0xff]   ;;  %8301 = vmatprep.subr.bf16.mxu1 %v9097_v2  ;;  %v9102_v7 = vld [vmem:[%s10129_s13 + $0x30] sm:$0xff]   ;;  %v9106_v11 = vld [vmem:[%s10129_s13 + $0x28] sm:$0xff]   ;;  %v10187_v34 = vshrl.u32 %v444_v29, 7 }
  0x8e   : > { %v9099_v4 = vld [vmem:[%s10129_s13 + $0xb8] sm:$0xff]   ;;  %8280 = vmatpush3.bf16.msra.mxu0 %v9098_v3  ;;  %v9103_v8 = vld [vmem:[%s10129_s13 + $0xb0] sm:$0xff]   ;;  %v9107_v12 = vld [vmem:[%s10129_s13 + $0xa8] sm:$0xff]   ;;  %v443_v40 = vunpack.c.0.s8 %v442_v38 }
  0x8f   : > { %8302 = vmatpush3.bf16.msra.mxu1 %v9099_v4  ;;  %8281 = vmatprep.subr.bf16.mxu0 %v9100_v5  ;;  %v9108_v13 = vld [vmem:[%s10129_s13 + $0x60] sm:$0xff]   ;;  %v9112_v17 = vld [vmem:[%s10129_s13 + $0x58] sm:$0xff]   ;;  %v9116_v21 = vld [vmem:[%s10129_s13 + $0x50] sm:$0xff]  }
  0x90   : > { %8303 = vmatprep.subr.bf16.mxu1 %v9101_v6  ;;  %v9109_v14 = vld [vmem:[%s10129_s13 + $0xe0] sm:$0xff]   ;;  %v9113_v18 = vld [vmem:[%s10129_s13 + $0xd8] sm:$0xff]   ;;  %v9117_v22 = vld [vmem:[%s10129_s13 + $0xd0] sm:$0xff]   ;;  %v10193_v42 = vsub.s32 %v443_v40, %v10187_v34 }
  0x91   : > { %v9110_v15 = vld [vmem:[%s10129_s13 + $0x20] sm:$0xff]   ;;  %v9114_v19 = vld [vmem:[%s10129_s13 + $0x18] sm:$0xff]   ;;  %v9118_v23 = vld [vmem:[%s10129_s13 + $0x10] sm:$0xff]  }
  0x92   : > { %8282 = vmatpush3.bf16.msra.mxu0 %v9102_v7  ;;  %v9111_v16 = vld [vmem:[%s10129_s13 + $0xa0] sm:$0xff]   ;;  %v9115_v20 = vld [vmem:[%s10129_s13 + $0x98] sm:$0xff]   ;;  %v9119_v24 = vld [vmem:[%s10129_s13 + $0x90] sm:$0xff]  }
  0x93   : > { %8304 = vmatpush3.bf16.msra.mxu1 %v9103_v8  ;;  %8283 = vmatprep.subr.bf16.mxu0 %v9104_v9  ;;  %v9120_v25 = vld [vmem:[%s10129_s13 + $0x48] sm:$0xff]   ;;  %v9124_v30 = vld [vmem:[%s10129_s13 + $0x40] sm:$0xff]   ;;  %v9129_v36 = vld [vmem:[%s10129_s13 + $0x178] sm:$0xff]  }
  0x94   : > { %8305 = vmatprep.subr.bf16.mxu1 %v9105_v10  ;;  %v9121_v26 = vld [vmem:[%s10129_s13 + $0xc8] sm:$0xff]   ;;  %v9125_v31 = vld [vmem:[%s10129_s13 + $0xc0] sm:$0xff]   ;;  %v9130_v39 = vld [vmem:[%s10129_s13 + $0x1f8] sm:$0xff]  }
  0x95   : > { %v9122_v27 = vld [vmem:[%s10129_s13 + $0x8] sm:$0xff]   ;;  %v9126_v32 = vld [vmem:[%s10129_s13] sm:$0xff]   ;;  %v9131_v47 = vld [vmem:[%s10129_s13 + $0x138] sm:$0xff]  }
  0x96   : > { %8284 = vmatpush3.bf16.msra.mxu0 %v9106_v11  ;;  %v9123_v28 = vld [vmem:[%s10129_s13 + $0x88] sm:$0xff]   ;;  %v9127_v33 = vld [vmem:[%s10129_s13 + $0x80] sm:$0xff]   ;;  %v9132_v50 = vld [vmem:[%s10129_s13 + $0x1b8] sm:$0xff]  }
  0x97   : > { %8306 = vmatpush3.bf16.msra.mxu1 %v9107_v12  ;;  %8285 = vmatprep.subr.bf16.mxu0 %v9108_v13  ;;  %v408_v35 = vld [vmem:[%s10151_s25] sm:$0xff]  ;;  %v9133_v53 = vld [vmem:[%s10129_s13 + $0x170] sm:$0xff]   ;;  %v9137_v57 = vld [vmem:[%s10129_s13 + $0x168] sm:$0xff]  }
  0x98   : > { %8307 = vmatprep.subr.bf16.mxu1 %v9109_v14  ;;  %v440_v41 = vcombine.high %v408_v35, %v408_v35  ;;  %v447_v43 = vrot.slane %v408_v35, %v10193_v42  ;;  %v9134_v54 = vld [vmem:[%s10129_s13 + $0x1f0] sm:$0xff]   ;;  %v9138_v58 = vld [vmem:[%s10129_s13 + $0x1e8] sm:$0xff]   ;;  %v9141_v61 = vld [vmem:[%s10129_s13 + $0x160] sm:$0xff]  }
  0x99   : > { %v9135_v55 = vld [vmem:[%s10129_s13 + $0x130] sm:$0xff]   ;;  %v9139_v59 = vld [vmem:[%s10129_s13 + $0x128] sm:$0xff]   ;;  %v9142_v62 = vld [vmem:[%s10129_s13 + $0x1e0] sm:$0xff]  }
  0x9a   : > { %8286 = vmatpush3.bf16.msra.mxu0 %v9110_v15  ;;  %v454_v44 = vrot.slane %v440_v41, %v10193_v42  ;;  %v455_v45 = vcombine.high %v447_v43, %v447_v43  ;;  %v776_v48 = vpack.c.bf16 %v447_v43, %v447_v43  ;;  %v9136_v56 = vld [vmem:[%s10129_s13 + $0x1b0] sm:$0xff]   ;;  %v9140_v60 = vld [vmem:[%s10129_s13 + $0x1a8] sm:$0xff]   ;;  %v9143_v63 = vld [vmem:[%s10129_s13 + $0x120] sm:$0xff]  }
  0x9b   : > { %8308 = vmatpush3.bf16.msra.mxu1 %v9111_v16  ;;  %8287 = vmatprep.subr.bf16.mxu0 %v9112_v17  ;;  %v9144_v0 = vld [vmem:[%s10129_s13 + $0x1a0] sm:$0xff]   ;;  %v9145_v1 = vld [vmem:[%s10129_s13 + $0x158] sm:$0xff]   ;;  %v9149_v5 = vld [vmem:[%s10129_s13 + $0x150] sm:$0xff]  }
  0x9c   : > { %8309 = vmatprep.subr.bf16.mxu1 %v9113_v18  ;;  %v456_v46 = vcombine.high %v454_v44, %v454_v44  ;;  %v778_v49 = vpack.c.bf16 %v454_v44, %v454_v44  ;;  %v777_v51 = vpack.c.bf16 %v455_v45, %v455_v45  ;;  %v9146_v2 = vld [vmem:[%s10129_s13 + $0x1d8] sm:$0xff]   ;;  %v9150_v6 = vld [vmem:[%s10129_s13 + $0x1d0] sm:$0xff]   ;;  %v9153_v9 = vld [vmem:[%s10129_s13 + $0x148] sm:$0xff]  }
  0x9d   : > { %v9147_v3 = vld [vmem:[%s10129_s13 + $0x118] sm:$0xff]   ;;  %v9151_v7 = vld [vmem:[%s10129_s13 + $0x110] sm:$0xff]   ;;  %v9154_v10 = vld [vmem:[%s10129_s13 + $0x1c8] sm:$0xff]  }
  0x9e   : > { %8288 = vmatpush3.bf16.msra.mxu0 %v9114_v19  ;;  %v779_v52 = vpack.c.bf16 %v456_v46, %v456_v46  ;;  %4968 = vmatprep.mubr.bf16.mxu0 %v777_v51  ;;  %v9148_v4 = vld [vmem:[%s10129_s13 + $0x198] sm:$0xff]   ;;  %v9152_v8 = vld [vmem:[%s10129_s13 + $0x190] sm:$0xff]   ;;  %v409_v11 = vld [vmem:[%s10151_s25 + $0x8] sm:$0xff] }
  0x9f   : > { %8310 = vmatpush3.bf16.msra.mxu1 %v9115_v20  ;;  %8289 = vmatprep.subr.bf16.mxu0 %v9116_v21  ;;  %v9155_v12 = vld [vmem:[%s10129_s13 + $0x108] sm:$0xff]   ;;  %v464_v13 = vrot.slane %v409_v11, %v10193_v42  ;;  %v457_v14 = vcombine.high %v409_v11, %v409_v11  ;;  %v9157_v16 = vld [vmem:[%s10129_s13 + $0x140] sm:$0xff]   ;;  %v9169_v35 = vld [vmem:[%s10129_s13 + $0x2b0] sm:$0xff]  }
  0xa0   : > { %8311 = vmatprep.subr.bf16.mxu1 %v9117_v22  ;;  %5008 = vmatprep.mubr.bf16.mxu1 %v779_v52  ;;  %v9156_v15 = vld [vmem:[%s10129_s13 + $0x188] sm:$0xff]   ;;  %v9158_v19 = vld [vmem:[%s10129_s13 + $0x1c0] sm:$0xff]   ;;  %v9178_v45 = vld [vmem:[%s10129_s13 + $0x258] sm:$0xff]  }
  0xa1   : > { %v472_v17 = vcombine.high %v464_v13, %v464_v13  ;;  %v471_v18 = vrot.slane %v457_v14, %v10193_v42  ;;  %v9159_v20 = vld [vmem:[%s10129_s13 + $0x100] sm:$0xff]   ;;  %v9171_v37 = vld [vmem:[%s10129_s13 + $0x2e8] sm:$0xff]   ;;  %v9179_v46 = vld [vmem:[%s10129_s13 + $0x2d8] sm:$0xff]  }
  0xa2   : > { %8290 = vmatpush3.bf16.msra.mxu0 %v9118_v23  ;;  %v9160_v23 = vld [vmem:[%s10129_s13 + $0x180] sm:$0xff]   ;;  %v9172_v38 = vld [vmem:[%s10129_s13 + $0x228] sm:$0xff]   ;;  %v9184_v51 = vld [vmem:[%s10129_s13 + $0x210] sm:$0xff]  }
  0xa3   : > { %8312 = vmatpush3.bf16.msra.mxu1 %v9119_v24  ;;  %8291 = vmatprep.subr.bf16.mxu0 %v9120_v25  ;;  %v781_v21 = vpack.c.bf16 %v472_v17, %v472_v17  ;;  %v473_v22 = vcombine.high %v471_v18, %v471_v18  ;;  %v9162_v25 = vld [vmem:[%s10129_s13 + $0x278] sm:$0xff]   ;;  %v782_v29 = vpack.c.bf16 %v471_v18, %v471_v18  ;;  %v9174_v40 = vld [vmem:[%s10129_s13 + $0x260] sm:$0xff]   ;;  %v9185_v52 = vld [vmem:[%s10129_s13 + $0x290] sm:$0xff]  }
  0xa4   : > { %8313 = vmatprep.subr.bf16.mxu1 %v9121_v26  ;;  %v9163_v26 = vld [vmem:[%s10129_s13 + $0x2f8] sm:$0xff]   ;;  %v9175_v41 = vld [vmem:[%s10129_s13 + $0x2e0] sm:$0xff]   ;;  %v9199_v11 = vld [vmem:[%s10129_s13 + $0x370] sm:$0xff]  }
  0xa5   : > { %v783_v24 = vpack.c.bf16 %v473_v22, %v473_v22  ;;  %v9176_v43 = vld [vmem:[%s10129_s13 + $0x220] sm:$0xff]   ;;  %v9202_v14 = vld [vmem:[%s10129_s13 + $0x3b0] sm:$0xff]   ;;  %v9205_v17 = vld [vmem:[%s10129_s13 + $0x328] sm:$0xff]  }
  0xa6   : > { %8292 = vmatpush3.bf16.msra.mxu0 %v9122_v27  ;;  %v9164_v27 = vld [vmem:[%s10129_s13 + $0x238] sm:$0xff]   ;;  %v9177_v44 = vld [vmem:[%s10129_s13 + $0x2a0] sm:$0xff]   ;;  %v9206_v18 = vld [vmem:[%s10129_s13 + $0x3a8] sm:$0xff]  }
  0xa7   : > { %8314 = vmatpush3.bf16.msra.mxu1 %v9123_v28  ;;  %8293 = vmatprep.subr.bf16.mxu0 %v9124_v30  ;;  %v780_v28 = vpack.c.bf16 %v464_v13, %v464_v13  ;;  %v9165_v30 = vld [vmem:[%s10129_s13 + $0x2b8] sm:$0xff]   ;;  %v9201_v13 = vld [vmem:[%s10129_s13 + $0x330] sm:$0xff]   ;;  %v9210_v22 = vld [vmem:[%s10129_s13 + $0x3a0] sm:$0xff]  }
  0xa8   : > { %8315 = vmatprep.subr.bf16.mxu1 %v9125_v31  ;;  %v9166_v31 = vld [vmem:[%s10129_s13 + $0x270] sm:$0xff]  }
  0xaa   : > { %8294 = vmatpush3.bf16.msra.mxu0 %v9126_v32  ;;  %v9167_v32 = vld [vmem:[%s10129_s13 + $0x2f0] sm:$0xff]  }
  0xab   : > { %8316 = vmatpush3.bf16.msra.mxu1 %v9127_v33  ;;  %8323 = vmatprep.subr.bf16.mxu0 %v9129_v36  ;;  %v9168_v33 = vld [vmem:[%s10129_s13 + $0x230] sm:$0xff]   ;;  %v9170_v36 = vld [vmem:[%s10129_s13 + $0x268] sm:$0xff]  }
  0xac   : > { %8345 = vmatprep.subr.bf16.mxu1 %v9130_v39  ;;  %v9173_v39 = vld [vmem:[%s10129_s13 + $0x2a8] sm:$0xff]  }
  0xad   : > { %4969 = vmatmul.mubr.bf16.vlgmr.msra.gmra.mxu0 %v776_v48  ;;  %v9181_v48 = vld [vmem:[%s10129_s13 + $0x298] sm:$0xff]  }
  0xae   : > { %5009 = vmatmul.mubr.bf16.vlgmr.msra.gmra.mxu1 %v778_v49  ;;  %8324 = vmatpush3.bf16.msra.mxu0 %v9131_v47  ;;  %v9180_v47 = vld [vmem:[%s10129_s13 + $0x218] sm:$0xff]   ;;  %v9182_v49 = vld [vmem:[%s10129_s13 + $0x250] sm:$0xff]  }
  0xaf   : > { %8346 = vmatpush3.bf16.msra.mxu1 %v9132_v50  ;;  %8325 = vmatprep.subr.bf16.mxu0 %v9133_v53  ;;  %v9183_v50 = vld [vmem:[%s10129_s13 + $0x2d0] sm:$0xff]   ;;  %v9186_v53 = vld [vmem:[%s10129_s13 + $0x248] sm:$0xff]  }
  0xb0   : > { %8347 = vmatprep.subr.bf16.mxu1 %v9134_v54  ;;  %5048 = vmatprep.mubr.bf16.mxu0 %v781_v21  ;;  %v9187_v54 = vld [vmem:[%s10129_s13 + $0x2c8] sm:$0xff]   ;;  %v9209_v21 = vld [vmem:[%s10129_s13 + $0x320] sm:$0xff]  }
  0xb1   : > { %5088 = vmatprep.mubr.bf16.mxu1 %v783_v24  ;;  %v9212_v24 = vld [vmem:[%s10129_s13 + $0x3d8] sm:$0xff]  }
  0xb2   : > { %8326 = vmatpush3.bf16.msra.mxu0 %v9135_v55  ;;  %v410_v55 = vld [vmem:[%s10151_s25 + $0x10] sm:$0xff] }
  0xb3   : > { %8348 = vmatpush3.bf16.msra.mxu1 %v9136_v56  ;;  %8327 = vmatprep.subr.bf16.mxu0 %v9137_v57  ;;  %v9188_v56 = vld [vmem:[%s10129_s13 + $0x208] sm:$0xff]   ;;  %v481_v57 = vrot.slane %v410_v55, %v10193_v42 }
  0xb4   : > { %8349 = vmatprep.subr.bf16.mxu1 %v9138_v58  ;;  %v474_v58 = vcombine.high %v410_v55, %v410_v55  ;;  %v9232_v55 = vld [vmem:[%s10129_s13 + $0x470] sm:$0xff]  }
  0xb6   : > { %8328 = vmatpush3.bf16.msra.mxu0 %v9139_v59  ;;  %v9189_v59 = vld [vmem:[%s10129_s13 + $0x288] sm:$0xff]  }
  0xb7   : > { %8350 = vmatpush3.bf16.msra.mxu1 %v9140_v60  ;;  %8329 = vmatprep.subr.bf16.mxu0 %v9141_v61  ;;  %v9190_v60 = vld [vmem:[%s10129_s13 + $0x240] sm:$0xff]   ;;  %v489_v61 = vcombine.high %v481_v57, %v481_v57 }
  0xb8   : > { %8351 = vmatprep.subr.bf16.mxu1 %v9142_v62  ;;  %v488_v62 = vrot.slane %v474_v58, %v10193_v42  ;;  %v9235_v58 = vld [vmem:[%s10129_s13 + $0x4b0] sm:$0xff]  }
  0xba   : > { %8330 = vmatpush3.bf16.msra.mxu0 %v9143_v63  ;;  %v9191_v63 = vld [vmem:[%s10129_s13 + $0x2c0] sm:$0xff]  }
  0xbb   : > { %8352 = vmatpush3.bf16.msra.mxu1 %v9144_v0  ;;  %8331 = vmatprep.subr.bf16.mxu0 %v9145_v1  ;;  %v9192_v0 = vld [vmem:[%s10129_s13 + $0x200] sm:$0xff]   ;;  %v785_v1 = vpack.c.bf16 %v489_v61, %v489_v61  ;;  %v9238_v61 = vld [vmem:[%s10129_s13 + $0x428] sm:$0xff]  }
  0xbc   : > { %8353 = vmatprep.subr.bf16.mxu1 %v9146_v2  ;;  %v490_v2 = vcombine.high %v488_v62, %v488_v62 }
  0xbe   : > { %8332 = vmatpush3.bf16.msra.mxu0 %v9147_v3  ;;  %v9193_v3 = vld [vmem:[%s10129_s13 + $0x280] sm:$0xff]  }
  0xbf   : > { %8354 = vmatpush3.bf16.msra.mxu1 %v9148_v4  ;;  %8333 = vmatprep.subr.bf16.mxu0 %v9149_v5  ;;  %v787_v4 = vpack.c.bf16 %v490_v2, %v490_v2  ;;  %v9195_v5 = vld [vmem:[%s10129_s13 + $0x378] sm:$0xff]   ;;  %v9243_v2 = vld [vmem:[%s10129_s13 + $0x4a0] sm:$0xff]  }
  0xc0   : > { %8355 = vmatprep.subr.bf16.mxu1 %v9150_v6  ;;  %v9196_v6 = vld [vmem:[%s10129_s13 + $0x3f8] sm:$0xff]  }
  0xc2   : > { %8334 = vmatpush3.bf16.msra.mxu0 %v9151_v7  ;;  %v9197_v7 = vld [vmem:[%s10129_s13 + $0x338] sm:$0xff]  }
  0xc3   : > { %8356 = vmatpush3.bf16.msra.mxu1 %v9152_v8  ;;  %8335 = vmatprep.subr.bf16.mxu0 %v9153_v9  ;;  %v784_v8 = vpack.c.bf16 %v481_v57, %v481_v57  ;;  %v786_v9 = vpack.c.bf16 %v488_v62, %v488_v62  ;;  %v9234_v57 = vld [vmem:[%s10129_s13 + $0x430] sm:$0xff]   ;;  %v9239_v62 = vld [vmem:[%s10129_s13 + $0x4a8] sm:$0xff]  }
  0xc4   : > { %8357 = vmatprep.subr.bf16.mxu1 %v9154_v10  ;;  %v9198_v10 = vld [vmem:[%s10129_s13 + $0x3b8] sm:$0xff]  }
  0xc6   : > { %8336 = vmatpush3.bf16.msra.mxu0 %v9155_v12  ;;  %v9200_v12 = vld [vmem:[%s10129_s13 + $0x3f0] sm:$0xff]  }
  0xc7   : > { %8358 = vmatpush3.bf16.msra.mxu1 %v9156_v15  ;;  %8337 = vmatprep.subr.bf16.mxu0 %v9157_v16  ;;  %v9203_v15 = vld [vmem:[%s10129_s13 + $0x368] sm:$0xff]  }
  0xc8   : > { %8359 = vmatprep.subr.bf16.mxu1 %v9158_v19  ;;  %v9204_v16 = vld [vmem:[%s10129_s13 + $0x3e8] sm:$0xff]   ;;  %v9207_v19 = vld [vmem:[%s10129_s13 + $0x360] sm:$0xff]  }
  0xca   : > { %8338 = vmatpush3.bf16.msra.mxu0 %v9159_v20  ;;  %v9208_v20 = vld [vmem:[%s10129_s13 + $0x3e0] sm:$0xff]  }
  0xcb   : > { %8360 = vmatpush3.bf16.msra.mxu1 %v9160_v23  ;;  %8367 = vmatprep.subr.bf16.mxu0 %v9162_v25  ;;  %v9211_v23 = vld [vmem:[%s10129_s13 + $0x358] sm:$0xff]  }
  0xcc   : > { %8389 = vmatprep.subr.bf16.mxu1 %v9163_v26  ;;  %v9213_v25 = vld [vmem:[%s10129_s13 + $0x318] sm:$0xff]  }
  0xcd   : > { %5049 = vmatmul.mubr.bf16.vlgmr.msra.gmra.mxu0 %v780_v28  ;;  %v9214_v26 = vld [vmem:[%s10129_s13 + $0x398] sm:$0xff]   ;;  %v9216_v28 = vld [vmem:[%s10129_s13 + $0x3d0] sm:$0xff]  }
  0xce   : > { %5089 = vmatmul.mubr.bf16.vlgmr.msra.gmra.mxu1 %v782_v29  ;;  %8368 = vmatpush3.bf16.msra.mxu0 %v9164_v27  ;;  %v9215_v27 = vld [vmem:[%s10129_s13 + $0x350] sm:$0xff]  }
  0xcf   : > { %8390 = vmatpush3.bf16.msra.mxu1 %v9165_v30  ;;  %8369 = vmatprep.subr.bf16.mxu0 %v9166_v31  ;;  %v9217_v29 = vld [vmem:[%s10129_s13 + $0x310] sm:$0xff]   ;;  %v9219_v31 = vld [vmem:[%s10129_s13 + $0x348] sm:$0xff]  }
  0xd0   : > { %8391 = vmatprep.subr.bf16.mxu1 %v9167_v32  ;;  %5128 = vmatprep.mubr.bf16.mxu0 %v785_v1  ;;  %v9218_v30 = vld [vmem:[%s10129_s13 + $0x390] sm:$0xff]   ;;  %v9220_v32 = vld [vmem:[%s10129_s13 + $0x3c8] sm:$0xff]   ;;  %v9242_v1 = vld [vmem:[%s10129_s13 + $0x420] sm:$0xff]  }
  0xd1   : > { %5168 = vmatprep.mubr.bf16.mxu1 %v787_v4  ;;  %v9245_v4 = vld [vmem:[%s10129_s13 + $0x4d8] sm:$0xff]  }
  0xd2   : > { %8370 = vmatpush3.bf16.msra.mxu0 %v9168_v33  ;;  %v9221_v33 = vld [vmem:[%s10129_s13 + $0x308] sm:$0xff]  }
  0xd3   : > { %8392 = vmatpush3.bf16.msra.mxu1 %v9169_v35  ;;  %8371 = vmatprep.subr.bf16.mxu0 %v9170_v36  ;;  %v411_v35 = vld [vmem:[%s10151_s25 + $0x18] sm:$0xff]  ;;  %v9222_v36 = vld [vmem:[%s10129_s13 + $0x388] sm:$0xff]  }
  0xd4   : > { %8393 = vmatprep.subr.bf16.mxu1 %v9171_v37  ;;  %v498_v37 = vrot.slane %v411_v35, %v10193_v42 }
  0xd6   : > { %8372 = vmatpush3.bf16.msra.mxu0 %v9172_v38  ;;  %v491_v38 = vcombine.high %v411_v35, %v411_v35  ;;  %v9266_v35 = vld [vmem:[%s10129_s13 + $0x5f0] sm:$0xff]  }
  0xd7   : > { %8394 = vmatpush3.bf16.msra.mxu1 %v9173_v39  ;;  %8373 = vmatprep.subr.bf16.mxu0 %v9174_v40  ;;  %v9223_v39 = vld [vmem:[%s10129_s13 + $0x340] sm:$0xff]  }
  0xd8   : > { %8395 = vmatprep.subr.bf16.mxu1 %v9175_v41  ;;  %v9224_v40 = vld [vmem:[%s10129_s13 + $0x3c0] sm:$0xff]   ;;  %v506_v41 = vcombine.high %v498_v37, %v498_v37 }
  0xda   : > { %8374 = vmatpush3.bf16.msra.mxu0 %v9176_v43  ;;  %v505_v43 = vrot.slane %v491_v38, %v10193_v42  ;;  %v9269_v38 = vld [vmem:[%s10129_s13 + $0x568] sm:$0xff]  }
  0xdb   : > { %8396 = vmatpush3.bf16.msra.mxu1 %v9177_v44  ;;  %8375 = vmatprep.subr.bf16.mxu0 %v9178_v45  ;;  %v9225_v44 = vld [vmem:[%s10129_s13 + $0x300] sm:$0xff]  }
  0xdc   : > { %8397 = vmatprep.subr.bf16.mxu1 %v9179_v46  ;;  %v9226_v45 = vld [vmem:[%s10129_s13 + $0x380] sm:$0xff]   ;;  %v789_v46 = vpack.c.bf16 %v506_v41, %v506_v41  ;;  %v9272_v41 = vld [vmem:[%s10129_s13 + $0x5a8] sm:$0xff]  }
  0xde   : > { %8376 = vmatpush3.bf16.msra.mxu0 %v9180_v47  ;;  %v507_v47 = vcombine.high %v505_v43, %v505_v43 }
  0xdf   : > { %8398 = vmatpush3.bf16.msra.mxu1 %v9181_v48  ;;  %8377 = vmatprep.subr.bf16.mxu0 %v9182_v49  ;;  %v9228_v48 = vld [vmem:[%s10129_s13 + $0x478] sm:$0xff]  }
  0xe0   : > { %8399 = vmatprep.subr.bf16.mxu1 %v9183_v50  ;;  %v791_v49 = vpack.c.bf16 %v507_v47, %v507_v47  ;;  %v9229_v50 = vld [vmem:[%s10129_s13 + $0x4f8] sm:$0xff]  }
  0xe1   : > { %v9277_v47 = vld [vmem:[%s10129_s13 + $0x558] sm:$0xff]  }
  0xe2   : > { %8378 = vmatpush3.bf16.msra.mxu0 %v9184_v51  ;;  %v9230_v51 = vld [vmem:[%s10129_s13 + $0x438] sm:$0xff]  }
  0xe3   : > { %8400 = vmatpush3.bf16.msra.mxu1 %v9185_v52  ;;  %8379 = vmatprep.subr.bf16.mxu0 %v9186_v53  ;;  %v788_v52 = vpack.c.bf16 %v498_v37, %v498_v37  ;;  %v790_v53 = vpack.c.bf16 %v505_v43, %v505_v43  ;;  %v9268_v37 = vld [vmem:[%s10129_s13 + $0x5b0] sm:$0xff]   ;;  %v9273_v43 = vld [vmem:[%s10129_s13 + $0x560] sm:$0xff]  }
  0xe4   : > { %8401 = vmatprep.subr.bf16.mxu1 %v9187_v54  ;;  %v9231_v54 = vld [vmem:[%s10129_s13 + $0x4b8] sm:$0xff]  }
  0xe6   : > { %8380 = vmatpush3.bf16.msra.mxu0 %v9188_v56  ;;  %v9233_v56 = vld [vmem:[%s10129_s13 + $0x4f0] sm:$0xff]  }
  0xe7   : > { %8402 = vmatpush3.bf16.msra.mxu1 %v9189_v59  ;;  %8381 = vmatprep.subr.bf16.mxu0 %v9190_v60  ;;  %v9236_v59 = vld [vmem:[%s10129_s13 + $0x468] sm:$0xff]  }
  0xe8   : > { %8403 = vmatprep.subr.bf16.mxu1 %v9191_v63  ;;  %v9237_v60 = vld [vmem:[%s10129_s13 + $0x4e8] sm:$0xff]   ;;  %v9240_v63 = vld [vmem:[%s10129_s13 + $0x460] sm:$0xff]  }
  0xea   : > { %8382 = vmatpush3.bf16.msra.mxu0 %v9192_v0  ;;  %v9241_v0 = vld [vmem:[%s10129_s13 + $0x4e0] sm:$0xff]  }
  0xeb   : > { %8404 = vmatpush3.bf16.msra.mxu1 %v9193_v3  ;;  %8411 = vmatprep.subr.bf16.mxu0 %v9195_v5  ;;  %v9244_v3 = vld [vmem:[%s10129_s13 + $0x458] sm:$0xff]  }
  0xec   : > { %8433 = vmatprep.subr.bf16.mxu1 %v9196_v6  ;;  %v9246_v5 = vld [vmem:[%s10129_s13 + $0x418] sm:$0xff]  }
  0xed   : > { %5129 = vmatmul.mubr.bf16.vlgmr.msra.gmra.mxu0 %v784_v8  ;;  %v9247_v6 = vld [vmem:[%s10129_s13 + $0x498] sm:$0xff]   ;;  %v9249_v8 = vld [vmem:[%s10129_s13 + $0x4d0] sm:$0xff]  }
  0xee   : > { %5169 = vmatmul.mubr.bf16.vlgmr.msra.gmra.mxu1 %v786_v9  ;;  %8412 = vmatpush3.bf16.msra.mxu0 %v9197_v7  ;;  %v9248_v7 = vld [vmem:[%s10129_s13 + $0x450] sm:$0xff]  }
  0xef   : > { %8434 = vmatpush3.bf16.msra.mxu1 %v9198_v10  ;;  %8413 = vmatprep.subr.bf16.mxu0 %v9199_v11  ;;  %v9250_v9 = vld [vmem:[%s10129_s13 + $0x410] sm:$0xff]   ;;  %v9252_v11 = vld [vmem:[%s10129_s13 + $0x448] sm:$0xff]  }
  0xf0   : > { %8435 = vmatprep.subr.bf16.mxu1 %v9200_v12  ;;  %5208 = vmatprep.mubr.bf16.mxu0 %v789_v46  ;;  %v9251_v10 = vld [vmem:[%s10129_s13 + $0x490] sm:$0xff]   ;;  %v9253_v12 = vld [vmem:[%s10129_s13 + $0x4c8] sm:$0xff]   ;;  %v9276_v46 = vld [vmem:[%s10129_s13 + $0x5a0] sm:$0xff]  }
  0xf1   : > { %5248 = vmatprep.mubr.bf16.mxu1 %v791_v49  ;;  %v9279_v49 = vld [vmem:[%s10129_s13 + $0x518] sm:$0xff]  }
  0xf2   : > { %8414 = vmatpush3.bf16.msra.mxu0 %v9201_v13  ;;  %v9254_v13 = vld [vmem:[%s10129_s13 + $0x408] sm:$0xff]  }
  0xf3   : > { %8436 = vmatpush3.bf16.msra.mxu1 %v9202_v14  ;;  %8415 = vmatprep.subr.bf16.mxu0 %v9203_v15  ;;  %v412_v14 = vld [vmem:[%s10151_s25 + $0x20] sm:$0xff]  ;;  %v9255_v15 = vld [vmem:[%s10129_s13 + $0x488] sm:$0xff]  }
  0xf4   : > { %8437 = vmatprep.subr.bf16.mxu1 %v9204_v16  ;;  %v515_v16 = vrot.slane %v412_v14, %v10193_v42 }
  0xf6   : > { %8416 = vmatpush3.bf16.msra.mxu0 %v9205_v17  ;;  %v508_v17 = vcombine.high %v412_v14, %v412_v14  ;;  %v9299_v14 = vld [vmem:[%s10129_s13 + $0x6f0] sm:$0xff]  }
  0xf7   : > { %8438 = vmatpush3.bf16.msra.mxu1 %v9206_v18  ;;  %8417 = vmatprep.subr.bf16.mxu0 %v9207_v19  ;;  %v9256_v18 = vld [vmem:[%s10129_s13 + $0x440] sm:$0xff]  }
  0xf8   : > { %8439 = vmatprep.subr.bf16.mxu1 %v9208_v20  ;;  %v9257_v19 = vld [vmem:[%s10129_s13 + $0x4c0] sm:$0xff]   ;;  %v523_v20 = vcombine.high %v515_v16, %v515_v16 }
  0xfa   : > { %8418 = vmatpush3.bf16.msra.mxu0 %v9209_v21  ;;  %v522_v21 = vrot.slane %v508_v17, %v10193_v42  ;;  %v9302_v17 = vld [vmem:[%s10129_s13 + $0x668] sm:$0xff]  }
  0xfb   : > { %8440 = vmatpush3.bf16.msra.mxu1 %v9210_v22  ;;  %8419 = vmatprep.subr.bf16.mxu0 %v9211_v23  ;;  %v9258_v22 = vld [vmem:[%s10129_s13 + $0x400] sm:$0xff]  }
  0xfc   : > { %8441 = vmatprep.subr.bf16.mxu1 %v9212_v24  ;;  %v9259_v23 = vld [vmem:[%s10129_s13 + $0x480] sm:$0xff]   ;;  %v793_v24 = vpack.c.bf16 %v523_v20, %v523_v20  ;;  %v9305_v20 = vld [vmem:[%s10129_s13 + $0x6a8] sm:$0xff]  }
  0xfe   : > { %8420 = vmatpush3.bf16.msra.mxu0 %v9213_v25  ;;  %v524_v25 = vcombine.high %v522_v21, %v522_v21 }
  0xff   : > { %8442 = vmatpush3.bf16.msra.mxu1 %v9214_v26  ;;  %8421 = vmatprep.subr.bf16.mxu0 %v9215_v27  ;;  %v9261_v26 = vld [vmem:[%s10129_s13 + $0x578] sm:$0xff]  }
 0x100   : > { %8443 = vmatprep.subr.bf16.mxu1 %v9216_v28  ;;  %v795_v27 = vpack.c.bf16 %v524_v25, %v524_v25  ;;  %v9262_v28 = vld [vmem:[%s10129_s13 + $0x5f8] sm:$0xff]  }
 0x101   : > { %v9310_v25 = vld [vmem:[%s10129_s13 + $0x658] sm:$0xff]  }
 0x102   : > { %8422 = vmatpush3.bf16.msra.mxu0 %v9217_v29  ;;  %v9263_v29 = vld [vmem:[%s10129_s13 + $0x538] sm:$0xff]  }
 0x103   : > { %8444 = vmatpush3.bf16.msra.mxu1 %v9218_v30  ;;  %8423 = vmatprep.subr.bf16.mxu0 %v9219_v31  ;;  %v792_v30 = vpack.c.bf16 %v515_v16, %v515_v16  ;;  %v794_v31 = vpack.c.bf16 %v522_v21, %v522_v21  ;;  %v9301_v16 = vld [vmem:[%s10129_s13 + $0x6b0] sm:$0xff]   ;;  %v9306_v21 = vld [vmem:[%s10129_s13 + $0x660] sm:$0xff]  }
 0x104   : > { %8445 = vmatprep.subr.bf16.mxu1 %v9220_v32  ;;  %v9264_v32 = vld [vmem:[%s10129_s13 + $0x5b8] sm:$0xff]  }
 0x106   : > { %8424 = vmatpush3.bf16.msra.mxu0 %v9221_v33  ;;  %v9265_v33 = vld [vmem:[%s10129_s13 + $0x570] sm:$0xff]  }
 0x107   : > { %8446 = vmatpush3.bf16.msra.mxu1 %v9222_v36  ;;  %8425 = vmatprep.subr.bf16.mxu0 %v9223_v39  ;;  %v9267_v36 = vld [vmem:[%s10129_s13 + $0x530] sm:$0xff]   ;;  %v9270_v39 = vld [vmem:[%s10129_s13 + $0x5e8] sm:$0xff]  }
 0x108   : > { %8447 = vmatprep.subr.bf16.mxu1 %v9224_v40  ;;  %v9271_v40 = vld [vmem:[%s10129_s13 + $0x528] sm:$0xff]  }
 0x10a   : > { %8426 = vmatpush3.bf16.msra.mxu0 %v9225_v44  ;;  %v9274_v44 = vld [vmem:[%s10129_s13 + $0x5e0] sm:$0xff]  }
 0x10b   : > { %8448 = vmatpush3.bf16.msra.mxu1 %v9226_v45  ;;  %8455 = vmatprep.subr.bf16.mxu0 %v9228_v48  ;;  %v9275_v45 = vld [vmem:[%s10129_s13 + $0x520] sm:$0xff]   ;;  %v9278_v48 = vld [vmem:[%s10129_s13 + $0x5d8] sm:$0xff]  }
 0x10c   : > { %8477 = vmatprep.subr.bf16.mxu1 %v9229_v50  ;;  %v9280_v50 = vld [vmem:[%s10129_s13 + $0x598] sm:$0xff]  }
 0x10d   : > { %5209 = vmatmul.mubr.bf16.vlgmr.msra.gmra.mxu0 %v788_v52  ;;  %v9282_v52 = vld [vmem:[%s10129_s13 + $0x5d0] sm:$0xff]  }
 0x10e   : > { %5249 = vmatmul.mubr.bf16.vlgmr.msra.gmra.mxu1 %v790_v53  ;;  %8456 = vmatpush3.bf16.msra.mxu0 %v9230_v51  ;;  %v9281_v51 = vld [vmem:[%s10129_s13 + $0x550] sm:$0xff]  }
 0x10f   : > { %8478 = vmatpush3.bf16.msra.mxu1 %v9231_v54  ;;  %8457 = vmatprep.subr.bf16.mxu0 %v9232_v55  ;;  %v9283_v53 = vld [vmem:[%s10129_s13 + $0x510] sm:$0xff]   ;;  %v9285_v55 = vld [vmem:[%s10129_s13 + $0x548] sm:$0xff]  }
 0x110   : > { %8479 = vmatprep.subr.bf16.mxu1 %v9233_v56  ;;  %5288 = vmatprep.mubr.bf16.mxu0 %v793_v24  ;;  %v9284_v54 = vld [vmem:[%s10129_s13 + $0x590] sm:$0xff]   ;;  %v9286_v56 = vld [vmem:[%s10129_s13 + $0x5c8] sm:$0xff]   ;;  %v9309_v24 = vld [vmem:[%s10129_s13 + $0x6a0] sm:$0xff]  }
 0x111   : > { %5328 = vmatprep.mubr.bf16.mxu1 %v795_v27  ;;  %v9312_v27 = vld [vmem:[%s10129_s13 + $0x618] sm:$0xff]  }
 0x112   : > { %8458 = vmatpush3.bf16.msra.mxu0 %v9234_v57  ;;  %v9287_v57 = vld [vmem:[%s10129_s13 + $0x508] sm:$0xff]  }
 0x113   : > { %8480 = vmatpush3.bf16.msra.mxu1 %v9235_v58  ;;  %8459 = vmatprep.subr.bf16.mxu0 %v9236_v59  ;;  %v413_v58 = vld [vmem:[%s10151_s25 + $0x28] sm:$0xff] }
 0x114   : > { %8481 = vmatprep.subr.bf16.mxu1 %v9237_v60  ;;  %v9288_v59 = vld [vmem:[%s10129_s13 + $0x588] sm:$0xff]   ;;  %v532_v60 = vrot.slane %v413_v58, %v10193_v42 }
 0x116   : > { %8460 = vmatpush3.bf16.msra.mxu0 %v9238_v61  ;;  %v525_v61 = vcombine.high %v413_v58, %v413_v58  ;;  %v9332_v58 = vld [vmem:[%s10129_s13 + $0x7f0] sm:$0xff]  }
 0x117   : > { %8482 = vmatpush3.bf16.msra.mxu1 %v9239_v62  ;;  %8461 = vmatprep.subr.bf16.mxu0 %v9240_v63  ;;  %v9289_v62 = vld [vmem:[%s10129_s13 + $0x540] sm:$0xff]  }
 0x118   : > { %8483 = vmatprep.subr.bf16.mxu1 %v9241_v0  ;;  %v9290_v63 = vld [vmem:[%s10129_s13 + $0x5c0] sm:$0xff]   ;;  %v540_v0 = vcombine.high %v532_v60, %v532_v60 }
 0x11a   : > { %8462 = vmatpush3.bf16.msra.mxu0 %v9242_v1  ;;  %v539_v1 = vrot.slane %v525_v61, %v10193_v42 }
 0x11b   : > { %8484 = vmatpush3.bf16.msra.mxu1 %v9243_v2  ;;  %8463 = vmatprep.subr.bf16.mxu0 %v9244_v3  ;;  %v9291_v2 = vld [vmem:[%s10129_s13 + $0x500] sm:$0xff]  }
 0x11c   : > { %8485 = vmatprep.subr.bf16.mxu1 %v9245_v4  ;;  %v9292_v3 = vld [vmem:[%s10129_s13 + $0x580] sm:$0xff]   ;;  %v797_v4 = vpack.c.bf16 %v540_v0, %v540_v0 }
 0x11e   : > { %8464 = vmatpush3.bf16.msra.mxu0 %v9246_v5  ;;  %v541_v5 = vcombine.high %v539_v1, %v539_v1 }
 0x11f   : > { %8486 = vmatpush3.bf16.msra.mxu1 %v9247_v6  ;;  %8465 = vmatprep.subr.bf16.mxu0 %v9248_v7  ;;  %v9294_v6 = vld [vmem:[%s10129_s13 + $0x678] sm:$0xff]  }
 0x120   : > { %8487 = vmatprep.subr.bf16.mxu1 %v9249_v8  ;;  %v799_v7 = vpack.c.bf16 %v541_v5, %v541_v5  ;;  %v9295_v8 = vld [vmem:[%s10129_s13 + $0x6f8] sm:$0xff]   ;;  %v9337_v5 = vld [vmem:[%s10129_s13 + $0x728] sm:$0xff]  }
 0x122   : > { %8466 = vmatpush3.bf16.msra.mxu0 %v9250_v9  ;;  %v9296_v9 = vld [vmem:[%s10129_s13 + $0x638] sm:$0xff]  }
 0x123   : > { %8488 = vmatpush3.bf16.msra.mxu1 %v9251_v10  ;;  %8467 = vmatprep.subr.bf16.mxu0 %v9252_v11  ;;  %v796_v10 = vpack.c.bf16 %v532_v60, %v532_v60  ;;  %v798_v11 = vpack.c.bf16 %v539_v1, %v539_v1 }
 0x124   : > { %8489 = vmatprep.subr.bf16.mxu1 %v9253_v12  ;;  %v9297_v12 = vld [vmem:[%s10129_s13 + $0x6b8] sm:$0xff]  }
 0x126   : > { %8468 = vmatpush3.bf16.msra.mxu0 %v9254_v13  ;;  %v9298_v13 = vld [vmem:[%s10129_s13 + $0x670] sm:$0xff]  }
 0x127   : > { %8490 = vmatpush3.bf16.msra.mxu1 %v9255_v15  ;;  %8469 = vmatprep.subr.bf16.mxu0 %v9256_v18  ;;  %v9300_v15 = vld [vmem:[%s10129_s13 + $0x630] sm:$0xff]   ;;  %v9303_v18 = vld [vmem:[%s10129_s13 + $0x6e8] sm:$0xff]  }
 0x128   : > { %8491 = vmatprep.subr.bf16.mxu1 %v9257_v19  ;;  %v9304_v19 = vld [vmem:[%s10129_s13 + $0x628] sm:$0xff]  }
 0x12a   : > { %8470 = vmatpush3.bf16.msra.mxu0 %v9258_v22  ;;  %v9307_v22 = vld [vmem:[%s10129_s13 + $0x6e0] sm:$0xff]  }
 0x12b   : > { %8492 = vmatpush3.bf16.msra.mxu1 %v9259_v23  ;;  %8499 = vmatprep.subr.bf16.mxu0 %v9261_v26  ;;  %v9308_v23 = vld [vmem:[%s10129_s13 + $0x620] sm:$0xff]   ;;  %v9311_v26 = vld [vmem:[%s10129_s13 + $0x6d8] sm:$0xff]  }
 0x12c   : > { %8521 = vmatprep.subr.bf16.mxu1 %v9262_v28  ;;  %v9313_v28 = vld [vmem:[%s10129_s13 + $0x698] sm:$0xff]  }
 0x12d   : > { %5289 = vmatmul.mubr.bf16.vlgmr.msra.gmra.mxu0 %v792_v30  ;;  %v9315_v30 = vld [vmem:[%s10129_s13 + $0x6d0] sm:$0xff]  }
 0x12e   : > { %5329 = vmatmul.mubr.bf16.vlgmr.msra.gmra.mxu1 %v794_v31  ;;  %8500 = vmatpush3.bf16.msra.mxu0 %v9263_v29  ;;  %v9314_v29 = vld [vmem:[%s10129_s13 + $0x650] sm:$0xff]  }
 0x12f   : > { %8522 = vmatpush3.bf16.msra.mxu1 %v9264_v32  ;;  %8501 = vmatprep.subr.bf16.mxu0 %v9265_v33  ;;  %v9316_v31 = vld [vmem:[%s10129_s13 + $0x610] sm:$0xff]   ;;  %v9318_v33 = vld [vmem:[%s10129_s13 + $0x648] sm:$0xff]  }
 0x130   : > { %8523 = vmatprep.subr.bf16.mxu1 %v9266_v35  ;;  %5368 = vmatprep.mubr.bf16.mxu0 %v797_v4  ;;  %v9317_v32 = vld [vmem:[%s10129_s13 + $0x690] sm:$0xff]   ;;  %v9319_v35 = vld [vmem:[%s10129_s13 + $0x6c8] sm:$0xff]  }
 0x131   : > { %5408 = vmatprep.mubr.bf16.mxu1 %v799_v7 }
 0x132   : > { %8502 = vmatpush3.bf16.msra.mxu0 %v9267_v36  ;;  %v9320_v36 = vld [vmem:[%s10129_s13 + $0x608] sm:$0xff]  }
 0x133   : > { %8524 = vmatpush3.bf16.msra.mxu1 %v9268_v37  ;;  %8503 = vmatprep.subr.bf16.mxu0 %v9269_v38  ;;  %v9321_v37 = vld [vmem:[%s10129_s13 + $0x688] sm:$0xff]   ;;  %v414_v38 = vld [vmem:[%s10151_s25 + $0x30] sm:$0xff] }
 0x134   : > { %8525 = vmatprep.subr.bf16.mxu1 %v9270_v39  ;;  %v9322_v39 = vld [vmem:[%s10129_s13 + $0x640] sm:$0xff]  }
 0x136   : > { %8504 = vmatpush3.bf16.msra.mxu0 %v9271_v40  ;;  %v549_v40 = vrot.slane %v414_v38, %v10193_v42 }
 0x137   : > { %8526 = vmatpush3.bf16.msra.mxu1 %v9272_v41  ;;  %8505 = vmatprep.subr.bf16.mxu0 %v9273_v43  ;;  %v542_v41 = vcombine.high %v414_v38, %v414_v38  ;;  %v9323_v43 = vld [vmem:[%s10129_s13 + $0x6c0] sm:$0xff]  }
 0x138   : > { %8527 = vmatprep.subr.bf16.mxu1 %v9274_v44  ;;  %v9324_v44 = vld [vmem:[%s10129_s13 + $0x600] sm:$0xff]  }
 0x13a   : > { %8506 = vmatpush3.bf16.msra.mxu0 %v9275_v45  ;;  %v557_v45 = vcombine.high %v549_v40, %v549_v40 }
 0x13b   : > { %8528 = vmatpush3.bf16.msra.mxu1 %v9276_v46  ;;  %8507 = vmatprep.subr.bf16.mxu0 %v9277_v47  ;;  %v556_v46 = vrot.slane %v542_v41, %v10193_v42  ;;  %v9325_v47 = vld [vmem:[%s10129_s13 + $0x680] sm:$0xff]   ;;  %v9361_v41 = vld [vmem:[%s10129_s13 + $0x8f8] sm:$0xff]  }
 0x13c   : > { %8529 = vmatprep.subr.bf16.mxu1 %v9278_v48  ;;  %v801_v48 = vpack.c.bf16 %v557_v45, %v557_v45 }
 0x13e   : > { %8508 = vmatpush3.bf16.msra.mxu0 %v9279_v49  ;;  %v558_v49 = vcombine.high %v556_v46, %v556_v46 }
 0x13f   : > { %8530 = vmatpush3.bf16.msra.mxu1 %v9280_v50  ;;  %8509 = vmatprep.subr.bf16.mxu0 %v9281_v51  ;;  %v9327_v50 = vld [vmem:[%s10129_s13 + $0x778] sm:$0xff]  }
 0x140   : > { %8531 = vmatprep.subr.bf16.mxu1 %v9282_v52  ;;  %v9328_v51 = vld [vmem:[%s10129_s13 + $0x7f8] sm:$0xff]   ;;  %v803_v52 = vpack.c.bf16 %v558_v49, %v558_v49  ;;  %v9365_v49 = vld [vmem:[%s10129_s13 + $0x8f0] sm:$0xff]  }
 0x142   : > { %8510 = vmatpush3.bf16.msra.mxu0 %v9283_v53  ;;  %v9329_v53 = vld [vmem:[%s10129_s13 + $0x738] sm:$0xff]  }
 0x143   : > { %8532 = vmatpush3.bf16.msra.mxu1 %v9284_v54  ;;  %8511 = vmatprep.subr.bf16.mxu0 %v9285_v55  ;;  %v800_v54 = vpack.c.bf16 %v549_v40, %v549_v40  ;;  %v802_v55 = vpack.c.bf16 %v556_v46, %v556_v46  ;;  %v9360_v40 = vld [vmem:[%s10129_s13 + $0x878] sm:$0xff]  }
 0x144   : > { %8533 = vmatprep.subr.bf16.mxu1 %v9286_v56  ;;  %v9330_v56 = vld [vmem:[%s10129_s13 + $0x7b8] sm:$0xff]  }
 0x146   : > { %8512 = vmatpush3.bf16.msra.mxu0 %v9287_v57  ;;  %v9331_v57 = vld [vmem:[%s10129_s13 + $0x770] sm:$0xff]  }
 0x147   : > { %8534 = vmatpush3.bf16.msra.mxu1 %v9288_v59  ;;  %8513 = vmatprep.subr.bf16.mxu0 %v9289_v62  ;;  %v9333_v59 = vld [vmem:[%s10129_s13 + $0x730] sm:$0xff]  }
 0x148   : > { %8535 = vmatprep.subr.bf16.mxu1 %v9290_v63  ;;  %v9334_v62 = vld [vmem:[%s10129_s13 + $0x7b0] sm:$0xff]   ;;  %v9335_v63 = vld [vmem:[%s10129_s13 + $0x768] sm:$0xff]  }
 0x14a   : > { %8514 = vmatpush3.bf16.msra.mxu0 %v9291_v2  ;;  %v9336_v2 = vld [vmem:[%s10129_s13 + $0x7e8] sm:$0xff]  }
 0x14b   : > { %8536 = vmatpush3.bf16.msra.mxu1 %v9292_v3  ;;  %8543 = vmatprep.subr.bf16.mxu0 %v9294_v6 }
 0x14c   : > { %8565 = vmatprep.subr.bf16.mxu1 %v9295_v8  ;;  %v9338_v8 = vld [vmem:[%s10129_s13 + $0x7a8] sm:$0xff]  }
 0x14d   : > { %5369 = vmatmul.mubr.bf16.vlgmr.msra.gmra.mxu0 %v796_v10  ;;  %v9339_v10 = vld [vmem:[%s10129_s13 + $0x760] sm:$0xff]  }
 0x14e   : > { %5409 = vmatmul.mubr.bf16.vlgmr.msra.gmra.mxu1 %v798_v11  ;;  %8544 = vmatpush3.bf16.msra.mxu0 %v9296_v9 }
 0x14f   : > { %8566 = vmatpush3.bf16.msra.mxu1 %v9297_v12  ;;  %8545 = vmatprep.subr.bf16.mxu0 %v9298_v13  ;;  %v9340_v13 = vld [vmem:[%s10129_s13 + $0x7e0] sm:$0xff]  }
 0x150   : > { %8567 = vmatprep.subr.bf16.mxu1 %v9299_v14  ;;  %5448 = vmatprep.mubr.bf16.mxu0 %v801_v48  ;;  %v9341_v14 = vld [vmem:[%s10129_s13 + $0x720] sm:$0xff]   ;;  %v9364_v48 = vld [vmem:[%s10129_s13 + $0x870] sm:$0xff]  }
 0x151   : > { %5488 = vmatprep.mubr.bf16.mxu1 %v803_v52 }
 0x152   : > { %8546 = vmatpush3.bf16.msra.mxu0 %v9300_v15  ;;  %v9342_v15 = vld [vmem:[%s10129_s13 + $0x7a0] sm:$0xff]  }
 0x153   : > { %8568 = vmatpush3.bf16.msra.mxu1 %v9301_v16  ;;  %8547 = vmatprep.subr.bf16.mxu0 %v9302_v17  ;;  %v9343_v16 = vld [vmem:[%s10129_s13 + $0x758] sm:$0xff]  }
 0x154   : > { %8569 = vmatprep.subr.bf16.mxu1 %v9303_v18  ;;  %v9344_v17 = vld [vmem:[%s10129_s13 + $0x7d8] sm:$0xff]  }
 0x155   : > { %v9345_v18 = vld [vmem:[%s10129_s13 + $0x718] sm:$0xff]  }
 0x156   : > { %8548 = vmatpush3.bf16.msra.mxu0 %v9304_v19  ;;  %v9346_v19 = vld [vmem:[%s10129_s13 + $0x798] sm:$0xff]  }
 0x157   : > { %8570 = vmatpush3.bf16.msra.mxu1 %v9305_v20  ;;  %8549 = vmatprep.subr.bf16.mxu0 %v9306_v21  ;;  %v9347_v20 = vld [vmem:[%s10129_s13 + $0x750] sm:$0xff]  }
 0x158   : > { %8571 = vmatprep.subr.bf16.mxu1 %v9307_v22  ;;  %v9348_v21 = vld [vmem:[%s10129_s13 + $0x7d0] sm:$0xff]  }
 0x159   : > { %v9349_v22 = vld [vmem:[%s10129_s13 + $0x710] sm:$0xff]  }
 0x15a   : > { %8550 = vmatpush3.bf16.msra.mxu0 %v9308_v23  ;;  %v9350_v23 = vld [vmem:[%s10129_s13 + $0x790] sm:$0xff]  }
 0x15b   : > { %8572 = vmatpush3.bf16.msra.mxu1 %v9309_v24  ;;  %8551 = vmatprep.subr.bf16.mxu0 %v9310_v25  ;;  %v9351_v24 = vld [vmem:[%s10129_s13 + $0x748] sm:$0xff]  }
 0x15c   : > { %8573 = vmatprep.subr.bf16.mxu1 %v9311_v26  ;;  %v9352_v25 = vld [vmem:[%s10129_s13 + $0x7c8] sm:$0xff]  }
 0x15d   : > { %v9353_v26 = vld [vmem:[%s10129_s13 + $0x708] sm:$0xff]  }
 0x15e   : > { %8552 = vmatpush3.bf16.msra.mxu0 %v9312_v27  ;;  %v9354_v27 = vld [vmem:[%s10129_s13 + $0x788] sm:$0xff]  }
 0x15f   : > { %8574 = vmatpush3.bf16.msra.mxu1 %v9313_v28  ;;  %8553 = vmatprep.subr.bf16.mxu0 %v9314_v29  ;;  %v415_v28 = vld [vmem:[%s10151_s25 + $0x38] sm:$0xff]  ;;  %v9355_v29 = vld [vmem:[%s10129_s13 + $0x740] sm:$0xff]  }
 0x160   : > { %8575 = vmatprep.subr.bf16.mxu1 %v9315_v30  ;;  %v566_v30 = vrot.slane %v415_v28, %v10193_v42 }
 0x162   : > { %8554 = vmatpush3.bf16.msra.mxu0 %v9316_v31  ;;  %v559_v31 = vcombine.high %v415_v28, %v415_v28  ;;  %v804_v45 = vpack.c.bf16 %v566_v30, %v566_v30  ;;  %v9391_v28 = vld [vmem:[%s10129_s13 + $0x880] sm:$0xff]  }
 0x163   : > { %8576 = vmatpush3.bf16.msra.mxu1 %v9317_v32  ;;  %8555 = vmatprep.subr.bf16.mxu0 %v9318_v33  ;;  %v9356_v32 = vld [vmem:[%s10129_s13 + $0x7c0] sm:$0xff]  }
 0x164   : > { %8577 = vmatprep.subr.bf16.mxu1 %v9319_v35  ;;  %v9357_v33 = vld [vmem:[%s10129_s13 + $0x700] sm:$0xff]   ;;  %v574_v35 = vcombine.high %v566_v30, %v566_v30 }
 0x166   : > { %8556 = vmatpush3.bf16.msra.mxu0 %v9320_v36  ;;  %v573_v36 = vrot.slane %v559_v31, %v10193_v42  ;;  %v805_v38 = vpack.c.bf16 %v574_v35, %v574_v35  ;;  %v9393_v31 = vld [vmem:[%s10129_s13 + $0x978] sm:$0xff]  }
 0x167   : > { %8578 = vmatpush3.bf16.msra.mxu1 %v9321_v37  ;;  %8557 = vmatprep.subr.bf16.mxu0 %v9322_v39  ;;  %v9358_v37 = vld [vmem:[%s10129_s13 + $0x780] sm:$0xff]   ;;  %v9395_v35 = vld [vmem:[%s10129_s13 + $0x938] sm:$0xff]  }
 0x168   : > { %8579 = vmatprep.subr.bf16.mxu1 %v9323_v43  ;;  %v575_v39 = vcombine.high %v573_v36, %v573_v36  ;;  %v806_v46 = vpack.c.bf16 %v573_v36, %v573_v36 }
 0x16a   : > { %8558 = vmatpush3.bf16.msra.mxu0 %v9324_v44  ;;  %v807_v43 = vpack.c.bf16 %v575_v39, %v575_v39  ;;  %v9362_v44 = vld [vmem:[%s10129_s13 + $0x838] sm:$0xff]   ;;  %v9397_v39 = vld [vmem:[%s10129_s13 + $0x970] sm:$0xff]  }
 0x16b   : > { %8580 = vmatpush3.bf16.msra.mxu1 %v9325_v47  ;;  %8587 = vmatprep.subr.bf16.mxu0 %v9327_v50  ;;  %v9363_v47 = vld [vmem:[%s10129_s13 + $0x8b8] sm:$0xff]   ;;  %v9366_v50 = vld [vmem:[%s10129_s13 + $0x830] sm:$0xff]  }
 0x16c   : > { %8609 = vmatprep.subr.bf16.mxu1 %v9328_v51 }
 0x16d   : > { %v8295_v60 = vpop.f32.mrf.mxu0  ;;  %5449 = vmatmul.mubr.bf16.vlgmr.msra.gmra.mxu0 %v800_v54  ;;  %v9368_v54 = vld [vmem:[%s10129_s13 + $0x868] sm:$0xff]  }
 0x16e   : > { %v8317_v61 = vpop.f32.mrf.mxu1  ;;  %5489 = vmatmul.mubr.bf16.vlgmr.msra.gmra.mxu1 %v802_v55  ;;  %8588 = vmatpush3.bf16.msra.mxu0 %v9329_v53  ;;  %v9367_v53 = vld [vmem:[%s10129_s13 + $0x8b0] sm:$0xff]  }
 0x16f   : > { %8610 = vmatpush3.bf16.msra.mxu1 %v9330_v56  ;;  %v8296_v0 = vpop.f32.mrf.mxu0  ;;  %8589 = vmatprep.subr.bf16.mxu0 %v9331_v57  ;;  %v9369_v57 = vld [vmem:[%s10129_s13 + $0x8e8] sm:$0xff]  }
 0x170   : > { %v8318_v1 = vpop.f32.mrf.mxu1  ;;  %8611 = vmatprep.subr.bf16.mxu1 %v9332_v58  ;;  %v8297_v3 = vadd.f32 %v8296_v0, %v8295_v60  ;;  %5528 = vmatprep.mubr.bf16.mxu0 %v805_v38  ;;  %v9370_v60 = vld [vmem:[%s10129_s13 + $0x828] sm:$0xff]   ;;  %v9396_v38 = vld [vmem:[%s10129_s13 + $0x9b8] sm:$0xff]  }
 0x171   : > { %v8319_v4 = vadd.f32 %v8318_v1, %v8317_v61  ;;  %v8298_v6 = vpop.f32.mrf.mxu0  ;;  %5568 = vmatprep.mubr.bf16.mxu1 %v807_v43  ;;  %v9372_v1 = vld [vmem:[%s10129_s13 + $0x860] sm:$0xff]  }
 0x172   : > { %v8320_v7 = vpop.f32.mrf.mxu1  ;;  %8590 = vmatpush3.bf16.msra.mxu0 %v9333_v59  ;;  %v9374_v6 = vld [vmem:[%s10129_s13 + $0x820] sm:$0xff]  }
 0x173   : > { %v10417_v9 = vadd.f32 %v8319_v4, %v8297_v3  ;;  %8612 = vmatpush3.bf16.msra.mxu1 %v9334_v62  ;;  %v8299_v11 = vpop.f32.mrf.mxu0  ;;  %8591 = vmatprep.subr.bf16.mxu0 %v9335_v63  ;;  %v9371_v63 = vld [vmem:[%s10129_s13 + $0x8a8] sm:$0xff]   ;;  %v9373_v4 = vld [vmem:[%s10129_s13 + $0x8e0] sm:$0xff]  }
 0x174   : > { %v8321_v12 = vpop.f32.mrf.mxu1  ;;  %8613 = vmatprep.subr.bf16.mxu1 %v9336_v2  ;;  %v9375_v7 = vld [vmem:[%s10129_s13 + $0x8a0] sm:$0xff]   ;;  %v9379_v11 = vld [vmem:[%s10129_s13 + $0x898] sm:$0xff]  }
 0x175   : > { %v9380_v12 = vld [vmem:[%s10129_s13 + $0x850] sm:$0xff]  }
 0x176   : > { %8592 = vmatpush3.bf16.msra.mxu0 %v9337_v5 }
 0x177   : > { %8614 = vmatpush3.bf16.msra.mxu1 %v9338_v8  ;;  %8593 = vmatprep.subr.bf16.mxu0 %v9339_v10  ;;  %v9376_v8 = vld [vmem:[%s10129_s13 + $0x858] sm:$0xff]  }
 0x178   : > { %8615 = vmatprep.subr.bf16.mxu1 %v9340_v13  ;;  %v9378_v10 = vld [vmem:[%s10129_s13 + $0x818] sm:$0xff]   ;;  %v9381_v13 = vld [vmem:[%s10129_s13 + $0x8d0] sm:$0xff]  }
 0x17a   : > { %8594 = vmatpush3.bf16.msra.mxu0 %v9341_v14  ;;  %v9382_v14 = vld [vmem:[%s10129_s13 + $0x810] sm:$0xff]  }
 0x17b   : > { %8616 = vmatpush3.bf16.msra.mxu1 %v9342_v15  ;;  %8595 = vmatprep.subr.bf16.mxu0 %v9343_v16  ;;  %v9383_v15 = vld [vmem:[%s10129_s13 + $0x890] sm:$0xff]   ;;  %v9384_v16 = vld [vmem:[%s10129_s13 + $0x848] sm:$0xff]  }
 0x17c   : > { %8617 = vmatprep.subr.bf16.mxu1 %v9344_v17  ;;  %v9385_v17 = vld [vmem:[%s10129_s13 + $0x8c8] sm:$0xff]  }
 0x17e   : > { %8596 = vmatpush3.bf16.msra.mxu0 %v9345_v18  ;;  %v9386_v18 = vld [vmem:[%s10129_s13 + $0x808] sm:$0xff]  }
 0x17f   : > { %8618 = vmatpush3.bf16.msra.mxu1 %v9346_v19  ;;  %8597 = vmatprep.subr.bf16.mxu0 %v9347_v20  ;;  %v9387_v19 = vld [vmem:[%s10129_s13 + $0x888] sm:$0xff]   ;;  %v416_v20 = vld [vmem:[%s10151_s25 + $0x40] sm:$0xff] }
 0x180   : > { %8619 = vmatprep.subr.bf16.mxu1 %v9348_v21  ;;  %v9388_v21 = vld [vmem:[%s10129_s13 + $0x840] sm:$0xff]  }
 0x182   : > { %8598 = vmatpush3.bf16.msra.mxu0 %v9349_v22  ;;  %v583_v22 = vrot.slane %v416_v20, %v10193_v42 }
 0x183   : > { %8620 = vmatpush3.bf16.msra.mxu1 %v9350_v23  ;;  %8599 = vmatprep.subr.bf16.mxu0 %v9351_v24  ;;  %v576_v23 = vcombine.high %v416_v20, %v416_v20  ;;  %v9389_v24 = vld [vmem:[%s10129_s13 + $0x8c0] sm:$0xff]  }
 0x184   : > { %8621 = vmatprep.subr.bf16.mxu1 %v9352_v25  ;;  %v9390_v25 = vld [vmem:[%s10129_s13 + $0x800] sm:$0xff]   ;;  %v808_v36 = vpack.c.bf16 %v583_v22, %v583_v22 }
 0x186   : > { %8600 = vmatpush3.bf16.msra.mxu0 %v9353_v26  ;;  %v591_v26 = vcombine.high %v583_v22, %v583_v22 }
 0x187   : > { %8622 = vmatpush3.bf16.msra.mxu1 %v9354_v27  ;;  %8601 = vmatprep.subr.bf16.mxu0 %v9355_v29  ;;  %v590_v27 = vrot.slane %v576_v23, %v10193_v42 }
 0x188   : > { %8623 = vmatprep.subr.bf16.mxu1 %v9356_v32  ;;  %v809_v29 = vpack.c.bf16 %v591_v26, %v591_v26  ;;  %v9394_v32 = vld [vmem:[%s10129_s13 + $0x9f8] sm:$0xff]  }
 0x189   : > { %v592_v30 = vcombine.high %v590_v27, %v590_v27 }
 0x18a   : > { %8602 = vmatpush3.bf16.msra.mxu0 %v9357_v33 }
 0x18b   : > { %8624 = vmatpush3.bf16.msra.mxu1 %v9358_v37  ;;  %8631 = vmatprep.subr.bf16.mxu0 %v9360_v40  ;;  %v811_v33 = vpack.c.bf16 %v592_v30, %v592_v30  ;;  %v810_v37 = vpack.c.bf16 %v590_v27, %v590_v27  ;;  %v9398_v40 = vld [vmem:[%s10129_s13 + $0x9f0] sm:$0xff]  }
 0x18c   : > { %8653 = vmatprep.subr.bf16.mxu1 %v9361_v41  ;;  %v9399_v41 = vld [vmem:[%s10129_s13 + $0x930] sm:$0xff]  }
 0x18d   : > { %v8339_v51 = vpop.f32.mrf.mxu0  ;;  %5529 = vmatmul.mubr.bf16.vlgmr.msra.gmra.mxu0 %v804_v45  ;;  %v9400_v45 = vld [vmem:[%s10129_s13 + $0x9b0] sm:$0xff]  }
 0x18e   : > { %v8361_v52 = vpop.f32.mrf.mxu1  ;;  %5569 = vmatmul.mubr.bf16.vlgmr.msra.gmra.mxu1 %v806_v46  ;;  %8632 = vmatpush3.bf16.msra.mxu0 %v9362_v44  ;;  %v9401_v46 = vld [vmem:[%s10129_s13 + $0x968] sm:$0xff]   ;;  %v9430_v30 = vld [vmem:[%s10129_s13 + $0xa70] sm:$0xff]  }
 0x18f   : > { %8654 = vmatpush3.bf16.msra.mxu1 %v9363_v47  ;;  %v8340_v55 = vpop.f32.mrf.mxu0  ;;  %8633 = vmatprep.subr.bf16.mxu0 %v9364_v48 }
 0x190   : > { %v8362_v56 = vpop.f32.mrf.mxu1  ;;  %8655 = vmatprep.subr.bf16.mxu1 %v9365_v49  ;;  %v8341_v58 = vadd.f32 %v8340_v55, %v8339_v51  ;;  %5608 = vmatprep.mubr.bf16.mxu0 %v809_v29  ;;  %v9402_v49 = vld [vmem:[%s10129_s13 + $0x9e8] sm:$0xff]   ;;  %v9429_v29 = vld [vmem:[%s10129_s13 + $0xab8] sm:$0xff]  }
 0x191   : > { %v8363_v59 = vadd.f32 %v8362_v56, %v8361_v52  ;;  %v8342_v61 = vpop.f32.mrf.mxu0  ;;  %5648 = vmatprep.mubr.bf16.mxu1 %v811_v33  ;;  %v9403_v52 = vld [vmem:[%s10129_s13 + $0x928] sm:$0xff]  }
 0x192   : > { %v8364_v62 = vpop.f32.mrf.mxu1  ;;  %v5051_v0 = vadd.f32 %v8341_v58, %v10417_v9  ;;  %8634 = vmatpush3.bf16.msra.mxu0 %v9366_v50  ;;  %v9377_v9 = vld [vmem:[%s10129_s13 + $0x8d8] sm:$0xff]   ;;  %v9404_v55 = vld [vmem:[%s10129_s13 + $0x9a8] sm:$0xff]  }
 0x193   : > { %8656 = vmatpush3.bf16.msra.mxu1 %v9367_v53  ;;  %v8343_v2 = vpop.f32.mrf.mxu0  ;;  %8635 = vmatprep.subr.bf16.mxu0 %v9368_v54  ;;  %v9407_v62 = vld [vmem:[%s10129_s13 + $0x920] sm:$0xff]  }
 0x194   : > { %v8365_v3 = vpop.f32.mrf.mxu1  ;;  %8657 = vmatprep.subr.bf16.mxu1 %v9369_v57  ;;  %v10457_v5 = vadd.f32 %v8363_v59, %v5051_v0  ;;  %v9405_v57 = vld [vmem:[%s10129_s13 + $0x960] sm:$0xff]   ;;  %v9409_v0 = vld [vmem:[%s10129_s13 + $0x958] sm:$0xff]  }
 0x195   : > { %v9411_v2 = vld [vmem:[%s10129_s13 + $0x918] sm:$0xff]  }
 0x196   : > { %8636 = vmatpush3.bf16.msra.mxu0 %v9370_v60  ;;  %v9406_v60 = vld [vmem:[%s10129_s13 + $0x9e0] sm:$0xff]   ;;  %v9412_v3 = vld [vmem:[%s10129_s13 + $0x998] sm:$0xff]  }
 0x197   : > { %8658 = vmatpush3.bf16.msra.mxu1 %v9371_v63  ;;  %8637 = vmatprep.subr.bf16.mxu0 %v9372_v1  ;;  %v9408_v63 = vld [vmem:[%s10129_s13 + $0x9a0] sm:$0xff]   ;;  %v9410_v1 = vld [vmem:[%s10129_s13 + $0x9d8] sm:$0xff]  }
 0x198   : > { %8659 = vmatprep.subr.bf16.mxu1 %v9373_v4  ;;  %v9413_v4 = vld [vmem:[%s10129_s13 + $0x950] sm:$0xff]  }
 0x19a   : > { %8638 = vmatpush3.bf16.msra.mxu0 %v9374_v6  ;;  %v9415_v6 = vld [vmem:[%s10129_s13 + $0x910] sm:$0xff]  }
 0x19b   : > { %8660 = vmatpush3.bf16.msra.mxu1 %v9375_v7  ;;  %8639 = vmatprep.subr.bf16.mxu0 %v9376_v8  ;;  %v9416_v7 = vld [vmem:[%s10129_s13 + $0x990] sm:$0xff]   ;;  %v9417_v8 = vld [vmem:[%s10129_s13 + $0x948] sm:$0xff]  }
 0x19c   : > { %8661 = vmatprep.subr.bf16.mxu1 %v9377_v9  ;;  %v9418_v9 = vld [vmem:[%s10129_s13 + $0x9c8] sm:$0xff]  }
 0x19e   : > { %8640 = vmatpush3.bf16.msra.mxu0 %v9378_v10  ;;  %v9419_v10 = vld [vmem:[%s10129_s13 + $0x908] sm:$0xff]  }
 0x19f   : > { %8662 = vmatpush3.bf16.msra.mxu1 %v9379_v11  ;;  %8641 = vmatprep.subr.bf16.mxu0 %v9380_v12  ;;  %v9420_v11 = vld [vmem:[%s10129_s13 + $0x988] sm:$0xff]   ;;  %v9421_v12 = vld [vmem:[%s10129_s13 + $0x940] sm:$0xff]  }
 0x1a0   : > { %8663 = vmatprep.subr.bf16.mxu1 %v9381_v13  ;;  %v417_v13 = vld [vmem:[%s10151_s25 + $0x48] sm:$0xff] }
 0x1a2   : > { %8642 = vmatpush3.bf16.msra.mxu0 %v9382_v14  ;;  %v9422_v14 = vld [vmem:[%s10129_s13 + $0x9c0] sm:$0xff]  }
 0x1a3   : > { %8664 = vmatpush3.bf16.msra.mxu1 %v9383_v15  ;;  %8643 = vmatprep.subr.bf16.mxu0 %v9384_v16  ;;  %v600_v15 = vrot.slane %v417_v13, %v10193_v42  ;;  %v593_v16 = vcombine.high %v417_v13, %v417_v13  ;;  %v9459_v13 = vld [vmem:[%s10129_s13 + $0xb78] sm:$0xff]  }
 0x1a4   : > { %8665 = vmatprep.subr.bf16.mxu1 %v9385_v17  ;;  %v9423_v17 = vld [vmem:[%s10129_s13 + $0x900] sm:$0xff]  }
 0x1a5   : > { %v607_v20 = vrot.slane %v593_v16, %v10193_v42  ;;  %v812_v27 = vpack.c.bf16 %v600_v15, %v600_v15  ;;  %v9460_v16 = vld [vmem:[%s10129_s13 + $0xbf8] sm:$0xff]  }
 0x1a6   : > { %8644 = vmatpush3.bf16.msra.mxu0 %v9386_v18  ;;  %v9424_v18 = vld [vmem:[%s10129_s13 + $0x980] sm:$0xff]  }
 0x1a7   : > { %8666 = vmatpush3.bf16.msra.mxu1 %v9387_v19  ;;  %8645 = vmatprep.subr.bf16.mxu0 %v9388_v21  ;;  %v608_v19 = vcombine.high %v600_v15, %v600_v15  ;;  %v9426_v21 = vld [vmem:[%s10129_s13 + $0xa78] sm:$0xff]   ;;  %v609_v23 = vcombine.high %v607_v20, %v607_v20 }
 0x1a8   : > { %8667 = vmatprep.subr.bf16.mxu1 %v9389_v24  ;;  %v9427_v24 = vld [vmem:[%s10129_s13 + $0xaf8] sm:$0xff]  }
 0x1a9   : > { %v813_v22 = vpack.c.bf16 %v608_v19, %v608_v19  ;;  %v815_v26 = vpack.c.bf16 %v609_v23, %v609_v23  ;;  %v9464_v23 = vld [vmem:[%s10129_s13 + $0xbf0] sm:$0xff]  }
 0x1aa   : > { %8646 = vmatpush3.bf16.msra.mxu0 %v9390_v25  ;;  %v9428_v25 = vld [vmem:[%s10129_s13 + $0xa38] sm:$0xff]  }
 0x1ab   : > { %8668 = vmatpush3.bf16.msra.mxu1 %v9391_v28  ;;  %8675 = vmatprep.subr.bf16.mxu0 %v9393_v31  ;;  %v814_v28 = vpack.c.bf16 %v607_v20, %v607_v20  ;;  %v9431_v31 = vld [vmem:[%s10129_s13 + $0xaf0] sm:$0xff]  }
 0x1ac   : > { %8697 = vmatprep.subr.bf16.mxu1 %v9394_v32  ;;  %v9432_v32 = vld [vmem:[%s10129_s13 + $0xa30] sm:$0xff]  }
 0x1ad   : > { %v8383_v43 = vpop.f32.mrf.mxu0  ;;  %5609 = vmatmul.mubr.bf16.vlgmr.msra.gmra.mxu0 %v808_v36  ;;  %v9433_v36 = vld [vmem:[%s10129_s13 + $0xab0] sm:$0xff]  }
 0x1ae   : > { %v8405_v44 = vpop.f32.mrf.mxu1  ;;  %5649 = vmatmul.mubr.bf16.vlgmr.msra.gmra.mxu1 %v810_v37  ;;  %8676 = vmatpush3.bf16.msra.mxu0 %v9395_v35  ;;  %v9434_v37 = vld [vmem:[%s10129_s13 + $0xa68] sm:$0xff]  }
 0x1af   : > { %8698 = vmatpush3.bf16.msra.mxu1 %v9396_v38  ;;  %v8384_v47 = vpop.f32.mrf.mxu0  ;;  %8677 = vmatprep.subr.bf16.mxu0 %v9397_v39 }
 0x1b0   : > { %v8406_v48 = vpop.f32.mrf.mxu1  ;;  %8699 = vmatprep.subr.bf16.mxu1 %v9398_v40  ;;  %v8385_v50 = vadd.f32 %v8384_v47, %v8383_v43  ;;  %5688 = vmatprep.mubr.bf16.mxu0 %v813_v22  ;;  %v9435_v40 = vld [vmem:[%s10129_s13 + $0xae8] sm:$0xff]   ;;  %v9463_v22 = vld [vmem:[%s10129_s13 + $0xb70] sm:$0xff]  }
 0x1b1   : > { %v8407_v51 = vadd.f32 %v8406_v48, %v8405_v44  ;;  %v8386_v53 = vpop.f32.mrf.mxu0  ;;  %5728 = vmatprep.mubr.bf16.mxu1 %v815_v26  ;;  %v9436_v44 = vld [vmem:[%s10129_s13 + $0xa28] sm:$0xff]  }
 0x1b2   : > { %v8408_v54 = vpop.f32.mrf.mxu1  ;;  %v5131_v56 = vadd.f32 %v8385_v50, %v10457_v5  ;;  %8678 = vmatpush3.bf16.msra.mxu0 %v9399_v41  ;;  %v9414_v5 = vld [vmem:[%s10129_s13 + $0x9d0] sm:$0xff]   ;;  %v9437_v47 = vld [vmem:[%s10129_s13 + $0xaa8] sm:$0xff]  }
 0x1b3   : > { %8700 = vmatpush3.bf16.msra.mxu1 %v9400_v45  ;;  %v8387_v58 = vpop.f32.mrf.mxu0  ;;  %8679 = vmatprep.subr.bf16.mxu0 %v9401_v46  ;;  %v9440_v54 = vld [vmem:[%s10129_s13 + $0xa20] sm:$0xff]  }
 0x1b4   : > { %v8409_v59 = vpop.f32.mrf.mxu1  ;;  %8701 = vmatprep.subr.bf16.mxu1 %v9402_v49  ;;  %v10495_v61 = vadd.f32 %v8407_v51, %v5131_v56  ;;  %v9438_v49 = vld [vmem:[%s10129_s13 + $0xa60] sm:$0xff]   ;;  %v9442_v56 = vld [vmem:[%s10129_s13 + $0xa58] sm:$0xff]  }
 0x1b5   : > { %v9444_v58 = vld [vmem:[%s10129_s13 + $0xa18] sm:$0xff]  }
 0x1b6   : > { %8680 = vmatpush3.bf16.msra.mxu0 %v9403_v52  ;;  %v9439_v52 = vld [vmem:[%s10129_s13 + $0xae0] sm:$0xff]   ;;  %v9445_v59 = vld [vmem:[%s10129_s13 + $0xa98] sm:$0xff]  }
 0x1b7   : > { %8702 = vmatpush3.bf16.msra.mxu1 %v9404_v55  ;;  %8681 = vmatprep.subr.bf16.mxu0 %v9405_v57  ;;  %v9441_v55 = vld [vmem:[%s10129_s13 + $0xaa0] sm:$0xff]   ;;  %v9443_v57 = vld [vmem:[%s10129_s13 + $0xad8] sm:$0xff]  }
 0x1b8   : > { %8703 = vmatprep.subr.bf16.mxu1 %v9406_v60  ;;  %v9446_v60 = vld [vmem:[%s10129_s13 + $0xa50] sm:$0xff]  }
 0x1ba   : > { %8682 = vmatpush3.bf16.msra.mxu0 %v9407_v62  ;;  %v9448_v62 = vld [vmem:[%s10129_s13 + $0xa10] sm:$0xff]  }
 0x1bb   : > { %8704 = vmatpush3.bf16.msra.mxu1 %v9408_v63  ;;  %8683 = vmatprep.subr.bf16.mxu0 %v9409_v0  ;;  %v9449_v63 = vld [vmem:[%s10129_s13 + $0xa90] sm:$0xff]   ;;  %v9450_v0 = vld [vmem:[%s10129_s13 + $0xa48] sm:$0xff]  }
 0x1bc   : > { %8705 = vmatprep.subr.bf16.mxu1 %v9410_v1  ;;  %v9451_v1 = vld [vmem:[%s10129_s13 + $0xac8] sm:$0xff]  }
 0x1be   : > { %8684 = vmatpush3.bf16.msra.mxu0 %v9411_v2  ;;  %v9452_v2 = vld [vmem:[%s10129_s13 + $0xa08] sm:$0xff]  }
 0x1bf   : > { %8706 = vmatpush3.bf16.msra.mxu1 %v9412_v3  ;;  %8685 = vmatprep.subr.bf16.mxu0 %v9413_v4  ;;  %v9453_v3 = vld [vmem:[%s10129_s13 + $0xa88] sm:$0xff]   ;;  %v9454_v4 = vld [vmem:[%s10129_s13 + $0xa40] sm:$0xff]  }
 0x1c0   : > { %8707 = vmatprep.subr.bf16.mxu1 %v9414_v5  ;;  %v418_v5 = vld [vmem:[%s10151_s25 + $0x50] sm:$0xff] }
 0x1c2   : > { %8686 = vmatpush3.bf16.msra.mxu0 %v9415_v6  ;;  %v9455_v6 = vld [vmem:[%s10129_s13 + $0xac0] sm:$0xff]  }
 0x1c3   : > { %8708 = vmatpush3.bf16.msra.mxu1 %v9416_v7  ;;  %8687 = vmatprep.subr.bf16.mxu0 %v9417_v8  ;;  %v617_v7 = vrot.slane %v418_v5, %v10193_v42  ;;  %v610_v8 = vcombine.high %v418_v5, %v418_v5  ;;  %v9492_v5 = vld [vmem:[%s10129_s13 + $0xc78] sm:$0xff]  }
 0x1c4   : > { %8709 = vmatprep.subr.bf16.mxu1 %v9418_v9  ;;  %v9456_v9 = vld [vmem:[%s10129_s13 + $0xa00] sm:$0xff]  }
 0x1c5   : > { %v816_v19 = vpack.c.bf16 %v617_v7, %v617_v7 }
 0x1c6   : > { %8688 = vmatpush3.bf16.msra.mxu0 %v9419_v10  ;;  %v9457_v10 = vld [vmem:[%s10129_s13 + $0xa80] sm:$0xff]  }
 0x1c7   : > { %8710 = vmatpush3.bf16.msra.mxu1 %v9420_v11  ;;  %8689 = vmatprep.subr.bf16.mxu0 %v9421_v12  ;;  %v625_v11 = vcombine.high %v617_v7, %v617_v7  ;;  %v624_v12 = vrot.slane %v610_v8, %v10193_v42  ;;  %v9493_v8 = vld [vmem:[%s10129_s13 + $0xcf8] sm:$0xff]  }
 0x1c8   : > { %8711 = vmatprep.subr.bf16.mxu1 %v9422_v14 }
 0x1c9   : > { %v817_v14 = vpack.c.bf16 %v625_v11, %v625_v11  ;;  %v626_v15 = vcombine.high %v624_v12, %v624_v12  ;;  %v818_v20 = vpack.c.bf16 %v624_v12, %v624_v12 }
 0x1ca   : > { %8690 = vmatpush3.bf16.msra.mxu0 %v9423_v17  ;;  %v9461_v17 = vld [vmem:[%s10129_s13 + $0xb38] sm:$0xff]  }
 0x1cb   : > { %8712 = vmatpush3.bf16.msra.mxu1 %v9424_v18  ;;  %8719 = vmatprep.subr.bf16.mxu0 %v9426_v21  ;;  %v819_v18 = vpack.c.bf16 %v626_v15, %v626_v15  ;;  %v9462_v21 = vld [vmem:[%s10129_s13 + $0xbb8] sm:$0xff]   ;;  %v9497_v15 = vld [vmem:[%s10129_s13 + $0xcf0] sm:$0xff]  }
 0x1cc   : > { %8741 = vmatprep.subr.bf16.mxu1 %v9427_v24  ;;  %v9465_v24 = vld [vmem:[%s10129_s13 + $0xb30] sm:$0xff]  }
 0x1cd   : > { %v8427_v33 = vpop.f32.mrf.mxu0  ;;  %5689 = vmatmul.mubr.bf16.vlgmr.msra.gmra.mxu0 %v812_v27  ;;  %v9466_v27 = vld [vmem:[%s10129_s13 + $0xbb0] sm:$0xff]  }
 0x1ce   : > { %v8449_v35 = vpop.f32.mrf.mxu1  ;;  %5729 = vmatmul.mubr.bf16.vlgmr.msra.gmra.mxu1 %v814_v28  ;;  %8720 = vmatpush3.bf16.msra.mxu0 %v9428_v25  ;;  %v9467_v28 = vld [vmem:[%s10129_s13 + $0xb68] sm:$0xff]  }
 0x1cf   : > { %8742 = vmatpush3.bf16.msra.mxu1 %v9429_v29  ;;  %v8428_v38 = vpop.f32.mrf.mxu0  ;;  %8721 = vmatprep.subr.bf16.mxu0 %v9430_v30 }
 0x1d0   : > { %v8450_v39 = vpop.f32.mrf.mxu1  ;;  %8743 = vmatprep.subr.bf16.mxu1 %v9431_v31  ;;  %v8429_v41 = vadd.f32 %v8428_v38, %v8427_v33  ;;  %5768 = vmatprep.mubr.bf16.mxu0 %v817_v14  ;;  %v9468_v31 = vld [vmem:[%s10129_s13 + $0xbe8] sm:$0xff]   ;;  %v9496_v14 = vld [vmem:[%s10129_s13 + $0xc70] sm:$0xff]  }
 0x1d1   : > { %v8451_v43 = vadd.f32 %v8450_v39, %v8449_v35  ;;  %v8430_v45 = vpop.f32.mrf.mxu0  ;;  %5808 = vmatprep.mubr.bf16.mxu1 %v819_v18  ;;  %v9469_v35 = vld [vmem:[%s10129_s13 + $0xb28] sm:$0xff]  }
 0x1d2   : > { %v8452_v46 = vpop.f32.mrf.mxu1  ;;  %v5211_v48 = vadd.f32 %v8429_v41, %v10495_v61  ;;  %8722 = vmatpush3.bf16.msra.mxu0 %v9432_v32  ;;  %v9447_v61 = vld [vmem:[%s10129_s13 + $0xad0] sm:$0xff]   ;;  %v9470_v38 = vld [vmem:[%s10129_s13 + $0xba8] sm:$0xff]  }
 0x1d3   : > { %8744 = vmatpush3.bf16.msra.mxu1 %v9433_v36  ;;  %v8431_v50 = vpop.f32.mrf.mxu0  ;;  %8723 = vmatprep.subr.bf16.mxu0 %v9434_v37  ;;  %v9473_v46 = vld [vmem:[%s10129_s13 + $0xb20] sm:$0xff]  }
 0x1d4   : > { %v8453_v51 = vpop.f32.mrf.mxu1  ;;  %8745 = vmatprep.subr.bf16.mxu1 %v9435_v40  ;;  %v10533_v53 = vadd.f32 %v8451_v43, %v5211_v48  ;;  %v9471_v40 = vld [vmem:[%s10129_s13 + $0xb60] sm:$0xff]   ;;  %v9475_v48 = vld [vmem:[%s10129_s13 + $0xb58] sm:$0xff]  }
 0x1d5   : > { %v9477_v50 = vld [vmem:[%s10129_s13 + $0xb18] sm:$0xff]  }
 0x1d6   : > { %8724 = vmatpush3.bf16.msra.mxu0 %v9436_v44  ;;  %v9472_v44 = vld [vmem:[%s10129_s13 + $0xbe0] sm:$0xff]   ;;  %v9478_v51 = vld [vmem:[%s10129_s13 + $0xb98] sm:$0xff]  }
 0x1d7   : > { %8746 = vmatpush3.bf16.msra.mxu1 %v9437_v47  ;;  %8725 = vmatprep.subr.bf16.mxu0 %v9438_v49  ;;  %v9474_v47 = vld [vmem:[%s10129_s13 + $0xba0] sm:$0xff]   ;;  %v9476_v49 = vld [vmem:[%s10129_s13 + $0xbd8] sm:$0xff]  }
 0x1d8   : > { %8747 = vmatprep.subr.bf16.mxu1 %v9439_v52  ;;  %v9479_v52 = vld [vmem:[%s10129_s13 + $0xb50] sm:$0xff]  }
 0x1da   : > { %8726 = vmatpush3.bf16.msra.mxu0 %v9440_v54  ;;  %v9481_v54 = vld [vmem:[%s10129_s13 + $0xb10] sm:$0xff]  }
 0x1db   : > { %8748 = vmatpush3.bf16.msra.mxu1 %v9441_v55  ;;  %8727 = vmatprep.subr.bf16.mxu0 %v9442_v56  ;;  %v9482_v55 = vld [vmem:[%s10129_s13 + $0xb90] sm:$0xff]   ;;  %v9483_v56 = vld [vmem:[%s10129_s13 + $0xb48] sm:$0xff]  }
 0x1dc   : > { %8749 = vmatprep.subr.bf16.mxu1 %v9443_v57  ;;  %v9484_v57 = vld [vmem:[%s10129_s13 + $0xbc8] sm:$0xff]  }
 0x1de   : > { %8728 = vmatpush3.bf16.msra.mxu0 %v9444_v58  ;;  %v9485_v58 = vld [vmem:[%s10129_s13 + $0xb08] sm:$0xff]  }
 0x1df   : > { %8750 = vmatpush3.bf16.msra.mxu1 %v9445_v59  ;;  %8729 = vmatprep.subr.bf16.mxu0 %v9446_v60  ;;  %v9486_v59 = vld [vmem:[%s10129_s13 + $0xb88] sm:$0xff]   ;;  %v9487_v60 = vld [vmem:[%s10129_s13 + $0xb40] sm:$0xff]  }
 0x1e0   : > { %8751 = vmatprep.subr.bf16.mxu1 %v9447_v61  ;;  %v419_v61 = vld [vmem:[%s10151_s25 + $0x58] sm:$0xff] }
 0x1e2   : > { %8730 = vmatpush3.bf16.msra.mxu0 %v9448_v62  ;;  %v9488_v62 = vld [vmem:[%s10129_s13 + $0xbc0] sm:$0xff]  }
 0x1e3   : > { %8752 = vmatpush3.bf16.msra.mxu1 %v9449_v63  ;;  %8731 = vmatprep.subr.bf16.mxu0 %v9450_v0  ;;  %v634_v63 = vrot.slane %v419_v61, %v10193_v42  ;;  %v627_v0 = vcombine.high %v419_v61, %v419_v61  ;;  %v9525_v61 = vld [vmem:[%s10129_s13 + $0xd78] sm:$0xff]  }
 0x1e4   : > { %8753 = vmatprep.subr.bf16.mxu1 %v9451_v1  ;;  %v9489_v1 = vld [vmem:[%s10129_s13 + $0xb00] sm:$0xff]  }
 0x1e5   : > { %v820_v11 = vpack.c.bf16 %v634_v63, %v634_v63 }
 0x1e6   : > { %8732 = vmatpush3.bf16.msra.mxu0 %v9452_v2  ;;  %v9490_v2 = vld [vmem:[%s10129_s13 + $0xb80] sm:$0xff]  }
 0x1e7   : > { %8754 = vmatpush3.bf16.msra.mxu1 %v9453_v3  ;;  %8733 = vmatprep.subr.bf16.mxu0 %v9454_v4  ;;  %v642_v3 = vcombine.high %v634_v63, %v634_v63  ;;  %v641_v4 = vrot.slane %v627_v0, %v10193_v42 }
 0x1e8   : > { %8755 = vmatprep.subr.bf16.mxu1 %v9455_v6 }
 0x1e9   : > { %v821_v6 = vpack.c.bf16 %v642_v3, %v642_v3  ;;  %v643_v7 = vcombine.high %v641_v4, %v641_v4  ;;  %v822_v12 = vpack.c.bf16 %v641_v4, %v641_v4  ;;  %v9528_v4 = vld [vmem:[%s10129_s13 + $0xdb8] sm:$0xff]  }
 0x1ea   : > { %8734 = vmatpush3.bf16.msra.mxu0 %v9456_v9  ;;  %v9494_v9 = vld [vmem:[%s10129_s13 + $0xc38] sm:$0xff]  }
 0x1eb   : > { %8756 = vmatpush3.bf16.msra.mxu1 %v9457_v10  ;;  %8763 = vmatprep.subr.bf16.mxu0 %v9459_v13  ;;  %v823_v10 = vpack.c.bf16 %v643_v7, %v643_v7  ;;  %v9495_v13 = vld [vmem:[%s10129_s13 + $0xcb8] sm:$0xff]   ;;  %v9530_v7 = vld [vmem:[%s10129_s13 + $0xdf0] sm:$0xff]  }
 0x1ec   : > { %8785 = vmatprep.subr.bf16.mxu1 %v9460_v16  ;;  %v9498_v16 = vld [vmem:[%s10129_s13 + $0xc30] sm:$0xff]  }
 0x1ed   : > { %v8471_v25 = vpop.f32.mrf.mxu0  ;;  %5769 = vmatmul.mubr.bf16.vlgmr.msra.gmra.mxu0 %v816_v19  ;;  %v9499_v19 = vld [vmem:[%s10129_s13 + $0xcb0] sm:$0xff]  }
 0x1ee   : > { %v8493_v26 = vpop.f32.mrf.mxu1  ;;  %5809 = vmatmul.mubr.bf16.vlgmr.msra.gmra.mxu1 %v818_v20  ;;  %8764 = vmatpush3.bf16.msra.mxu0 %v9461_v17  ;;  %v9500_v20 = vld [vmem:[%s10129_s13 + $0xc68] sm:$0xff]  }
 0x1ef   : > { %8786 = vmatpush3.bf16.msra.mxu1 %v9462_v21  ;;  %v8472_v29 = vpop.f32.mrf.mxu0  ;;  %8765 = vmatprep.subr.bf16.mxu0 %v9463_v22 }
 0x1f0   : > { %v8494_v30 = vpop.f32.mrf.mxu1  ;;  %8787 = vmatprep.subr.bf16.mxu1 %v9464_v23  ;;  %v8473_v32 = vadd.f32 %v8472_v29, %v8471_v25  ;;  %5848 = vmatprep.mubr.bf16.mxu0 %v821_v6  ;;  %v9501_v23 = vld [vmem:[%s10129_s13 + $0xce8] sm:$0xff]   ;;  %v9529_v6 = vld [vmem:[%s10129_s13 + $0xd70] sm:$0xff]  }
 0x1f1   : > { %v8495_v33 = vadd.f32 %v8494_v30, %v8493_v26  ;;  %v8474_v36 = vpop.f32.mrf.mxu0  ;;  %5888 = vmatprep.mubr.bf16.mxu1 %v823_v10  ;;  %v9502_v26 = vld [vmem:[%s10129_s13 + $0xc28] sm:$0xff]  }
 0x1f2   : > { %v8496_v37 = vpop.f32.mrf.mxu1  ;;  %v5291_v39 = vadd.f32 %v8473_v32, %v10533_v53  ;;  %8766 = vmatpush3.bf16.msra.mxu0 %v9465_v24  ;;  %v9480_v53 = vld [vmem:[%s10129_s13 + $0xbd0] sm:$0xff]   ;;  %v9503_v29 = vld [vmem:[%s10129_s13 + $0xca8] sm:$0xff]  }
 0x1f3   : > { %8788 = vmatpush3.bf16.msra.mxu1 %v9466_v27  ;;  %v8475_v41 = vpop.f32.mrf.mxu0  ;;  %8767 = vmatprep.subr.bf16.mxu0 %v9467_v28  ;;  %v9506_v37 = vld [vmem:[%s10129_s13 + $0xc20] sm:$0xff]  }
 0x1f4   : > { %v8497_v43 = vpop.f32.mrf.mxu1  ;;  %8789 = vmatprep.subr.bf16.mxu1 %v9468_v31  ;;  %v10571_v45 = vadd.f32 %v8495_v33, %v5291_v39  ;;  %v9504_v31 = vld [vmem:[%s10129_s13 + $0xc60] sm:$0xff]   ;;  %v9508_v39 = vld [vmem:[%s10129_s13 + $0xc58] sm:$0xff]  }
 0x1f5   : > { %v9510_v41 = vld [vmem:[%s10129_s13 + $0xc18] sm:$0xff]  }
 0x1f6   : > { %8768 = vmatpush3.bf16.msra.mxu0 %v9469_v35  ;;  %v9505_v35 = vld [vmem:[%s10129_s13 + $0xce0] sm:$0xff]   ;;  %v9511_v43 = vld [vmem:[%s10129_s13 + $0xc98] sm:$0xff]  }
 0x1f7   : > { %8790 = vmatpush3.bf16.msra.mxu1 %v9470_v38  ;;  %8769 = vmatprep.subr.bf16.mxu0 %v9471_v40  ;;  %v9507_v38 = vld [vmem:[%s10129_s13 + $0xca0] sm:$0xff]   ;;  %v9509_v40 = vld [vmem:[%s10129_s13 + $0xcd8] sm:$0xff]  }
 0x1f8   : > { %8791 = vmatprep.subr.bf16.mxu1 %v9472_v44  ;;  %v9512_v44 = vld [vmem:[%s10129_s13 + $0xc50] sm:$0xff]  }
 0x1fa   : > { %8770 = vmatpush3.bf16.msra.mxu0 %v9473_v46  ;;  %v9514_v46 = vld [vmem:[%s10129_s13 + $0xc10] sm:$0xff]  }
 0x1fb   : > { %8792 = vmatpush3.bf16.msra.mxu1 %v9474_v47  ;;  %8771 = vmatprep.subr.bf16.mxu0 %v9475_v48  ;;  %v9515_v47 = vld [vmem:[%s10129_s13 + $0xc90] sm:$0xff]   ;;  %v9516_v48 = vld [vmem:[%s10129_s13 + $0xc48] sm:$0xff]  }
 0x1fc   : > { %8793 = vmatprep.subr.bf16.mxu1 %v9476_v49  ;;  %v9517_v49 = vld [vmem:[%s10129_s13 + $0xcc8] sm:$0xff]  }
 0x1fe   : > { %8772 = vmatpush3.bf16.msra.mxu0 %v9477_v50  ;;  %v9518_v50 = vld [vmem:[%s10129_s13 + $0xc08] sm:$0xff]  }
 0x1ff   : > { %8794 = vmatpush3.bf16.msra.mxu1 %v9478_v51  ;;  %8773 = vmatprep.subr.bf16.mxu0 %v9479_v52  ;;  %v9519_v51 = vld [vmem:[%s10129_s13 + $0xc88] sm:$0xff]   ;;  %v9520_v52 = vld [vmem:[%s10129_s13 + $0xc40] sm:$0xff]  }
 0x200   : > { %8795 = vmatprep.subr.bf16.mxu1 %v9480_v53  ;;  %v9521_v53 = vld [vmem:[%s10129_s13 + $0xcc0] sm:$0xff]  }
 0x202   : > { %8774 = vmatpush3.bf16.msra.mxu0 %v9481_v54  ;;  %v420_v54 = vld [vmem:[%s10151_s25 + $0x60] sm:$0xff] }
 0x203   : > { %8796 = vmatpush3.bf16.msra.mxu1 %v9482_v55  ;;  %8775 = vmatprep.subr.bf16.mxu0 %v9483_v56  ;;  %v9522_v55 = vld [vmem:[%s10129_s13 + $0xc00] sm:$0xff]   ;;  %v651_v56 = vrot.slane %v420_v54, %v10193_v42 }
 0x204   : > { %8797 = vmatprep.subr.bf16.mxu1 %v9484_v57  ;;  %v644_v57 = vcombine.high %v420_v54, %v420_v54  ;;  %v9559_v54 = vld [vmem:[%s10129_s13 + $0xef8] sm:$0xff]  }
 0x206   : > { %8776 = vmatpush3.bf16.msra.mxu0 %v9485_v58  ;;  %v9523_v58 = vld [vmem:[%s10129_s13 + $0xc80] sm:$0xff]  }
 0x207   : > { %8798 = vmatpush3.bf16.msra.mxu1 %v9486_v59  ;;  %8777 = vmatprep.subr.bf16.mxu0 %v9487_v60  ;;  %v659_v59 = vcombine.high %v651_v56, %v651_v56  ;;  %v658_v60 = vrot.slane %v644_v57, %v10193_v42  ;;  %v9560_v57 = vld [vmem:[%s10129_s13 + $0xe38] sm:$0xff]  }
 0x208   : > { %8799 = vmatprep.subr.bf16.mxu1 %v9488_v62  ;;  %v9526_v62 = vld [vmem:[%s10129_s13 + $0xdf8] sm:$0xff]  }
 0x209   : > { %v825_v63 = vpack.c.bf16 %v659_v59, %v659_v59  ;;  %v660_v0 = vcombine.high %v658_v60, %v658_v60  ;;  %v826_v3 = vpack.c.bf16 %v658_v60, %v658_v60  ;;  %v9561_v60 = vld [vmem:[%s10129_s13 + $0xeb8] sm:$0xff]  }
 0x20a   : > { %8778 = vmatpush3.bf16.msra.mxu0 %v9489_v1  ;;  %v9527_v1 = vld [vmem:[%s10129_s13 + $0xd38] sm:$0xff]  }
 0x20b   : > { %8800 = vmatpush3.bf16.msra.mxu1 %v9490_v2  ;;  %8807 = vmatprep.subr.bf16.mxu0 %v9492_v5  ;;  %v824_v2 = vpack.c.bf16 %v651_v56, %v651_v56  ;;  %v827_v5 = vpack.c.bf16 %v660_v0, %v660_v0  ;;  %v9564_v0 = vld [vmem:[%s10129_s13 + $0xe30] sm:$0xff]  }
 0x20c   : > { %8829 = vmatprep.subr.bf16.mxu1 %v9493_v8  ;;  %v9531_v8 = vld [vmem:[%s10129_s13 + $0xd30] sm:$0xff]  }
 0x20d   : > { %v8515_v17 = vpop.f32.mrf.mxu0  ;;  %5849 = vmatmul.mubr.bf16.vlgmr.msra.gmra.mxu0 %v820_v11  ;;  %v9532_v11 = vld [vmem:[%s10129_s13 + $0xdb0] sm:$0xff]  }
 0x20e   : > { %v8537_v18 = vpop.f32.mrf.mxu1  ;;  %5889 = vmatmul.mubr.bf16.vlgmr.msra.gmra.mxu1 %v822_v12  ;;  %8808 = vmatpush3.bf16.msra.mxu0 %v9494_v9  ;;  %v9533_v12 = vld [vmem:[%s10129_s13 + $0xd68] sm:$0xff]  }
 0x20f   : > { %8830 = vmatpush3.bf16.msra.mxu1 %v9495_v13  ;;  %v8516_v21 = vpop.f32.mrf.mxu0  ;;  %8809 = vmatprep.subr.bf16.mxu0 %v9496_v14 }
 0x210   : > { %v8538_v22 = vpop.f32.mrf.mxu1  ;;  %8831 = vmatprep.subr.bf16.mxu1 %v9497_v15  ;;  %v8517_v24 = vadd.f32 %v8516_v21, %v8515_v17  ;;  %5928 = vmatprep.mubr.bf16.mxu0 %v825_v63  ;;  %v9534_v15 = vld [vmem:[%s10129_s13 + $0xde8] sm:$0xff]   ;;  %v9563_v63 = vld [vmem:[%s10129_s13 + $0xef0] sm:$0xff]  }
 0x211   : > { %v8539_v25 = vadd.f32 %v8538_v22, %v8537_v18  ;;  %v8518_v27 = vpop.f32.mrf.mxu0  ;;  %5968 = vmatprep.mubr.bf16.mxu1 %v827_v5  ;;  %v9535_v18 = vld [vmem:[%s10129_s13 + $0xd28] sm:$0xff]  }
 0x212   : > { %v8540_v28 = vpop.f32.mrf.mxu1  ;;  %v5371_v30 = vadd.f32 %v8517_v24, %v10571_v45  ;;  %8810 = vmatpush3.bf16.msra.mxu0 %v9498_v16  ;;  %v9513_v45 = vld [vmem:[%s10129_s13 + $0xcd0] sm:$0xff]   ;;  %v9536_v21 = vld [vmem:[%s10129_s13 + $0xda8] sm:$0xff]  }
 0x213   : > { %8832 = vmatpush3.bf16.msra.mxu1 %v9499_v19  ;;  %v8519_v32 = vpop.f32.mrf.mxu0  ;;  %8811 = vmatprep.subr.bf16.mxu0 %v9500_v20  ;;  %v9539_v28 = vld [vmem:[%s10129_s13 + $0xd20] sm:$0xff]  }
 0x214   : > { %v8541_v33 = vpop.f32.mrf.mxu1  ;;  %8833 = vmatprep.subr.bf16.mxu1 %v9501_v23  ;;  %v10609_v36 = vadd.f32 %v8539_v25, %v5371_v30  ;;  %v9537_v23 = vld [vmem:[%s10129_s13 + $0xd60] sm:$0xff]   ;;  %v9541_v30 = vld [vmem:[%s10129_s13 + $0xd58] sm:$0xff]  }
 0x215   : > { %v9543_v32 = vld [vmem:[%s10129_s13 + $0xd18] sm:$0xff]  }
 0x216   : > { %8812 = vmatpush3.bf16.msra.mxu0 %v9502_v26  ;;  %v9538_v26 = vld [vmem:[%s10129_s13 + $0xde0] sm:$0xff]   ;;  %v9544_v33 = vld [vmem:[%s10129_s13 + $0xd98] sm:$0xff]  }
 0x217   : > { %8834 = vmatpush3.bf16.msra.mxu1 %v9503_v29  ;;  %8813 = vmatprep.subr.bf16.mxu0 %v9504_v31  ;;  %v9540_v29 = vld [vmem:[%s10129_s13 + $0xda0] sm:$0xff]   ;;  %v9542_v31 = vld [vmem:[%s10129_s13 + $0xdd8] sm:$0xff]  }
 0x218   : > { %8835 = vmatprep.subr.bf16.mxu1 %v9505_v35  ;;  %v9545_v35 = vld [vmem:[%s10129_s13 + $0xd50] sm:$0xff]  }
 0x21a   : > { %8814 = vmatpush3.bf16.msra.mxu0 %v9506_v37  ;;  %v9547_v37 = vld [vmem:[%s10129_s13 + $0xd10] sm:$0xff]  }
 0x21b   : > { %8836 = vmatpush3.bf16.msra.mxu1 %v9507_v38  ;;  %8815 = vmatprep.subr.bf16.mxu0 %v9508_v39  ;;  %v9548_v38 = vld [vmem:[%s10129_s13 + $0xd90] sm:$0xff]   ;;  %v9549_v39 = vld [vmem:[%s10129_s13 + $0xd48] sm:$0xff]  }
 0x21c   : > { %8837 = vmatprep.subr.bf16.mxu1 %v9509_v40  ;;  %v9550_v40 = vld [vmem:[%s10129_s13 + $0xdc8] sm:$0xff]  }
 0x21e   : > { %8816 = vmatpush3.bf16.msra.mxu0 %v9510_v41  ;;  %v9551_v41 = vld [vmem:[%s10129_s13 + $0xd08] sm:$0xff]  }
 0x21f   : > { %8838 = vmatpush3.bf16.msra.mxu1 %v9511_v43  ;;  %8817 = vmatprep.subr.bf16.mxu0 %v9512_v44  ;;  %v9552_v43 = vld [vmem:[%s10129_s13 + $0xd88] sm:$0xff]   ;;  %v9553_v44 = vld [vmem:[%s10129_s13 + $0xd40] sm:$0xff]  }
 0x220   : > { %8839 = vmatprep.subr.bf16.mxu1 %v9513_v45  ;;  %v9554_v45 = vld [vmem:[%s10129_s13 + $0xdc0] sm:$0xff]  }
 0x222   : > { %8818 = vmatpush3.bf16.msra.mxu0 %v9514_v46  ;;  %v421_v46 = vld [vmem:[%s10151_s25 + $0x68] sm:$0xff] }
 0x223   : > { %8840 = vmatpush3.bf16.msra.mxu1 %v9515_v47  ;;  %8819 = vmatprep.subr.bf16.mxu0 %v9516_v48  ;;  %v9555_v47 = vld [vmem:[%s10129_s13 + $0xd00] sm:$0xff]   ;;  %v668_v48 = vrot.slane %v421_v46, %v10193_v42 }
 0x224   : > { %8841 = vmatprep.subr.bf16.mxu1 %v9517_v49  ;;  %v661_v49 = vcombine.high %v421_v46, %v421_v46  ;;  %v9592_v46 = vld [vmem:[%s10129_s13 + $0xff8] sm:$0xff]  }
 0x226   : > { %8820 = vmatpush3.bf16.msra.mxu0 %v9518_v50  ;;  %v9556_v50 = vld [vmem:[%s10129_s13 + $0xd80] sm:$0xff]  }
 0x227   : > { %8842 = vmatpush3.bf16.msra.mxu1 %v9519_v51  ;;  %8821 = vmatprep.subr.bf16.mxu0 %v9520_v52  ;;  %v676_v51 = vcombine.high %v668_v48, %v668_v48  ;;  %v675_v52 = vrot.slane %v661_v49, %v10193_v42  ;;  %v9593_v49 = vld [vmem:[%s10129_s13 + $0xf38] sm:$0xff]  }
 0x228   : > { %8843 = vmatprep.subr.bf16.mxu1 %v9521_v53  ;;  %v9558_v53 = vld [vmem:[%s10129_s13 + $0xe78] sm:$0xff]  }
 0x229   : > { %v677_v56 = vcombine.high %v675_v52, %v675_v52  ;;  %v830_v59 = vpack.c.bf16 %v675_v52, %v675_v52  ;;  %v9594_v52 = vld [vmem:[%s10129_s13 + $0xfb8] sm:$0xff]  }
 0x22a   : > { %8822 = vmatpush3.bf16.msra.mxu0 %v9522_v55  ;;  %v829_v55 = vpack.c.bf16 %v676_v51, %v676_v51 }
 0x22b   : > { %8844 = vmatpush3.bf16.msra.mxu1 %v9523_v58  ;;  %8851 = vmatprep.subr.bf16.mxu0 %v9525_v61  ;;  %v828_v58 = vpack.c.bf16 %v668_v48, %v668_v48  ;;  %v831_v61 = vpack.c.bf16 %v677_v56, %v677_v56  ;;  %v9597_v56 = vld [vmem:[%s10129_s13 + $0xf30] sm:$0xff]  }
 0x22c   : > { %8873 = vmatprep.subr.bf16.mxu1 %v9526_v62  ;;  %v9562_v62 = vld [vmem:[%s10129_s13 + $0xe70] sm:$0xff]  }
 0x22d   : > { %v8559_v9 = vpop.f32.mrf.mxu0  ;;  %5929 = vmatmul.mubr.bf16.vlgmr.msra.gmra.mxu0 %v824_v2 }
 0x22e   : > { %v8581_v10 = vpop.f32.mrf.mxu1  ;;  %5969 = vmatmul.mubr.bf16.vlgmr.msra.gmra.mxu1 %v826_v3  ;;  %8852 = vmatpush3.bf16.msra.mxu0 %v9527_v1  ;;  %v9565_v3 = vld [vmem:[%s10129_s13 + $0xeb0] sm:$0xff]  }
 0x22f   : > { %8874 = vmatpush3.bf16.msra.mxu1 %v9528_v4  ;;  %v8560_v13 = vpop.f32.mrf.mxu0  ;;  %8853 = vmatprep.subr.bf16.mxu0 %v9529_v6  ;;  %v9566_v4 = vld [vmem:[%s10129_s13 + $0xe68] sm:$0xff]  }
 0x230   : > { %v8582_v14 = vpop.f32.mrf.mxu1  ;;  %8875 = vmatprep.subr.bf16.mxu1 %v9530_v7  ;;  %v8561_v16 = vadd.f32 %v8560_v13, %v8559_v9  ;;  %6008 = vmatprep.mubr.bf16.mxu0 %v829_v55  ;;  %v9567_v7 = vld [vmem:[%s10129_s13 + $0xee8] sm:$0xff]   ;;  %v9596_v55 = vld [vmem:[%s10129_s13 + $0xff0] sm:$0xff]  }
 0x231   : > { %v8583_v17 = vadd.f32 %v8582_v14, %v8581_v10  ;;  %v8562_v19 = vpop.f32.mrf.mxu0  ;;  %6048 = vmatprep.mubr.bf16.mxu1 %v831_v61  ;;  %v9568_v10 = vld [vmem:[%s10129_s13 + $0xe28] sm:$0xff]  }
 0x232   : > { %v8584_v20 = vpop.f32.mrf.mxu1  ;;  %v5451_v22 = vadd.f32 %v8561_v16, %v10609_v36  ;;  %8854 = vmatpush3.bf16.msra.mxu0 %v9531_v8  ;;  %v9546_v36 = vld [vmem:[%s10129_s13 + $0xdd0] sm:$0xff]   ;;  %v9569_v13 = vld [vmem:[%s10129_s13 + $0xea8] sm:$0xff]  }
 0x233   : > { %8876 = vmatpush3.bf16.msra.mxu1 %v9532_v11  ;;  %v8563_v24 = vpop.f32.mrf.mxu0  ;;  %8855 = vmatprep.subr.bf16.mxu0 %v9533_v12  ;;  %v9572_v20 = vld [vmem:[%s10129_s13 + $0xe20] sm:$0xff]  }
 0x234   : > { %v8585_v25 = vpop.f32.mrf.mxu1  ;;  %8877 = vmatprep.subr.bf16.mxu1 %v9534_v15  ;;  %v10647_v27 = vadd.f32 %v8583_v17, %v5451_v22  ;;  %v9570_v15 = vld [vmem:[%s10129_s13 + $0xe60] sm:$0xff]   ;;  %v9574_v22 = vld [vmem:[%s10129_s13 + $0xe58] sm:$0xff]  }
 0x235   : > { %v9576_v24 = vld [vmem:[%s10129_s13 + $0xe18] sm:$0xff]  }
 0x236   : > { %8856 = vmatpush3.bf16.msra.mxu0 %v9535_v18  ;;  %v9571_v18 = vld [vmem:[%s10129_s13 + $0xee0] sm:$0xff]   ;;  %v9577_v25 = vld [vmem:[%s10129_s13 + $0xe98] sm:$0xff]  }
 0x237   : > { %8878 = vmatpush3.bf16.msra.mxu1 %v9536_v21  ;;  %8857 = vmatprep.subr.bf16.mxu0 %v9537_v23  ;;  %v9573_v21 = vld [vmem:[%s10129_s13 + $0xea0] sm:$0xff]   ;;  %v9575_v23 = vld [vmem:[%s10129_s13 + $0xed8] sm:$0xff]  }
 0x238   : > { %8879 = vmatprep.subr.bf16.mxu1 %v9538_v26  ;;  %v9578_v26 = vld [vmem:[%s10129_s13 + $0xe50] sm:$0xff]  }
 0x23a   : > { %8858 = vmatpush3.bf16.msra.mxu0 %v9539_v28  ;;  %v9580_v28 = vld [vmem:[%s10129_s13 + $0xe10] sm:$0xff]  }
 0x23b   : > { %8880 = vmatpush3.bf16.msra.mxu1 %v9540_v29  ;;  %8859 = vmatprep.subr.bf16.mxu0 %v9541_v30  ;;  %v9581_v29 = vld [vmem:[%s10129_s13 + $0xe90] sm:$0xff]   ;;  %v9582_v30 = vld [vmem:[%s10129_s13 + $0xe48] sm:$0xff]  }
 0x23c   : > { %8881 = vmatprep.subr.bf16.mxu1 %v9542_v31  ;;  %v9583_v31 = vld [vmem:[%s10129_s13 + $0xec8] sm:$0xff]  }
 0x23e   : > { %8860 = vmatpush3.bf16.msra.mxu0 %v9543_v32  ;;  %v9584_v32 = vld [vmem:[%s10129_s13 + $0xe08] sm:$0xff]  }
 0x23f   : > { %8882 = vmatpush3.bf16.msra.mxu1 %v9544_v33  ;;  %8861 = vmatprep.subr.bf16.mxu0 %v9545_v35  ;;  %v9585_v33 = vld [vmem:[%s10129_s13 + $0xe88] sm:$0xff]   ;;  %v9586_v35 = vld [vmem:[%s10129_s13 + $0xe40] sm:$0xff]  }
 0x240   : > { %8883 = vmatprep.subr.bf16.mxu1 %v9546_v36  ;;  %v9587_v36 = vld [vmem:[%s10129_s13 + $0xec0] sm:$0xff]  }
 0x242   : > { %8862 = vmatpush3.bf16.msra.mxu0 %v9547_v37  ;;  %v422_v37 = vld [vmem:[%s10151_s25 + $0x70] sm:$0xff] }
 0x243   : > { %8884 = vmatpush3.bf16.msra.mxu1 %v9548_v38  ;;  %8863 = vmatprep.subr.bf16.mxu0 %v9549_v39  ;;  %v9588_v38 = vld [vmem:[%s10129_s13 + $0xe00] sm:$0xff]   ;;  %v685_v39 = vrot.slane %v422_v37, %v10193_v42 }
 0x244   : > { %8885 = vmatprep.subr.bf16.mxu1 %v9550_v40  ;;  %v678_v40 = vcombine.high %v422_v37, %v422_v37 }
 0x246   : > { %8864 = vmatpush3.bf16.msra.mxu0 %v9551_v41  ;;  %v9589_v41 = vld [vmem:[%s10129_s13 + $0xe80] sm:$0xff]  }
 0x247   : > { %8886 = vmatpush3.bf16.msra.mxu1 %v9552_v43  ;;  %8865 = vmatprep.subr.bf16.mxu0 %v9553_v44  ;;  %v693_v43 = vcombine.high %v685_v39, %v685_v39  ;;  %v692_v44 = vrot.slane %v678_v40, %v10193_v42 }
 0x248   : > { %8887 = vmatprep.subr.bf16.mxu1 %v9554_v45  ;;  %v9591_v45 = vld [vmem:[%s10129_s13 + $0xf78] sm:$0xff]  }
 0x249   : > { %v694_v48 = vcombine.high %v692_v44, %v692_v44  ;;  %v834_v51 = vpack.c.bf16 %v692_v44, %v692_v44 }
 0x24a   : > { %8866 = vmatpush3.bf16.msra.mxu0 %v9555_v47  ;;  %v833_v47 = vpack.c.bf16 %v693_v43, %v693_v43 }
 0x24b   : > { %8888 = vmatpush3.bf16.msra.mxu1 %v9556_v50  ;;  %8895 = vmatprep.subr.bf16.mxu0 %v9558_v53  ;;  %v832_v50 = vpack.c.bf16 %v685_v39, %v685_v39  ;;  %v835_v53 = vpack.c.bf16 %v694_v48, %v694_v48 }
 0x24c   : > { %8917 = vmatprep.subr.bf16.mxu1 %v9559_v54  ;;  %v9595_v54 = vld [vmem:[%s10129_s13 + $0xf70] sm:$0xff]  }
 0x24d   : > { %v8603_v1 = vpop.f32.mrf.mxu0  ;;  %6009 = vmatmul.mubr.bf16.vlgmr.msra.gmra.mxu0 %v828_v58 }
 0x24e   : > { %v8625_v2 = vpop.f32.mrf.mxu1  ;;  %6049 = vmatmul.mubr.bf16.vlgmr.msra.gmra.mxu1 %v830_v59  ;;  %8896 = vmatpush3.bf16.msra.mxu0 %v9560_v57  ;;  %v9598_v59 = vld [vmem:[%s10129_s13 + $0xfb0] sm:$0xff]  }
 0x24f   : > { %8918 = vmatpush3.bf16.msra.mxu1 %v9561_v60  ;;  %v8604_v5 = vpop.f32.mrf.mxu0  ;;  %8897 = vmatprep.subr.bf16.mxu0 %v9562_v62  ;;  %v9599_v60 = vld [vmem:[%s10129_s13 + $0xf68] sm:$0xff]  }
 0x250   : > { %v8626_v6 = vpop.f32.mrf.mxu1  ;;  %8919 = vmatprep.subr.bf16.mxu1 %v9563_v63  ;;  %v8605_v8 = vadd.f32 %v8604_v5, %v8603_v1  ;;  %6088 = vmatprep.mubr.bf16.mxu0 %v833_v47  ;;  %v9600_v63 = vld [vmem:[%s10129_s13 + $0xfe8] sm:$0xff]  }
 0x251   : > { %v8627_v9 = vadd.f32 %v8626_v6, %v8625_v2  ;;  %v8606_v11 = vpop.f32.mrf.mxu0  ;;  %6128 = vmatprep.mubr.bf16.mxu1 %v835_v53  ;;  %v9601_v2 = vld [vmem:[%s10129_s13 + $0xf28] sm:$0xff]  }
 0x252   : > { %v8628_v12 = vpop.f32.mrf.mxu1  ;;  %v5531_v14 = vadd.f32 %v8605_v8, %v10647_v27  ;;  %8898 = vmatpush3.bf16.msra.mxu0 %v9564_v0  ;;  %v9579_v27 = vld [vmem:[%s10129_s13 + $0xed0] sm:$0xff]   ;;  %v9602_v5 = vld [vmem:[%s10129_s13 + $0xfa8] sm:$0xff]  }
 0x253   : > { %8920 = vmatpush3.bf16.msra.mxu1 %v9565_v3  ;;  %v8607_v16 = vpop.f32.mrf.mxu0  ;;  %8899 = vmatprep.subr.bf16.mxu0 %v9566_v4  ;;  %v9605_v12 = vld [vmem:[%s10129_s13 + $0xf20] sm:$0xff]  }
 0x254   : > { %v8629_v17 = vpop.f32.mrf.mxu1  ;;  %8921 = vmatprep.subr.bf16.mxu1 %v9567_v7  ;;  %v10685_v19 = vadd.f32 %v8627_v9, %v5531_v14  ;;  %v9603_v7 = vld [vmem:[%s10129_s13 + $0xf60] sm:$0xff]   ;;  %v9607_v14 = vld [vmem:[%s10129_s13 + $0xf58] sm:$0xff]  }
 0x255   : > { %v9609_v16 = vld [vmem:[%s10129_s13 + $0xf18] sm:$0xff]  }
 0x256   : > { %8900 = vmatpush3.bf16.msra.mxu0 %v9568_v10  ;;  %v9604_v10 = vld [vmem:[%s10129_s13 + $0xfe0] sm:$0xff]   ;;  %v9610_v17 = vld [vmem:[%s10129_s13 + $0xf98] sm:$0xff]  }
 0x257   : > { %8922 = vmatpush3.bf16.msra.mxu1 %v9569_v13  ;;  %8901 = vmatprep.subr.bf16.mxu0 %v9570_v15  ;;  %v9606_v13 = vld [vmem:[%s10129_s13 + $0xfa0] sm:$0xff]   ;;  %v9608_v15 = vld [vmem:[%s10129_s13 + $0xfd8] sm:$0xff]  }
 0x258   : > { %8923 = vmatprep.subr.bf16.mxu1 %v9571_v18  ;;  %v9611_v18 = vld [vmem:[%s10129_s13 + $0xf50] sm:$0xff]  }
 0x25a   : > { %8902 = vmatpush3.bf16.msra.mxu0 %v9572_v20  ;;  %v9613_v20 = vld [vmem:[%s10129_s13 + $0xf10] sm:$0xff]  }
 0x25b   : > { %8924 = vmatpush3.bf16.msra.mxu1 %v9573_v21  ;;  %8903 = vmatprep.subr.bf16.mxu0 %v9574_v22  ;;  %v9614_v21 = vld [vmem:[%s10129_s13 + $0xf90] sm:$0xff]   ;;  %v9615_v22 = vld [vmem:[%s10129_s13 + $0xf48] sm:$0xff]  }
 0x25c   : > { %8925 = vmatprep.subr.bf16.mxu1 %v9575_v23  ;;  %v9616_v23 = vld [vmem:[%s10129_s13 + $0xfc8] sm:$0xff]  }
 0x25e   : > { %8904 = vmatpush3.bf16.msra.mxu0 %v9576_v24  ;;  %v9617_v24 = vld [vmem:[%s10129_s13 + $0xf08] sm:$0xff]  }
 0x25f   : > { %8926 = vmatpush3.bf16.msra.mxu1 %v9577_v25  ;;  %8905 = vmatprep.subr.bf16.mxu0 %v9578_v26  ;;  %v9618_v25 = vld [vmem:[%s10129_s13 + $0xf88] sm:$0xff]   ;;  %v9619_v26 = vld [vmem:[%s10129_s13 + $0xf40] sm:$0xff]  }
 0x260   : > { %8927 = vmatprep.subr.bf16.mxu1 %v9579_v27  ;;  %v9620_v27 = vld [vmem:[%s10129_s13 + $0xfc0] sm:$0xff]  }
 0x262   : > { %8906 = vmatpush3.bf16.msra.mxu0 %v9580_v28  ;;  %v423_v28 = vld [vmem:[%s10151_s25 + $0x78] sm:$0xff] }
 0x263   : > { %8928 = vmatpush3.bf16.msra.mxu1 %v9581_v29  ;;  %8907 = vmatprep.subr.bf16.mxu0 %v9582_v30  ;;  %v702_v29 = vrot.slane %v423_v28, %v10193_v42  ;;  %v695_v30 = vcombine.high %v423_v28, %v423_v28 }
 0x264   : > { %8929 = vmatprep.subr.bf16.mxu1 %v9583_v31  ;;  %v9621_v31 = vld [vmem:[%s10129_s13 + $0xf00] sm:$0xff]  }
 0x266   : > { %8908 = vmatpush3.bf16.msra.mxu0 %v9584_v32  ;;  %v9622_v32 = vld [vmem:[%s10129_s13 + $0xf80] sm:$0xff]  }
 0x267   : > { %8930 = vmatpush3.bf16.msra.mxu1 %v9585_v33  ;;  %8909 = vmatprep.subr.bf16.mxu0 %v9586_v35  ;;  %v710_v33 = vcombine.high %v702_v29, %v702_v29  ;;  %v709_v35 = vrot.slane %v695_v30, %v10193_v42 }
 0x268   : > { %8931 = vmatprep.subr.bf16.mxu1 %v9587_v36 }
 0x269   : > { %v837_v36 = vpack.c.bf16 %v710_v33, %v710_v33  ;;  %v711_v37 = vcombine.high %v709_v35, %v709_v35  ;;  %v838_v39 = vpack.c.bf16 %v709_v35, %v709_v35 }
 0x26a   : > { %8910 = vmatpush3.bf16.msra.mxu0 %v9588_v38  ;;  %v836_v38 = vpack.c.bf16 %v702_v29, %v702_v29 }
 0x26b   : > { %8932 = vmatpush3.bf16.msra.mxu1 %v9589_v41  ;;  %8939 = vmatprep.subr.bf16.mxu0 %v9591_v45  ;;  %v839_v40 = vpack.c.bf16 %v711_v37, %v711_v37 }
 0x26c   : > { %8961 = vmatprep.subr.bf16.mxu1 %v9592_v46 }
 0x26d   : > { %v8647_v57 = vpop.f32.mrf.mxu0  ;;  %6089 = vmatmul.mubr.bf16.vlgmr.msra.gmra.mxu0 %v832_v50 }
 0x26e   : > { %v8669_v58 = vpop.f32.mrf.mxu1  ;;  %6129 = vmatmul.mubr.bf16.vlgmr.msra.gmra.mxu1 %v834_v51  ;;  %8940 = vmatpush3.bf16.msra.mxu0 %v9593_v49 }
 0x26f   : > { %8962 = vmatpush3.bf16.msra.mxu1 %v9594_v52  ;;  %v8648_v61 = vpop.f32.mrf.mxu0  ;;  %8941 = vmatprep.subr.bf16.mxu0 %v9595_v54 }
 0x270   : > { %v8670_v62 = vpop.f32.mrf.mxu1  ;;  %8963 = vmatprep.subr.bf16.mxu1 %v9596_v55  ;;  %v8649_v0 = vadd.f32 %v8648_v61, %v8647_v57  ;;  %6168 = vmatprep.mubr.bf16.mxu0 %v837_v36 }
 0x271   : > { %v8671_v1 = vadd.f32 %v8670_v62, %v8669_v58  ;;  %v8650_v3 = vpop.f32.mrf.mxu0  ;;  %6208 = vmatprep.mubr.bf16.mxu1 %v839_v40 }
 0x272   : > { %v8672_v4 = vpop.f32.mrf.mxu1  ;;  %v5611_v6 = vadd.f32 %v8649_v0, %v10685_v19  ;;  %8942 = vmatpush3.bf16.msra.mxu0 %v9597_v56  ;;  %v9612_v19 = vld [vmem:[%s10129_s13 + $0xfd0] sm:$0xff]  }
 0x273   : > { %8964 = vmatpush3.bf16.msra.mxu1 %v9598_v59  ;;  %v8651_v8 = vpop.f32.mrf.mxu0  ;;  %8943 = vmatprep.subr.bf16.mxu0 %v9599_v60 }
 0x274   : > { %v8673_v9 = vpop.f32.mrf.mxu1  ;;  %8965 = vmatprep.subr.bf16.mxu1 %v9600_v63  ;;  %v10723_v11 = vadd.f32 %v8671_v1, %v5611_v6 }
 0x276   : > { %8944 = vmatpush3.bf16.msra.mxu0 %v9601_v2 }
 0x277   : > { %8966 = vmatpush3.bf16.msra.mxu1 %v9602_v5  ;;  %8945 = vmatprep.subr.bf16.mxu0 %v9603_v7 }
 0x278   : > { %8967 = vmatprep.subr.bf16.mxu1 %v9604_v10 }
 0x27a   : > { %8946 = vmatpush3.bf16.msra.mxu0 %v9605_v12 }
 0x27b   : > { %8968 = vmatpush3.bf16.msra.mxu1 %v9606_v13  ;;  %8947 = vmatprep.subr.bf16.mxu0 %v9607_v14 }
 0x27c   : > { %8969 = vmatprep.subr.bf16.mxu1 %v9608_v15 }
 0x27e   : > { %8948 = vmatpush3.bf16.msra.mxu0 %v9609_v16 }
 0x27f   : > { %8970 = vmatpush3.bf16.msra.mxu1 %v9610_v17  ;;  %8949 = vmatprep.subr.bf16.mxu0 %v9611_v18 }
 0x280   : > { %8971 = vmatprep.subr.bf16.mxu1 %v9612_v19 }
 0x282   : > { %8950 = vmatpush3.bf16.msra.mxu0 %v9613_v20 }
 0x283   : > { %8972 = vmatpush3.bf16.msra.mxu1 %v9614_v21  ;;  %8951 = vmatprep.subr.bf16.mxu0 %v9615_v22 }
 0x284   : > { %8973 = vmatprep.subr.bf16.mxu1 %v9616_v23 }
 0x286   : > { %8952 = vmatpush3.bf16.msra.mxu0 %v9617_v24 }
 0x287   : > { %8974 = vmatpush3.bf16.msra.mxu1 %v9618_v25  ;;  %8953 = vmatprep.subr.bf16.mxu0 %v9619_v26 }
 0x288   : > { %8975 = vmatprep.subr.bf16.mxu1 %v9620_v27 }
 0x28a   : > { %8954 = vmatpush3.bf16.msra.mxu0 %v9621_v31 }
 0x28b   : > { %8976 = vmatpush3.bf16.msra.mxu1 %v9622_v32 }
 0x28d   : > { %v8691_v41 = vpop.f32.mrf.mxu0  ;;  %6169 = vmatmul.mubr.bf16.vlgmr.msra.gmra.mxu0 %v836_v38 }
 0x28e   : > { %v8713_v43 = vpop.f32.mrf.mxu1  ;;  %6209 = vmatmul.mubr.bf16.vlgmr.msra.gmra.mxu1 %v838_v39 }
 0x28f   : > { %v8692_v44 = vpop.f32.mrf.mxu0 }
 0x290   : > { %v8714_v45 = vpop.f32.mrf.mxu1  ;;  %v8693_v46 = vadd.f32 %v8692_v44, %v8691_v41 }
 0x291   : > { %v8715_v47 = vadd.f32 %v8714_v45, %v8713_v43  ;;  %v8694_v48 = vpop.f32.mrf.mxu0 }
 0x292   : > { %v8716_v49 = vpop.f32.mrf.mxu1  ;;  %v5691_v50 = vadd.f32 %v8693_v46, %v10723_v11 }
 0x293   : > { %v8695_v51 = vpop.f32.mrf.mxu0 }
 0x294   : > { %v8717_v52 = vpop.f32.mrf.mxu1  ;;  %v5731_v53 = vadd.f32 %v8715_v47, %v5691_v50 }
 0x2ad   : > { %v8735_v54 = vpop.f32.mrf.mxu0 }
 0x2ae   : > { %v8757_v55 = vpop.f32.mrf.mxu1 }
 0x2af   : > { %v8736_v56 = vpop.f32.mrf.mxu0 }
 0x2b0   : > { %v8758_v57 = vpop.f32.mrf.mxu1  ;;  %v8737_v58 = vadd.f32 %v8736_v56, %v8735_v54 }
 0x2b1   : > { %v8759_v59 = vadd.f32 %v8758_v57, %v8757_v55  ;;  %v8738_v60 = vpop.f32.mrf.mxu0 }
 0x2b2   : > { %v8760_v61 = vpop.f32.mrf.mxu1  ;;  %v5771_v62 = vadd.f32 %v8737_v58, %v5731_v53 }
 0x2b3   : > { %v8739_v63 = vpop.f32.mrf.mxu0  ;;  %v407_v61 = vld [vmem:[#allocation13] sm:$0x3] }
 0x2b4   : > { %v8761_v0 = vpop.f32.mrf.mxu1  ;;  %v5811_v1 = vadd.f32 %v8759_v59, %v5771_v62 }
 0x2cd   : > { %v8779_v2 = vpop.f32.mrf.mxu0 }
 0x2ce   : > { %v8801_v3 = vpop.f32.mrf.mxu1 }
 0x2cf   : > { %v8780_v4 = vpop.f32.mrf.mxu0 }
 0x2d0   : > { %v8802_v5 = vpop.f32.mrf.mxu1  ;;  %v8781_v6 = vadd.f32 %v8780_v4, %v8779_v2 }
 0x2d1   : > { %v8803_v7 = vadd.f32 %v8802_v5, %v8801_v3  ;;  %v8782_v8 = vpop.f32.mrf.mxu0 }
 0x2d2   : > { %v8804_v9 = vpop.f32.mrf.mxu1  ;;  %v5851_v10 = vadd.f32 %v8781_v6, %v5811_v1 }
 0x2d3   : > { %v8783_v11 = vpop.f32.mrf.mxu0 }
 0x2d4   : > { %v8805_v12 = vpop.f32.mrf.mxu1  ;;  %v5891_v13 = vadd.f32 %v8803_v7, %v5851_v10 }
 0x2ed   : > { %v8823_v14 = vpop.f32.mrf.mxu0 }
 0x2ee   : > { %v8845_v15 = vpop.f32.mrf.mxu1 }
 0x2ef   : > { %v8824_v16 = vpop.f32.mrf.mxu0 }
 0x2f0   : > { %v8846_v17 = vpop.f32.mrf.mxu1  ;;  %v8825_v18 = vadd.f32 %v8824_v16, %v8823_v14 }
 0x2f1   : > { %v8847_v19 = vadd.f32 %v8846_v17, %v8845_v15  ;;  %v8826_v20 = vpop.f32.mrf.mxu0 }
 0x2f2   : > { %v8848_v21 = vpop.f32.mrf.mxu1  ;;  %v5931_v22 = vadd.f32 %v8825_v18, %v5891_v13 }
 0x2f3   : > { %v8827_v23 = vpop.f32.mrf.mxu0 }
 0x2f4   : > { %v8849_v24 = vpop.f32.mrf.mxu1  ;;  %v5971_v25 = vadd.f32 %v8847_v19, %v5931_v22 }
 0x30d   : > { %v8867_v26 = vpop.f32.mrf.mxu0 }
 0x30e   : > { %v8889_v27 = vpop.f32.mrf.mxu1 }
 0x30f   : > { %v8868_v28 = vpop.f32.mrf.mxu0 }
 0x310   : > { %v8890_v29 = vpop.f32.mrf.mxu1  ;;  %v8869_v44 = vadd.f32 %v8868_v28, %v8867_v26 }
 0x311   : > { %v8870_v30 = vpop.f32.mrf.mxu0  ;;  %v8891_v46 = vadd.f32 %v8890_v29, %v8889_v27 }
 0x312   : > { %v8892_v31 = vpop.f32.mrf.mxu1  ;;  %v6011_v45 = vadd.f32 %v8869_v44, %v5971_v25 }
 0x313   : > { %v8871_v32 = vpop.f32.mrf.mxu0 }
 0x314   : > { %v8893_v33 = vpop.f32.mrf.mxu1  ;;  %v6051_v48 = vadd.f32 %v8891_v46, %v6011_v45 }
 0x32d   : > { %v8911_v35 = vpop.f32.mrf.mxu0 }
 0x32e   : > { %v8933_v36 = vpop.f32.mrf.mxu1 }
 0x32f   : > { %v8912_v37 = vpop.f32.mrf.mxu0 }
 0x330   : > { %v8934_v38 = vpop.f32.mrf.mxu1  ;;  %v8913_v47 = vadd.f32 %v8912_v37, %v8911_v35 }
 0x331   : > { %v8914_v39 = vpop.f32.mrf.mxu0  ;;  %v8935_v50 = vadd.f32 %v8934_v38, %v8933_v36 }
 0x332   : > { %v8936_v40 = vpop.f32.mrf.mxu1  ;;  %v6091_v49 = vadd.f32 %v8913_v47, %v6051_v48 }
 0x333   : > { %v8915_v41 = vpop.f32.mrf.mxu0 }
 0x334   : > { %v8937_v43 = vpop.f32.mrf.mxu1  ;;  %v6131_v54 = vadd.f32 %v8935_v50, %v6091_v49 }
 0x34d   : > { %v8955_v51 = vpop.f32.mrf.mxu0 }
 0x34e   : > { %v8977_v52 = vpop.f32.mrf.mxu1 }
 0x34f   : > { %v8956_v53 = vpop.f32.mrf.mxu0 }
 0x350   : > { %v8957_v55 = vadd.f32 %v8956_v53, %v8955_v51  ;;  %v8978_v56 = vpop.f32.mrf.mxu1 }
 0x351   : > { %v8958_v57 = vpop.f32.mrf.mxu0  ;;  %v8979_v59 = vadd.f32 %v8978_v56, %v8977_v52 }
 0x352   : > { %v6171_v58 = vadd.f32 %v8957_v55, %v6131_v54  ;;  %v8980_v60 = vpop.f32.mrf.mxu1 }
 0x353   : > { %v8959_v62 = vpop.f32.mrf.mxu0 }
 0x354   : > { %v6211_v63 = vadd.f32 %v8979_v59, %v6171_v58  ;;  %v8981_v0 = vpop.f32.mrf.mxu1  ;;  %6221 = sbr.rel (%p8134_p11) target bundleno = 1693 (0x69d), region = 80 }
 0x356   : > { %v6216_v1 = vadd.f32 %v6211_v63, %v407_v61 }
 0x358   : > { %6217 = vst [vmem:[#allocation13] sm:$0x3] %v6216_v1 }
 0x359   : > { %v8135_v3 = vld [vmem:[#allocation5] ss:$0 sm:$0xff]  ;;  %v6270_v6 = vld [vmem:[#allocation7 + $0xf0] sm:$0xff]  ;;  %v6269_v7 = vld [vmem:[#allocation7 + $0xe8] sm:$0xff]  ;;  %vm6232_vm0 = vcmask 1041408   ;;  %v9936_v28 = vmov 0.0  }
 0x35a   : > { %v6271_v4 = vld [vmem:[#allocation7 + $0xf8] sm:$0xff]  ;;  %v6268_v8 = vld [vmem:[#allocation7 + $0xe0] sm:$0xff]  ;;  %v6266_v11 = vld [vmem:[#allocation7 + $0xd0] sm:$0xff]  ;;  %6348 = vmatprep.mubr.f32.mxu0 %v9936_v28 }
 0x35b   : > { %6284 = vmatprep.subr.mxu0 %v6271_v4  ;;  %v6267_v9 = vld [vmem:[#allocation7 + $0xd8] sm:$0xff]  ;;  %v6265_v12 = vld [vmem:[#allocation7 + $0xc8] sm:$0xff]  ;;  %v6264_v14 = vld [vmem:[#allocation7 + $0xc0] sm:$0xff] }
 0x35c   : > { %6285 = vmatpush1.msra.mxu0 %v6270_v6  ;;  %v6263_v15 = vld [vmem:[#allocation7 + $0xb8] sm:$0xff]  ;;  %v6262_v16 = vld [vmem:[#allocation7 + $0xb0] sm:$0xff]  ;;  %v6261_v17 = vld [vmem:[#allocation7 + $0xa8] sm:$0xff] }
 0x35d   : > { %6286 = vmatprep.subr.mxu0 %v6269_v7  ;;  %v6260_v18 = vld [vmem:[#allocation7 + $0xa0] sm:$0xff]  ;;  %v6259_v19 = vld [vmem:[#allocation7 + $0x98] sm:$0xff]  ;;  %v6258_v20 = vld [vmem:[#allocation7 + $0x90] sm:$0xff] }
 0x35e   : > { %6287 = vmatpush1.msra.mxu0 %v6268_v8  ;;  %v6257_v21 = vld [vmem:[#allocation7 + $0x88] sm:$0xff]  ;;  %v6256_v22 = vld [vmem:[#allocation7 + $0x80] sm:$0xff]  ;;  %v6255_v23 = vld [vmem:[#allocation7 + $0x78] sm:$0xff] }
 0x35f   : > { %v6222_v2 = vld [vmem:[#allocation13] sm:$0x3]  ;;  %6288 = vmatprep.subr.mxu0 %v6267_v9  ;;  %v6254_v24 = vld [vmem:[#allocation7 + $0x70] sm:$0xff]  ;;  %v6252_v26 = vld [vmem:[#allocation7 + $0x60] sm:$0xff] }
 0x360   : > { %v10748_v5 = vadd.f32 %v8135_v3, %v6222_v2  ;;  %6289 = vmatpush1.msra.mxu0 %v6266_v11  ;;  %v6253_v25 = vld [vmem:[#allocation7 + $0x68] sm:$0xff]  ;;  %v6251_v27 = vld [vmem:[#allocation7 + $0x58] sm:$0xff]  ;;  %v6250_v29 = vld [vmem:[#allocation7 + $0x50] sm:$0xff] }
 0x361   : > { %6290 = vmatprep.subr.mxu0 %v6265_v12  ;;  %v6249_v30 = vld [vmem:[#allocation7 + $0x48] sm:$0xff]  ;;  %v6248_v31 = vld [vmem:[#allocation7 + $0x40] sm:$0xff]  ;;  %v6247_v32 = vld [vmem:[#allocation7 + $0x38] sm:$0xff] }
 0x362   : > { %v6231_v10 = vmul.f32 %v10748_v5, %v10748_v5  ;;  %6291 = vmatpush1.msra.mxu0 %v6264_v14  ;;  %v6246_v33 = vld [vmem:[#allocation7 + $0x30] sm:$0xff]  ;;  %v6245_v35 = vld [vmem:[#allocation7 + $0x28] sm:$0xff]  ;;  %v6244_v36 = vld [vmem:[#allocation7 + $0x20] sm:$0xff] }
 0x363   : > { %6292 = vmatprep.subr.mxu0 %v6263_v15  ;;  %v6243_v37 = vld [vmem:[#allocation7 + $0x18] sm:$0xff]  ;;  %v6242_v38 = vld [vmem:[#allocation7 + $0x10] sm:$0xff]  ;;  %v6241_v39 = vld [vmem:[#allocation7 + $0x8] sm:$0xff] }
 0x364   : > { %v6233_v13 = vsel %vm6232_vm0, %v6231_v10, 0.0  ;;  %6293 = vmatpush1.msra.mxu0 %v6262_v16  ;;  %v6240_v40 = vld [vmem:[#allocation7] sm:$0xff]  ;;  %v10753_v44 = vld [vmem:[#allocation10 + $0x1c8] sm:$0xff] }
 0x365   : > { %6234 = vadd.xlane.f32.xlu0 %v6233_v13  ;;  %6294 = vmatprep.subr.mxu0 %v6261_v17  ;;  %v6415_v41 = vld [vmem:[#allocation10 + $0x1c0] sm:$0xff]  ;;  %v10755_v46 = vld [vmem:[#allocation10 + $0x1e8] sm:$0xff] }
 0x366   : > { %6295 = vmatpush1.msra.mxu0 %v6260_v18  ;;  %v6419_v43 = vld [vmem:[#allocation10 + $0x1e0] sm:$0xff]  ;;  %v8194_v50 = vcombine.low %v10753_v44, %v10755_v46  ;;  %v8195_v51 = vcombine.high %v10753_v44, %v10755_v46 }
 0x367   : > { %6296 = vmatprep.subr.mxu0 %v6259_v19  ;;  %v8193_v45 = vcombine.high %v6415_v41, %v6419_v43  ;;  %v8192_v47 = vcombine.low %v6415_v41, %v6419_v43  ;;  %v6407_v48 = vld [vmem:[#allocation10 + $0x180] sm:$0xff]  ;;  %v6408_v43 = vld [vmem:[#allocation10 + $0x188] sm:$0xff] }
 0x368   : > { %6297 = vmatpush1.msra.mxu0 %v6258_v20  ;;  %v6411_v49 = vld [vmem:[#allocation10 + $0x1a0] sm:$0xff] }
 0x369   : > { %6298 = vmatprep.subr.mxu0 %v6257_v21  ;;  %v8185_v52 = vcombine.high %v6407_v48, %v6411_v49  ;;  %7169 = vmatprep.subr.bf16.mxu1 %v8193_v45  ;;  %v8184_v53 = vcombine.low %v6407_v48, %v6411_v49  ;;  %v6399_v54 = vld [vmem:[#allocation10 + $0x140] sm:$0xff]  ;;  %v6412_v45 = vld [vmem:[#allocation10 + $0x1a8] sm:$0xff] }
 0x36a   : > { %6299 = vmatpush1.msra.mxu0 %v6256_v22  ;;  %7170 = vmatpush1.bf16.msra.mxu1 %v8192_v47  ;;  %v6403_v55 = vld [vmem:[#allocation10 + $0x160] sm:$0xff]  ;;  %v8187_v49 = vcombine.high %v6408_v43, %v6412_v45 }
 0x36b   : > { %6300 = vmatprep.subr.mxu0 %v6255_v23  ;;  %7171 = vmatprep.subr.bf16.mxu1 %v8185_v52  ;;  %v8177_v56 = vcombine.high %v6399_v54, %v6403_v55  ;;  %v8176_v57 = vcombine.low %v6399_v54, %v6403_v55  ;;  %v6391_v58 = vld [vmem:[#allocation10 + $0x100] sm:$0xff]  ;;  %v6404_v52 = vld [vmem:[#allocation10 + $0x168] sm:$0xff] }
 0x36c   : > { %6301 = vmatpush1.msra.mxu0 %v6254_v24  ;;  %v6395_v59 = vld [vmem:[#allocation10 + $0x120] sm:$0xff]  ;;  %v6392_v55 = vld [vmem:[#allocation10 + $0x108] sm:$0xff] }
 0x36d   : > { %6302 = vmatprep.subr.mxu0 %v6253_v25  ;;  %v8169_v60 = vcombine.high %v6391_v58, %v6395_v59  ;;  %v8168_v61 = vcombine.low %v6391_v58, %v6395_v59  ;;  %v6383_v62 = vld [vmem:[#allocation10 + $0xc0] sm:$0xff]  ;;  %v6384_v59 = vld [vmem:[#allocation10 + $0xc8] sm:$0xff] }
 0x36e   : > { %6303 = vmatpush1.msra.mxu0 %v6252_v26  ;;  %7172 = vmatpush1.bf16.msra.mxu1 %v8184_v53  ;;  %v6387_v63 = vld [vmem:[#allocation10 + $0xe0] sm:$0xff]  ;;  %v8186_v53 = vcombine.low %v6408_v43, %v6412_v45 }
 0x36f   : > { %6304 = vmatprep.subr.mxu0 %v6251_v27  ;;  %7173 = vmatprep.subr.bf16.mxu1 %v8177_v56  ;;  %v8161_v0 = vcombine.high %v6383_v62, %v6387_v63  ;;  %v8160_v1 = vcombine.low %v6383_v62, %v6387_v63  ;;  %v6375_v2 = vld [vmem:[#allocation10 + $0x80] sm:$0xff]  ;;  %v6396_v56 = vld [vmem:[#allocation10 + $0x128] sm:$0xff] }
 0x370   : > { %6305 = vmatpush1.msra.mxu0 %v6250_v29  ;;  %v6379_v3 = vld [vmem:[#allocation10 + $0xa0] sm:$0xff]  ;;  %v8171_v58 = vcombine.high %v6392_v55, %v6396_v56  ;;  %v6376_v62 = vld [vmem:[#allocation10 + $0x88] sm:$0xff] }
 0x371   : > { %6306 = vmatprep.subr.mxu0 %v6249_v30  ;;  %v8153_v4 = vcombine.high %v6375_v2, %v6379_v3  ;;  %v8152_v6 = vcombine.low %v6375_v2, %v6379_v3  ;;  %v6367_v7 = vld [vmem:[#allocation10 + $0x40] sm:$0xff]  ;;  %v6380_v63 = vld [vmem:[#allocation10 + $0xa8] sm:$0xff] }
 0x372   : > { %6307 = vmatpush1.msra.mxu0 %v6248_v31  ;;  %7174 = vmatpush1.bf16.msra.mxu1 %v8176_v57  ;;  %v6371_v8 = vld [vmem:[#allocation10 + $0x60] sm:$0xff]  ;;  %v8155_v46 = vcombine.high %v6376_v62, %v6380_v63  ;;  %v6360_v3 = vld [vmem:[#allocation10 + $0x8] sm:$0xff] }
 0x373   : > { %6308 = vmatprep.subr.mxu0 %v6247_v32  ;;  %7175 = vmatprep.subr.bf16.mxu1 %v8169_v60  ;;  %v8145_v9 = vcombine.high %v6367_v7, %v6371_v8  ;;  %v8144_v10 = vcombine.low %v6367_v7, %v6371_v8  ;;  %v6359_v11 = vld [vmem:[#allocation10] sm:$0xff]  ;;  %v8170_v60 = vcombine.low %v6392_v55, %v6396_v56  ;;  %v6480_v8 = vld [vmem:[#allocation10 + $0x3c8] sm:$0xff]  ;;  %v6421_v55 = vld [vmem:[#allocation10 + $0x1f0] sm:$0xff] }
 0x374   : > { %6309 = vmatpush1.msra.mxu0 %v6246_v33  ;;  %v6363_v12 = vld [vmem:[#allocation10 + $0x20] sm:$0xff]  ;;  %v6418_v56 = vld [vmem:[#allocation10 + $0x1d8] sm:$0xff] }
 0x375   : > { %6310 = vmatprep.subr.mxu0 %v6245_v35  ;;  %v8137_v13 = vcombine.high %v6359_v11, %v6363_v12  ;;  %v8136_v14 = vcombine.low %v6359_v11, %v6363_v12  ;;  %v6479_v15 = vld [vmem:[#allocation10 + $0x3c0] sm:$0xff]  ;;  %v6472_v12 = vld [vmem:[#allocation10 + $0x388] sm:$0xff] }
 0x376   : > { %6311 = vmatpush1.msra.mxu0 %v6244_v36  ;;  %7176 = vmatpush1.bf16.msra.mxu1 %v8168_v61  ;;  %v6483_v16 = vld [vmem:[#allocation10 + $0x3e0] sm:$0xff] }
 0x377   : > { %6312 = vmatprep.subr.mxu0 %v6243_v37  ;;  %7177 = vmatprep.subr.bf16.mxu1 %v8161_v0  ;;  %v8257_v17 = vcombine.high %v6479_v15, %v6483_v16  ;;  %v8256_v18 = vcombine.low %v6479_v15, %v6483_v16  ;;  %v6471_v19 = vld [vmem:[#allocation10 + $0x380] sm:$0xff]  ;;  %v6372_v0 = vld [vmem:[#allocation10 + $0x68] sm:$0xff] }
 0x378   : > { %6313 = vmatpush1.msra.mxu0 %v6242_v38  ;;  %v6475_v20 = vld [vmem:[#allocation10 + $0x3a0] sm:$0xff]  ;;  %v6464_v16 = vld [vmem:[#allocation10 + $0x348] sm:$0xff] }
 0x379   : > { %6314 = vmatprep.subr.mxu0 %v6241_v39  ;;  %v8249_v21 = vcombine.high %v6471_v19, %v6475_v20  ;;  %v8248_v22 = vcombine.low %v6471_v19, %v6475_v20  ;;  %v6463_v23 = vld [vmem:[#allocation10 + $0x340] sm:$0xff]  ;;  %v6456_v20 = vld [vmem:[#allocation10 + $0x308] sm:$0xff] }
 0x37a   : > { %6315 = vmatpush1.msra.mxu0 %v6240_v40  ;;  %7178 = vmatpush1.bf16.msra.mxu1 %v8160_v1  ;;  %v6467_v24 = vld [vmem:[#allocation10 + $0x360] sm:$0xff]  ;;  %v8154_v1 = vcombine.low %v6376_v62, %v6380_v63  ;;  %v6272_v62 = vld [vmem:[#allocation8] sm:$0x3]  ;;  %v6280_v63 = vsub.s32 1, %v10187_v34 }
 0x37b   : > { %7210 = vmatprep.subr.bf16.mxu0 %v8195_v51  ;;  %7179 = vmatprep.subr.bf16.mxu1 %v8153_v4  ;;  %v8241_v25 = vcombine.high %v6463_v23, %v6467_v24  ;;  %v8240_v26 = vcombine.low %v6463_v23, %v6467_v24  ;;  %v6455_v27 = vld [vmem:[#allocation10 + $0x300] sm:$0xff]  ;;  %v6400_v51 = vld [vmem:[#allocation10 + $0x148] sm:$0xff] }
 0x37c   : > { %v6459_v28 = vld [vmem:[#allocation10 + $0x320] sm:$0xff]  ;;  %v8179_v54 = vcombine.high %v6400_v51, %v6404_v52  ;;  %v8178_v57 = vcombine.low %v6400_v51, %v6404_v52  ;;  %v6364_v4 = vld [vmem:[#allocation10 + $0x28] sm:$0xff] }
 0x37d   : > { %v8233_v29 = vcombine.high %v6455_v27, %v6459_v28  ;;  %v8232_v30 = vcombine.low %v6455_v27, %v6459_v28  ;;  %v6447_v31 = vld [vmem:[#allocation10 + $0x2c0] sm:$0xff]  ;;  %v8139_v7 = vcombine.high %v6360_v3, %v6364_v4  ;;  %v6448_v24 = vld [vmem:[#allocation10 + $0x2c8] sm:$0xff] }
 0x37e   : > { %7180 = vmatpush1.bf16.msra.mxu1 %v8152_v6  ;;  %v6451_v32 = vld [vmem:[#allocation10 + $0x2e0] sm:$0xff]  ;;  %v6440_v28 = vld [vmem:[#allocation10 + $0x288] sm:$0xff] }
 0x37f   : > { %7181 = vmatprep.subr.bf16.mxu1 %v8145_v9  ;;  %v8225_v33 = vcombine.high %v6447_v31, %v6451_v32  ;;  %v8224_v35 = vcombine.low %v6447_v31, %v6451_v32  ;;  %v6439_v36 = vld [vmem:[#allocation10 + $0x280] sm:$0xff]  ;;  %v6484_v9 = vld [vmem:[#allocation10 + $0x3e8] sm:$0xff] }
 0x380   : > { %v6443_v37 = vld [vmem:[#allocation10 + $0x2a0] sm:$0xff]  ;;  %v8259_v11 = vcombine.high %v6480_v8, %v6484_v9 }
 0x381   : > { %v8217_v38 = vcombine.high %v6439_v36, %v6443_v37  ;;  %v8216_v39 = vcombine.low %v6439_v36, %v6443_v37  ;;  %v6432_v36 = vld [vmem:[#allocation10 + $0x248] sm:$0xff]  ;;  %v6423_v43 = vld [vmem:[#allocation10 + $0x200] sm:$0xff] }
 0x382   : > { %7182 = vmatpush1.bf16.msra.mxu1 %v8144_v10  ;;  %v8138_v10 = vcombine.low %v6360_v3, %v6364_v4  ;;  %v6427_v45 = vld [vmem:[#allocation10 + $0x220] sm:$0xff] }
 0x383   : > { %7183 = vmatprep.subr.bf16.mxu1 %v8137_v13  ;;  %v6476_v13 = vld [vmem:[#allocation10 + $0x3a8] sm:$0xff] }
 0x384   : > { %v8251_v15 = vcombine.high %v6472_v12, %v6476_v13 }
 0x386   : > { %7184 = vmatpush1.bf16.msra.mxu1 %v8136_v14  ;;  %v8258_v14 = vcombine.low %v6480_v8, %v6484_v9  ;;  %v6410_v8 = vld [vmem:[#allocation10 + $0x198] sm:$0xff] }
 0x387   : > { %7185 = vmatprep.subr.bf16.mxu1 %v8257_v17  ;;  %v6468_v17 = vld [vmem:[#allocation10 + $0x368] sm:$0xff]  ;;  %v6414_v9 = vld [vmem:[#allocation10 + $0x1b8] sm:$0xff] }
 0x388   : > { %v8243_v19 = vcombine.high %v6464_v16, %v6468_v17 }
 0x38a   : > { %7186 = vmatpush2.bf16.msra.mxu1 %v8256_v18  ;;  %v8250_v18 = vcombine.low %v6472_v12, %v6476_v13  ;;  %v6401_v12 = vld [vmem:[#allocation10 + $0x150] sm:$0xff] }
 0x38b   : > { %7187 = vmatprep.subr.bf16.mxu1 %v8249_v21  ;;  %v6460_v21 = vld [vmem:[#allocation10 + $0x328] sm:$0xff] }
 0x38c   : > { %v8235_v23 = vcombine.high %v6456_v20, %v6460_v21 }
 0x38e   : > { %7188 = vmatpush2.bf16.msra.mxu1 %v8248_v22  ;;  %v8242_v22 = vcombine.low %v6464_v16, %v6468_v17  ;;  %v6402_v16 = vld [vmem:[#allocation10 + $0x158] sm:$0xff] }
 0x38f   : > { %7189 = vmatprep.subr.bf16.mxu1 %v8241_v25  ;;  %v6452_v25 = vld [vmem:[#allocation10 + $0x2e8] sm:$0xff]  ;;  %v6406_v17 = vld [vmem:[#allocation10 + $0x178] sm:$0xff] }
 0x390   : > { %v8227_v27 = vcombine.high %v6448_v24, %v6452_v25 }
 0x392   : > { %7190 = vmatpush2.bf16.msra.mxu1 %v8240_v26  ;;  %v8234_v26 = vcombine.low %v6456_v20, %v6460_v21  ;;  %v8183_v21 = vcombine.high %v6402_v16, %v6406_v17 }
 0x393   : > { %7191 = vmatprep.subr.bf16.mxu1 %v8233_v29  ;;  %v6444_v29 = vld [vmem:[#allocation10 + $0x2a8] sm:$0xff] }
 0x394   : > { %v8219_v31 = vcombine.high %v6440_v28, %v6444_v29  ;;  %v8218_v32 = vcombine.low %v6440_v28, %v6444_v29 }
 0x396   : > { %7192 = vmatpush2.bf16.msra.mxu1 %v8232_v30  ;;  %v8226_v30 = vcombine.low %v6448_v24, %v6452_v25  ;;  %v6394_v24 = vld [vmem:[#allocation10 + $0x118] sm:$0xff] }
 0x397   : > { %7193 = vmatprep.subr.bf16.mxu1 %v8225_v33  ;;  %v6431_v33 = vld [vmem:[#allocation10 + $0x240] sm:$0xff]  ;;  %v6398_v25 = vld [vmem:[#allocation10 + $0x138] sm:$0xff] }
 0x398   : > { %v8175_v29 = vcombine.high %v6394_v24, %v6398_v25 }
 0x39a   : > { %7194 = vmatpush2.bf16.msra.mxu1 %v8224_v35  ;;  %v6435_v35 = vld [vmem:[#allocation10 + $0x260] sm:$0xff] }
 0x39b   : > { %7195 = vmatprep.subr.bf16.mxu1 %v8217_v38  ;;  %v8209_v37 = vcombine.high %v6431_v33, %v6435_v35  ;;  %v6436_v38 = vld [vmem:[#allocation10 + $0x268] sm:$0xff] }
 0x39e   : > { %7196 = vmatpush2.bf16.msra.mxu1 %v8216_v39  ;;  %v8210_v39 = vcombine.low %v6432_v36, %v6436_v38 }
 0x39f   : > { %7197 = vmatprep.subr.bf16.mxu1 %v8209_v37 }
 0x3ee   : > { %v6235_v40 = vpop.xlane.xlu0 %6234 }
 0x3ef   : > { %v6236_v41 = vadd.f32 1e-12, %v6235_v40  ;;  %v8211_v40 = vcombine.high %v6432_v36, %v6436_v38  ;;  %v8174_v36 = vcombine.low %v6394_v24, %v6398_v25 }
 0x3f1   : > { %9624 = vrsqrt.f32 %v6236_v41  ;;  %v8208_v41 = vcombine.low %v6431_v33, %v6435_v35  ;;  %v6390_v33 = vld [vmem:[#allocation10 + $0xf8] sm:$0xff] }
 0x3f3   : > { %7198 = vmatpush2.bf16.msra.mxu1 %v8208_v41  ;;  %v6378_v41 = vld [vmem:[#allocation10 + $0x98] sm:$0xff] }
 0x3fe   : > { %v9625_v47 = vpop.eup %9624 }
 0x3ff   : > { %v6238_v48 = vmul.f32 %v9625_v47, %v10748_v5  ;;  %v6388_v5 = vld [vmem:[#allocation10 + $0xe8] sm:$0xff] }
 0x400   : > { %v8163_v61 = vcombine.high %v6384_v59, %v6388_v5  ;;  %v8162_v44 = vcombine.low %v6384_v59, %v6388_v5  ;;  %v6424_v47 = vld [vmem:[#allocation10 + $0x208] sm:$0xff] }
 0x401   : > { %6239 = vst [vmem:[#allocation13] sm:$0x3] %v6238_v48  ;;  %6349 = vmatmul.mubr.f32.vlgmr.msra.gmra.mxu0 %v6238_v48  ;;  %v8201_v48 = vcombine.high %v6423_v43, %v6427_v45 }
 0x402   : > { %7211 = vmatpush1.bf16.msra.mxu0 %v8194_v50  ;;  %v6368_v50 = vld [vmem:[#allocation10 + $0x48] sm:$0xff] }
 0x403   : > { %7212 = vmatprep.subr.bf16.mxu0 %v8187_v49  ;;  %v8147_v2 = vcombine.high %v6368_v50, %v6372_v0  ;;  %v8146_v6 = vcombine.low %v6368_v50, %v6372_v0  ;;  %v6428_v49 = vld [vmem:[#allocation10 + $0x228] sm:$0xff]  ;;  %7199 = vmatprep.subr.bf16.mxu1 %v8201_v48 }
 0x404   : > { %v8202_v51 = vcombine.low %v6424_v47, %v6428_v49  ;;  %v8203_v52 = vcombine.high %v6424_v47, %v6428_v49 }
 0x406   : > { %7213 = vmatpush1.bf16.msra.mxu0 %v8186_v53  ;;  %v8200_v53 = vcombine.low %v6423_v43, %v6427_v45  ;;  %v6382_v43 = vld [vmem:[#allocation10 + $0xb8] sm:$0xff] }
 0x407   : > { %7214 = vmatprep.subr.bf16.mxu0 %v8179_v54  ;;  %v6417_v54 = vld [vmem:[#allocation10 + $0x1d0] sm:$0xff]  ;;  %v8159_v49 = vcombine.high %v6378_v41, %v6382_v43 }
 0x408   : > { %7200 = vmatpush2.bf16.msra.mxu1 %v8200_v53  ;;  %v8196_v59 = vcombine.low %v6417_v54, %v6421_v55  ;;  %v6370_v53 = vld [vmem:[#allocation10 + $0x58] sm:$0xff] }
 0x40a   : > { %7215 = vmatpush1.bf16.msra.mxu0 %v8178_v57  ;;  %v8197_v57 = vcombine.high %v6417_v54, %v6421_v55  ;;  %v6374_v54 = vld [vmem:[#allocation10 + $0x78] sm:$0xff] }
 0x40b   : > { %7216 = vmatprep.subr.bf16.mxu0 %v8171_v58  ;;  %v6422_v58 = vld [vmem:[#allocation10 + $0x1f8] sm:$0xff] }
 0x40c   : > { %v8198_v5 = vcombine.low %v6418_v56, %v6422_v58  ;;  %7251 = vmatprep.subr.bf16.mxu1 %v8197_v57 }
 0x40e   : > { %7217 = vmatpush1.bf16.msra.mxu0 %v8170_v60  ;;  %v8199_v60 = vcombine.high %v6418_v56, %v6422_v58  ;;  %v8158_v56 = vcombine.low %v6378_v41, %v6382_v43  ;;  %v8151_v58 = vcombine.high %v6370_v53, %v6374_v54 }
 0x40f   : > { %7218 = vmatprep.subr.bf16.mxu0 %v8163_v61  ;;  %v6276_v61 = vsub.s32 0, %v10187_v34 }
 0x412   : > { %7219 = vmatpush1.bf16.msra.mxu0 %v8162_v44  ;;  %v6277_v44 = vrot.slane %v6272_v62, %v6276_v61 }
 0x413   : > { %7220 = vmatprep.subr.bf16.mxu0 %v8155_v46  ;;  %v6281_v46 = vrot.slane %v6272_v62, %v6280_v63  ;;  %v6366_v62 = vld [vmem:[#allocation10 + $0x38] sm:$0xff] }
 0x416   : > { %7221 = vmatpush1.bf16.msra.mxu0 %v8154_v1 }
 0x417   : > { %7222 = vmatprep.subr.bf16.mxu0 %v8147_v2 }
 0x41a   : > { %7223 = vmatpush1.bf16.msra.mxu0 %v8146_v6  ;;  %v6409_v6 = vld [vmem:[#allocation10 + $0x190] sm:$0xff] }
 0x41b   : > { %7224 = vmatprep.subr.bf16.mxu0 %v8139_v7  ;;  %v6413_v7 = vld [vmem:[#allocation10 + $0x1b0] sm:$0xff] }
 0x41c   : > { %v8189_v13 = vcombine.high %v6409_v6, %v6413_v7 }
 0x41e   : > { %7225 = vmatpush1.bf16.msra.mxu0 %v8138_v10 }
 0x41f   : > { %7226 = vmatprep.subr.bf16.mxu0 %v8259_v11 }
 0x422   : > { %7227 = vmatpush2.bf16.msra.mxu0 %v8258_v14  ;;  %v8191_v14 = vcombine.high %v6410_v8, %v6414_v9 }
 0x423   : > { %7228 = vmatprep.subr.bf16.mxu0 %v8251_v15  ;;  %v6405_v15 = vld [vmem:[#allocation10 + $0x170] sm:$0xff] }
 0x424   : > { %v8181_v20 = vcombine.high %v6401_v12, %v6405_v15 }
 0x426   : > { %7229 = vmatpush2.bf16.msra.mxu0 %v8250_v18  ;;  %v8188_v18 = vcombine.low %v6409_v6, %v6413_v7 }
 0x427   : > { %7230 = vmatprep.subr.bf16.mxu0 %v8243_v19  ;;  %v8190_v19 = vcombine.low %v6410_v8, %v6414_v9 }
 0x42a   : > { %7231 = vmatpush2.bf16.msra.mxu0 %v8242_v22  ;;  %v6393_v22 = vld [vmem:[#allocation10 + $0x110] sm:$0xff] }
 0x42b   : > { %7232 = vmatprep.subr.bf16.mxu0 %v8235_v23  ;;  %v6397_v23 = vld [vmem:[#allocation10 + $0x130] sm:$0xff] }
 0x42c   : > { %v8173_v28 = vcombine.high %v6393_v22, %v6397_v23  ;;  %v8172_v35 = vcombine.low %v6393_v22, %v6397_v23  ;;  %v6470_v22 = vld [vmem:[#allocation10 + $0x378] sm:$0xff] }
 0x42e   : > { %7233 = vmatpush2.bf16.msra.mxu0 %v8234_v26  ;;  %v8180_v26 = vcombine.low %v6401_v12, %v6405_v15  ;;  %v6477_v12 = vld [vmem:[#allocation10 + $0x3b0] sm:$0xff] }
 0x42f   : > { %7234 = vmatprep.subr.bf16.mxu0 %v8227_v27  ;;  %v8182_v27 = vcombine.low %v6402_v16, %v6406_v17 }
 0x432   : > { %7235 = vmatpush2.bf16.msra.mxu0 %v8226_v30  ;;  %v6385_v30 = vld [vmem:[#allocation10 + $0xd0] sm:$0xff] }
 0x433   : > { %7236 = vmatprep.subr.bf16.mxu0 %v8219_v31  ;;  %v6389_v31 = vld [vmem:[#allocation10 + $0xf0] sm:$0xff] }
 0x434   : > { %v8165_v37 = vcombine.high %v6385_v30, %v6389_v31  ;;  %v8164_v45 = vcombine.low %v6385_v30, %v6389_v31  ;;  %v6462_v30 = vld [vmem:[#allocation10 + $0x338] sm:$0xff] }
 0x436   : > { %7237 = vmatpush2.bf16.msra.mxu0 %v8218_v32  ;;  %v6386_v32 = vld [vmem:[#allocation10 + $0xd8] sm:$0xff] }
 0x437   : > { %7238 = vmatprep.subr.bf16.mxu0 %v8211_v40  ;;  %v8167_v38 = vcombine.high %v6386_v32, %v6390_v33  ;;  %v6381_v40 = vld [vmem:[#allocation10 + $0xb0] sm:$0xff]  ;;  %v8166_v47 = vcombine.low %v6386_v32, %v6390_v33 }
 0x43a   : > { %7239 = vmatpush2.bf16.msra.mxu0 %v8210_v39  ;;  %v6377_v39 = vld [vmem:[#allocation10 + $0x90] sm:$0xff] }
 0x43b   : > { %7240 = vmatprep.subr.bf16.mxu0 %v8203_v52  ;;  %v8157_v48 = vcombine.high %v6377_v39, %v6381_v40  ;;  %v6373_v52 = vld [vmem:[#allocation10 + $0x70] sm:$0xff]  ;;  %v8156_v55 = vcombine.low %v6377_v39, %v6381_v40  ;;  %v6454_v39 = vld [vmem:[#allocation10 + $0x2f8] sm:$0xff] }
 0x43e   : > { %7241 = vmatpush2.bf16.msra.mxu0 %v8202_v51  ;;  %v6369_v51 = vld [vmem:[#allocation10 + $0x50] sm:$0xff] }
 0x43f   : > { %7292 = vmatprep.subr.bf16.mxu0 %v8199_v60  ;;  %v8149_v57 = vcombine.high %v6369_v51, %v6373_v52  ;;  %v6362_v60 = vld [vmem:[#allocation10 + $0x18] sm:$0xff] }
 0x440   : > { %v8142_v7 = vcombine.low %v6362_v60, %v6366_v62 }
 0x4c1   : > { %v6350_v50 = vpop.f32.mrf.mxu0 }
 0x4c2   : > { %v6351_v0 = vadd.f32 %v6350_v50, %v6277_v44  ;;  %v8148_v44 = vcombine.low %v6369_v51, %v6373_v52  ;;  %v6446_v51 = vld [vmem:[#allocation10 + $0x2b8] sm:$0xff] }
 0x4c3   : > { %v6352_v1 = vpop.f32.mrf.mxu0 }
 0x4c4   : > { %v6353_v2 = vadd.f32 %v6352_v1, %v6281_v46  ;;  %v6355_v3 = vmax.f32 %v6351_v0, 0.0  ;;  %v8150_v46 = vcombine.low %v6370_v53, %v6374_v54  ;;  %v8143_v0 = vcombine.high %v6362_v60, %v6366_v62  ;;  %v6481_v1 = vld [vmem:[#allocation10 + $0x3d0] sm:$0xff] }
 0x4c6   : > { %v6356_v4 = vmax.f32 %v6353_v2, 0.0  ;;  %v10771_v11 = vpack.c.bf16 %v6355_v3, %v6355_v3  ;;  %v6485_v2 = vld [vmem:[#allocation10 + $0x3f0] sm:$0xff]  ;;  %v6482_v3 = vld [vmem:[#allocation10 + $0x3d8] sm:$0xff] }
 0x4c7   : > { %v8261_v8 = vcombine.high %v6481_v1, %v6485_v2  ;;  %v8260_v15 = vcombine.low %v6481_v1, %v6485_v2  ;;  %v6430_v1 = vld [vmem:[#allocation10 + $0x238] sm:$0xff] }
 0x4c8   : > { %v6358_v10 = vpack.c.bf16 %v6356_v4, %v6356_v4  ;;  %v6486_v4 = vld [vmem:[#allocation10 + $0x3f8] sm:$0xff] }
 0x4c9   : > { %v8263_v9 = vcombine.high %v6482_v3, %v6486_v4  ;;  %v8262_v16 = vcombine.low %v6482_v3, %v6486_v4 }
 0x4ca   : > { %7201 = vmatprep.mubr.bf16.mxu1 %v6358_v10  ;;  %7242 = vmatprep.mubr.bf16.mxu0 %v6358_v10 }
 0x4cb   : > { %7202 = vmatmul.mubr.bf16.vlgmr.msra.gmra.mxu1 %v10771_v11  ;;  %7243 = vmatmul.mubr.bf16.vlgmr.msra.gmra.mxu0 %v10771_v11 }
 0x4cc   : > { %7252 = vmatpush1.bf16.msra.mxu1 %v8196_v59  ;;  %7293 = vmatpush1.bf16.msra.mxu0 %v8198_v5  ;;  %v6361_v59 = vld [vmem:[#allocation10 + $0x10] sm:$0xff] }
 0x4cd   : > { %7283 = vmatprep.mubr.bf16.mxu1 %v6358_v10  ;;  %7324 = vmatprep.mubr.bf16.mxu0 %v6358_v10  ;;  %v6365_v5 = vld [vmem:[#allocation10 + $0x30] sm:$0xff] }
 0x4ce   : > { %7253 = vmatprep.subr.bf16.mxu1 %v8189_v13  ;;  %7294 = vmatprep.subr.bf16.mxu0 %v8191_v14  ;;  %v8141_v50 = vcombine.high %v6361_v59, %v6365_v5  ;;  %v8140_v6 = vcombine.low %v6361_v59, %v6365_v5  ;;  %v6473_v10 = vld [vmem:[#allocation10 + $0x390] sm:$0xff]  ;;  %v6474_v13 = vld [vmem:[#allocation10 + $0x398] sm:$0xff] }
 0x4cf   : > { %v6478_v14 = vld [vmem:[#allocation10 + $0x3b8] sm:$0xff]  ;;  %v8253_v17 = vcombine.high %v6473_v10, %v6477_v12  ;;  %v8252_v23 = vcombine.low %v6473_v10, %v6477_v12 }
 0x4d0   : > { %7254 = vmatpush1.bf16.msra.mxu1 %v8188_v18  ;;  %7295 = vmatpush1.bf16.msra.mxu0 %v8190_v19  ;;  %v8255_v18 = vcombine.high %v6474_v13, %v6478_v14  ;;  %v6465_v19 = vld [vmem:[#allocation10 + $0x350] sm:$0xff]  ;;  %v8254_v24 = vcombine.low %v6474_v13, %v6478_v14  ;;  %v6438_v59 = vld [vmem:[#allocation10 + $0x278] sm:$0xff] }
 0x4d1   : > { %7255 = vmatprep.subr.bf16.mxu1 %v8181_v20  ;;  %7296 = vmatprep.subr.bf16.mxu0 %v8183_v21  ;;  %v6469_v20 = vld [vmem:[#allocation10 + $0x370] sm:$0xff]  ;;  %v6466_v21 = vld [vmem:[#allocation10 + $0x358] sm:$0xff] }
 0x4d2   : > { %v8245_v25 = vcombine.high %v6465_v19, %v6469_v20  ;;  %v8244_v31 = vcombine.low %v6465_v19, %v6469_v20  ;;  %v8246_v32 = vcombine.low %v6466_v21, %v6470_v22 }
 0x4d4   : > { %7256 = vmatpush1.bf16.msra.mxu1 %v8180_v26  ;;  %7297 = vmatpush1.bf16.msra.mxu0 %v8182_v27  ;;  %v8247_v26 = vcombine.high %v6466_v21, %v6470_v22  ;;  %v6457_v27 = vld [vmem:[#allocation10 + $0x310] sm:$0xff]  ;;  %v6499_v22 = vsub.s32 2, %v10187_v34 }
 0x4d5   : > { %7257 = vmatprep.subr.bf16.mxu1 %v8173_v28  ;;  %7298 = vmatprep.subr.bf16.mxu0 %v8175_v29  ;;  %v6461_v28 = vld [vmem:[#allocation10 + $0x330] sm:$0xff]  ;;  %v6458_v29 = vld [vmem:[#allocation10 + $0x318] sm:$0xff] }
 0x4d6   : > { %v8237_v33 = vcombine.high %v6457_v27, %v6461_v28  ;;  %v8236_v40 = vcombine.low %v6457_v27, %v6461_v28  ;;  %v8238_v41 = vcombine.low %v6458_v29, %v6462_v30 }
 0x4d8   : > { %7258 = vmatpush1.bf16.msra.mxu1 %v8172_v35  ;;  %7299 = vmatpush1.bf16.msra.mxu0 %v8174_v36  ;;  %v8239_v35 = vcombine.high %v6458_v29, %v6462_v30  ;;  %v6449_v36 = vld [vmem:[#allocation10 + $0x2d0] sm:$0xff] }
 0x4d9   : > { %7259 = vmatprep.subr.bf16.mxu1 %v8165_v37  ;;  %7300 = vmatprep.subr.bf16.mxu0 %v8167_v38  ;;  %v6453_v37 = vld [vmem:[#allocation10 + $0x2f0] sm:$0xff]  ;;  %v6450_v38 = vld [vmem:[#allocation10 + $0x2d8] sm:$0xff] }
 0x4da   : > { %v8229_v43 = vcombine.high %v6449_v36, %v6453_v37  ;;  %v8228_v52 = vcombine.low %v6449_v36, %v6453_v37  ;;  %v8230_v53 = vcombine.low %v6450_v38, %v6454_v39 }
 0x4dc   : > { %7260 = vmatpush1.bf16.msra.mxu1 %v8164_v45  ;;  %7301 = vmatpush1.bf16.msra.mxu0 %v8166_v47  ;;  %v8231_v45 = vcombine.high %v6450_v38, %v6454_v39  ;;  %v6441_v47 = vld [vmem:[#allocation10 + $0x290] sm:$0xff] }
 0x4dd   : > { %7261 = vmatprep.subr.bf16.mxu1 %v8157_v48  ;;  %7302 = vmatprep.subr.bf16.mxu0 %v8159_v49  ;;  %v6445_v48 = vld [vmem:[#allocation10 + $0x2b0] sm:$0xff]  ;;  %v6442_v49 = vld [vmem:[#allocation10 + $0x298] sm:$0xff] }
 0x4de   : > { %v8221_v54 = vcombine.high %v6441_v47, %v6445_v48  ;;  %v8220_v5 = vcombine.low %v6441_v47, %v6445_v48  ;;  %v8222_v60 = vcombine.low %v6442_v49, %v6446_v51 }
 0x4e0   : > { %7262 = vmatpush1.bf16.msra.mxu1 %v8156_v55  ;;  %7303 = vmatpush1.bf16.msra.mxu0 %v8158_v56  ;;  %v8223_v55 = vcombine.high %v6442_v49, %v6446_v51  ;;  %v6433_v56 = vld [vmem:[#allocation10 + $0x250] sm:$0xff] }
 0x4e1   : > { %7263 = vmatprep.subr.bf16.mxu1 %v8149_v57  ;;  %7304 = vmatprep.subr.bf16.mxu0 %v8151_v58  ;;  %v6437_v57 = vld [vmem:[#allocation10 + $0x270] sm:$0xff]  ;;  %v6434_v58 = vld [vmem:[#allocation10 + $0x258] sm:$0xff] }
 0x4e2   : > { %v8213_v62 = vcombine.high %v6433_v56, %v6437_v57  ;;  %v8212_v2 = vcombine.low %v6433_v56, %v6437_v57  ;;  %v8214_v3 = vcombine.low %v6434_v58, %v6438_v59 }
 0x4e4   : > { %7264 = vmatpush1.bf16.msra.mxu1 %v8148_v44  ;;  %7305 = vmatpush1.bf16.msra.mxu0 %v8150_v46  ;;  %v8215_v44 = vcombine.high %v6434_v58, %v6438_v59  ;;  %v6425_v46 = vld [vmem:[#allocation10 + $0x210] sm:$0xff] }
 0x4e5   : > { %7265 = vmatprep.subr.bf16.mxu1 %v8141_v50  ;;  %7306 = vmatprep.subr.bf16.mxu0 %v8143_v0  ;;  %v6429_v50 = vld [vmem:[#allocation10 + $0x230] sm:$0xff]  ;;  %v6426_v0 = vld [vmem:[#allocation10 + $0x218] sm:$0xff] }
 0x4e6   : > { %v8205_v4 = vcombine.high %v6425_v46, %v6429_v50 }
 0x4e8   : > { %7266 = vmatpush1.bf16.msra.mxu1 %v8140_v6  ;;  %7307 = vmatpush1.bf16.msra.mxu0 %v8142_v7  ;;  %v8207_v6 = vcombine.high %v6426_v0, %v6430_v1  ;;  %v8204_v7 = vcombine.low %v6425_v46, %v6429_v50 }
 0x4e9   : > { %7267 = vmatprep.subr.bf16.mxu1 %v8261_v8  ;;  %7308 = vmatprep.subr.bf16.mxu0 %v8263_v9  ;;  %v8206_v8 = vcombine.low %v6426_v0, %v6430_v1 }
 0x4ec   : > { %7268 = vmatpush2.bf16.msra.mxu1 %v8260_v15  ;;  %7309 = vmatpush2.bf16.msra.mxu0 %v8262_v16 }
 0x4ed   : > { %7269 = vmatprep.subr.bf16.mxu1 %v8253_v17  ;;  %7310 = vmatprep.subr.bf16.mxu0 %v8255_v18  ;;  %v6487_v18 = vld [vmem:[#allocation11] sm:$0xff] }
 0x4ee   : > { %v6492_v19 = vrot.slane %v6487_v18, %v6276_v61  ;;  %v6496_v20 = vrot.slane %v6487_v18, %v6280_v63  ;;  %v6515_v63 = vsub.s32 6, %v10187_v34 }
 0x4f0   : > { %7270 = vmatpush2.bf16.msra.mxu1 %v8252_v23  ;;  %7311 = vmatpush2.bf16.msra.mxu0 %v8254_v24  ;;  %v6500_v24 = vrot.slane %v6487_v18, %v6499_v22  ;;  %v6516_v38 = vrot.slane %v6487_v18, %v6515_v63 }
 0x4f1   : > { %7271 = vmatprep.subr.bf16.mxu1 %v8245_v25  ;;  %7312 = vmatprep.subr.bf16.mxu0 %v8247_v26  ;;  %v6503_v25 = vsub.s32 3, %v10187_v34 }
 0x4f3   : > { %v6504_v28 = vrot.slane %v6487_v18, %v6503_v25 }
 0x4f4   : > { %7272 = vmatpush2.bf16.msra.mxu1 %v8244_v31  ;;  %7313 = vmatpush2.bf16.msra.mxu0 %v8246_v32  ;;  %v6507_v31 = vsub.s32 4, %v10187_v34 }
 0x4f5   : > { %7273 = vmatprep.subr.bf16.mxu1 %v8237_v33  ;;  %7314 = vmatprep.subr.bf16.mxu0 %v8239_v35  ;;  %v6511_v33 = vsub.s32 5, %v10187_v34  ;;  %v6519_v35 = vsub.s32 7, %v10187_v34 }
 0x4f6   : > { %v6508_v37 = vrot.slane %v6487_v18, %v6507_v31 }
 0x4f8   : > { %7274 = vmatpush2.bf16.msra.mxu1 %v8236_v40  ;;  %7315 = vmatpush2.bf16.msra.mxu0 %v8238_v41  ;;  %v6512_v40 = vrot.slane %v6487_v18, %v6511_v33  ;;  %v6520_v41 = vrot.slane %v6487_v18, %v6519_v35 }
 0x4f9   : > { %7275 = vmatprep.subr.bf16.mxu1 %v8229_v43  ;;  %7316 = vmatprep.subr.bf16.mxu0 %v8231_v45 }
 0x4fc   : > { %7276 = vmatpush2.bf16.msra.mxu1 %v8228_v52  ;;  %7317 = vmatpush2.bf16.msra.mxu0 %v8230_v53 }
 0x4fd   : > { %7277 = vmatprep.subr.bf16.mxu1 %v8221_v54  ;;  %7318 = vmatprep.subr.bf16.mxu0 %v8223_v55 }
 0x500   : > { %7278 = vmatpush2.bf16.msra.mxu1 %v8220_v5  ;;  %7319 = vmatpush2.bf16.msra.mxu0 %v8222_v60 }
 0x501   : > { %7279 = vmatprep.subr.bf16.mxu1 %v8213_v62  ;;  %7320 = vmatprep.subr.bf16.mxu0 %v8215_v44 }
 0x504   : > { %7280 = vmatpush2.bf16.msra.mxu1 %v8212_v2  ;;  %7321 = vmatpush2.bf16.msra.mxu0 %v8214_v3 }
 0x505   : > { %7281 = vmatprep.subr.bf16.mxu1 %v8205_v4  ;;  %7322 = vmatprep.subr.bf16.mxu0 %v8207_v6 }
 0x508   : > { %7282 = vmatpush2.bf16.msra.mxu1 %v8204_v7  ;;  %7323 = vmatpush2.bf16.msra.mxu0 %v8206_v8 }
 0x50b   : > { %7284 = vmatmul.mubr.bf16.vlgmr.msra.gmra.mxu1 %v10771_v11  ;;  %7325 = vmatmul.mubr.bf16.vlgmr.msra.gmra.mxu0 %v10771_v11 }
 0x58b   : > { %v7203_v9 = vpop.f32.mrf.mxu1  ;;  %v7244_v10 = vpop.f32.mrf.mxu0 }
 0x58c   : > { %v7204_v21 = vadd.f32 %v7203_v9, %v6492_v19  ;;  %v7245_v27 = vadd.f32 %v7244_v10, %v6500_v24 }
 0x58d   : > { %v7205_v12 = vpop.f32.mrf.mxu1  ;;  %v7246_v13 = vpop.f32.mrf.mxu0 }
 0x58e   : > { %v7206_v23 = vadd.f32 %v7205_v12, %v6496_v20  ;;  %v8264_v11 = vmul.f32 -1.442695, %v7204_v21  ;;  %v8266_v29 = vmul.f32 -1.442695, %v7245_v27  ;;  %v7247_v30 = vadd.f32 %v7246_v13, %v6504_v28 }
 0x58f   : > { %v7207_v14 = vpop.f32.mrf.mxu1  ;;  %v7248_v15 = vpop.f32.mrf.mxu0 }
 0x590   : > { %v8265_v26 = vmul.f32 -1.442695, %v7206_v23  ;;  %9626 = vpow2.f32 %v8264_v11  ;;  %v8267_v61 = vmul.f32 -1.442695, %v7247_v30 }
 0x591   : > { %v7208_v16 = vpop.f32.mrf.mxu1  ;;  %v7249_v17 = vpop.f32.mrf.mxu0 }
 0x592   : > { %9628 = vpow2.f32 %v8265_v26 }
 0x593   : > { %9630 = vpow2.f32 %v8266_v29 }
 0x594   : > { %9632 = vpow2.f32 %v8267_v61 }
 0x59d   : > { %v9627_v32 = vpop.eup %9626 }
 0x59e   : > { %v7357_v39 = vadd.f32 1.0, %v9627_v32 }
 0x59f   : > { %v9629_v36 = vpop.eup %9628 }
 0x5a0   : > { %v7358_v43 = vadd.f32 1.0, %v9629_v36  ;;  %9634 = vrcp.f32 %v7357_v39  ;;  %v9631_v57 = vpop.eup %9630 }
 0x5a1   : > { %v7359_v44 = vadd.f32 1.0, %v9631_v57  ;;  %v9633_v46 = vpop.eup %9632 }
 0x5a2   : > { %9636 = vrcp.f32 %v7358_v43  ;;  %v7360_v50 = vadd.f32 1.0, %v9633_v46 }
 0x5ad   : > { %v9635_v0 = vpop.eup %9634 }
 0x5ae   : > { %v7381_v13 = vmul.f32 %v9635_v0, %v9635_v0 }
 0x5af   : > { %v9637_v1 = vpop.eup %9636 }
 0x5b0   : > { %v7382_v10 = vmul.f32 %v9637_v1, %v9637_v1  ;;  %v7389_v17 = vsel %vm6232_vm0, %v7381_v13, 0.0 }
 0x5b2   : > { %v7390_v15 = vsel %vm6232_vm0, %v7382_v10, 0.0 }
 0x5b3   : > { %v7391_v19 = vadd.f32 %v7390_v15, %v7389_v17 }
 0x5cb   : > { %v7285_v45 = vpop.f32.mrf.mxu1  ;;  %v7326_v47 = vpop.f32.mrf.mxu0 }
 0x5cc   : > { %v7286_v48 = vadd.f32 %v7285_v45, %v6508_v37  ;;  %v7327_v49 = vadd.f32 %v7326_v47, %v6516_v38 }
 0x5cd   : > { %v7287_v51 = vpop.f32.mrf.mxu1  ;;  %v7328_v52 = vpop.f32.mrf.mxu0 }
 0x5ce   : > { %v8268_v53 = vmul.f32 -1.442695, %v7286_v48  ;;  %v8270_v54 = vmul.f32 -1.442695, %v7327_v49  ;;  %v7288_v55 = vadd.f32 %v7287_v51, %v6512_v40  ;;  %v7329_v56 = vadd.f32 %v7328_v52, %v6520_v41 }
 0x5cf   : > { %v7289_v34 = vpop.f32.mrf.mxu1  ;;  %v7330_v58 = vpop.f32.mrf.mxu0 }
 0x5d0   : > { %9638 = vpow2.f32 %v8268_v53  ;;  %v8269_v59 = vmul.f32 -1.442695, %v7288_v55  ;;  %v8271_v5 = vmul.f32 -1.442695, %v7329_v56 }
 0x5d1   : > { %9640 = vpow2.f32 %v8270_v54  ;;  %v7290_v60 = vpop.f32.mrf.mxu1  ;;  %v7331_v62 = vpop.f32.mrf.mxu0 }
 0x5d2   : > { %9642 = vpow2.f32 %v8269_v59 }
 0x5d3   : > { %9644 = vpow2.f32 %v8271_v5 }
 0x5d4   : > { %9646 = vrcp.f32 %v7359_v44 }
 0x5d5   : > { %9648 = vrcp.f32 %v7360_v50 }
 0x5dd   : > { %v9639_v2 = vpop.eup %9638 }
 0x5de   : > { %v9641_v3 = vpop.eup %9640  ;;  %v7361_v4 = vadd.f32 1.0, %v9639_v2 }
 0x5df   : > { %v9643_v6 = vpop.eup %9642  ;;  %v7363_v7 = vadd.f32 1.0, %v9641_v3 }
 0x5e0   : > { %v9645_v8 = vpop.eup %9644  ;;  %9650 = vrcp.f32 %v7361_v4  ;;  %v7362_v9 = vadd.f32 1.0, %v9643_v6 }
 0x5e1   : > { %9652 = vrcp.f32 %v7363_v7  ;;  %v7364_v12 = vadd.f32 1.0, %v9645_v8  ;;  %v9647_v14 = vpop.eup %9646 }
 0x5e2   : > { %9654 = vrcp.f32 %v7362_v9  ;;  %v7383_v16 = vmul.f32 %v9647_v14, %v9647_v14  ;;  %v9649_v18 = vpop.eup %9648 }
 0x5e3   : > { %9656 = vrcp.f32 %v7364_v12  ;;  %v7384_v20 = vmul.f32 %v9649_v18, %v9649_v18 }
 0x5e4   : > { %v7392_v21 = vsel %vm6232_vm0, %v7383_v16, 0.0 }
 0x5e5   : > { %v7393_v22 = vadd.f32 %v7392_v21, %v7391_v19  ;;  %v7394_v25 = vsel %vm6232_vm0, %v7384_v20, 0.0 }
 0x5e7   : > { %v7395_v27 = vadd.f32 %v7394_v25, %v7393_v22 }
 0x5ed   : > { %v9651_v23 = vpop.eup %9650 }
 0x5ee   : > { %v9653_v11 = vpop.eup %9652  ;;  %v7385_v24 = vmul.f32 %v9651_v23, %v9651_v23 }
 0x5ef   : > { %v9655_v26 = vpop.eup %9654  ;;  %v7387_v30 = vmul.f32 %v9653_v11, %v9653_v11 }
 0x5f0   : > { %v9657_v28 = vpop.eup %9656  ;;  %v7386_v29 = vmul.f32 %v9655_v26, %v9655_v26  ;;  %v7396_v61 = vsel %vm6232_vm0, %v7385_v24, 0.0 }
 0x5f1   : > { %v7397_v31 = vadd.f32 %v7396_v61, %v7395_v27  ;;  %v7388_v63 = vmul.f32 %v9657_v28, %v9657_v28  ;;  %v7400_v35 = vsel %vm6232_vm0, %v7387_v30, 0.0 }
 0x5f2   : > { %v7398_v32 = vsel %vm6232_vm0, %v7386_v29, 0.0 }
 0x5f3   : > { %v7399_v33 = vadd.f32 %v7398_v32, %v7397_v31  ;;  %v7402_v37 = vsel %vm6232_vm0, %v7388_v63, 0.0 }
 0x5f5   : > { %v7401_v36 = vadd.f32 %v7400_v35, %v7399_v33 }
 0x5f7   : > { %v7403_v38 = vadd.f32 %v7402_v37, %v7401_v36 }
 0x5f9   : > { %7404 = vadd.xlane.f32.xlu0 %v7403_v38 }
 0x682   : > { %v7405_v39 = vpop.xlane.xlu0 %7404 }
 0x683   : > { %v7406_v40 = vadd.f32 1e-12, %v7405_v39 }
 0x685   : > { %9658 = vrsqrt.f32 %v7406_v40 }
 0x692   : > { %v9659_v41 = vpop.eup %9658 }
 0x693   : > { %v7408_v43 = vmul.f32 %v9659_v41, %v9635_v0  ;;  %v7409_v45 = vmul.f32 %v9659_v41, %v9637_v1  ;;  %v7410_v47 = vmul.f32 %v9659_v41, %v9647_v14  ;;  %v7411_v48 = vmul.f32 %v9659_v41, %v9649_v18 }
 0x694   : > { %v7412_v49 = vmul.f32 %v9659_v41, %v9651_v23  ;;  %v7413_v51 = vmul.f32 %v9659_v41, %v9655_v26  ;;  %v7414_v52 = vmul.f32 %v9659_v41, %v9653_v11  ;;  %v7415_v53 = vmul.f32 %v9659_v41, %v9657_v28 }
 0x695   : > { %v7424_v54 = vcombine.low %v7408_v43, %v7409_v45  ;;  %v7425_v55 = vcombine.low %v7410_v47, %v7411_v48 }
 0x696   : > { %v7441_v56 = vcombine.low %v7412_v49, %v7413_v51  ;;  %v7442_v57 = vcombine.low %v7414_v52, %v7415_v53 }
 0x697   : > { %v7432_v34 = vrot.slane %v7424_v54, %v10193_v42  ;;  %v7439_v58 = vrot.slane %v7425_v55, %v10193_v42 }
 0x698   : > { %v7449_v59 = vrot.slane %v7441_v56, %v10193_v42  ;;  %v7456_v5 = vrot.slane %v7442_v57, %v10193_v42 }
 0x699   : > { %v7440_v60 = vcombine.low %v7432_v34, %v7439_v58 }
 0x69a   : > { %v7457_v62 = vcombine.low %v7449_v59, %v7456_v5 }
 0x69b   : > { %7460 = vst [vmem:[#allocation14] sm:$0xff] %v7440_v60 }
 0x69c   : > { %7461 = vst [vmem:[#allocation14 + $0x8] sm:$0xff] %v7457_v62 }
 0x69d PF: > { %p9044_p13 = scmp.eq.s32.totalorder %s10005_s11, 1  ;;  %s9937_s26 = smov [#allocation13]  }
 0x69e   : > { %s7469_s20 = sshll.u32 %s9937_s26, 4  ;;  %s9938_s19 = smov [#allocation14]   ;;  %s7470_s20 = int_to_ptr.vmem [resolvable:$true] %s7469_s20 }
 0x69f   : > { %s7480_s21 = sshll.u32 %s9938_s19, 4  ;;  %s9818_s22 = scalar_lea.vmem %s7470_s20, 32  ;;  %s7481_s21 = int_to_ptr.vmem [resolvable:$true] %s7480_s21 }
 0x6a0   : > { %p9819_p0 = scmp.ne.s32.totalorder %s7470_s20, %s9818_s22  ;;  %p9825_p4 = scmp.lt.s32.totalorder %s7470_s20, %s7470_s20 }
 0x6a1   : > { %p9826_p12 = scmp.lt.s32.totalorder %s9818_s22, %s9818_s22 }
 0x6a2   : > { %p9820_p3 = pnand %p9819_p0, %p9044_p13 }
 0x6a3   : > { %p9827_p6 = por %p9826_p12, %p9825_p4 }
 0x6a4   : > { %p9821_p1 = pneg %p9820_p3 }
 0x6a6   : > { %p9828_p2 = pnand %p9827_p6, %p9821_p1 }
 0x6a8   : > { %9831 = shalt.err (!%p9828_p2)
}
 0x6a9   : > { %9006 = dma.vmem_to_hbm [thread:$0]  (%p9044_p13), %s7470_s20, 32, %s10842_s7, [#allocation4]  }
 0x6aa   : > { %s9842_s30 = scalar_lea.vmem %s7481_s21, 256  ;;  %p9849_p9 = scmp.lt.s32.totalorder %s7481_s21, %s7481_s21 }
 0x6ab   : > { %p9843_p7 = scmp.ne.s32.totalorder %s7481_s21, %s9842_s30  ;;  %p9850_p10 = scmp.lt.s32.totalorder %s9842_s30, %s9842_s30 }
 0x6ad   : > { %p9844_p5 = pnand %p9843_p7, %p9044_p13  ;;  %p9851_p11 = por %p9850_p10, %p9849_p9 }
 0x6af   : > { %p9845_p8 = pneg %p9844_p5 }
 0x6b1   : > { %p9852_p0 = pnand %p9851_p11, %p9845_p8 }
 0x6b3   : > { %9855 = shalt.err (!%p9852_p0)
}
 0x6b4   : > { %9008 = dma.vmem_to_hbm [thread:$0]  (%p9044_p13), %s7481_s21, 256, %s10843_s8, [#allocation15]  }
 0x6b5   : > { %9899 = dma.done.wait (%p9044_p13), [#allocation4], 32  }
 0x6b6   : > { %9901 = vsyncadd (%p9044_p13), [#allocation4], 4294967264 }
 0x6b7   : > { %9903 = dma.done.wait (%p9044_p13), [#allocation15], 256  }
 0x6b8   : > { %9905 = vsyncadd (%p9044_p13), [#allocation15], 4294967040 }
 0x6b9 PF: > { %p24_p3 = scmp.ge.s32.totalorder %s10072_s18, 4   ;;  %s10862_s27 = smov %s9912_s28 }
 0x6ba   : > { %s10863_s28 = smov %s9916_s29  ;;  %s10864_s29 = smov %s10083_s15 }
 0x6bb   : > { %s10865_s30 = smov %s10072_s18  ;;  %26 = sbr.rel (!%p24_p3) target bundleno = 8 (0x8), region = 124 }
 0x6c0   :  { %7497 = vsyncpa [#allocation3], 1 }
 0x6c1   :  { %7499 = vsyncpa [#allocation3 + $0x1], 1 }
 0x6c2   :  { %7500 = vsyncpa [#allocation6], 1 }
 0x6c3   :  { %7501 = vsyncpa [#allocation9], 1 }
 0x6c4   :  { %7502 = vsyncpa [#allocation12], 1 }
 0x6c5   :  { %7503 = vsyncpa [#allocation4], 1 }
 0x6c6   :  { %7505 = vsyncpa [#allocation4 + $0x1], 1 }
 0x6c7   :  { %7506 = vsyncpa [#allocation15], 1 }

// kernel: chaosdonkey06_ae_forward.2
= control target key start
LH: loop header
LB: loop body
LE: loop exit
PB: predicated region body
PF: predicated region fallthrough
CT: control target
= control target key end

     0   :  { %9 = vsyncpa [#allocation3], 0  ;;  %s3879_s0 = inlined_call_operand.vmem [shape: f32[512,49], index: 0, kind: input, shape index: {}]   ;;  %s3880_s1 = inlined_call_operand.hbm [shape: f32[49,64], index: 1, kind: input, shape index: {}]   ;;  %s3881_s2 = inlined_call_operand.hbm [shape: f32[1,64], index: 2, kind: input, shape index: {}]   ;;  %s3882_s3 = inlined_call_operand.hbm [shape: f32[1,64], index: 3, kind: input, shape index: {}]   ;;  %s3883_s4 = inlined_call_operand.vmem [shape: f32[512,64], index: 4, kind: output, shape index: {}]  }
   0x1   :  { %10 = vsyncpa [#allocation5], 0  ;;  %s1782_s15 = smov [#allocation4]   ;;  %s1783_s17 = smov [#allocation2]  }
   0x2   :  { %s31_s16 = sshll.u32 %s1782_s15, 4  ;;  %s18_s18 = sshll.u32 %s1783_s17, 4  ;;  %s32_s16 = int_to_ptr.vmem [resolvable:$true] %s31_s16  ;;  %s19_s18 = int_to_ptr.vmem [resolvable:$true] %s18_s18 }
   0x3   :  { %s1726_s19 = scalar_lea.vmem %s32_s16, 16  ;;  %s1730_s20 = scalar_lea.vmem %s32_s16, 32 }
   0x4   :  { %p1727_p0 = scmp.ne.s32.totalorder %s32_s16, %s1726_s19  ;;  %p1731_p1 = scmp.lt.s32.totalorder %s32_s16, %s32_s16 }
   0x5   :  { %p1732_p2 = scmp.lt.s32.totalorder %s1730_s20, %s1726_s19 }
   0x7   :  { %p1733_p3 = por %p1732_p2, %p1731_p1 }
   0x9   :  { %p1734_p4 = pnand %p1733_p3, %p1727_p0 }
   0xb   :  { %1737 = shalt.err (!%p1734_p4)
}
   0xc   :  { %34 = dma.hbm_to_vmem [thread:$0]  %s3881_s2, 16, %s32_s16, [#allocation5]  }
   0xd   :  { %s1746_s23 = scalar_lea.vmem %s19_s18, 896  ;;  %p1751_p6 = scmp.lt.s32.totalorder %s19_s18, %s19_s18 }
   0xe   :  { %p1747_p5 = scmp.ne.s32.totalorder %s19_s18, %s1746_s23  ;;  %p1752_p7 = scmp.lt.s32.totalorder %s1746_s23, %s1746_s23 }
  0x10   :  { %p1753_p8 = por %p1752_p7, %p1751_p6 }
  0x12   :  { %p1754_p9 = pnand %p1753_p8, %p1747_p5 }
  0x14   :  { %1757 = shalt.err (!%p1754_p9)
}
  0x15   :  { %s1784_s24 = smov 128   ;;  %s1785_s25 = smov 8  }
  0x16   :  { %24 = dma.hbm_to_vmem [thread:$0]  %s3880_s1, 896, %s19_s18, [#allocation3], %s1784_s24, %s1784_s24, %s1785_s25  }
  0x17   :  { %s1786_s28 = smov [#allocation6]  }
  0x18   :  { %s41_s29 = sshll.u32 %s1786_s28, 4  ;;  %s42_s29 = int_to_ptr.vmem [resolvable:$true] %s41_s29 }
  0x19   :  { %s1766_s30 = scalar_lea.vmem %s42_s29, 16  ;;  %s1770_s5 = scalar_lea.vmem %s42_s29, 32 }
  0x1a   :  { %p1767_p10 = scmp.ne.s32.totalorder %s42_s29, %s1766_s30  ;;  %p1771_p11 = scmp.lt.s32.totalorder %s42_s29, %s42_s29 }
  0x1b   :  { %p1772_p12 = scmp.lt.s32.totalorder %s1770_s5, %s1766_s30 }
  0x1d   :  { %p1773_p13 = por %p1772_p12, %p1771_p11 }
  0x1f   :  { %p1774_p0 = pnand %p1773_p13, %p1767_p10 }
  0x21   :  { %1777 = shalt.err (!%p1774_p0)
}
  0x22   :  { %44 = dma.hbm_to_vmem [thread:$0]  %s3882_s3, 16, %s42_s29, [#allocation5]  }
  0x23   :  { %1778 = dma.done.wait [#allocation3], 896  }
  0x24   :  { %1779 = vsyncadd [#allocation3], 4294966400 }
  0x25   :  { %1780 = dma.done.wait [#allocation5], 32  }
  0x26   :  { %1781 = vsyncadd [#allocation5], 4294967264  ;;  %vm318_vm0 = vcmask 1040384   ;;  %v124_v0 = vld [vmem:[#allocation2 + $0x30] sm:$0x1]  ;;  %v123_v1 = vld [vmem:[#allocation2 + $0x28] sm:$0xff] }
  0x27   :  { %vm125_vm1 = vcmask 400384   ;;  %1587 = vmatprep.subr.msk.mxu0 %vm318_vm0, %v124_v0  ;;  %1697 = vmatprep.subr.msk.mxu1 %vm318_vm0, %v124_v0  ;;  %v122_v2 = vld [vmem:[#allocation2 + $0x20] sm:$0xff]  ;;  %v121_v4 = vld [vmem:[#allocation2 + $0x18] sm:$0xff]  ;;  %v120_v5 = vld [vmem:[#allocation2 + $0x10] sm:$0xff]  ;;  %vm707_vm2 = vcmask 523264  }
  0x28   :  { %1588 = vmatpush3.msk.msra.mxu0 %vm318_vm0, %v124_v0  ;;  %v54_v3 = vld [vmem:[%s3879_s0] sm:$0xff]  ;;  %1704 = vmatpush3.msk.msra.mxu1 %vm318_vm0, %v124_v0  ;;  %v119_v6 = vld [vmem:[#allocation2 + $0x8] sm:$0xff]  ;;  %v56_v9 = vld [vmem:[%s3879_s0 + $0x10] sm:$0xff] }
  0x29   :  { %1589 = vmatprep.subr.mxu0 %v123_v1  ;;  %1601 = vmatprep.mubr.msk.f32.mxu0 %vm125_vm1, %v54_v3  ;;  %v118_v7 = vld [vmem:[#allocation2] sm:$0xff]  ;;  %v55_v8 = vld [vmem:[%s3879_s0 + $0x8] sm:$0xff]  ;;  %v88_v12 = vld [vmem:[%s3879_s0 + $0x110] sm:$0xff] }
  0x2a   :  { %1590 = vmatpush3.msra.mxu0 %v123_v1  ;;  %1698 = vmatprep.subr.mxu1 %v123_v1  ;;  %v86_v10 = vld [vmem:[%s3879_s0 + $0x100] sm:$0xff]  ;;  %v87_v11 = vld [vmem:[%s3879_s0 + $0x108] sm:$0xff]  ;;  %v57_v13 = vld [vmem:[%s3879_s0 + $0x18] sm:$0xff] }
  0x2b   :  { %1591 = vmatprep.subr.mxu0 %v122_v2  ;;  %1705 = vmatpush3.msra.mxu1 %v123_v1  ;;  %v58_v14 = vld [vmem:[%s3879_s0 + $0x20] sm:$0xff]  ;;  %v89_v15 = vld [vmem:[%s3879_s0 + $0x118] sm:$0xff]  ;;  %v59_v17 = vld [vmem:[%s3879_s0 + $0x28] sm:$0xff] }
  0x2c   :  { %1592 = vmatpush3.msra.mxu0 %v122_v2  ;;  %1699 = vmatprep.subr.mxu1 %v122_v2  ;;  %v90_v16 = vld [vmem:[%s3879_s0 + $0x120] sm:$0xff]  ;;  %v60_v18 = vld [vmem:[%s3879_s0 + $0x30] sm:$0xff]  ;;  %v91_v19 = vld [vmem:[%s3879_s0 + $0x128] sm:$0xff] }
  0x2d   :  { %1593 = vmatprep.subr.mxu0 %v121_v4  ;;  %1706 = vmatpush3.msra.mxu1 %v122_v2  ;;  %v92_v20 = vld [vmem:[%s3879_s0 + $0x130] sm:$0xff]  ;;  %v61_v21 = vld [vmem:[%s3879_s0 + $0x38] sm:$0xff]  ;;  %v62_v22 = vld [vmem:[%s3879_s0 + $0x40] sm:$0xff] }
  0x2e   :  { %1594 = vmatpush3.msra.mxu0 %v121_v4  ;;  %1700 = vmatprep.subr.mxu1 %v121_v4  ;;  %v93_v23 = vld [vmem:[%s3879_s0 + $0x138] sm:$0xff]  ;;  %v94_v24 = vld [vmem:[%s3879_s0 + $0x140] sm:$0xff]  ;;  %v63_v25 = vld [vmem:[%s3879_s0 + $0x48] sm:$0xff] }
  0x2f   :  { %1595 = vmatprep.subr.mxu0 %v120_v5  ;;  %1707 = vmatpush3.msra.mxu1 %v121_v4  ;;  %v64_v26 = vld [vmem:[%s3879_s0 + $0x50] sm:$0xff]  ;;  %v95_v27 = vld [vmem:[%s3879_s0 + $0x148] sm:$0xff]  ;;  %v65_v29 = vld [vmem:[%s3879_s0 + $0x58] sm:$0xff] }
  0x30   :  { %1596 = vmatpush3.msra.mxu0 %v120_v5  ;;  %1701 = vmatprep.subr.mxu1 %v120_v5  ;;  %v96_v28 = vld [vmem:[%s3879_s0 + $0x150] sm:$0xff]  ;;  %v66_v30 = vld [vmem:[%s3879_s0 + $0x60] sm:$0xff]  ;;  %v97_v31 = vld [vmem:[%s3879_s0 + $0x158] sm:$0xff] }
  0x31   :  { %1597 = vmatprep.subr.mxu0 %v119_v6  ;;  %1708 = vmatpush3.msra.mxu1 %v120_v5  ;;  %v98_v32 = vld [vmem:[%s3879_s0 + $0x160] sm:$0xff]  ;;  %v67_v33 = vld [vmem:[%s3879_s0 + $0x68] sm:$0xff]  ;;  %v68_v34 = vld [vmem:[%s3879_s0 + $0x70] sm:$0xff] }
  0x32   :  { %1598 = vmatpush3.msra.mxu0 %v119_v6  ;;  %1702 = vmatprep.subr.mxu1 %v119_v6  ;;  %v99_v35 = vld [vmem:[%s3879_s0 + $0x168] sm:$0xff]  ;;  %v100_v36 = vld [vmem:[%s3879_s0 + $0x170] sm:$0xff]  ;;  %v69_v37 = vld [vmem:[%s3879_s0 + $0x78] sm:$0xff] }
  0x33   :  { %1599 = vmatprep.subr.mxu0 %v118_v7  ;;  %1709 = vmatpush3.msra.mxu1 %v119_v6  ;;  %v70_v38 = vld [vmem:[%s3879_s0 + $0x80] sm:$0xff]  ;;  %v101_v39 = vld [vmem:[%s3879_s0 + $0x178] sm:$0xff]  ;;  %v71_v41 = vld [vmem:[%s3879_s0 + $0x88] sm:$0xff] }
  0x34   :  { %1600 = vmatpush3.msra.mxu0 %v118_v7  ;;  %1703 = vmatprep.subr.mxu1 %v118_v7  ;;  %v102_v40 = vld [vmem:[%s3879_s0 + $0x180] sm:$0xff]  ;;  %v72_v42 = vld [vmem:[%s3879_s0 + $0x90] sm:$0xff]  ;;  %v103_v43 = vld [vmem:[%s3879_s0 + $0x188] sm:$0xff] }
  0x35   :  { %1602 = vmatmul.mubr.msk.f32.vlgmr.msra.gmra.mxu0 %vm125_vm1, %v55_v8  ;;  %1710 = vmatpush3.msra.mxu1 %v118_v7  ;;  %v104_v44 = vld [vmem:[%s3879_s0 + $0x190] sm:$0xff]  ;;  %v73_v45 = vld [vmem:[%s3879_s0 + $0x98] sm:$0xff]  ;;  %v74_v46 = vld [vmem:[%s3879_s0 + $0xa0] sm:$0xff] }
  0x36   :  { %1604 = vmatprep.mubr.msk.f32.mxu0 %vm125_vm1, %v56_v9  ;;  %1649 = vmatprep.mubr.msk.f32.mxu1 %vm125_vm1, %v86_v10  ;;  %v105_v47 = vld [vmem:[%s3879_s0 + $0x198] sm:$0xff]  ;;  %v106_v48 = vld [vmem:[%s3879_s0 + $0x1a0] sm:$0xff]  ;;  %v75_v49 = vld [vmem:[%s3879_s0 + $0xa8] sm:$0xff] }
  0x37   :  { %1650 = vmatmul.mubr.msk.f32.vlgmr.msra.gmra.mxu1 %vm125_vm1, %v87_v11  ;;  %v76_v50 = vld [vmem:[%s3879_s0 + $0xb0] sm:$0xff]  ;;  %v107_v51 = vld [vmem:[%s3879_s0 + $0x1a8] sm:$0xff]  ;;  %v77_v53 = vld [vmem:[%s3879_s0 + $0xb8] sm:$0xff] }
  0x38   :  { %1652 = vmatprep.mubr.msk.f32.mxu1 %vm125_vm1, %v88_v12  ;;  %v108_v52 = vld [vmem:[%s3879_s0 + $0x1b0] sm:$0xff]  ;;  %v78_v54 = vld [vmem:[%s3879_s0 + $0xc0] sm:$0xff]  ;;  %v109_v55 = vld [vmem:[%s3879_s0 + $0x1b8] sm:$0xff] }
  0x39   :  { %1605 = vmatmul.mubr.msk.f32.gmra.mxu0 %vm125_vm1, %v57_v13  ;;  %v110_v56 = vld [vmem:[%s3879_s0 + $0x1c0] sm:$0xff]  ;;  %v79_v57 = vld [vmem:[%s3879_s0 + $0xc8] sm:$0xff]  ;;  %v80_v58 = vld [vmem:[%s3879_s0 + $0xd0] sm:$0xff] }
  0x3a   :  { %1607 = vmatprep.mubr.msk.f32.mxu0 %vm125_vm1, %v58_v14  ;;  %v111_v59 = vld [vmem:[%s3879_s0 + $0x1c8] sm:$0xff]  ;;  %v112_v60 = vld [vmem:[%s3879_s0 + $0x1d0] sm:$0xff]  ;;  %v81_v61 = vld [vmem:[%s3879_s0 + $0xd8] sm:$0xff] }
  0x3b   :  { %1653 = vmatmul.mubr.msk.f32.gmra.mxu1 %vm125_vm1, %v89_v15  ;;  %v82_v62 = vld [vmem:[%s3879_s0 + $0xe0] sm:$0xff]  ;;  %v113_v63 = vld [vmem:[%s3879_s0 + $0x1d8] sm:$0xff]  ;;  %v83_v1 = vld [vmem:[%s3879_s0 + $0xe8] sm:$0xff] }
  0x3c   :  { %1655 = vmatprep.mubr.msk.f32.mxu1 %vm125_vm1, %v90_v16  ;;  %v114_v0 = vld [vmem:[%s3879_s0 + $0x1e0] sm:$0xff]  ;;  %v84_v2 = vld [vmem:[%s3879_s0 + $0xf0] sm:$0xff]  ;;  %v115_v3 = vld [vmem:[%s3879_s0 + $0x1e8] sm:$0xff] }
  0x3d   :  { %1608 = vmatmul.mubr.msk.f32.gmra.mxu0 %vm125_vm1, %v59_v17  ;;  %v116_v4 = vld [vmem:[%s3879_s0 + $0x1f0] sm:$0xff]  ;;  %v85_v5 = vld [vmem:[%s3879_s0 + $0xf8] sm:$0xff] }
  0x3e   :  { %1610 = vmatprep.mubr.msk.f32.mxu0 %vm125_vm1, %v60_v18  ;;  %v117_v6 = vld [vmem:[%s3879_s0 + $0x1f8] sm:$0xff] }
  0x3f   :  { %1656 = vmatmul.mubr.msk.f32.gmra.mxu1 %vm125_vm1, %v91_v19 }
  0x40   :  { %1658 = vmatprep.mubr.msk.f32.mxu1 %vm125_vm1, %v92_v20 }
  0x41   :  { %1611 = vmatmul.mubr.msk.f32.gmra.mxu0 %vm125_vm1, %v61_v21 }
  0x42   :  { %1613 = vmatprep.mubr.msk.f32.mxu0 %vm125_vm1, %v62_v22 }
  0x43   :  { %1659 = vmatmul.mubr.msk.f32.gmra.mxu1 %vm125_vm1, %v93_v23 }
  0x44   :  { %1661 = vmatprep.mubr.msk.f32.mxu1 %vm125_vm1, %v94_v24 }
  0x45   :  { %1614 = vmatmul.mubr.msk.f32.gmra.mxu0 %vm125_vm1, %v63_v25 }
  0x46   :  { %1616 = vmatprep.mubr.msk.f32.mxu0 %vm125_vm1, %v64_v26 }
  0x47   :  { %1662 = vmatmul.mubr.msk.f32.gmra.mxu1 %vm125_vm1, %v95_v27 }
  0x48   :  { %1664 = vmatprep.mubr.msk.f32.mxu1 %vm125_vm1, %v96_v28 }
  0x49   :  { %1617 = vmatmul.mubr.msk.f32.gmra.mxu0 %vm125_vm1, %v65_v29 }
  0x4a   :  { %1619 = vmatprep.mubr.msk.f32.mxu0 %vm125_vm1, %v66_v30 }
  0x4b   :  { %1665 = vmatmul.mubr.msk.f32.gmra.mxu1 %vm125_vm1, %v97_v31 }
  0x4c   :  { %1667 = vmatprep.mubr.msk.f32.mxu1 %vm125_vm1, %v98_v32 }
  0x4d   :  { %1620 = vmatmul.mubr.msk.f32.gmra.mxu0 %vm125_vm1, %v67_v33 }
  0x4e   :  { %1622 = vmatprep.mubr.msk.f32.mxu0 %vm125_vm1, %v68_v34 }
  0x4f   :  { %1668 = vmatmul.mubr.msk.f32.gmra.mxu1 %vm125_vm1, %v99_v35 }
  0x50   :  { %1670 = vmatprep.mubr.msk.f32.mxu1 %vm125_vm1, %v100_v36 }
  0x51   :  { %1623 = vmatmul.mubr.msk.f32.gmra.mxu0 %vm125_vm1, %v69_v37 }
  0x52   :  { %1625 = vmatprep.mubr.msk.f32.mxu0 %vm125_vm1, %v70_v38 }
  0x53   :  { %1671 = vmatmul.mubr.msk.f32.gmra.mxu1 %vm125_vm1, %v101_v39 }
  0x54   :  { %1673 = vmatprep.mubr.msk.f32.mxu1 %vm125_vm1, %v102_v40 }
  0x55   :  { %1626 = vmatmul.mubr.msk.f32.gmra.mxu0 %vm125_vm1, %v71_v41 }
  0x56   :  { %1628 = vmatprep.mubr.msk.f32.mxu0 %vm125_vm1, %v72_v42 }
  0x57   :  { %1674 = vmatmul.mubr.msk.f32.gmra.mxu1 %vm125_vm1, %v103_v43 }
  0x58   :  { %1676 = vmatprep.mubr.msk.f32.mxu1 %vm125_vm1, %v104_v44 }
  0x59   :  { %1629 = vmatmul.mubr.msk.f32.gmra.mxu0 %vm125_vm1, %v73_v45 }
  0x5a   :  { %1631 = vmatprep.mubr.msk.f32.mxu0 %vm125_vm1, %v74_v46 }
  0x5b   :  { %1677 = vmatmul.mubr.msk.f32.gmra.mxu1 %vm125_vm1, %v105_v47 }
  0x5c   :  { %1679 = vmatprep.mubr.msk.f32.mxu1 %vm125_vm1, %v106_v48 }
  0x5d   :  { %1632 = vmatmul.mubr.msk.f32.gmra.mxu0 %vm125_vm1, %v75_v49 }
  0x5e   :  { %1634 = vmatprep.mubr.msk.f32.mxu0 %vm125_vm1, %v76_v50 }
  0x5f   :  { %1680 = vmatmul.mubr.msk.f32.gmra.mxu1 %vm125_vm1, %v107_v51 }
  0x60   :  { %1682 = vmatprep.mubr.msk.f32.mxu1 %vm125_vm1, %v108_v52 }
  0x61   :  { %1635 = vmatmul.mubr.msk.f32.gmra.mxu0 %vm125_vm1, %v77_v53 }
  0x62   :  { %1637 = vmatprep.mubr.msk.f32.mxu0 %vm125_vm1, %v78_v54 }
  0x63   :  { %1683 = vmatmul.mubr.msk.f32.gmra.mxu1 %vm125_vm1, %v109_v55 }
  0x64   :  { %1685 = vmatprep.mubr.msk.f32.mxu1 %vm125_vm1, %v110_v56 }
  0x65   :  { %1638 = vmatmul.mubr.msk.f32.gmra.mxu0 %vm125_vm1, %v79_v57 }
  0x66   :  { %1640 = vmatprep.mubr.msk.f32.mxu0 %vm125_vm1, %v80_v58 }
  0x67   :  { %1686 = vmatmul.mubr.msk.f32.gmra.mxu1 %vm125_vm1, %v111_v59 }
  0x68   :  { %1688 = vmatprep.mubr.msk.f32.mxu1 %vm125_vm1, %v112_v60 }
  0x69   :  { %1641 = vmatmul.mubr.msk.f32.gmra.mxu0 %vm125_vm1, %v81_v61 }
  0x6a   :  { %1643 = vmatprep.mubr.msk.f32.mxu0 %vm125_vm1, %v82_v62 }
  0x6b   :  { %1689 = vmatmul.mubr.msk.f32.gmra.mxu1 %vm125_vm1, %v113_v63 }
  0x6c   :  { %1691 = vmatprep.mubr.msk.f32.mxu1 %vm125_vm1, %v114_v0 }
  0x6d   :  { %1644 = vmatmul.mubr.msk.f32.gmra.mxu0 %vm125_vm1, %v83_v1 }
  0x6e   :  { %1646 = vmatprep.mubr.msk.f32.mxu0 %vm125_vm1, %v84_v2 }
  0x6f   :  { %1692 = vmatmul.mubr.msk.f32.gmra.mxu1 %vm125_vm1, %v115_v3 }
  0x70   :  { %1694 = vmatprep.mubr.msk.f32.mxu1 %vm125_vm1, %v116_v4 }
  0x71   :  { %1647 = vmatmul.mubr.msk.f32.gmra.mxu0 %vm125_vm1, %v85_v5 }
  0x73   :  { %1695 = vmatmul.mubr.msk.f32.gmra.mxu1 %vm125_vm1, %v117_v6 }
  0xf5   :  { %v2077_v7 = vpop.f32.mrf.mxu0 }
  0xf6   :  { %v843_v10 = vmul.f32 %v2077_v7, %v2077_v7  ;;  %v709_v15 = vsel %vm707_vm2, %v2077_v7, 0.0 }
  0xf7   :  { %v2079_v8 = vpop.f32.mrf.mxu0  ;;  %v2081_v9 = vpop.f32.mrf.mxu1 }
  0xf8   :  { %3933 = vst [vmem:[#allocation9_spill] sm:$0xff] %v2081_v9  ;;  %v708_v11 = vsel %vm707_vm2, %v2079_v8, 0.0  ;;  %v842_v12 = vmul.f32 %v2079_v8, %v2079_v8  ;;  %v907_v20 = vsel %vm707_vm2, %v843_v10, 0.0 }
  0xf9   :  { %v2089_v13 = vpop.f32.mrf.mxu0  ;;  %v2091_v14 = vpop.f32.mrf.mxu1  ;;  %v710_v17 = vadd.f32 %v709_v15, %v708_v11 }
  0xfa   :  { %v906_v16 = vsel %vm707_vm2, %v842_v12, 0.0  ;;  %v845_v21 = vmul.f32 %v2089_v13, %v2089_v13  ;;  %v713_v27 = vsel %vm707_vm2, %v2089_v13, 0.0 }
  0xfb   :  { %v2096_v18 = vpop.f32.mrf.mxu0  ;;  %v2098_v19 = vpop.f32.mrf.mxu1  ;;  %v908_v24 = vadd.f32 %v907_v20, %v906_v16 }
  0xfc   :  { %3934 = vst [vmem:[#allocation10_spill] sm:$0xff] %v2098_v19  ;;  %v711_v22 = vsel %vm707_vm2, %v2096_v18, 0.0  ;;  %v844_v23 = vmul.f32 %v2096_v18, %v2096_v18  ;;  %v911_v33 = vsel %vm707_vm2, %v845_v21, 0.0 }
  0xfd   :  { %v712_v25 = vadd.f32 %v711_v22, %v710_v17  ;;  %v2107_v26 = vpop.f32.mrf.mxu0  ;;  %v2114_v32 = vpop.f32.mrf.mxu1 }
  0xfe   :  { %v909_v28 = vsel %vm707_vm2, %v844_v23, 0.0  ;;  %v847_v34 = vmul.f32 %v2107_v26, %v2107_v26  ;;  %v717_v40 = vsel %vm707_vm2, %v2107_v26, 0.0 }
  0xff   :  { %v910_v29 = vadd.f32 %v909_v28, %v908_v24  ;;  %v2112_v30 = vpop.f32.mrf.mxu0  ;;  %v714_v31 = vadd.f32 %v713_v27, %v712_v25  ;;  %v2130_v45 = vpop.f32.mrf.mxu1 }
 0x100   :  { %v715_v35 = vsel %vm707_vm2, %v2112_v30, 0.0  ;;  %v846_v36 = vmul.f32 %v2112_v30, %v2112_v30  ;;  %3935 = vst [vmem:[#allocation11_spill] sm:$0xff] %v2130_v45  ;;  %v915_v46 = vsel %vm707_vm2, %v847_v34, 0.0 }
 0x101   :  { %v716_v37 = vadd.f32 %v715_v35, %v714_v31  ;;  %v912_v38 = vadd.f32 %v911_v33, %v910_v29  ;;  %v2123_v39 = vpop.f32.mrf.mxu0  ;;  %v2146_v58 = vpop.f32.mrf.mxu1 }
 0x102   :  { %v913_v41 = vsel %vm707_vm2, %v846_v36, 0.0  ;;  %v849_v47 = vmul.f32 %v2123_v39, %v2123_v39  ;;  %v721_v53 = vsel %vm707_vm2, %v2123_v39, 0.0 }
 0x103   :  { %v914_v42 = vadd.f32 %v913_v41, %v912_v38  ;;  %v2128_v43 = vpop.f32.mrf.mxu0  ;;  %v718_v44 = vadd.f32 %v717_v40, %v716_v37  ;;  %v2162_v10 = vpop.f32.mrf.mxu1 }
 0x104   :  { %v719_v48 = vsel %vm707_vm2, %v2128_v43, 0.0  ;;  %v848_v49 = vmul.f32 %v2128_v43, %v2128_v43  ;;  %v919_v59 = vsel %vm707_vm2, %v849_v47, 0.0  ;;  %3936 = vst [vmem:[#allocation12_spill] sm:$0xff] %v2162_v10 }
 0x105   :  { %v720_v50 = vadd.f32 %v719_v48, %v718_v44  ;;  %v916_v51 = vadd.f32 %v915_v46, %v914_v42  ;;  %v2139_v52 = vpop.f32.mrf.mxu0  ;;  %v2178_v28 = vpop.f32.mrf.mxu1 }
 0x106   :  { %v917_v54 = vsel %vm707_vm2, %v848_v49, 0.0  ;;  %v851_v60 = vmul.f32 %v2139_v52, %v2139_v52  ;;  %v725_v2 = vsel %vm707_vm2, %v2139_v52, 0.0 }
 0x107   :  { %v918_v55 = vadd.f32 %v917_v54, %v916_v51  ;;  %v2144_v56 = vpop.f32.mrf.mxu0  ;;  %v722_v57 = vadd.f32 %v721_v53, %v720_v50  ;;  %v2194_v46 = vpop.f32.mrf.mxu1 }
 0x108   :  { %v723_v61 = vsel %vm707_vm2, %v2144_v56, 0.0  ;;  %v850_v62 = vmul.f32 %v2144_v56, %v2144_v56  ;;  %v923_v11 = vsel %vm707_vm2, %v851_v60, 0.0  ;;  %3937 = vst [vmem:[#allocation13_spill] sm:$0xff] %v2194_v46 }
 0x109   :  { %v724_v63 = vadd.f32 %v723_v61, %v722_v57  ;;  %v920_v0 = vadd.f32 %v919_v59, %v918_v55  ;;  %v2155_v1 = vpop.f32.mrf.mxu0 }
 0x10a   :  { %v921_v3 = vsel %vm707_vm2, %v850_v62, 0.0  ;;  %v853_v12 = vmul.f32 %v2155_v1, %v2155_v1  ;;  %v729_v22 = vsel %vm707_vm2, %v2155_v1, 0.0  ;;  %v2210_v62 = vpop.f32.mrf.mxu1 }
 0x10b   :  { %v922_v4 = vadd.f32 %v921_v3, %v920_v0  ;;  %v2160_v5 = vpop.f32.mrf.mxu0  ;;  %v726_v6 = vadd.f32 %v725_v2, %v724_v63 }
 0x10c   :  { %v727_v15 = vsel %vm707_vm2, %v2160_v5, 0.0  ;;  %v852_v16 = vmul.f32 %v2160_v5, %v2160_v5  ;;  %v927_v29 = vsel %vm707_vm2, %v853_v12, 0.0 }
 0x10d   :  { %v728_v17 = vadd.f32 %v727_v15, %v726_v6  ;;  %v924_v20 = vadd.f32 %v923_v11, %v922_v4  ;;  %v2171_v21 = vpop.f32.mrf.mxu0 }
 0x10e   :  { %v925_v23 = vsel %vm707_vm2, %v852_v16, 0.0  ;;  %v855_v31 = vmul.f32 %v2171_v21, %v2171_v21  ;;  %v733_v38 = vsel %vm707_vm2, %v2171_v21, 0.0 }
 0x10f   :  { %v926_v24 = vadd.f32 %v925_v23, %v924_v20  ;;  %v2176_v25 = vpop.f32.mrf.mxu0  ;;  %v730_v27 = vadd.f32 %v729_v22, %v728_v17  ;;  %v2226_v22 = vpop.f32.mrf.mxu1 }
 0x110   :  { %v731_v33 = vsel %vm707_vm2, %v2176_v25, 0.0  ;;  %v854_v34 = vmul.f32 %v2176_v25, %v2176_v25  ;;  %v931_v47 = vsel %vm707_vm2, %v855_v31, 0.0  ;;  %3938 = vst [vmem:[#allocation14_spill] sm:$0xff] %v2226_v22 }
 0x111   :  { %v732_v35 = vadd.f32 %v731_v33, %v730_v27  ;;  %v928_v36 = vadd.f32 %v927_v29, %v926_v24  ;;  %v2187_v37 = vpop.f32.mrf.mxu0 }
 0x112   :  { %v929_v40 = vsel %vm707_vm2, %v854_v34, 0.0  ;;  %v857_v48 = vmul.f32 %v2187_v37, %v2187_v37  ;;  %v737_v55 = vsel %vm707_vm2, %v2187_v37, 0.0 }
 0x113   :  { %v930_v41 = vadd.f32 %v929_v40, %v928_v36  ;;  %v2192_v42 = vpop.f32.mrf.mxu0  ;;  %v734_v44 = vadd.f32 %v733_v38, %v732_v35 }
 0x114   :  { %v735_v49 = vsel %vm707_vm2, %v2192_v42, 0.0  ;;  %v856_v50 = vmul.f32 %v2192_v42, %v2192_v42  ;;  %v935_v63 = vsel %vm707_vm2, %v857_v48, 0.0 }
 0x115   :  { %v736_v51 = vadd.f32 %v735_v49, %v734_v44  ;;  %v932_v53 = vadd.f32 %v931_v47, %v930_v41  ;;  %v2203_v54 = vpop.f32.mrf.mxu0  ;;  %v2242_v44 = vpop.f32.mrf.mxu1 }
 0x116   :  { %v933_v57 = vsel %vm707_vm2, %v856_v50, 0.0  ;;  %v859_v0 = vmul.f32 %v2203_v54, %v2203_v54  ;;  %v741_v12 = vsel %vm707_vm2, %v2203_v54, 0.0 }
 0x117   :  { %v934_v59 = vadd.f32 %v933_v57, %v932_v53  ;;  %v2208_v60 = vpop.f32.mrf.mxu0  ;;  %v738_v61 = vadd.f32 %v737_v55, %v736_v51 }
 0x118   :  { %v739_v2 = vsel %vm707_vm2, %v2208_v60, 0.0  ;;  %v858_v3 = vmul.f32 %v2208_v60, %v2208_v60  ;;  %v939_v23 = vsel %vm707_vm2, %v859_v0, 0.0 }
 0x119   :  { %v740_v4 = vadd.f32 %v739_v2, %v738_v61  ;;  %v936_v6 = vadd.f32 %v935_v63, %v934_v59  ;;  %v2219_v11 = vpop.f32.mrf.mxu0  ;;  %v2258_v2 = vpop.f32.mrf.mxu1 }
 0x11a   :  { %v937_v15 = vsel %vm707_vm2, %v858_v3, 0.0  ;;  %v861_v24 = vmul.f32 %v2219_v11, %v2219_v11  ;;  %v745_v35 = vsel %vm707_vm2, %v2219_v11, 0.0  ;;  %3939 = vst [vmem:[#allocation15_spill] sm:$0xff] %v2258_v2 }
 0x11b   :  { %v938_v16 = vadd.f32 %v937_v15, %v936_v6  ;;  %v2224_v17 = vpop.f32.mrf.mxu0  ;;  %v742_v20 = vadd.f32 %v741_v12, %v740_v4 }
 0x11c   :  { %v743_v27 = vsel %vm707_vm2, %v2224_v17, 0.0  ;;  %v860_v29 = vmul.f32 %v2224_v17, %v2224_v17  ;;  %v943_v47 = vsel %vm707_vm2, %v861_v24, 0.0 }
 0x11d   :  { %v744_v31 = vadd.f32 %v743_v27, %v742_v20  ;;  %v940_v33 = vadd.f32 %v939_v23, %v938_v16  ;;  %v2235_v34 = vpop.f32.mrf.mxu0 }
 0x11e   :  { %v941_v36 = vsel %vm707_vm2, %v860_v29, 0.0  ;;  %v863_v48 = vmul.f32 %v2235_v34, %v2235_v34  ;;  %v749_v57 = vsel %vm707_vm2, %v2235_v34, 0.0 }
 0x11f   :  { %v942_v38 = vadd.f32 %v941_v36, %v940_v33  ;;  %v2240_v40 = vpop.f32.mrf.mxu0  ;;  %v746_v41 = vadd.f32 %v745_v35, %v744_v31  ;;  %v2274_v33 = vpop.f32.mrf.mxu1 }
 0x120   :  { %v747_v49 = vsel %vm707_vm2, %v2240_v40, 0.0  ;;  %v862_v50 = vmul.f32 %v2240_v40, %v2240_v40  ;;  %v947_v3 = vsel %vm707_vm2, %v863_v48, 0.0 }
 0x121   :  { %v748_v51 = vadd.f32 %v747_v49, %v746_v41  ;;  %v944_v53 = vadd.f32 %v943_v47, %v942_v38  ;;  %v2251_v55 = vpop.f32.mrf.mxu0 }
 0x122   :  { %v945_v59 = vsel %vm707_vm2, %v862_v50, 0.0  ;;  %v865_v4 = vmul.f32 %v2251_v55, %v2251_v55  ;;  %v753_v23 = vsel %vm707_vm2, %v2251_v55, 0.0 }
 0x123   :  { %v946_v61 = vadd.f32 %v945_v59, %v944_v53  ;;  %v2256_v63 = vpop.f32.mrf.mxu0  ;;  %v750_v0 = vadd.f32 %v749_v57, %v748_v51 }
 0x124   :  { %v751_v6 = vsel %vm707_vm2, %v2256_v63, 0.0  ;;  %v864_v12 = vmul.f32 %v2256_v63, %v2256_v63  ;;  %v951_v35 = vsel %vm707_vm2, %v865_v4, 0.0 }
 0x125   :  { %v752_v15 = vadd.f32 %v751_v6, %v750_v0  ;;  %v948_v16 = vadd.f32 %v947_v3, %v946_v61  ;;  %v2267_v20 = vpop.f32.mrf.mxu0  ;;  %v2290_v61 = vpop.f32.mrf.mxu1 }
 0x126   :  { %v949_v24 = vsel %vm707_vm2, %v864_v12, 0.0  ;;  %v867_v36 = vmul.f32 %v2267_v20, %v2267_v20  ;;  %v757_v50 = vsel %vm707_vm2, %v2267_v20, 0.0  ;;  %3940 = vst [vmem:[#allocation16_spill] sm:$0xff] %v2290_v61 }
 0x127   :  { %v950_v27 = vadd.f32 %v949_v24, %v948_v16  ;;  %v2272_v29 = vpop.f32.mrf.mxu0  ;;  %v754_v31 = vadd.f32 %v753_v23, %v752_v15 }
 0x128   :  { %v755_v38 = vsel %vm707_vm2, %v2272_v29, 0.0  ;;  %v866_v41 = vmul.f32 %v2272_v29, %v2272_v29  ;;  %v955_v0 = vsel %vm707_vm2, %v867_v36, 0.0  ;;  %v2306_v36 = vpop.f32.mrf.mxu1 }
 0x129   :  { %v756_v47 = vadd.f32 %v755_v38, %v754_v31  ;;  %v952_v48 = vadd.f32 %v951_v35, %v950_v27  ;;  %v2283_v49 = vpop.f32.mrf.mxu0 }
 0x12a   :  { %v953_v51 = vsel %vm707_vm2, %v866_v41, 0.0  ;;  %v869_v3 = vmul.f32 %v2283_v49, %v2283_v49  ;;  %v761_v23 = vsel %vm707_vm2, %v2283_v49, 0.0 }
 0x12b   :  { %v954_v53 = vadd.f32 %v953_v51, %v952_v48  ;;  %v2288_v57 = vpop.f32.mrf.mxu0  ;;  %v758_v59 = vadd.f32 %v757_v50, %v756_v47 }
 0x12c   :  { %v759_v4 = vsel %vm707_vm2, %v2288_v57, 0.0  ;;  %v868_v6 = vmul.f32 %v2288_v57, %v2288_v57  ;;  %v959_v38 = vsel %vm707_vm2, %v869_v3, 0.0 }
 0x12d   :  { %v760_v12 = vadd.f32 %v759_v4, %v758_v59  ;;  %v956_v15 = vadd.f32 %v955_v0, %v954_v53  ;;  %v2299_v16 = vpop.f32.mrf.mxu0 }
 0x12e   :  { %3941 = vst [vmem:[#allocation17_spill] sm:$0xff] %v2299_v16  ;;  %v957_v24 = vsel %vm707_vm2, %v868_v6, 0.0  ;;  %v871_v41 = vmul.f32 %v2299_v16, %v2299_v16  ;;  %v765_v59 = vsel %vm707_vm2, %v2299_v16, 0.0  ;;  %v875_v16 = vmul.f32 %v2081_v9, %v2081_v9 }
 0x12f   :  { %v958_v27 = vadd.f32 %v957_v24, %v956_v15  ;;  %v2304_v31 = vpop.f32.mrf.mxu0  ;;  %v762_v35 = vadd.f32 %v761_v23, %v760_v12  ;;  %v2322_v12 = vpop.f32.mrf.mxu1 }
 0x130   :  { %v763_v47 = vsel %vm707_vm2, %v2304_v31, 0.0  ;;  %v870_v48 = vmul.f32 %v2304_v31, %v2304_v31  ;;  %3943 = vst [vmem:[#allocation19_spill] sm:$0xff] %v2322_v12  ;;  %v963_v15 = vsel %vm707_vm2, %v871_v41, 0.0 }
 0x131   :  { %v764_v50 = vadd.f32 %v763_v47, %v762_v35  ;;  %v960_v51 = vadd.f32 %v959_v38, %v958_v27  ;;  %v2315_v53 = vpop.f32.mrf.mxu0 }
 0x132   :  { %3942 = vst [vmem:[#allocation18_spill] sm:$0xff] %v2315_v53  ;;  %v961_v0 = vsel %vm707_vm2, %v870_v48, 0.0  ;;  %v873_v23 = vmul.f32 %v2315_v53, %v2315_v53  ;;  %v769_v47 = vsel %vm707_vm2, %v2315_v53, 0.0  ;;  %v877_v53 = vmul.f32 %v2098_v19, %v2098_v19 }
 0x133   :  { %v962_v4 = vadd.f32 %v961_v0, %v960_v51  ;;  %v2320_v3 = vpop.f32.mrf.mxu0  ;;  %v766_v6 = vadd.f32 %v765_v59, %v764_v50  ;;  %v874_v50 = vmul.f32 %v2091_v14, %v2091_v14  ;;  %v2336_v59 = vpop.f32.mrf.mxu1 }
 0x134   :  { %v767_v24 = vsel %vm707_vm2, %v2320_v3, 0.0  ;;  %v872_v27 = vmul.f32 %v2320_v3, %v2320_v3  ;;  %3944 = vst [vmem:[#allocation20_spill] sm:$0xff] %v2336_v59  ;;  %v967_v0 = vsel %vm707_vm2, %v873_v23, 0.0  ;;  %v971_v23 = vsel %vm707_vm2, %v875_v16, 0.0 }
 0x135   :  { %v768_v35 = vadd.f32 %v767_v24, %v766_v6  ;;  %v964_v38 = vadd.f32 %v963_v15, %v962_v4  ;;  %v771_v4 = vsel %vm707_vm2, %v2091_v14, 0.0  ;;  %v773_v24 = vsel %vm707_vm2, %v2081_v9, 0.0 }
 0x136   :  { %v965_v48 = vsel %vm707_vm2, %v872_v27, 0.0  ;;  %v969_v27 = vsel %vm707_vm2, %v874_v50, 0.0  ;;  %v777_v50 = vsel %vm707_vm2, %v2098_v19, 0.0  ;;  %v975_v16 = vsel %vm707_vm2, %v877_v53, 0.0 }
 0x137   :  { %v770_v41 = vadd.f32 %v769_v47, %v768_v35  ;;  %v966_v51 = vadd.f32 %v965_v48, %v964_v38  ;;  %v876_v35 = vmul.f32 %v2114_v32, %v2114_v32  ;;  %v2348_v48 = vpop.f32.mrf.mxu1  ;;  %v879_v9 = vmul.f32 %v2130_v45, %v2130_v45 }
 0x138   :  { %3945 = vst [vmem:[#allocation21_spill] sm:$0xff] %v2348_v48  ;;  %v881_v19 = vmul.f32 %v2162_v10, %v2162_v10 }
 0x139   :  { %v968_v6 = vadd.f32 %v967_v0, %v966_v51  ;;  %v772_v15 = vadd.f32 %v771_v4, %v770_v41  ;;  %v775_v41 = vsel %vm707_vm2, %v2114_v32, 0.0  ;;  %v973_v4 = vsel %vm707_vm2, %v876_v35, 0.0 }
 0x13a   :  { %v781_v35 = vsel %vm707_vm2, %v2130_v45, 0.0  ;;  %v979_v53 = vsel %vm707_vm2, %v879_v9, 0.0  ;;  %v983_v9 = vsel %vm707_vm2, %v881_v19, 0.0  ;;  %v883_v45 = vmul.f32 %v2194_v46, %v2194_v46 }
 0x13b   :  { %v970_v38 = vadd.f32 %v969_v27, %v968_v6  ;;  %v774_v47 = vadd.f32 %v773_v24, %v772_v15  ;;  %v878_v6 = vmul.f32 %v2146_v58, %v2146_v58  ;;  %v2360_v27 = vpop.f32.mrf.mxu1 }
 0x13c   :  { %3946 = vst [vmem:[#allocation22_spill] sm:$0xff] %v2360_v27  ;;  %v987_v19 = vsel %vm707_vm2, %v883_v45, 0.0 }
 0x13d   :  { %v776_v51 = vadd.f32 %v775_v41, %v774_v47  ;;  %v972_v0 = vadd.f32 %v971_v23, %v970_v38  ;;  %v779_v38 = vsel %vm707_vm2, %v2146_v58, 0.0  ;;  %v977_v41 = vsel %vm707_vm2, %v878_v6, 0.0 }
 0x13e   :  { %v785_v6 = vsel %vm707_vm2, %v2162_v10, 0.0  ;;  %v885_v10 = vmul.f32 %v2226_v22, %v2226_v22 }
 0x13f   :  { %v974_v15 = vadd.f32 %v973_v4, %v972_v0  ;;  %v778_v24 = vadd.f32 %v777_v50, %v776_v51  ;;  %v880_v51 = vmul.f32 %v2178_v28, %v2178_v28  ;;  %v2372_v4 = vpop.f32.mrf.mxu1 }
 0x140   :  { %3947 = vst [vmem:[#allocation23_spill] sm:$0xff] %v2372_v4  ;;  %v991_v45 = vsel %vm707_vm2, %v885_v10, 0.0 }
 0x141   :  { %v780_v47 = vadd.f32 %v779_v38, %v778_v24  ;;  %v976_v23 = vadd.f32 %v975_v16, %v974_v15  ;;  %v783_v15 = vsel %vm707_vm2, %v2178_v28, 0.0  ;;  %v981_v38 = vsel %vm707_vm2, %v880_v51, 0.0 }
 0x142   :  { %v789_v51 = vsel %vm707_vm2, %v2194_v46, 0.0  ;;  %v887_v46 = vmul.f32 %v2258_v2, %v2258_v2 }
 0x143   :  { %v978_v0 = vadd.f32 %v977_v41, %v976_v23  ;;  %v782_v50 = vadd.f32 %v781_v35, %v780_v47  ;;  %v882_v47 = vmul.f32 %v2210_v62, %v2210_v62  ;;  %v2384_v41 = vpop.f32.mrf.mxu1 }
 0x144   :  { %3948 = vst [vmem:[#allocation24_spill] sm:$0xff] %v2384_v41  ;;  %v995_v10 = vsel %vm707_vm2, %v887_v46, 0.0 }
 0x145   :  { %v784_v24 = vadd.f32 %v783_v15, %v782_v50  ;;  %v980_v16 = vadd.f32 %v979_v53, %v978_v0  ;;  %v787_v0 = vsel %vm707_vm2, %v2210_v62, 0.0  ;;  %v985_v15 = vsel %vm707_vm2, %v882_v47, 0.0 }
 0x146   :  { %v793_v47 = vsel %vm707_vm2, %v2226_v22, 0.0  ;;  %v889_v22 = vmul.f32 %v2290_v61, %v2290_v61 }
 0x147   :  { %v982_v23 = vadd.f32 %v981_v38, %v980_v16  ;;  %v786_v35 = vadd.f32 %v785_v6, %v784_v24  ;;  %v884_v24 = vmul.f32 %v2242_v44, %v2242_v44  ;;  %v2396_v38 = vpop.f32.mrf.mxu1 }
 0x148   :  { %3949 = vst [vmem:[#allocation25_spill] sm:$0xff] %v2396_v38  ;;  %v999_v46 = vsel %vm707_vm2, %v889_v22, 0.0 }
 0x149   :  { %v788_v50 = vadd.f32 %v787_v0, %v786_v35  ;;  %v984_v53 = vadd.f32 %v983_v9, %v982_v23  ;;  %v791_v23 = vsel %vm707_vm2, %v2242_v44, 0.0  ;;  %v989_v0 = vsel %vm707_vm2, %v884_v24, 0.0 }
 0x14a   :  { %v797_v24 = vsel %vm707_vm2, %v2258_v2, 0.0  ;;  %v891_v2 = vmul.f32 %v2322_v12, %v2322_v12 }
 0x14b   :  { %v986_v16 = vadd.f32 %v985_v15, %v984_v53  ;;  %v790_v6 = vadd.f32 %v789_v51, %v788_v50  ;;  %v886_v50 = vmul.f32 %v2274_v33, %v2274_v33  ;;  %v2408_v15 = vpop.f32.mrf.mxu1 }
 0x14c   :  { %3950 = vst [vmem:[#allocation26_spill] sm:$0xff] %v2408_v15  ;;  %v1003_v22 = vsel %vm707_vm2, %v891_v2, 0.0 }
 0x14d   :  { %v792_v35 = vadd.f32 %v791_v23, %v790_v6  ;;  %v988_v9 = vadd.f32 %v987_v19, %v986_v16  ;;  %v795_v16 = vsel %vm707_vm2, %v2274_v33, 0.0  ;;  %v993_v23 = vsel %vm707_vm2, %v886_v50, 0.0 }
 0x14e   :  { %v801_v50 = vsel %vm707_vm2, %v2290_v61, 0.0  ;;  %v893_v61 = vmul.f32 %v2348_v48, %v2348_v48 }
 0x14f   :  { %v990_v53 = vadd.f32 %v989_v0, %v988_v9  ;;  %v794_v51 = vadd.f32 %v793_v47, %v792_v35  ;;  %v888_v35 = vmul.f32 %v2306_v36, %v2306_v36  ;;  %v2420_v0 = vpop.f32.mrf.mxu1 }
 0x150   :  { %3951 = vst [vmem:[#allocation27_spill] sm:$0xff] %v2420_v0  ;;  %v1007_v2 = vsel %vm707_vm2, %v893_v61, 0.0 }
 0x151   :  { %v796_v6 = vadd.f32 %v795_v16, %v794_v51  ;;  %v992_v19 = vadd.f32 %v991_v45, %v990_v53  ;;  %v799_v53 = vsel %vm707_vm2, %v2306_v36, 0.0  ;;  %v997_v16 = vsel %vm707_vm2, %v888_v35, 0.0 }
 0x152   :  { %v805_v35 = vsel %vm707_vm2, %v2322_v12, 0.0  ;;  %v895_v12 = vmul.f32 %v2372_v4, %v2372_v4 }
 0x153   :  { %v994_v9 = vadd.f32 %v993_v23, %v992_v19  ;;  %v798_v47 = vadd.f32 %v797_v24, %v796_v6  ;;  %v890_v6 = vmul.f32 %v2336_v59, %v2336_v59  ;;  %v2432_v23 = vpop.f32.mrf.mxu1 }
 0x154   :  { %3952 = vst [vmem:[#allocation28_spill] sm:$0xff] %v2432_v23  ;;  %v1011_v61 = vsel %vm707_vm2, %v895_v12, 0.0 }
 0x155   :  { %v800_v51 = vadd.f32 %v799_v53, %v798_v47  ;;  %v996_v45 = vadd.f32 %v995_v10, %v994_v9  ;;  %v803_v9 = vsel %vm707_vm2, %v2336_v59, 0.0  ;;  %v1001_v53 = vsel %vm707_vm2, %v890_v6, 0.0 }
 0x156   :  { %v809_v6 = vsel %vm707_vm2, %v2348_v48, 0.0  ;;  %v897_v48 = vmul.f32 %v2396_v38, %v2396_v38 }
 0x157   :  { %v998_v19 = vadd.f32 %v997_v16, %v996_v45  ;;  %v802_v24 = vadd.f32 %v801_v50, %v800_v51  ;;  %v892_v51 = vmul.f32 %v2360_v27, %v2360_v27  ;;  %v2444_v16 = vpop.f32.mrf.mxu1 }
 0x158   :  { %3953 = vst [vmem:[#allocation29_spill] sm:$0xff] %v2444_v16  ;;  %v1015_v12 = vsel %vm707_vm2, %v897_v48, 0.0 }
 0x159   :  { %v804_v47 = vadd.f32 %v803_v9, %v802_v24  ;;  %v1000_v10 = vadd.f32 %v999_v46, %v998_v19  ;;  %v807_v19 = vsel %vm707_vm2, %v2360_v27, 0.0  ;;  %v1005_v9 = vsel %vm707_vm2, %v892_v51, 0.0 }
 0x15a   :  { %v813_v51 = vsel %vm707_vm2, %v2372_v4, 0.0  ;;  %v899_v4 = vmul.f32 %v2420_v0, %v2420_v0 }
 0x15b   :  { %v1002_v45 = vadd.f32 %v1001_v53, %v1000_v10  ;;  %v806_v50 = vadd.f32 %v805_v35, %v804_v47  ;;  %v894_v47 = vmul.f32 %v2384_v41, %v2384_v41  ;;  %v2456_v53 = vpop.f32.mrf.mxu1 }
 0x15c   :  { %3954 = vst [vmem:[#allocation30_spill] sm:$0xff] %v2456_v53  ;;  %v1019_v48 = vsel %vm707_vm2, %v899_v4, 0.0 }
 0x15d   :  { %v808_v24 = vadd.f32 %v807_v19, %v806_v50  ;;  %v1004_v46 = vadd.f32 %v1003_v22, %v1002_v45  ;;  %v811_v45 = vsel %vm707_vm2, %v2384_v41, 0.0  ;;  %v1009_v19 = vsel %vm707_vm2, %v894_v47, 0.0 }
 0x15e   :  { %v817_v47 = vsel %vm707_vm2, %v2396_v38, 0.0  ;;  %v901_v38 = vmul.f32 %v2444_v16, %v2444_v16 }
 0x15f   :  { %v1006_v10 = vadd.f32 %v1005_v9, %v1004_v46  ;;  %v810_v35 = vadd.f32 %v809_v6, %v808_v24  ;;  %v896_v24 = vmul.f32 %v2408_v15, %v2408_v15  ;;  %v2468_v9 = vpop.f32.mrf.mxu1 }
 0x160   :  { %3955 = vst [vmem:[#allocation31_spill] sm:$0xff] %v2468_v9  ;;  %v1023_v4 = vsel %vm707_vm2, %v901_v38, 0.0 }
 0x161   :  { %v812_v50 = vadd.f32 %v811_v45, %v810_v35  ;;  %v1008_v22 = vadd.f32 %v1007_v2, %v1006_v10  ;;  %v815_v10 = vsel %vm707_vm2, %v2408_v15, 0.0  ;;  %v1013_v45 = vsel %vm707_vm2, %v896_v24, 0.0 }
 0x162   :  { %v821_v24 = vsel %vm707_vm2, %v2420_v0, 0.0  ;;  %v903_v0 = vmul.f32 %v2468_v9, %v2468_v9 }
 0x163   :  { %v1010_v46 = vadd.f32 %v1009_v19, %v1008_v22  ;;  %v814_v6 = vadd.f32 %v813_v51, %v812_v50  ;;  %v898_v50 = vmul.f32 %v2432_v23, %v2432_v23  ;;  %v2480_v19 = vpop.f32.mrf.mxu1 }
 0x164   :  { %3956 = vst [vmem:[#allocation32_spill] sm:$0xff] %v2480_v19  ;;  %v1027_v38 = vsel %vm707_vm2, %v903_v0, 0.0 }
 0x165   :  { %v816_v35 = vadd.f32 %v815_v10, %v814_v6  ;;  %v1012_v2 = vadd.f32 %v1011_v61, %v1010_v46  ;;  %v819_v46 = vsel %vm707_vm2, %v2432_v23, 0.0  ;;  %v1017_v10 = vsel %vm707_vm2, %v898_v50, 0.0 }
 0x166   :  { %v825_v50 = vsel %vm707_vm2, %v2444_v16, 0.0 }
 0x167   :  { %v1014_v22 = vadd.f32 %v1013_v45, %v1012_v2  ;;  %v818_v51 = vadd.f32 %v817_v47, %v816_v35  ;;  %v900_v35 = vmul.f32 %v2456_v53, %v2456_v53  ;;  %v2492_v45 = vpop.f32.mrf.mxu1 }
 0x168   :  { %3957 = vst [vmem:[#allocation33_spill] sm:$0xff] %v2492_v45 }
 0x169   :  { %v820_v6 = vadd.f32 %v819_v46, %v818_v51  ;;  %v1016_v61 = vadd.f32 %v1015_v12, %v1014_v22  ;;  %v823_v22 = vsel %vm707_vm2, %v2456_v53, 0.0  ;;  %v1021_v46 = vsel %vm707_vm2, %v900_v35, 0.0 }
 0x16a   :  { %v829_v35 = vsel %vm707_vm2, %v2468_v9, 0.0 }
 0x16b   :  { %v1018_v2 = vadd.f32 %v1017_v10, %v1016_v61  ;;  %v822_v47 = vadd.f32 %v821_v24, %v820_v6  ;;  %v902_v6 = vmul.f32 %v2480_v19, %v2480_v19  ;;  %v2504_v10 = vpop.f32.mrf.mxu1 }
 0x16c   :  { %3958 = vst [vmem:[#allocation34_spill] sm:$0xff] %v2504_v10 }
 0x16d   :  { %v824_v51 = vadd.f32 %v823_v22, %v822_v47  ;;  %v1020_v12 = vadd.f32 %v1019_v48, %v1018_v2  ;;  %v827_v2 = vsel %vm707_vm2, %v2480_v19, 0.0  ;;  %v1025_v22 = vsel %vm707_vm2, %v902_v6, 0.0 }
 0x16e   :  { %v831_v19 = vsel %vm707_vm2, %v2504_v10, 0.0 }
 0x16f   :  { %v1022_v61 = vadd.f32 %v1021_v46, %v1020_v12  ;;  %v826_v24 = vadd.f32 %v825_v50, %v824_v51  ;;  %v904_v51 = vmul.f32 %v2504_v10, %v2504_v10  ;;  %v905_v46 = vmul.f32 %v2492_v45, %v2492_v45 }
 0x171   :  { %v828_v47 = vadd.f32 %v827_v2, %v826_v24  ;;  %v1024_v48 = vadd.f32 %v1023_v4, %v1022_v61  ;;  %v833_v4 = vsel %vm707_vm2, %v2492_v45, 0.0  ;;  %v1029_v6 = vsel %vm707_vm2, %v904_v51, 0.0 }
 0x173   :  { %v1026_v12 = vadd.f32 %v1025_v22, %v1024_v48  ;;  %v830_v50 = vadd.f32 %v829_v35, %v828_v47  ;;  %v1031_v48 = vsel %vm707_vm2, %v905_v46, 0.0 }
 0x175   :  { %v832_v24 = vadd.f32 %v831_v19, %v830_v50  ;;  %v1028_v61 = vadd.f32 %v1027_v38, %v1026_v12 }
 0x177   :  { %v834_v2 = vadd.f32 %v833_v4, %v832_v24  ;;  %v1030_v9 = vadd.f32 %v1029_v6, %v1028_v61  ;;  %v3975_v6 = vld [vmem:[#allocation27_spill] sm:$0xff]  ;;  %v3977_v4 = vld [vmem:[#allocation29_spill] sm:$0xff] }
 0x179   :  { %v835_v47 = vrot.slane %v834_v2, 4  ;;  %v1032_v35 = vadd.f32 %v1031_v48, %v1030_v9  ;;  %v3971_v48 = vld [vmem:[#allocation23_spill] sm:$0xff] }
 0x17b   :  { %v836_v0 = vadd.f32 %v835_v47, %v834_v2  ;;  %v1033_v22 = vrot.slane %v1032_v35, 4  ;;  %v3980_v2 = vld [vmem:[#allocation34_spill] sm:$0xff] }
 0x17d   :  { %v837_v16 = vrot.slane %v836_v0, 2  ;;  %v1034_v53 = vadd.f32 %v1033_v22, %v1032_v35  ;;  %v3967_v22 = vld [vmem:[#allocation15_spill] sm:$0xff] }
 0x17f   :  { %v838_v23 = vadd.f32 %v837_v16, %v836_v0  ;;  %v1035_v15 = vrot.slane %v1034_v53, 2  ;;  %v3968_v0 = vld [vmem:[#allocation16_spill] sm:$0xff] }
 0x181   :  { %v839_v10 = vrot.slane %v838_v23, 1  ;;  %v1036_v19 = vadd.f32 %v1035_v15, %v1034_v53  ;;  %v3978_v15 = vld [vmem:[#allocation32_spill] sm:$0xff]  ;;  %v3981_v53 = vld [vmem:[#allocation33_spill] sm:$0xff] }
 0x183   :  { %v840_v12 = vadd.f32 %v839_v10, %v838_v23  ;;  %v1037_v50 = vrot.slane %v1036_v19, 1  ;;  %v3979_v10 = vld [vmem:[#allocation31_spill] sm:$0xff] }
 0x185   :  { %v2525_v38 = vmul.f32 0.001953125, %v840_v12  ;;  %v1038_v45 = vadd.f32 %v1037_v50, %v1036_v19  ;;  %v3959_v12 = vld [vmem:[#allocation17_spill] sm:$0xff]  ;;  %v3963_v50 = vld [vmem:[#allocation11_spill] sm:$0xff]  ;;  %v3966_v19 = vld [vmem:[#allocation14_spill] sm:$0xff] }
 0x187   :  { %v1039_v51 = vmul.f32 0.001953125, %v1038_v45  ;;  %v1040_v24 = vmul.f32 %v2525_v38, %v2525_v38  ;;  %v3982_v47 = vsub.f32 %v2079_v8, %v2525_v38  ;;  %v3983_v41 = vsub.f32 %v2077_v7, %v2525_v38 }
 0x188   :  { %v3984_v9 = vsub.f32 %v2096_v18, %v2525_v38  ;;  %v3985_v27 = vsub.f32 %v2089_v13, %v2525_v38 }
 0x189   :  { %v1041_v46 = vsub.f32 %v1039_v51, %v1040_v24  ;;  %v3960_v51 = vld [vmem:[#allocation18_spill] sm:$0xff]  ;;  %v3964_v24 = vld [vmem:[#allocation12_spill] sm:$0xff] }
 0x18b   :  { %v1042_v61 = vmax.f32 %v1041_v46, 0.0  ;;  %v3961_v46 = vld [vmem:[#allocation9_spill] sm:$0xff] }
 0x18d   :  { %v1107_v45 = vadd.f32 1e-05, %v1042_v61  ;;  %v3965_v61 = vld [vmem:[#allocation13_spill] sm:$0xff] }
 0x18f   :  { %1716 = vrsqrt.f32 %v1107_v45  ;;  %v3962_v45 = vld [vmem:[#allocation10_spill] sm:$0xff] }
 0x19c   :  { %v2649_v59 = vpop.eup %1716 }
 0x19d   :  { %v2663_v23 = vmul.f32 %v2649_v59, %v3982_v47  ;;  %v2669_v16 = vmul.f32 %v2649_v59, %v3983_v41  ;;  %v2675_v35 = vmul.f32 %v2649_v59, %v3984_v9  ;;  %v2681_v8 = vmul.f32 %v2649_v59, %v3985_v27 }
 0x19e   :  { %v3986_v47 = vsub.f32 %v2112_v30, %v2525_v38  ;;  %v3987_v41 = vsub.f32 %v2107_v26, %v2525_v38  ;;  %v3988_v9 = vsub.f32 %v2128_v43, %v2525_v38  ;;  %v3989_v27 = vsub.f32 %v2123_v39, %v2525_v38 }
 0x1a0   :  { %v2687_v7 = vmul.f32 %v2649_v59, %v3986_v47  ;;  %v2693_v18 = vmul.f32 %v2649_v59, %v3987_v41  ;;  %v2699_v13 = vmul.f32 %v2649_v59, %v3988_v9  ;;  %v2705_v30 = vmul.f32 %v2649_v59, %v3989_v27 }
 0x1a1   :  { %v3990_v47 = vsub.f32 %v2144_v56, %v2525_v38  ;;  %v3991_v41 = vsub.f32 %v2139_v52, %v2525_v38  ;;  %v3992_v9 = vsub.f32 %v2160_v5, %v2525_v38  ;;  %v3993_v27 = vsub.f32 %v2155_v1, %v2525_v38 }
 0x1a3   :  { %v2711_v26 = vmul.f32 %v2649_v59, %v3990_v47  ;;  %v2717_v43 = vmul.f32 %v2649_v59, %v3991_v41  ;;  %v2723_v39 = vmul.f32 %v2649_v59, %v3992_v9  ;;  %v2729_v56 = vmul.f32 %v2649_v59, %v3993_v27 }
 0x1a4   :  { %v3994_v47 = vsub.f32 %v2176_v25, %v2525_v38  ;;  %v3995_v41 = vsub.f32 %v2171_v21, %v2525_v38  ;;  %v3996_v9 = vsub.f32 %v2192_v42, %v2525_v38  ;;  %v3997_v27 = vsub.f32 %v2187_v37, %v2525_v38 }
 0x1a6   :  { %v2735_v52 = vmul.f32 %v2649_v59, %v3994_v47  ;;  %v2741_v5 = vmul.f32 %v2649_v59, %v3995_v41  ;;  %v2747_v1 = vmul.f32 %v2649_v59, %v3996_v9  ;;  %v2753_v25 = vmul.f32 %v2649_v59, %v3997_v27 }
 0x1a7   :  { %v3998_v47 = vsub.f32 %v2208_v60, %v2525_v38  ;;  %v3999_v41 = vsub.f32 %v2203_v54, %v2525_v38  ;;  %v4000_v9 = vsub.f32 %v2224_v17, %v2525_v38  ;;  %v4001_v27 = vsub.f32 %v2219_v11, %v2525_v38 }
 0x1a9   :  { %v2759_v21 = vmul.f32 %v2649_v59, %v3998_v47  ;;  %v2765_v42 = vmul.f32 %v2649_v59, %v3999_v41  ;;  %v2771_v37 = vmul.f32 %v2649_v59, %v4000_v9  ;;  %v2777_v60 = vmul.f32 %v2649_v59, %v4001_v27 }
 0x1aa   :  { %v4002_v47 = vsub.f32 %v2240_v40, %v2525_v38  ;;  %v4003_v41 = vsub.f32 %v2235_v34, %v2525_v38  ;;  %v4004_v9 = vsub.f32 %v2256_v63, %v2525_v38  ;;  %v4005_v27 = vsub.f32 %v2251_v55, %v2525_v38 }
 0x1ac   :  { %v2783_v54 = vmul.f32 %v2649_v59, %v4002_v47  ;;  %v2789_v17 = vmul.f32 %v2649_v59, %v4003_v41  ;;  %v2795_v11 = vmul.f32 %v2649_v59, %v4004_v9  ;;  %v2801_v40 = vmul.f32 %v2649_v59, %v4005_v27 }
 0x1ad   :  { %v4006_v47 = vsub.f32 %v2272_v29, %v2525_v38  ;;  %v4007_v41 = vsub.f32 %v2267_v20, %v2525_v38  ;;  %v4008_v9 = vsub.f32 %v2288_v57, %v2525_v38  ;;  %v4009_v27 = vsub.f32 %v2283_v49, %v2525_v38 }
 0x1af   :  { %v2807_v34 = vmul.f32 %v2649_v59, %v4006_v47  ;;  %v2813_v63 = vmul.f32 %v2649_v59, %v4007_v41  ;;  %v2819_v55 = vmul.f32 %v2649_v59, %v4008_v9  ;;  %v2825_v29 = vmul.f32 %v2649_v59, %v4009_v27 }
 0x1b0   :  { %v4010_v47 = vsub.f32 %v2304_v31, %v2525_v38  ;;  %v4011_v41 = vsub.f32 %v3959_v12, %v2525_v38  ;;  %v4012_v9 = vsub.f32 %v2320_v3, %v2525_v38  ;;  %v4013_v27 = vsub.f32 %v3960_v51, %v2525_v38 }
 0x1b2   :  { %v2831_v20 = vmul.f32 %v2649_v59, %v4010_v47  ;;  %v2837_v57 = vmul.f32 %v2649_v59, %v4011_v41  ;;  %v2843_v49 = vmul.f32 %v2649_v59, %v4012_v9  ;;  %v2849_v31 = vmul.f32 %v2649_v59, %v4013_v27 }
 0x1b3   :  { %v4014_v47 = vsub.f32 %v2091_v14, %v2525_v38  ;;  %v4015_v41 = vsub.f32 %v3961_v46, %v2525_v38  ;;  %v4016_v9 = vsub.f32 %v2114_v32, %v2525_v38  ;;  %v4017_v27 = vsub.f32 %v3962_v45, %v2525_v38 }
 0x1b5   :  { %v2855_v12 = vmul.f32 %v2649_v59, %v4014_v47  ;;  %v2861_v3 = vmul.f32 %v2649_v59, %v4015_v41  ;;  %v2867_v51 = vmul.f32 %v2649_v59, %v4016_v9  ;;  %v2873_v14 = vmul.f32 %v2649_v59, %v4017_v27 }
 0x1b6   :  { %v4018_v47 = vsub.f32 %v2146_v58, %v2525_v38  ;;  %v4019_v41 = vsub.f32 %v3963_v50, %v2525_v38  ;;  %v4020_v9 = vsub.f32 %v2178_v28, %v2525_v38  ;;  %v4021_v27 = vsub.f32 %v3964_v24, %v2525_v38 }
 0x1b8   :  { %v2879_v46 = vmul.f32 %v2649_v59, %v4018_v47  ;;  %v2885_v32 = vmul.f32 %v2649_v59, %v4019_v41  ;;  %v2891_v45 = vmul.f32 %v2649_v59, %v4020_v9  ;;  %v2897_v58 = vmul.f32 %v2649_v59, %v4021_v27 }
 0x1b9   :  { %v4022_v47 = vsub.f32 %v2210_v62, %v2525_v38  ;;  %v4023_v41 = vsub.f32 %v3965_v61, %v2525_v38  ;;  %v4024_v9 = vsub.f32 %v2242_v44, %v2525_v38  ;;  %v4025_v27 = vsub.f32 %v3966_v19, %v2525_v38 }
 0x1bb   :  { %v2903_v50 = vmul.f32 %v2649_v59, %v4022_v47  ;;  %v2909_v28 = vmul.f32 %v2649_v59, %v4023_v41  ;;  %v2915_v24 = vmul.f32 %v2649_v59, %v4024_v9  ;;  %v2921_v62 = vmul.f32 %v2649_v59, %v4025_v27 }
 0x1bc   :  { %v4026_v47 = vsub.f32 %v2274_v33, %v2525_v38  ;;  %v4028_v41 = vsub.f32 %v3967_v22, %v2525_v38  ;;  %v4030_v9 = vsub.f32 %v2306_v36, %v2525_v38  ;;  %v4032_v27 = vsub.f32 %v3968_v0, %v2525_v38 }
 0x1be   :  { %v2927_v61 = vmul.f32 %v2649_v59, %v4026_v47  ;;  %v2933_v44 = vmul.f32 %v2649_v59, %v4028_v41  ;;  %v2939_v19 = vmul.f32 %v2649_v59, %v4030_v9  ;;  %v2945_v33 = vmul.f32 %v2649_v59, %v4032_v27  ;;  %v4034_v47 = vld [vmem:[#allocation20_spill] sm:$0xff]  ;;  %v4037_v41 = vld [vmem:[#allocation19_spill] sm:$0xff]  ;;  %v4039_v9 = vld [vmem:[#allocation22_spill] sm:$0xff] }
 0x1bf   :  { %v4042_v27 = vld [vmem:[#allocation21_spill] sm:$0xff] }
 0x1c0   :  { %4027 = vst [vmem:[#allocation17_spill] sm:$0xff] %v2927_v61  ;;  %4029 = vst [vmem:[#allocation18_spill] sm:$0xff] %v2933_v44  ;;  %v4035_v61 = vsub.f32 %v4034_v47, %v2525_v38  ;;  %v4038_v44 = vsub.f32 %v4037_v41, %v2525_v38 }
 0x1c1   :  { %4031 = vst [vmem:[#allocation9_spill] sm:$0xff] %v2939_v19  ;;  %4033 = vst [vmem:[#allocation10_spill] sm:$0xff] %v2945_v33  ;;  %v4040_v19 = vsub.f32 %v4039_v9, %v2525_v38  ;;  %v4043_v33 = vsub.f32 %v4042_v27, %v2525_v38 }
 0x1c2   :  { %v2951_v22 = vmul.f32 %v2649_v59, %v4035_v61  ;;  %v2957_v36 = vmul.f32 %v2649_v59, %v4038_v44  ;;  %v4045_v61 = vld [vmem:[#allocation24_spill] sm:$0xff]  ;;  %v4048_v44 = vsub.f32 %v3971_v48, %v2525_v38 }
 0x1c3   :  { %v2963_v0 = vmul.f32 %v2649_v59, %v4040_v19  ;;  %v2969_v47 = vmul.f32 %v2649_v59, %v4043_v33  ;;  %v4049_v19 = vld [vmem:[#allocation26_spill] sm:$0xff]  ;;  %v4052_v33 = vld [vmem:[#allocation25_spill] sm:$0xff] }
 0x1c4   :  { %4036 = vst [vmem:[#allocation11_spill] sm:$0xff] %v2951_v22  ;;  %v4046_v22 = vsub.f32 %v4045_v61, %v2525_v38  ;;  %v2981_v9 = vmul.f32 %v2649_v59, %v4048_v44 }
 0x1c5   :  { %4041 = vst [vmem:[#allocation12_spill] sm:$0xff] %v2963_v0  ;;  %4044 = vst [vmem:[#allocation13_spill] sm:$0xff] %v2969_v47  ;;  %v4050_v0 = vsub.f32 %v4049_v19, %v2525_v38  ;;  %v4053_v47 = vsub.f32 %v4052_v33, %v2525_v38  ;;  %v4057_v19 = vsub.f32 %v3975_v6, %v2525_v38 }
 0x1c6   :  { %v2975_v41 = vmul.f32 %v2649_v59, %v4046_v22  ;;  %v2995_v22 = vld [vmem:[#allocation4] ss:$0 sm:$0xff] }
 0x1c7   :  { %v2987_v27 = vmul.f32 %v2649_v59, %v4050_v0  ;;  %v2993_v61 = vmul.f32 %v2649_v59, %v4053_v47  ;;  %v3007_v0 = vmul.f32 %v2649_v59, %v4057_v19  ;;  %v4062_v19 = vsub.f32 %v3979_v10, %v2525_v38 }
 0x1c8   :  { %4047 = vst [vmem:[#allocation14_spill] sm:$0xff] %v2975_v41  ;;  %v4055_v41 = vld [vmem:[#allocation28_spill] sm:$0xff]  ;;  %v3051_v10 = vmul.f32 %v2995_v22, %v2669_v16  ;;  %v3071_v16 = vmul.f32 %v2995_v22, %v2699_v13  ;;  %v3099_v13 = vmul.f32 %v2995_v22, %v2741_v5  ;;  %v3127_v5 = vmul.f32 %v2995_v22, %v2783_v54 }
 0x1c9   :  { %4051 = vst [vmem:[#allocation15_spill] sm:$0xff] %v2987_v27  ;;  %4054 = vst [vmem:[#allocation16_spill] sm:$0xff] %v2993_v61  ;;  %v4056_v48 = vsub.f32 %v4055_v41, %v2525_v38  ;;  %v4058_v27 = vld [vmem:[#allocation30_spill] sm:$0xff]  ;;  %v4060_v61 = vsub.f32 %v3977_v4, %v2525_v38  ;;  %v3155_v54 = vmul.f32 %v2995_v22, %v2825_v29 }
 0x1ca   :  { %v4059_v33 = vsub.f32 %v4058_v27, %v2525_v38  ;;  %v3031_v27 = vmul.f32 %v2649_v59, %v4062_v19  ;;  %v3059_v19 = vmul.f32 %v2995_v22, %v2681_v8  ;;  %v3087_v8 = vmul.f32 %v2995_v22, %v2723_v39 }
 0x1cb   :  { %v3001_v44 = vmul.f32 %v2649_v59, %v4056_v48  ;;  %v3019_v41 = vmul.f32 %v2649_v59, %v4060_v61  ;;  %v4061_v48 = vsub.f32 %v3978_v15, %v2525_v38  ;;  %v4064_v61 = vsub.f32 %v3981_v53, %v2525_v38 }
 0x1cc   :  { %v3013_v47 = vmul.f32 %v2649_v59, %v4059_v33  ;;  %v4063_v33 = vsub.f32 %v3980_v2, %v2525_v38  ;;  %v3055_v2 = vmul.f32 %v2995_v22, %v2675_v35  ;;  %v3067_v38 = vmul.f32 %v2995_v22, %v2693_v18 }
 0x1cd   :  { %v3025_v6 = vmul.f32 %v2649_v59, %v4061_v48  ;;  %v3043_v15 = vmul.f32 %v2649_v59, %v4064_v61  ;;  %v3047_v48 = vmul.f32 %v2995_v22, %v2663_v23  ;;  %v3075_v23 = vmul.f32 %v2995_v22, %v2705_v30  ;;  %v4072_v61 = vld [vmem:[#allocation10_spill] sm:$0xff] }
 0x1ce   :  { %v3037_v4 = vmul.f32 %v2649_v59, %v4063_v33  ;;  %v3063_v59 = vmul.f32 %v2995_v22, %v2687_v7  ;;  %v3079_v53 = vmul.f32 %v2995_v22, %v2711_v26  ;;  %v3083_v35 = vmul.f32 %v2995_v22, %v2717_v43  ;;  %v4070_v33 = vld [vmem:[#allocation9_spill] sm:$0xff] }
 0x1cf   :  { %v3091_v7 = vmul.f32 %v2995_v22, %v2729_v56  ;;  %v3095_v18 = vmul.f32 %v2995_v22, %v2735_v52  ;;  %v3103_v30 = vmul.f32 %v2995_v22, %v2747_v1  ;;  %v3107_v26 = vmul.f32 %v2995_v22, %v2753_v25 }
 0x1d0   :  { %v3111_v43 = vmul.f32 %v2995_v22, %v2759_v21  ;;  %v3115_v39 = vmul.f32 %v2995_v22, %v2765_v42  ;;  %v3119_v56 = vmul.f32 %v2995_v22, %v2771_v37  ;;  %v3123_v52 = vmul.f32 %v2995_v22, %v2777_v60 }
 0x1d1   :  { %v3131_v1 = vmul.f32 %v2995_v22, %v2789_v17  ;;  %v3135_v25 = vmul.f32 %v2995_v22, %v2795_v11  ;;  %v3139_v21 = vmul.f32 %v2995_v22, %v2801_v40  ;;  %v3143_v42 = vmul.f32 %v2995_v22, %v2807_v34 }
 0x1d2   :  { %v3147_v37 = vmul.f32 %v2995_v22, %v2813_v63  ;;  %v3151_v60 = vmul.f32 %v2995_v22, %v2819_v55  ;;  %v3159_v17 = vmul.f32 %v2995_v22, %v2831_v20  ;;  %v3163_v11 = vmul.f32 %v2995_v22, %v2837_v57 }
 0x1d3   :  { %v3167_v40 = vmul.f32 %v2995_v22, %v2843_v49  ;;  %v3171_v34 = vmul.f32 %v2995_v22, %v2849_v31  ;;  %v3175_v63 = vmul.f32 %v2995_v22, %v2855_v12  ;;  %v3179_v55 = vmul.f32 %v2995_v22, %v2861_v3 }
 0x1d4   :  { %v3183_v29 = vmul.f32 %v2995_v22, %v2867_v51  ;;  %v3187_v20 = vmul.f32 %v2995_v22, %v2873_v14  ;;  %v3191_v57 = vmul.f32 %v2995_v22, %v2879_v46  ;;  %v3195_v49 = vmul.f32 %v2995_v22, %v2885_v32  ;;  %v4066_v32 = vld [vmem:[#allocation17_spill] sm:$0xff] }
 0x1d5   :  { %v3199_v31 = vmul.f32 %v2995_v22, %v2891_v45  ;;  %v3203_v12 = vmul.f32 %v2995_v22, %v2897_v58  ;;  %v3207_v3 = vmul.f32 %v2995_v22, %v2903_v50  ;;  %v3211_v51 = vmul.f32 %v2995_v22, %v2909_v28  ;;  %v4068_v58 = vld [vmem:[#allocation18_spill] sm:$0xff] }
 0x1d6   :  { %v3215_v14 = vmul.f32 %v2995_v22, %v2915_v24  ;;  %v3219_v46 = vmul.f32 %v2995_v22, %v2921_v62  ;;  %v3223_v45 = vmul.f32 %v2995_v22, %v4066_v32  ;;  %v3227_v50 = vmul.f32 %v2995_v22, %v4068_v58 }
 0x1d7   :  { %v3231_v28 = vmul.f32 %v2995_v22, %v4070_v33  ;;  %v3235_v24 = vmul.f32 %v2995_v22, %v4072_v61  ;;  %v3243_v32 = vmul.f32 %v2995_v22, %v2957_v36 }
 0x1d8   :  { %4065 = vst [vmem:[#allocation23_spill] sm:$0xff] %v3215_v14  ;;  %4067 = vst [vmem:[#allocation27_spill] sm:$0xff] %v3223_v45  ;;  %v4073_v14 = vld [vmem:[#allocation11_spill] sm:$0xff]  ;;  %v4076_v45 = vld [vmem:[#allocation12_spill] sm:$0xff] }
 0x1d9   :  { %4069 = vst [vmem:[#allocation29_spill] sm:$0xff] %v3227_v50  ;;  %4071 = vst [vmem:[#allocation32_spill] sm:$0xff] %v3231_v28  ;;  %v3239_v62 = vmul.f32 %v2995_v22, %v4073_v14  ;;  %v3247_v58 = vmul.f32 %v2995_v22, %v4076_v45  ;;  %v4078_v50 = vld [vmem:[#allocation13_spill] sm:$0xff]  ;;  %v4079_v28 = vld [vmem:[#allocation14_spill] sm:$0xff]  ;;  %v3259_v14 = vmul.f32 %v2995_v22, %v2981_v9 }
 0x1da   :  { %4075 = vst [vmem:[#allocation34_spill] sm:$0xff] %v3243_v32  ;;  %v3251_v33 = vmul.f32 %v2995_v22, %v4078_v50  ;;  %v3255_v61 = vmul.f32 %v2995_v22, %v4079_v28  ;;  %v4081_v32 = vld [vmem:[#allocation16_spill] sm:$0xff]  ;;  %v3273_v50 = vmul.f32 %v2995_v22, %v3001_v44  ;;  %v3277_v28 = vmul.f32 %v2995_v22, %v3007_v0 }
 0x1db   :  { %4074 = vst [vmem:[#allocation31_spill] sm:$0xff] %v3239_v62  ;;  %4077 = vst [vmem:[#allocation33_spill] sm:$0xff] %v3247_v58  ;;  %v4080_v62 = vld [vmem:[#allocation15_spill] sm:$0xff]  ;;  %v3267_v45 = vmul.f32 %v2995_v22, %v4081_v32  ;;  %v3269_v58 = vld [vmem:[#allocation6] ss:$0 sm:$0xff]  ;;  %v3281_v9 = vmul.f32 %v2995_v22, %v3013_v47  ;;  %v3289_v32 = vmul.f32 %v2995_v22, %v3025_v6 }
 0x1dc   :  { %v3263_v36 = vmul.f32 %v2995_v22, %v4080_v62  ;;  %v3285_v62 = vmul.f32 %v2995_v22, %v3019_v41  ;;  %v3293_v44 = vmul.f32 %v2995_v22, %v3031_v27  ;;  %v3297_v0 = vmul.f32 %v2995_v22, %v3037_v4 }
 0x1dd   :  { %v3301_v47 = vmul.f32 %v2995_v22, %v3043_v15  ;;  %v3305_v41 = vadd.f32 %v3269_v58, %v3047_v48  ;;  %v3309_v6 = vadd.f32 %v3269_v58, %v3051_v10  ;;  %v3313_v27 = vadd.f32 %v3269_v58, %v3055_v2 }
 0x1de   :  { %v3317_v4 = vadd.f32 %v3269_v58, %v3059_v19  ;;  %v3321_v22 = vadd.f32 %v3269_v58, %v3063_v59  ;;  %v3325_v15 = vadd.f32 %v3269_v58, %v3067_v38  ;;  %v3329_v48 = vadd.f32 %v3269_v58, %v3071_v16 }
 0x1df   :  { %v3333_v10 = vadd.f32 %v3269_v58, %v3075_v23  ;;  %v3337_v2 = vadd.f32 %v3269_v58, %v3079_v53  ;;  %v3341_v19 = vadd.f32 %v3269_v58, %v3083_v35  ;;  %v3345_v59 = vadd.f32 %v3269_v58, %v3087_v8 }
 0x1e0   :  { %v3349_v38 = vadd.f32 %v3269_v58, %v3091_v7  ;;  %v3353_v16 = vadd.f32 %v3269_v58, %v3095_v18  ;;  %v3357_v23 = vadd.f32 %v3269_v58, %v3099_v13  ;;  %v3361_v53 = vadd.f32 %v3269_v58, %v3103_v30 }
 0x1e1   :  { %v3365_v35 = vadd.f32 %v3269_v58, %v3107_v26  ;;  %v3369_v8 = vadd.f32 %v3269_v58, %v3111_v43  ;;  %v3373_v7 = vadd.f32 %v3269_v58, %v3115_v39  ;;  %v3377_v18 = vadd.f32 %v3269_v58, %v3119_v56 }
 0x1e2   :  { %v3381_v13 = vadd.f32 %v3269_v58, %v3123_v52  ;;  %v3385_v30 = vadd.f32 %v3269_v58, %v3127_v5  ;;  %v3389_v26 = vadd.f32 %v3269_v58, %v3131_v1  ;;  %v3393_v43 = vadd.f32 %v3269_v58, %v3135_v25 }
 0x1e3   :  { %v3397_v39 = vadd.f32 %v3269_v58, %v3139_v21  ;;  %v3401_v56 = vadd.f32 %v3269_v58, %v3143_v42  ;;  %v3405_v52 = vadd.f32 %v3269_v58, %v3147_v37  ;;  %v3409_v5 = vadd.f32 %v3269_v58, %v3151_v60 }
 0x1e4   :  { %v3413_v1 = vadd.f32 %v3269_v58, %v3155_v54  ;;  %v3417_v25 = vadd.f32 %v3269_v58, %v3159_v17  ;;  %v3421_v21 = vadd.f32 %v3269_v58, %v3163_v11  ;;  %v3425_v42 = vadd.f32 %v3269_v58, %v3167_v40 }
 0x1e5   :  { %v3429_v37 = vadd.f32 %v3269_v58, %v3171_v34  ;;  %v3433_v60 = vadd.f32 %v3269_v58, %v3175_v63  ;;  %v3437_v54 = vadd.f32 %v3269_v58, %v3179_v55  ;;  %v3441_v17 = vadd.f32 %v3269_v58, %v3183_v29 }
 0x1e6   :  { %v3445_v11 = vadd.f32 %v3269_v58, %v3187_v20  ;;  %v3449_v40 = vadd.f32 %v3269_v58, %v3191_v57  ;;  %v3453_v34 = vadd.f32 %v3269_v58, %v3195_v49  ;;  %v3457_v63 = vadd.f32 %v3269_v58, %v3199_v31  ;;  %v4085_v57 = vld [vmem:[#allocation23_spill] sm:$0xff] }
 0x1e7   :  { %v3461_v55 = vadd.f32 %v3269_v58, %v3203_v12  ;;  %v3465_v29 = vadd.f32 %v3269_v58, %v3207_v3  ;;  %v3469_v20 = vadd.f32 %v3269_v58, %v3211_v51  ;;  %v3473_v49 = vadd.f32 %v3269_v58, %v4085_v57 }
 0x1e8   :  { %4082 = vst [vmem:[#allocation20_spill] sm:$0xff] %v3457_v63  ;;  %v3477_v31 = vadd.f32 %v3269_v58, %v3219_v46  ;;  %v4088_v63 = vld [vmem:[#allocation27_spill] sm:$0xff]  ;;  %v3493_v57 = vadd.f32 %v3269_v58, %v3235_v24  ;;  %v3513_v24 = vadd.f32 %v3269_v58, %v3255_v61  ;;  %v3533_v61 = vadd.f32 %v3269_v58, %v3277_v28 }
 0x1e9   :  { %4083 = vst [vmem:[#allocation19_spill] sm:$0xff] %v3461_v55  ;;  %4084 = vst [vmem:[#allocation22_spill] sm:$0xff] %v3465_v29  ;;  %v3481_v12 = vadd.f32 %v3269_v58, %v4088_v63  ;;  %v4090_v55 = vld [vmem:[#allocation29_spill] sm:$0xff]  ;;  %v4091_v29 = vld [vmem:[#allocation32_spill] sm:$0xff]  ;;  %v3553_v28 = vadd.f32 %v3269_v58, %v3297_v0  ;;  %v1322_v0 = vmax.f32 %v3333_v10, 0.0  ;;  %v1333_v10 = vmax.f32 %v3377_v18, 0.0 }
 0x1ea   :  { %4086 = vst [vmem:[#allocation21_spill] sm:$0xff] %v3473_v49  ;;  %4087 = vst [vmem:[#allocation24_spill] sm:$0xff] %v3477_v31  ;;  %v3485_v3 = vadd.f32 %v3269_v58, %v4090_v55  ;;  %v3489_v51 = vadd.f32 %v3269_v58, %v4091_v29  ;;  %v4092_v49 = vld [vmem:[#allocation31_spill] sm:$0xff]  ;;  %v4093_v31 = vld [vmem:[#allocation34_spill] sm:$0xff]  ;;  %v3509_v29 = vadd.f32 %v3269_v58, %v3251_v33  ;;  %v1344_v18 = vmax.f32 %v3421_v21, 0.0 }
 0x1eb   :  { %4089 = vst [vmem:[#allocation26_spill] sm:$0xff] %v3481_v12  ;;  %v3497_v46 = vadd.f32 %v3269_v58, %v4092_v49  ;;  %v3501_v63 = vadd.f32 %v3269_v58, %v4093_v31  ;;  %v4094_v12 = vld [vmem:[#allocation33_spill] sm:$0xff]  ;;  %v3517_v49 = vadd.f32 %v3269_v58, %v3259_v14  ;;  %v3521_v31 = vadd.f32 %v3269_v58, %v3263_v36 }
 0x1ec   :  { %v3505_v55 = vadd.f32 %v3269_v58, %v4094_v12  ;;  %v3525_v12 = vadd.f32 %v3269_v58, %v3267_v45  ;;  %v3529_v33 = vadd.f32 %v3269_v58, %v3273_v50  ;;  %v3537_v14 = vadd.f32 %v3269_v58, %v3281_v9  ;;  %4099 = vst [vmem:[#allocation18_spill] sm:$0xff] %v3553_v28 }
 0x1ed   :  { %v3541_v36 = vadd.f32 %v3269_v58, %v3285_v62  ;;  %v3545_v45 = vadd.f32 %v3269_v58, %v3289_v32  ;;  %v3549_v50 = vadd.f32 %v3269_v58, %v3293_v44  ;;  %v3557_v9 = vadd.f32 %v3269_v58, %v3301_v47  ;;  %1386 = vst.msk [vmem:[%s3883_s4 + $0x38] sm:$0xff] %vm707_vm2, %v1322_v0 }
 0x1ee   :  { %4095 = vst [vmem:[#allocation25_spill] sm:$0xff] %v3537_v14  ;;  %v1315_v14 = vmax.f32 %v3305_v41, 0.0  ;;  %v1316_v62 = vmax.f32 %v3309_v6, 0.0  ;;  %v1318_v32 = vmax.f32 %v3317_v4, 0.0  ;;  %v1320_v44 = vmax.f32 %v3325_v15, 0.0  ;;  %1397 = vst.msk [vmem:[%s3883_s4 + $0x90] sm:$0xff] %vm707_vm2, %v1333_v10 }
 0x1ef   :  { %4096 = vst [vmem:[#allocation28_spill] sm:$0xff] %v3541_v36  ;;  %4097 = vst [vmem:[#allocation30_spill] sm:$0xff] %v3545_v45  ;;  %v1317_v36 = vmax.f32 %v3313_v27, 0.0  ;;  %v1319_v45 = vmax.f32 %v3321_v22, 0.0  ;;  %v1323_v28 = vmax.f32 %v3337_v2, 0.0  ;;  %v1324_v58 = vmax.f32 %v3341_v19, 0.0 }
 0x1f0   :  { %4098 = vst [vmem:[#allocation17_spill] sm:$0xff] %v3549_v50  ;;  %v1321_v50 = vmax.f32 %v3329_v48, 0.0  ;;  %v1325_v47 = vmax.f32 %v3345_v59, 0.0  ;;  %v1326_v41 = vmax.f32 %v3349_v38, 0.0  ;;  %1379 = vst.msk [vmem:[%s3883_s4] sm:$0xff] %vm707_vm2, %v1315_v14  ;;  %v1327_v6 = vmax.f32 %v3353_v16, 0.0 }
 0x1f1   :  { %1380 = vst.msk [vmem:[%s3883_s4 + $0x8] sm:$0xff] %vm707_vm2, %v1316_v62  ;;  %1381 = vst.msk [vmem:[%s3883_s4 + $0x10] sm:$0xff] %vm707_vm2, %v1317_v36  ;;  %v1328_v27 = vmax.f32 %v3357_v23, 0.0  ;;  %v1329_v4 = vmax.f32 %v3361_v53, 0.0  ;;  %v1330_v22 = vmax.f32 %v3365_v35, 0.0  ;;  %v1331_v15 = vmax.f32 %v3369_v8, 0.0 }
 0x1f2   :  { %1382 = vst.msk [vmem:[%s3883_s4 + $0x18] sm:$0xff] %vm707_vm2, %v1318_v32  ;;  %1383 = vst.msk [vmem:[%s3883_s4 + $0x20] sm:$0xff] %vm707_vm2, %v1319_v45  ;;  %v1332_v48 = vmax.f32 %v3373_v7, 0.0  ;;  %v1334_v2 = vmax.f32 %v3381_v13, 0.0  ;;  %v1335_v19 = vmax.f32 %v3385_v30, 0.0  ;;  %v1336_v59 = vmax.f32 %v3389_v26, 0.0 }
 0x1f3   :  { %1384 = vst.msk [vmem:[%s3883_s4 + $0x28] sm:$0xff] %vm707_vm2, %v1320_v44  ;;  %1385 = vst.msk [vmem:[%s3883_s4 + $0x30] sm:$0xff] %vm707_vm2, %v1321_v50  ;;  %v1337_v38 = vmax.f32 %v3393_v43, 0.0  ;;  %v1338_v16 = vmax.f32 %v3397_v39, 0.0  ;;  %v1339_v23 = vmax.f32 %v3401_v56, 0.0  ;;  %v1340_v53 = vmax.f32 %v3405_v52, 0.0 }
 0x1f4   :  { %1387 = vst.msk [vmem:[%s3883_s4 + $0x40] sm:$0xff] %vm707_vm2, %v1323_v28  ;;  %1388 = vst.msk [vmem:[%s3883_s4 + $0x48] sm:$0xff] %vm707_vm2, %v1324_v58  ;;  %v1341_v35 = vmax.f32 %v3409_v5, 0.0  ;;  %v1342_v8 = vmax.f32 %v3413_v1, 0.0  ;;  %v1343_v7 = vmax.f32 %v3417_v25, 0.0  ;;  %v1345_v13 = vmax.f32 %v3425_v42, 0.0 }
 0x1f5   :  { %1389 = vst.msk [vmem:[%s3883_s4 + $0x50] sm:$0xff] %vm707_vm2, %v1325_v47  ;;  %1390 = vst.msk [vmem:[%s3883_s4 + $0x58] sm:$0xff] %vm707_vm2, %v1326_v41  ;;  %v1346_v30 = vmax.f32 %v3429_v37, 0.0  ;;  %v1347_v26 = vmax.f32 %v3433_v60, 0.0  ;;  %v1348_v43 = vmax.f32 %v3437_v54, 0.0  ;;  %v1349_v39 = vmax.f32 %v3441_v17, 0.0 }
 0x1f6   :  { %1391 = vst.msk [vmem:[%s3883_s4 + $0x60] sm:$0xff] %vm707_vm2, %v1327_v6  ;;  %1392 = vst.msk [vmem:[%s3883_s4 + $0x68] sm:$0xff] %vm707_vm2, %v1328_v27  ;;  %v1350_v56 = vmax.f32 %v3445_v11, 0.0  ;;  %v1351_v52 = vmax.f32 %v3449_v40, 0.0  ;;  %v1352_v5 = vmax.f32 %v3453_v34, 0.0  ;;  %v4100_v1 = vld [vmem:[#allocation20_spill] sm:$0xff] }
 0x1f7   :  { %1393 = vst.msk [vmem:[%s3883_s4 + $0x70] sm:$0xff] %vm707_vm2, %v1329_v4  ;;  %1394 = vst.msk [vmem:[%s3883_s4 + $0x78] sm:$0xff] %vm707_vm2, %v1330_v22  ;;  %v1353_v25 = vmax.f32 %v4100_v1, 0.0  ;;  %v4101_v21 = vld [vmem:[#allocation19_spill] sm:$0xff]  ;;  %v4102_v37 = vld [vmem:[#allocation22_spill] sm:$0xff]  ;;  %v1356_v54 = vmax.f32 %v3469_v20, 0.0 }
 0x1f8   :  { %1395 = vst.msk [vmem:[%s3883_s4 + $0x80] sm:$0xff] %vm707_vm2, %v1331_v15  ;;  %1396 = vst.msk [vmem:[%s3883_s4 + $0x88] sm:$0xff] %vm707_vm2, %v1332_v48  ;;  %v1354_v42 = vmax.f32 %v4101_v21, 0.0  ;;  %v1355_v60 = vmax.f32 %v4102_v37, 0.0  ;;  %v4103_v17 = vld [vmem:[#allocation21_spill] sm:$0xff]  ;;  %v4104_v40 = vld [vmem:[#allocation24_spill] sm:$0xff] }
 0x1f9   :  { %1398 = vst.msk [vmem:[%s3883_s4 + $0x98] sm:$0xff] %vm707_vm2, %v1334_v2  ;;  %1399 = vst.msk [vmem:[%s3883_s4 + $0xa0] sm:$0xff] %vm707_vm2, %v1335_v19  ;;  %v1357_v11 = vmax.f32 %v4103_v17, 0.0  ;;  %v1358_v34 = vmax.f32 %v4104_v40, 0.0  ;;  %v4105_v20 = vld [vmem:[#allocation26_spill] sm:$0xff]  ;;  %v1360_v36 = vmax.f32 %v3485_v3, 0.0 }
 0x1fa   :  { %1400 = vst.msk [vmem:[%s3883_s4 + $0xa8] sm:$0xff] %vm707_vm2, %v1336_v59  ;;  %1401 = vst.msk [vmem:[%s3883_s4 + $0xb0] sm:$0xff] %vm707_vm2, %v1337_v38  ;;  %v1359_v14 = vmax.f32 %v4105_v20, 0.0  ;;  %v1361_v45 = vmax.f32 %v3489_v51, 0.0  ;;  %v1362_v50 = vmax.f32 %v3493_v57, 0.0  ;;  %v1363_v3 = vmax.f32 %v3497_v46, 0.0 }
 0x1fb   :  { %1402 = vst.msk [vmem:[%s3883_s4 + $0xb8] sm:$0xff] %vm707_vm2, %v1338_v16  ;;  %1403 = vst.msk [vmem:[%s3883_s4 + $0xc0] sm:$0xff] %vm707_vm2, %v1339_v23  ;;  %v1364_v51 = vmax.f32 %v3501_v63, 0.0  ;;  %v1365_v57 = vmax.f32 %v3505_v55, 0.0  ;;  %v1366_v28 = vmax.f32 %v3509_v29, 0.0  ;;  %v1367_v46 = vmax.f32 %v3513_v24, 0.0 }
 0x1fc   :  { %1404 = vst.msk [vmem:[%s3883_s4 + $0xc8] sm:$0xff] %vm707_vm2, %v1340_v53  ;;  %1405 = vst.msk [vmem:[%s3883_s4 + $0xd0] sm:$0xff] %vm707_vm2, %v1341_v35  ;;  %v1368_v63 = vmax.f32 %v3517_v49, 0.0  ;;  %v1369_v55 = vmax.f32 %v3521_v31, 0.0  ;;  %v1370_v29 = vmax.f32 %v3525_v12, 0.0  ;;  %v1371_v24 = vmax.f32 %v3529_v33, 0.0 }
 0x1fd   :  { %1406 = vst.msk [vmem:[%s3883_s4 + $0xd8] sm:$0xff] %vm707_vm2, %v1342_v8  ;;  %1407 = vst.msk [vmem:[%s3883_s4 + $0xe0] sm:$0xff] %vm707_vm2, %v1343_v7  ;;  %v1372_v49 = vmax.f32 %v3533_v61, 0.0  ;;  %v4106_v31 = vld [vmem:[#allocation25_spill] sm:$0xff]  ;;  %v4107_v62 = vld [vmem:[#allocation28_spill] sm:$0xff]  ;;  %v1378_v41 = vmax.f32 %v3557_v9, 0.0 }
 0x1fe   :  { %1408 = vst.msk [vmem:[%s3883_s4 + $0xe8] sm:$0xff] %vm707_vm2, %v1344_v18  ;;  %1409 = vst.msk [vmem:[%s3883_s4 + $0xf0] sm:$0xff] %vm707_vm2, %v1345_v13  ;;  %v1373_v12 = vmax.f32 %v4106_v31, 0.0  ;;  %v1374_v32 = vmax.f32 %v4107_v62, 0.0  ;;  %v4108_v33 = vld [vmem:[#allocation30_spill] sm:$0xff]  ;;  %v4109_v44 = vld [vmem:[#allocation17_spill] sm:$0xff] }
 0x1ff   :  { %1410 = vst.msk [vmem:[%s3883_s4 + $0xf8] sm:$0xff] %vm707_vm2, %v1346_v30  ;;  %1411 = vst.msk [vmem:[%s3883_s4 + $0x100] sm:$0xff] %vm707_vm2, %v1347_v26  ;;  %v1375_v61 = vmax.f32 %v4108_v33, 0.0  ;;  %v1376_v0 = vmax.f32 %v4109_v44, 0.0  ;;  %v4110_v58 = vld [vmem:[#allocation18_spill] sm:$0xff] }
 0x200   :  { %1412 = vst.msk [vmem:[%s3883_s4 + $0x108] sm:$0xff] %vm707_vm2, %v1348_v43  ;;  %1413 = vst.msk [vmem:[%s3883_s4 + $0x110] sm:$0xff] %vm707_vm2, %v1349_v39  ;;  %v1377_v47 = vmax.f32 %v4110_v58, 0.0 }
 0x201   :  { %1414 = vst.msk [vmem:[%s3883_s4 + $0x118] sm:$0xff] %vm707_vm2, %v1350_v56  ;;  %1415 = vst.msk [vmem:[%s3883_s4 + $0x120] sm:$0xff] %vm707_vm2, %v1351_v52 }
 0x202   :  { %1416 = vst.msk [vmem:[%s3883_s4 + $0x128] sm:$0xff] %vm707_vm2, %v1352_v5  ;;  %1417 = vst.msk [vmem:[%s3883_s4 + $0x130] sm:$0xff] %vm707_vm2, %v1353_v25 }
 0x203   :  { %1418 = vst.msk [vmem:[%s3883_s4 + $0x138] sm:$0xff] %vm707_vm2, %v1354_v42  ;;  %1419 = vst.msk [vmem:[%s3883_s4 + $0x140] sm:$0xff] %vm707_vm2, %v1355_v60 }
 0x204   :  { %1420 = vst.msk [vmem:[%s3883_s4 + $0x148] sm:$0xff] %vm707_vm2, %v1356_v54  ;;  %1421 = vst.msk [vmem:[%s3883_s4 + $0x150] sm:$0xff] %vm707_vm2, %v1357_v11 }
 0x205   :  { %1422 = vst.msk [vmem:[%s3883_s4 + $0x158] sm:$0xff] %vm707_vm2, %v1358_v34  ;;  %1423 = vst.msk [vmem:[%s3883_s4 + $0x160] sm:$0xff] %vm707_vm2, %v1359_v14 }
 0x206   :  { %1424 = vst.msk [vmem:[%s3883_s4 + $0x168] sm:$0xff] %vm707_vm2, %v1360_v36  ;;  %1425 = vst.msk [vmem:[%s3883_s4 + $0x170] sm:$0xff] %vm707_vm2, %v1361_v45 }
 0x207   :  { %1426 = vst.msk [vmem:[%s3883_s4 + $0x178] sm:$0xff] %vm707_vm2, %v1362_v50  ;;  %1427 = vst.msk [vmem:[%s3883_s4 + $0x180] sm:$0xff] %vm707_vm2, %v1363_v3 }
 0x208   :  { %1428 = vst.msk [vmem:[%s3883_s4 + $0x188] sm:$0xff] %vm707_vm2, %v1364_v51  ;;  %1429 = vst.msk [vmem:[%s3883_s4 + $0x190] sm:$0xff] %vm707_vm2, %v1365_v57 }
 0x209   :  { %1430 = vst.msk [vmem:[%s3883_s4 + $0x198] sm:$0xff] %vm707_vm2, %v1366_v28  ;;  %1431 = vst.msk [vmem:[%s3883_s4 + $0x1a0] sm:$0xff] %vm707_vm2, %v1367_v46 }
 0x20a   :  { %1432 = vst.msk [vmem:[%s3883_s4 + $0x1a8] sm:$0xff] %vm707_vm2, %v1368_v63  ;;  %1433 = vst.msk [vmem:[%s3883_s4 + $0x1b0] sm:$0xff] %vm707_vm2, %v1369_v55 }
 0x20b   :  { %1434 = vst.msk [vmem:[%s3883_s4 + $0x1b8] sm:$0xff] %vm707_vm2, %v1370_v29  ;;  %1435 = vst.msk [vmem:[%s3883_s4 + $0x1c0] sm:$0xff] %vm707_vm2, %v1371_v24 }
 0x20c   :  { %1436 = vst.msk [vmem:[%s3883_s4 + $0x1c8] sm:$0xff] %vm707_vm2, %v1372_v49  ;;  %1437 = vst.msk [vmem:[%s3883_s4 + $0x1d0] sm:$0xff] %vm707_vm2, %v1373_v12 }
 0x20d   :  { %1438 = vst.msk [vmem:[%s3883_s4 + $0x1d8] sm:$0xff] %vm707_vm2, %v1374_v32  ;;  %1439 = vst.msk [vmem:[%s3883_s4 + $0x1e0] sm:$0xff] %vm707_vm2, %v1375_v61 }
 0x20e   :  { %1440 = vst.msk [vmem:[%s3883_s4 + $0x1e8] sm:$0xff] %vm707_vm2, %v1376_v0  ;;  %1441 = vst.msk [vmem:[%s3883_s4 + $0x1f0] sm:$0xff] %vm707_vm2, %v1377_v47 }
 0x20f   :  { %1442 = vst.msk [vmem:[%s3883_s4 + $0x1f8] sm:$0xff] %vm707_vm2, %v1378_v41 }
 0x210   :  { %1447 = vsyncpa [#allocation3], 1 }
 0x211   :  { %1448 = vsyncpa [#allocation5], 1 }

// kernel: chaosdonkey06_ae_forward.3
= control target key start
LH: loop header
LB: loop body
LE: loop exit
PB: predicated region body
PF: predicated region fallthrough
CT: control target
= control target key end

     0   :  { %14 = vsyncpa [#allocation3], 0  ;;  %s10835_s0 = inlined_call_operand.vmem [shape: f32[2,16384], index: 0, kind: input, shape index: {}]   ;;  %s10836_s1 = inlined_call_operand.hbm [shape: bf16[16384,128], index: 1, kind: input, shape index: {}]   ;;  %s10837_s2 = inlined_call_operand.hbm [shape: f32[1,128], index: 2, kind: input, shape index: {}]   ;;  %s10838_s3 = inlined_call_operand.hbm [shape: f32[128,256], index: 3, kind: input, shape index: {}]   ;;  %s10839_s4 = inlined_call_operand.hbm [shape: f32[1,256], index: 4, kind: input, shape index: {}]   ;;  %s10840_s5 = inlined_call_operand.hbm [shape: bf16[256,1024], index: 5, kind: input, shape index: {}]   ;;  %s10841_s6 = inlined_call_operand.hbm [shape: f32[1,1024], index: 6, kind: input, shape index: {}]   ;;  %s10842_s7 = inlined_call_operand.hbm [shape: f32[2,128], index: 7, kind: output, shape index: {0}]   ;;  %s10843_s8 = inlined_call_operand.hbm [shape: f32[2,1024], index: 8, kind: output, shape index: {1}]  }
   0x1   :  { %16 = vsyncpa [#allocation3 + $0x1], 0 }
   0x2   :  { %17 = vsyncpa [#allocation6], 0 }
   0x3   :  { %18 = vsyncpa [#allocation9], 0 }
   0x4   :  { %19 = vsyncpa [#allocation12], 0 }
   0x5   :  { %20 = vsyncpa [#allocation4], 0 }
   0x6   :  { %21 = vsyncpa [#allocation15], 0  ;;  %s9984_s27 = smov 0   ;;  %s9986_s28 = smov 0  }
   0x7   :  { %s9988_s29 = smov 0   ;;  %s9990_s30 = smov 0  }
   0x8 LB: > { %s9922_s9 = smov [#allocation5]   ;;  %s10005_s11 = sadd.s32 4294967295, %s9920_s30   ;;  %s9920_s30 = sphi %s9990_s30, %s10865_s30   ;;  %s9916_s29 = sphi %s9988_s29, %s10864_s29   ;;  %s9912_s28 = sphi %s9986_s28, %s10863_s28   ;;  %s9908_s27 = sphi %s9984_s27, %s10862_s27  }
   0x9   : > { %s244_s10 = sshll.u32 %s9922_s9, 4  ;;  %p7602_p0 = scmp.ge.s32.totalorder %s9920_s30, 1  ;;  %s245_s10 = int_to_ptr.vmem [resolvable:$true] %s244_s10 }
   0xa   : > { %p10844_p1 = scmp.eq.s32.totalorder %s10005_s11, 0  ;;  %p231_p2 = scmp.lt.s32.totalorder %s9920_s30, 3 }
   0xb   : > { %s9923_s13 = smov [#allocation8]   ;;  %s9924_s15 = smov [#allocation7]  }
   0xc   : > { %p10011_p4 = pnand %p7602_p0, %p231_p2  ;;  %s268_s14 = sshll.u32 %s9923_s13, 4  ;;  %s269_s14 = int_to_ptr.vmem [resolvable:$true] %s268_s14 }
   0xd   : > { %s254_s16 = sshll.u32 %s9924_s15, 4  ;;  %s9671_s19 = scalar_lea.vmem %s245_s10, 16  ;;  %s10023_s16 = int_to_ptr.vmem [resolvable:$true] %s254_s16 }
   0xe   : > { %s10847_s12 = scalar_select %p10011_p4, 1, 0 }
   0xf   : > { %p9013_p5 = pneg %p10011_p4  ;;  %p9672_p8 = scmp.ne.s32.totalorder %s245_s10, %s9671_s19 }
  0x10   : > { %s9678_s20 = scalar_lea.vmem %s245_s10, 32  ;;  %p9679_p11 = scmp.lt.s32.totalorder %s245_s10, %s245_s10 }
  0x11   : > { %p10019_p6 = pnand %p9013_p5, %p10844_p1  ;;  %p9680_p12 = scmp.lt.s32.totalorder %s9678_s20, %s9671_s19 }
  0x13   : > { %p10027_p7 = pneg %p10019_p6  ;;  %p9681_p13 = por %p9680_p12, %p9679_p11 }
  0x15   : > { %p9674_p9 = pnand %p9672_p8, %p10027_p7 }
  0x17   : > { %p9675_p10 = pneg %p9674_p9 }
  0x19   : > { %p9682_p0 = pnand %p9681_p13, %p9675_p10 }
  0x1b   : > { %9685 = shalt.err (!%p9682_p0)
}
  0x1c   : > { %9016 = dma.hbm_to_vmem [thread:$0]  (!%p10019_p6), %s10837_s2, 16, %s245_s10, [#allocation6]  }
  0x1d   : > { %s9697_s23 = scalar_lea.vmem %s269_s14, 32  ;;  %p9705_p8 = scmp.lt.s32.totalorder %s269_s14, %s269_s14 }
  0x1e   : > { %p9698_p2 = scmp.ne.s32.totalorder %s269_s14, %s9697_s23  ;;  %p9706_p9 = scmp.lt.s32.totalorder %s9697_s23, %s9697_s23 }
  0x20   : > { %p9700_p5 = pnand %p9698_p2, %p10027_p7  ;;  %p9707_p1 = por %p9706_p9, %p9705_p8 }
  0x22   : > { %p9701_p3 = pneg %p9700_p5 }
  0x24   : > { %p9708_p4 = pnand %p9707_p1, %p9701_p3 }
  0x26   : > { %9711 = shalt.err (!%p9708_p4)
}
  0x27   : > { %9022 = dma.hbm_to_vmem [thread:$0]  (!%p10019_p6), %s10839_s4, 32, %s269_s14, [#allocation9]  }
  0x28   : > { %s9723_s26 = scalar_lea.vmem %s10023_s16, 4096  ;;  %p9731_p13 = scmp.lt.s32.totalorder %s10023_s16, %s10023_s16 }
  0x29   : > { %p9724_p10 = scmp.ne.s32.totalorder %s10023_s16, %s9723_s26  ;;  %p9732_p0 = scmp.lt.s32.totalorder %s9723_s26, %s9723_s26 }
  0x2b   : > { %p9726_p11 = pnand %p9724_p10, %p10027_p7  ;;  %p9733_p1 = por %p9732_p0, %p9731_p13 }
  0x2d   : > { %p9727_p12 = pneg %p9726_p11 }
  0x2f   : > { %p9734_p3 = pnand %p9733_p1, %p9727_p12 }
  0x31   : > { %9737 = shalt.err (!%p9734_p3)
}
  0x32   : > { %s9925_s9 = smov 256   ;;  %s9926_s10 = smov 16  }
  0x33   : > { %9019 = dma.hbm_to_vmem [thread:$0]  (!%p10019_p6), %s10838_s3, 4096, %s10023_s16, [#allocation6], %s9925_s9, %s9925_s9, %s9926_s10  }
  0x34   : > { %s9927_s14 = smov [#allocation10]  }
  0x35   : > { %s278_s19 = sshll.u32 %s9927_s14, 4  ;;  %s279_s19 = int_to_ptr.vmem [resolvable:$true] %s278_s19 }
  0x36   : > { %s9749_s20 = scalar_lea.vmem %s279_s19, 16384  ;;  %p9757_p8 = scmp.lt.s32.totalorder %s279_s19, %s279_s19 }
  0x37   : > { %p9750_p4 = scmp.ne.s32.totalorder %s279_s19, %s9749_s20  ;;  %p9758_p9 = scmp.lt.s32.totalorder %s9749_s20, %s9749_s20 }
  0x39   : > { %p9752_p2 = pnand %p9750_p4, %p10027_p7  ;;  %p9759_p10 = por %p9758_p9, %p9757_p8 }
  0x3b   : > { %p9753_p5 = pneg %p9752_p2 }
  0x3d   : > { %p9760_p11 = pnand %p9759_p10, %p9753_p5 }
  0x3f   : > { %9763 = shalt.err (!%p9760_p11)
}
  0x40   : > { %s9928_s21 = smov 512   ;;  %s9929_s22 = smov 32  }
  0x41   : > { %9025 = dma.hbm_to_vmem [thread:$0]  (!%p10019_p6), %s10840_s5, 16384, %s279_s19, [#allocation9], %s9928_s21, %s9928_s21, %s9929_s22  }
  0x42   : > { %s9930_s24 = smov [#allocation11]  }
  0x43   : > { %s292_s25 = sshll.u32 %s9930_s24, 4  ;;  %s293_s25 = int_to_ptr.vmem [resolvable:$true] %s292_s25 }
  0x44   : > { %s9775_s26 = scalar_lea.vmem %s293_s25, 128  ;;  %p9783_p1 = scmp.lt.s32.totalorder %s293_s25, %s293_s25 }
  0x45   : > { %p9776_p12 = scmp.ne.s32.totalorder %s293_s25, %s9775_s26  ;;  %p9784_p3 = scmp.lt.s32.totalorder %s9775_s26, %s9775_s26 }
  0x47   : > { %p9778_p13 = pnand %p9776_p12, %p10027_p7  ;;  %p9785_p4 = por %p9784_p3, %p9783_p1 }
  0x49   : > { %p9779_p0 = pneg %p9778_p13 }
  0x4b   : > { %p9786_p2 = pnand %p9785_p4, %p9779_p0 }
  0x4d   : > { %9789 = shalt.err (!%p9786_p2)
}
  0x4e   : > { %9028 = dma.hbm_to_vmem [thread:$0]  (!%p10019_p6), %s10841_s6, 128, %s293_s25, [#allocation12]  }
  0x4f   : > { %s10072_s18 = sadd.s32 1, %s9920_s30   ;;  %s60_s13 = sadd.s32 1, %s9916_s29 }
  0x50   : > { %s57_s17 = ssub.s32 %s9920_s30, %s10072_s18  ;;  %p67_p5 = scmp.ne.s32.totalorder %s9916_s29, %s9912_s28 }
  0x51   : > { %p58_p7 = scmp.eq.s32.totalorder %s57_s17, 0  ;;  %p68_p8 = scmp.eq.s32.totalorder %s9920_s30, 0 }
  0x52   : > { %p73_p9 = scmp.ne.s32.totalorder %s9912_s28, %s9908_s27  ;;  %p10850_p11 = scmp.eq.s32.totalorder %s10005_s11, 0 }
  0x53   : > { %s10083_s15 = scalar_select %p58_p7, %s9916_s29, %s60_s13  }
  0x54   : > { %p69_p10 = por %p68_p8, %p67_p5  ;;  %p10087_p12 = por %p10850_p11, %p73_p9 }
  0x55   : > { %p9038_p13 = scmp.lt.s32.totalorder %s9920_s30, 2  ;;  %s312_s19 = sand.u32 1, %s9916_s29  }
  0x56   : > { %s10851_s14 = scalar_select %p10087_p12, 1, 0 }
  0x57   : > { %s7609_s20 = sshll.u32 %s312_s19, 12  ;;  %s8278_s21 = sshll.u32 %s9920_s30, 16 }
  0x58   : > { %s10097_s16 = scalar_lea.hbm %s10836_s1, %s8278_s21  ;;  %s316_s27 = scalar_lea.vmem [#allocation2], %s7609_s20 }
  0x59   : > { %s323_s24 = sshll.u32 %s316_s27, 4  ;;  %p10101_p6 = pnand %p9038_p13, %p69_p10  ;;  %s10099_s24 = int_to_ptr.vmem [resolvable:$true] %s323_s24 }
  0x5a   : > { %s10105_s26 = scalar_lea.sflag [#allocation3], %s312_s19  ;;  %s9790_s30 = scalar_lea.hbm %s10097_s16, 65536 }
  0x5b   : > { %p9791_p0 = scmp.ne.s32.totalorder %s10097_s16, %s9790_s30  ;;  %p9792_p1 = pneg %p10101_p6 }
  0x5c   : > { %s9795_s17 = scalar_lea.hbm %s10836_s1, 131072  ;;  %p9796_p2 = scmp.lt.s32.totalorder %s10097_s16, %s10836_s1 }
  0x5d   : > { %p9793_p3 = pnand %p9792_p1, %p9791_p0  ;;  %p9797_p7 = scmp.lt.s32.totalorder %s9795_s17, %s9790_s30 }
  0x5f   : > { %p9794_p4 = pneg %p9793_p3  ;;  %p9798_p5 = por %p9797_p7, %p9796_p2 }
  0x61   : > { %p9799_p8 = pnand %p9798_p5, %p9794_p4 }
  0x63   : > { %9802 = shalt.err (!%p9799_p8)
}
  0x64   : > { %s9803_s19 = scalar_lea.vmem %s10099_s24, 65536  ;;  %s9931_s21 = smov [#allocation2]  }
  0x65   : > { %p9804_p9 = scmp.ne.s32.totalorder %s10099_s24, %s9803_s19  ;;  %s9808_s22 = sshll.u32 %s9931_s21, 4  ;;  %s9809_s22 = int_to_ptr.vmem [resolvable:$false] %s9808_s22 }
  0x66   : > { %s9810_s23 = scalar_lea.vmem %s9809_s22, 131072  ;;  %p9811_p13 = scmp.lt.s32.totalorder %s10099_s24, %s9809_s22 }
  0x67   : > { %p9806_p10 = pnand %p9804_p9, %p9792_p1  ;;  %p9812_p0 = scmp.lt.s32.totalorder %s9810_s23, %s9803_s19 }
  0x69   : > { %p9807_p11 = pneg %p9806_p10  ;;  %p9813_p3 = por %p9812_p0, %p9811_p13 }
  0x6b   : > { %p9814_p12 = pnand %p9813_p3, %p9807_p11 }
  0x6d   : > { %9817 = shalt.err (!%p9814_p12)
}
  0x6e   : > { %s9932_s27 = smov 64   ;;  %s9933_s30 = smov 4  }
  0x6f   : > { %9032 = dma.hbm_to_vmem [thread:$0]  (!%p10101_p6), %s10097_s16, 65536, %s10099_s24, %s10105_s26, %s9932_s27, %s9932_s27, %s9933_s30  }
  0x70   : > { %p10853_p1 = scmp.ne.s32.totalorder %s10847_s12, 0 }
  0x71   : > { %s337_s9 = sand.u32 (!%p10853_p1), 1, %s9912_s28   ;;  %p10854_p4 = scmp.ne.s32.totalorder (!%p10853_p1), %s10851_s14, 0 }
  0x72   : > { %335 = sbr.rel (%p10853_p1) target bundleno = 1721 (0x6b9), region = 48  ;;  %s7613_s10 = sshll.u32 (!%p10853_p1), %s337_s9, 12 }
  0x73   : > { %s338_s17 = scalar_lea.sflag (!%p10853_p1), [#allocation3], %s337_s9  ;;  %s10129_s13 = scalar_lea.vmem (!%p10853_p1), [#allocation2], %s7613_s10 }
  0x77   : > { %9883 = dma.done.wait (%p10854_p4), %s338_s17, 65536  }
  0x78   : > { %9885 = vsyncadd (%p10854_p4), %s338_s17, 4294901760  ;;  %p10855_p12 = scmp.eq.s32.totalorder %s10005_s11, 0 }
  0x7a   : > { %9887 = dma.done.wait (%p10855_p12), [#allocation6], 4112   ;;  %p10856_p6 = pmov %p10855_p12 }
  0x7c   : > { %9889 = vsyncadd (%p10856_p6), [#allocation6], 4294963184  ;;  %p10857_p2 = pmov %p10856_p6 }
  0x7e   : > { %9891 = dma.done.wait (%p10857_p2), [#allocation9], 16416   ;;  %p10858_p7 = pmov %p10857_p2 }
  0x7f   : > { %p10859_p5 = pmov %p10857_p2 }
  0x80   : > { %9893 = vsyncadd (%p10858_p7), [#allocation9], 4294950880 }
  0x81   : > { %9895 = dma.done.wait (%p10859_p5), [#allocation12], 128   ;;  %p10860_p8 = pmov %p10857_p2 }
  0x82   : > { %s7619_s12 = sshll.u32 %s10005_s11, 6  ;;  %p10861_p10 = scmp.ne.s32.totalorder %s10005_s11, 0 }
  0x83   : > { %9897 = vsyncadd (%p10860_p8), [#allocation12], 4294967168  ;;  %p395_p9 = scmp.lt.s32.totalorder %s7619_s12, 127 }
  0x84   : > { %405 = sbr.rel (%p10861_p10) target bundleno = 139 (0x8b), region = 76 }
  0x85   : > { %s10867_s12 = smov (!%p395_p9, %s7619_s12), 127 }
  0x86   : > { %s7620_s14 = sshll.u32 %s10867_s12, 1 }
  0x87   : > { %s10151_s25 = scalar_lea.vmem %s10835_s0, %s7620_s14 }
  0x89   : > { %v9934_v0 = vmov 0.0  }
  0x8a   : > { %406 = vst [vmem:[#allocation13] sm:$0x3] %v9934_v0 }
  0x8b PF: > { %v9096_v1 = vld [vmem:[%s10129_s13 + $0x78] sm:$0xff]   ;;  %v9100_v5 = vld [vmem:[%s10129_s13 + $0x70] sm:$0xff]   ;;  %v9104_v9 = vld [vmem:[%s10129_s13 + $0x68] sm:$0xff]   ;;  %v444_v29 = vlaneseq  ;;  %v9935_v37 = vmov 1983009808   ;;  %p8134_p11 = scmp.ne.s32.totalorder %s10005_s11, 1 }
  0x8c   : > { %v9097_v2 = vld [vmem:[%s10129_s13 + $0xf8] sm:$0xff]   ;;  %8279 = vmatprep.subr.bf16.mxu0 %v9096_v1  ;;  %v9101_v6 = vld [vmem:[%s10129_s13 + $0xf0] sm:$0xff]   ;;  %v9105_v10 = vld [vmem:[%s10129_s13 + $0xe8] sm:$0xff]   ;;  %v442_v38 = vunpack.c.l.s4 %v9935_v37 }
  0x8d   : > { %v9098_v3 = vld [vmem:[%s10129_s13 + $0x38] sm:$0xff]   ;;  %8301 = vmatprep.subr.bf16.mxu1 %v9097_v2  ;;  %v9102_v7 = vld [vmem:[%s10129_s13 + $0x30] sm:$0xff]   ;;  %v9106_v11 = vld [vmem:[%s10129_s13 + $0x28] sm:$0xff]   ;;  %v10187_v34 = vshrl.u32 %v444_v29, 7 }
  0x8e   : > { %v9099_v4 = vld [vmem:[%s10129_s13 + $0xb8] sm:$0xff]   ;;  %8280 = vmatpush3.bf16.msra.mxu0 %v9098_v3  ;;  %v9103_v8 = vld [vmem:[%s10129_s13 + $0xb0] sm:$0xff]   ;;  %v9107_v12 = vld [vmem:[%s10129_s13 + $0xa8] sm:$0xff]   ;;  %v443_v40 = vunpack.c.0.s8 %v442_v38 }
  0x8f   : > { %8302 = vmatpush3.bf16.msra.mxu1 %v9099_v4  ;;  %8281 = vmatprep.subr.bf16.mxu0 %v9100_v5  ;;  %v9108_v13 = vld [vmem:[%s10129_s13 + $0x60] sm:$0xff]   ;;  %v9112_v17 = vld [vmem:[%s10129_s13 + $0x58] sm:$0xff]   ;;  %v9116_v21 = vld [vmem:[%s10129_s13 + $0x50] sm:$0xff]  }
  0x90   : > { %8303 = vmatprep.subr.bf16.mxu1 %v9101_v6  ;;  %v9109_v14 = vld [vmem:[%s10129_s13 + $0xe0] sm:$0xff]   ;;  %v9113_v18 = vld [vmem:[%s10129_s13 + $0xd8] sm:$0xff]   ;;  %v9117_v22 = vld [vmem:[%s10129_s13 + $0xd0] sm:$0xff]   ;;  %v10193_v42 = vsub.s32 %v443_v40, %v10187_v34 }
  0x91   : > { %v9110_v15 = vld [vmem:[%s10129_s13 + $0x20] sm:$0xff]   ;;  %v9114_v19 = vld [vmem:[%s10129_s13 + $0x18] sm:$0xff]   ;;  %v9118_v23 = vld [vmem:[%s10129_s13 + $0x10] sm:$0xff]  }
  0x92   : > { %8282 = vmatpush3.bf16.msra.mxu0 %v9102_v7  ;;  %v9111_v16 = vld [vmem:[%s10129_s13 + $0xa0] sm:$0xff]   ;;  %v9115_v20 = vld [vmem:[%s10129_s13 + $0x98] sm:$0xff]   ;;  %v9119_v24 = vld [vmem:[%s10129_s13 + $0x90] sm:$0xff]  }
  0x93   : > { %8304 = vmatpush3.bf16.msra.mxu1 %v9103_v8  ;;  %8283 = vmatprep.subr.bf16.mxu0 %v9104_v9  ;;  %v9120_v25 = vld [vmem:[%s10129_s13 + $0x48] sm:$0xff]   ;;  %v9124_v30 = vld [vmem:[%s10129_s13 + $0x40] sm:$0xff]   ;;  %v9129_v36 = vld [vmem:[%s10129_s13 + $0x178] sm:$0xff]  }
  0x94   : > { %8305 = vmatprep.subr.bf16.mxu1 %v9105_v10  ;;  %v9121_v26 = vld [vmem:[%s10129_s13 + $0xc8] sm:$0xff]   ;;  %v9125_v31 = vld [vmem:[%s10129_s13 + $0xc0] sm:$0xff]   ;;  %v9130_v39 = vld [vmem:[%s10129_s13 + $0x1f8] sm:$0xff]  }
  0x95   : > { %v9122_v27 = vld [vmem:[%s10129_s13 + $0x8] sm:$0xff]   ;;  %v9126_v32 = vld [vmem:[%s10129_s13] sm:$0xff]   ;;  %v9131_v47 = vld [vmem:[%s10129_s13 + $0x138] sm:$0xff]  }
  0x96   : > { %8284 = vmatpush3.bf16.msra.mxu0 %v9106_v11  ;;  %v9123_v28 = vld [vmem:[%s10129_s13 + $0x88] sm:$0xff]   ;;  %v9127_v33 = vld [vmem:[%s10129_s13 + $0x80] sm:$0xff]   ;;  %v9132_v50 = vld [vmem:[%s10129_s13 + $0x1b8] sm:$0xff]  }
  0x97   : > { %8306 = vmatpush3.bf16.msra.mxu1 %v9107_v12  ;;  %8285 = vmatprep.subr.bf16.mxu0 %v9108_v13  ;;  %v408_v35 = vld [vmem:[%s10151_s25] sm:$0xff]  ;;  %v9133_v53 = vld [vmem:[%s10129_s13 + $0x170] sm:$0xff]   ;;  %v9137_v57 = vld [vmem:[%s10129_s13 + $0x168] sm:$0xff]  }
  0x98   : > { %8307 = vmatprep.subr.bf16.mxu1 %v9109_v14  ;;  %v440_v41 = vcombine.high %v408_v35, %v408_v35  ;;  %v447_v43 = vrot.slane %v408_v35, %v10193_v42  ;;  %v9134_v54 = vld [vmem:[%s10129_s13 + $0x1f0] sm:$0xff]   ;;  %v9138_v58 = vld [vmem:[%s10129_s13 + $0x1e8] sm:$0xff]   ;;  %v9141_v61 = vld [vmem:[%s10129_s13 + $0x160] sm:$0xff]  }
  0x99   : > { %v9135_v55 = vld [vmem:[%s10129_s13 + $0x130] sm:$0xff]   ;;  %v9139_v59 = vld [vmem:[%s10129_s13 + $0x128] sm:$0xff]   ;;  %v9142_v62 = vld [vmem:[%s10129_s13 + $0x1e0] sm:$0xff]  }
  0x9a   : > { %8286 = vmatpush3.bf16.msra.mxu0 %v9110_v15  ;;  %v454_v44 = vrot.slane %v440_v41, %v10193_v42  ;;  %v455_v45 = vcombine.high %v447_v43, %v447_v43  ;;  %v776_v48 = vpack.c.bf16 %v447_v43, %v447_v43  ;;  %v9136_v56 = vld [vmem:[%s10129_s13 + $0x1b0] sm:$0xff]   ;;  %v9140_v60 = vld [vmem:[%s10129_s13 + $0x1a8] sm:$0xff]   ;;  %v9143_v63 = vld [vmem:[%s10129_s13 + $0x120] sm:$0xff]  }
  0x9b   : > { %8308 = vmatpush3.bf16.msra.mxu1 %v9111_v16  ;;  %8287 = vmatprep.subr.bf16.mxu0 %v9112_v17  ;;  %v9144_v0 = vld [vmem:[%s10129_s13 + $0x1a0] sm:$0xff]   ;;  %v9145_v1 = vld [vmem:[%s10129_s13 + $0x158] sm:$0xff]   ;;  %v9149_v5 = vld [vmem:[%s10129_s13 + $0x150] sm:$0xff]  }
  0x9c   : > { %8309 = vmatprep.subr.bf16.mxu1 %v9113_v18  ;;  %v456_v46 = vcombine.high %v454_v44, %v454_v44  ;;  %v778_v49 = vpack.c.bf16 %v454_v44, %v454_v44  ;;  %v777_v51 = vpack.c.bf16 %v455_v45, %v455_v45  ;;  %v9146_v2 = vld [vmem:[%s10129_s13 + $0x1d8] sm:$0xff]   ;;  %v9150_v6 = vld [vmem:[%s10129_s13 + $0x1d0] sm:$0xff]   ;;  %v9153_v9 = vld [vmem:[%s10129_s13 + $0x148] sm:$0xff]  }
  0x9d   : > { %v9147_v3 = vld [vmem:[%s10129_s13 + $0x118] sm:$0xff]   ;;  %v9151_v7 = vld [vmem:[%s10129_s13 + $0x110] sm:$0xff]   ;;  %v9154_v10 = vld [vmem:[%s10129_s13 + $0x1c8] sm:$0xff]  }
  0x9e   : > { %8288 = vmatpush3.bf16.msra.mxu0 %v9114_v19  ;;  %v779_v52 = vpack.c.bf16 %v456_v46, %v456_v46  ;;  %4968 = vmatprep.mubr.bf16.mxu0 %v777_v51  ;;  %v9148_v4 = vld [vmem:[%s10129_s13 + $0x198] sm:$0xff]   ;;  %v9152_v8 = vld [vmem:[%s10129_s13 + $0x190] sm:$0xff]   ;;  %v409_v11 = vld [vmem:[%s10151_s25 + $0x8] sm:$0xff] }
  0x9f   : > { %8310 = vmatpush3.bf16.msra.mxu1 %v9115_v20  ;;  %8289 = vmatprep.subr.bf16.mxu0 %v9116_v21  ;;  %v9155_v12 = vld [vmem:[%s10129_s13 + $0x108] sm:$0xff]   ;;  %v464_v13 = vrot.slane %v409_v11, %v10193_v42  ;;  %v457_v14 = vcombine.high %v409_v11, %v409_v11  ;;  %v9157_v16 = vld [vmem:[%s10129_s13 + $0x140] sm:$0xff]   ;;  %v9169_v35 = vld [vmem:[%s10129_s13 + $0x2b0] sm:$0xff]  }
  0xa0   : > { %8311 = vmatprep.subr.bf16.mxu1 %v9117_v22  ;;  %5008 = vmatprep.mubr.bf16.mxu1 %v779_v52  ;;  %v9156_v15 = vld [vmem:[%s10129_s13 + $0x188] sm:$0xff]   ;;  %v9158_v19 = vld [vmem:[%s10129_s13 + $0x1c0] sm:$0xff]   ;;  %v9178_v45 = vld [vmem:[%s10129_s13 + $0x258] sm:$0xff]  }
  0xa1   : > { %v472_v17 = vcombine.high %v464_v13, %v464_v13  ;;  %v471_v18 = vrot.slane %v457_v14, %v10193_v42  ;;  %v9159_v20 = vld [vmem:[%s10129_s13 + $0x100] sm:$0xff]   ;;  %v9171_v37 = vld [vmem:[%s10129_s13 + $0x2e8] sm:$0xff]   ;;  %v9179_v46 = vld [vmem:[%s10129_s13 + $0x2d8] sm:$0xff]  }
  0xa2   : > { %8290 = vmatpush3.bf16.msra.mxu0 %v9118_v23  ;;  %v9160_v23 = vld [vmem:[%s10129_s13 + $0x180] sm:$0xff]   ;;  %v9172_v38 = vld [vmem:[%s10129_s13 + $0x228] sm:$0xff]   ;;  %v9184_v51 = vld [vmem:[%s10129_s13 + $0x210] sm:$0xff]  }
  0xa3   : > { %8312 = vmatpush3.bf16.msra.mxu1 %v9119_v24  ;;  %8291 = vmatprep.subr.bf16.mxu0 %v9120_v25  ;;  %v781_v21 = vpack.c.bf16 %v472_v17, %v472_v17  ;;  %v473_v22 = vcombine.high %v471_v18, %v471_v18  ;;  %v9162_v25 = vld [vmem:[%s10129_s13 + $0x278] sm:$0xff]   ;;  %v782_v29 = vpack.c.bf16 %v471_v18, %v471_v18  ;;  %v9174_v40 = vld [vmem:[%s10129_s13 + $0x260] sm:$0xff]   ;;  %v9185_v52 = vld [vmem:[%s10129_s13 + $0x290] sm:$0xff]  }
  0xa4   : > { %8313 = vmatprep.subr.bf16.mxu1 %v9121_v26  ;;  %v9163_v26 = vld [vmem:[%s10129_s13 + $0x2f8] sm:$0xff]   ;;  %v9175_v41 = vld [vmem:[%s10129_s13 + $0x2e0] sm:$0xff]   ;;  %v9199_v11 = vld [vmem:[%s10129_s13 + $0x370] sm:$0xff]  }
  0xa5   : > { %v783_v24 = vpack.c.bf16 %v473_v22, %v473_v22  ;;  %v9176_v43 = vld [vmem:[%s10129_s13 + $0x220] sm:$0xff]   ;;  %v9202_v14 = vld [vmem:[%s10129_s13 + $0x3b0] sm:$0xff]   ;;  %v9205_v17 = vld [vmem:[%s10129_s13 + $0x328] sm:$0xff]  }
  0xa6   : > { %8292 = vmatpush3.bf16.msra.mxu0 %v9122_v27  ;;  %v9164_v27 = vld [vmem:[%s10129_s13 + $0x238] sm:$0xff]   ;;  %v9177_v44 = vld [vmem:[%s10129_s13 + $0x2a0] sm:$0xff]   ;;  %v9206_v18 = vld [vmem:[%s10129_s13 + $0x3a8] sm:$0xff]  }
  0xa7   : > { %8314 = vmatpush3.bf16.msra.mxu1 %v9123_v28  ;;  %8293 = vmatprep.subr.bf16.mxu0 %v9124_v30  ;;  %v780_v28 = vpack.c.bf16 %v464_v13, %v464_v13  ;;  %v9165_v30 = vld [vmem:[%s10129_s13 + $0x2b8] sm:$0xff]   ;;  %v9201_v13 = vld [vmem:[%s10129_s13 + $0x330] sm:$0xff]   ;;  %v9210_v22 = vld [vmem:[%s10129_s13 + $0x3a0] sm:$0xff]  }
  0xa8   : > { %8315 = vmatprep.subr.bf16.mxu1 %v9125_v31  ;;  %v9166_v31 = vld [vmem:[%s10129_s13 + $0x270] sm:$0xff]  }
  0xaa   : > { %8294 = vmatpush3.bf16.msra.mxu0 %v9126_v32  ;;  %v9167_v32 = vld [vmem:[%s10129_s13 + $0x2f0] sm:$0xff]  }
  0xab   : > { %8316 = vmatpush3.bf16.msra.mxu1 %v9127_v33  ;;  %8323 = vmatprep.subr.bf16.mxu0 %v9129_v36  ;;  %v9168_v33 = vld [vmem:[%s10129_s13 + $0x230] sm:$0xff]   ;;  %v9170_v36 = vld [vmem:[%s10129_s13 + $0x268] sm:$0xff]  }
  0xac   : > { %8345 = vmatprep.subr.bf16.mxu1 %v9130_v39  ;;  %v9173_v39 = vld [vmem:[%s10129_s13 + $0x2a8] sm:$0xff]  }
  0xad   : > { %4969 = vmatmul.mubr.bf16.vlgmr.msra.gmra.mxu0 %v776_v48  ;;  %v9181_v48 = vld [vmem:[%s10129_s13 + $0x298] sm:$0xff]  }
  0xae   : > { %5009 = vmatmul.mubr.bf16.vlgmr.msra.gmra.mxu1 %v778_v49  ;;  %8324 = vmatpush3.bf16.msra.mxu0 %v9131_v47  ;;  %v9180_v47 = vld [vmem:[%s10129_s13 + $0x218] sm:$0xff]   ;;  %v9182_v49 = vld [vmem:[%s10129_s13 + $0x250] sm:$0xff]  }
  0xaf   : > { %8346 = vmatpush3.bf16.msra.mxu1 %v9132_v50  ;;  %8325 = vmatprep.subr.bf16.mxu0 %v9133_v53  ;;  %v9183_v50 = vld [vmem:[%s10129_s13 + $0x2d0] sm:$0xff]   ;;  %v9186_v53 = vld [vmem:[%s10129_s13 + $0x248] sm:$0xff]  }
  0xb0   : > { %8347 = vmatprep.subr.bf16.mxu1 %v9134_v54  ;;  %5048 = vmatprep.mubr.bf16.mxu0 %v781_v21  ;;  %v9187_v54 = vld [vmem:[%s10129_s13 + $0x2c8] sm:$0xff]   ;;  %v9209_v21 = vld [vmem:[%s10129_s13 + $0x320] sm:$0xff]  }
  0xb1   : > { %5088 = vmatprep.mubr.bf16.mxu1 %v783_v24  ;;  %v9212_v24 = vld [vmem:[%s10129_s13 + $0x3d8] sm:$0xff]  }
  0xb2   : > { %8326 = vmatpush3.bf16.msra.mxu0 %v9135_v55  ;;  %v410_v55 = vld [vmem:[%s10151_s25 + $0x10] sm:$0xff] }
  0xb3   : > { %8348 = vmatpush3.bf16.msra.mxu1 %v9136_v56  ;;  %8327 = vmatprep.subr.bf16.mxu0 %v9137_v57  ;;  %v9188_v56 = vld [vmem:[%s10129_s13 + $0x208] sm:$0xff]   ;;  %v481_v57 = vrot.slane %v410_v55, %v10193_v42 }
  0xb4   : > { %8349 = vmatprep.subr.bf16.mxu1 %v9138_v58  ;;  %v474_v58 = vcombine.high %v410_v55, %v410_v55  ;;  %v9232_v55 = vld [vmem:[%s10129_s13 + $0x470] sm:$0xff]  }
  0xb6   : > { %8328 = vmatpush3.bf16.msra.mxu0 %v9139_v59  ;;  %v9189_v59 = vld [vmem:[%s10129_s13 + $0x288] sm:$0xff]  }
  0xb7   : > { %8350 = vmatpush3.bf16.msra.mxu1 %v9140_v60  ;;  %8329 = vmatprep.subr.bf16.mxu0 %v9141_v61  ;;  %v9190_v60 = vld [vmem:[%s10129_s13 + $0x240] sm:$0xff]   ;;  %v489_v61 = vcombine.high %v481_v57, %v481_v57 }
  0xb8   : > { %8351 = vmatprep.subr.bf16.mxu1 %v9142_v62  ;;  %v488_v62 = vrot.slane %v474_v58, %v10193_v42  ;;  %v9235_v58 = vld [vmem:[%s10129_s13 + $0x4b0] sm:$0xff]  }
  0xba   : > { %8330 = vmatpush3.bf16.msra.mxu0 %v9143_v63  ;;  %v9191_v63 = vld [vmem:[%s10129_s13 + $0x2c0] sm:$0xff]  }
  0xbb   : > { %8352 = vmatpush3.bf16.msra.mxu1 %v9144_v0  ;;  %8331 = vmatprep.subr.bf16.mxu0 %v9145_v1  ;;  %v9192_v0 = vld [vmem:[%s10129_s13 + $0x200] sm:$0xff]   ;;  %v785_v1 = vpack.c.bf16 %v489_v61, %v489_v61  ;;  %v9238_v61 = vld [vmem:[%s10129_s13 + $0x428] sm:$0xff]  }
  0xbc   : > { %8353 = vmatprep.subr.bf16.mxu1 %v9146_v2  ;;  %v490_v2 = vcombine.high %v488_v62, %v488_v62 }
  0xbe   : > { %8332 = vmatpush3.bf16.msra.mxu0 %v9147_v3  ;;  %v9193_v3 = vld [vmem:[%s10129_s13 + $0x280] sm:$0xff]  }
  0xbf   : > { %8354 = vmatpush3.bf16.msra.mxu1 %v9148_v4  ;;  %8333 = vmatprep.subr.bf16.mxu0 %v9149_v5  ;;  %v787_v4 = vpack.c.bf16 %v490_v2, %v490_v2  ;;  %v9195_v5 = vld [vmem:[%s10129_s13 + $0x378] sm:$0xff]   ;;  %v9243_v2 = vld [vmem:[%s10129_s13 + $0x4a0] sm:$0xff]  }
  0xc0   : > { %8355 = vmatprep.subr.bf16.mxu1 %v9150_v6  ;;  %v9196_v6 = vld [vmem:[%s10129_s13 + $0x3f8] sm:$0xff]  }
  0xc2   : > { %8334 = vmatpush3.bf16.msra.mxu0 %v9151_v7  ;;  %v9197_v7 = vld [vmem:[%s10129_s13 + $0x338] sm:$0xff]  }
  0xc3   : > { %8356 = vmatpush3.bf16.msra.mxu1 %v9152_v8  ;;  %8335 = vmatprep.subr.bf16.mxu0 %v9153_v9  ;;  %v784_v8 = vpack.c.bf16 %v481_v57, %v481_v57  ;;  %v786_v9 = vpack.c.bf16 %v488_v62, %v488_v62  ;;  %v9234_v57 = vld [vmem:[%s10129_s13 + $0x430] sm:$0xff]   ;;  %v9239_v62 = vld [vmem:[%s10129_s13 + $0x4a8] sm:$0xff]  }
  0xc4   : > { %8357 = vmatprep.subr.bf16.mxu1 %v9154_v10  ;;  %v9198_v10 = vld [vmem:[%s10129_s13 + $0x3b8] sm:$0xff]  }
  0xc6   : > { %8336 = vmatpush3.bf16.msra.mxu0 %v9155_v12  ;;  %v9200_v12 = vld [vmem:[%s10129_s13 + $0x3f0] sm:$0xff]  }
  0xc7   : > { %8358 = vmatpush3.bf16.msra.mxu1 %v9156_v15  ;;  %8337 = vmatprep.subr.bf16.mxu0 %v9157_v16  ;;  %v9203_v15 = vld [vmem:[%s10129_s13 + $0x368] sm:$0xff]  }
  0xc8   : > { %8359 = vmatprep.subr.bf16.mxu1 %v9158_v19  ;;  %v9204_v16 = vld [vmem:[%s10129_s13 + $0x3e8] sm:$0xff]   ;;  %v9207_v19 = vld [vmem:[%s10129_s13 + $0x360] sm:$0xff]  }
  0xca   : > { %8338 = vmatpush3.bf16.msra.mxu0 %v9159_v20  ;;  %v9208_v20 = vld [vmem:[%s10129_s13 + $0x3e0] sm:$0xff]  }
  0xcb   : > { %8360 = vmatpush3.bf16.msra.mxu1 %v9160_v23  ;;  %8367 = vmatprep.subr.bf16.mxu0 %v9162_v25  ;;  %v9211_v23 = vld [vmem:[%s10129_s13 + $0x358] sm:$0xff]  }
  0xcc   : > { %8389 = vmatprep.subr.bf16.mxu1 %v9163_v26  ;;  %v9213_v25 = vld [vmem:[%s10129_s13 + $0x318] sm:$0xff]  }
  0xcd   : > { %5049 = vmatmul.mubr.bf16.vlgmr.msra.gmra.mxu0 %v780_v28  ;;  %v9214_v26 = vld [vmem:[%s10129_s13 + $0x398] sm:$0xff]   ;;  %v9216_v28 = vld [vmem:[%s10129_s13 + $0x3d0] sm:$0xff]  }
  0xce   : > { %5089 = vmatmul.mubr.bf16.vlgmr.msra.gmra.mxu1 %v782_v29  ;;  %8368 = vmatpush3.bf16.msra.mxu0 %v9164_v27  ;;  %v9215_v27 = vld [vmem:[%s10129_s13 + $0x350] sm:$0xff]  }
  0xcf   : > { %8390 = vmatpush3.bf16.msra.mxu1 %v9165_v30  ;;  %8369 = vmatprep.subr.bf16.mxu0 %v9166_v31  ;;  %v9217_v29 = vld [vmem:[%s10129_s13 + $0x310] sm:$0xff]   ;;  %v9219_v31 = vld [vmem:[%s10129_s13 + $0x348] sm:$0xff]  }
  0xd0   : > { %8391 = vmatprep.subr.bf16.mxu1 %v9167_v32  ;;  %5128 = vmatprep.mubr.bf16.mxu0 %v785_v1  ;;  %v9218_v30 = vld [vmem:[%s10129_s13 + $0x390] sm:$0xff]   ;;  %v9220_v32 = vld [vmem:[%s10129_s13 + $0x3c8] sm:$0xff]   ;;  %v9242_v1 = vld [vmem:[%s10129_s13 + $0x420] sm:$0xff]  }
  0xd1   : > { %5168 = vmatprep.mubr.bf16.mxu1 %v787_v4  ;;  %v9245_v4 = vld [vmem:[%s10129_s13 + $0x4d8] sm:$0xff]  }
  0xd2   : > { %8370 = vmatpush3.bf16.msra.mxu0 %v9168_v33  ;;  %v9221_v33 = vld [vmem:[%s10129_s13 + $0x308] sm:$0xff]  }
  0xd3   : > { %8392 = vmatpush3.bf16.msra.mxu1 %v9169_v35  ;;  %8371 = vmatprep.subr.bf16.mxu0 %v9170_v36  ;;  %v411_v35 = vld [vmem:[%s10151_s25 + $0x18] sm:$0xff]  ;;  %v9222_v36 = vld [vmem:[%s10129_s13 + $0x388] sm:$0xff]  }
  0xd4   : > { %8393 = vmatprep.subr.bf16.mxu1 %v9171_v37  ;;  %v498_v37 = vrot.slane %v411_v35, %v10193_v42 }
  0xd6   : > { %8372 = vmatpush3.bf16.msra.mxu0 %v9172_v38  ;;  %v491_v38 = vcombine.high %v411_v35, %v411_v35  ;;  %v9266_v35 = vld [vmem:[%s10129_s13 + $0x5f0] sm:$0xff]  }
  0xd7   : > { %8394 = vmatpush3.bf16.msra.mxu1 %v9173_v39  ;;  %8373 = vmatprep.subr.bf16.mxu0 %v9174_v40  ;;  %v9223_v39 = vld [vmem:[%s10129_s13 + $0x340] sm:$0xff]  }
  0xd8   : > { %8395 = vmatprep.subr.bf16.mxu1 %v9175_v41  ;;  %v9224_v40 = vld [vmem:[%s10129_s13 + $0x3c0] sm:$0xff]   ;;  %v506_v41 = vcombine.high %v498_v37, %v498_v37 }
  0xda   : > { %8374 = vmatpush3.bf16.msra.mxu0 %v9176_v43  ;;  %v505_v43 = vrot.slane %v491_v38, %v10193_v42  ;;  %v9269_v38 = vld [vmem:[%s10129_s13 + $0x568] sm:$0xff]  }
  0xdb   : > { %8396 = vmatpush3.bf16.msra.mxu1 %v9177_v44  ;;  %8375 = vmatprep.subr.bf16.mxu0 %v9178_v45  ;;  %v9225_v44 = vld [vmem:[%s10129_s13 + $0x300] sm:$0xff]  }
  0xdc   : > { %8397 = vmatprep.subr.bf16.mxu1 %v9179_v46  ;;  %v9226_v45 = vld [vmem:[%s10129_s13 + $0x380] sm:$0xff]   ;;  %v789_v46 = vpack.c.bf16 %v506_v41, %v506_v41  ;;  %v9272_v41 = vld [vmem:[%s10129_s13 + $0x5a8] sm:$0xff]  }
  0xde   : > { %8376 = vmatpush3.bf16.msra.mxu0 %v9180_v47  ;;  %v507_v47 = vcombine.high %v505_v43, %v505_v43 }
  0xdf   : > { %8398 = vmatpush3.bf16.msra.mxu1 %v9181_v48  ;;  %8377 = vmatprep.subr.bf16.mxu0 %v9182_v49  ;;  %v9228_v48 = vld [vmem:[%s10129_s13 + $0x478] sm:$0xff]  }
  0xe0   : > { %8399 = vmatprep.subr.bf16.mxu1 %v9183_v50  ;;  %v791_v49 = vpack.c.bf16 %v507_v47, %v507_v47  ;;  %v9229_v50 = vld [vmem:[%s10129_s13 + $0x4f8] sm:$0xff]  }
  0xe1   : > { %v9277_v47 = vld [vmem:[%s10129_s13 + $0x558] sm:$0xff]  }
  0xe2   : > { %8378 = vmatpush3.bf16.msra.mxu0 %v9184_v51  ;;  %v9230_v51 = vld [vmem:[%s10129_s13 + $0x438] sm:$0xff]  }
  0xe3   : > { %8400 = vmatpush3.bf16.msra.mxu1 %v9185_v52  ;;  %8379 = vmatprep.subr.bf16.mxu0 %v9186_v53  ;;  %v788_v52 = vpack.c.bf16 %v498_v37, %v498_v37  ;;  %v790_v53 = vpack.c.bf16 %v505_v43, %v505_v43  ;;  %v9268_v37 = vld [vmem:[%s10129_s13 + $0x5b0] sm:$0xff]   ;;  %v9273_v43 = vld [vmem:[%s10129_s13 + $0x560] sm:$0xff]  }
  0xe4   : > { %8401 = vmatprep.subr.bf16.mxu1 %v9187_v54  ;;  %v9231_v54 = vld [vmem:[%s10129_s13 + $0x4b8] sm:$0xff]  }
  0xe6   : > { %8380 = vmatpush3.bf16.msra.mxu0 %v9188_v56  ;;  %v9233_v56 = vld [vmem:[%s10129_s13 + $0x4f0] sm:$0xff]  }
  0xe7   : > { %8402 = vmatpush3.bf16.msra.mxu1 %v9189_v59  ;;  %8381 = vmatprep.subr.bf16.mxu0 %v9190_v60  ;;  %v9236_v59 = vld [vmem:[%s10129_s13 + $0x468] sm:$0xff]  }
  0xe8   : > { %8403 = vmatprep.subr.bf16.mxu1 %v9191_v63  ;;  %v9237_v60 = vld [vmem:[%s10129_s13 + $0x4e8] sm:$0xff]   ;;  %v9240_v63 = vld [vmem:[%s10129_s13 + $0x460] sm:$0xff]  }
  0xea   : > { %8382 = vmatpush3.bf16.msra.mxu0 %v9192_v0  ;;  %v9241_v0 = vld [vmem:[%s10129_s13 + $0x4e0] sm:$0xff]  }
  0xeb   : > { %8404 = vmatpush3.bf16.msra.mxu1 %v9193_v3  ;;  %8411 = vmatprep.subr.bf16.mxu0 %v9195_v5  ;;  %v9244_v3 = vld [vmem:[%s10129_s13 + $0x458] sm:$0xff]  }
  0xec   : > { %8433 = vmatprep.subr.bf16.mxu1 %v9196_v6  ;;  %v9246_v5 = vld [vmem:[%s10129_s13 + $0x418] sm:$0xff]  }
  0xed   : > { %5129 = vmatmul.mubr.bf16.vlgmr.msra.gmra.mxu0 %v784_v8  ;;  %v9247_v6 = vld [vmem:[%s10129_s13 + $0x498] sm:$0xff]   ;;  %v9249_v8 = vld [vmem:[%s10129_s13 + $0x4d0] sm:$0xff]  }
  0xee   : > { %5169 = vmatmul.mubr.bf16.vlgmr.msra.gmra.mxu1 %v786_v9  ;;  %8412 = vmatpush3.bf16.msra.mxu0 %v9197_v7  ;;  %v9248_v7 = vld [vmem:[%s10129_s13 + $0x450] sm:$0xff]  }
  0xef   : > { %8434 = vmatpush3.bf16.msra.mxu1 %v9198_v10  ;;  %8413 = vmatprep.subr.bf16.mxu0 %v9199_v11  ;;  %v9250_v9 = vld [vmem:[%s10129_s13 + $0x410] sm:$0xff]   ;;  %v9252_v11 = vld [vmem:[%s10129_s13 + $0x448] sm:$0xff]  }
  0xf0   : > { %8435 = vmatprep.subr.bf16.mxu1 %v9200_v12  ;;  %5208 = vmatprep.mubr.bf16.mxu0 %v789_v46  ;;  %v9251_v10 = vld [vmem:[%s10129_s13 + $0x490] sm:$0xff]   ;;  %v9253_v12 = vld [vmem:[%s10129_s13 + $0x4c8] sm:$0xff]   ;;  %v9276_v46 = vld [vmem:[%s10129_s13 + $0x5a0] sm:$0xff]  }
  0xf1   : > { %5248 = vmatprep.mubr.bf16.mxu1 %v791_v49  ;;  %v9279_v49 = vld [vmem:[%s10129_s13 + $0x518] sm:$0xff]  }
  0xf2   : > { %8414 = vmatpush3.bf16.msra.mxu0 %v9201_v13  ;;  %v9254_v13 = vld [vmem:[%s10129_s13 + $0x408] sm:$0xff]  }
  0xf3   : > { %8436 = vmatpush3.bf16.msra.mxu1 %v9202_v14  ;;  %8415 = vmatprep.subr.bf16.mxu0 %v9203_v15  ;;  %v412_v14 = vld [vmem:[%s10151_s25 + $0x20] sm:$0xff]  ;;  %v9255_v15 = vld [vmem:[%s10129_s13 + $0x488] sm:$0xff]  }
  0xf4   : > { %8437 = vmatprep.subr.bf16.mxu1 %v9204_v16  ;;  %v515_v16 = vrot.slane %v412_v14, %v10193_v42 }
  0xf6   : > { %8416 = vmatpush3.bf16.msra.mxu0 %v9205_v17  ;;  %v508_v17 = vcombine.high %v412_v14, %v412_v14  ;;  %v9299_v14 = vld [vmem:[%s10129_s13 + $0x6f0] sm:$0xff]  }
  0xf7   : > { %8438 = vmatpush3.bf16.msra.mxu1 %v9206_v18  ;;  %8417 = vmatprep.subr.bf16.mxu0 %v9207_v19  ;;  %v9256_v18 = vld [vmem:[%s10129_s13 + $0x440] sm:$0xff]  }
  0xf8   : > { %8439 = vmatprep.subr.bf16.mxu1 %v9208_v20  ;;  %v9257_v19 = vld [vmem:[%s10129_s13 + $0x4c0] sm:$0xff]   ;;  %v523_v20 = vcombine.high %v515_v16, %v515_v16 }
  0xfa   : > { %8418 = vmatpush3.bf16.msra.mxu0 %v9209_v21  ;;  %v522_v21 = vrot.slane %v508_v17, %v10193_v42  ;;  %v9302_v17 = vld [vmem:[%s10129_s13 + $0x668] sm:$0xff]  }
  0xfb   : > { %8440 = vmatpush3.bf16.msra.mxu1 %v9210_v22  ;;  %8419 = vmatprep.subr.bf16.mxu0 %v9211_v23  ;;  %v9258_v22 = vld [vmem:[%s10129_s13 + $0x400] sm:$0xff]  }
  0xfc   : > { %8441 = vmatprep.subr.bf16.mxu1 %v9212_v24  ;;  %v9259_v23 = vld [vmem:[%s10129_s13 + $0x480] sm:$0xff]   ;;  %v793_v24 = vpack.c.bf16 %v523_v20, %v523_v20  ;;  %v9305_v20 = vld [vmem:[%s10129_s13 + $0x6a8] sm:$0xff]  }
  0xfe   : > { %8420 = vmatpush3.bf16.msra.mxu0 %v9213_v25  ;;  %v524_v25 = vcombine.high %v522_v21, %v522_v21 }
  0xff   : > { %8442 = vmatpush3.bf16.msra.mxu1 %v9214_v26  ;;  %8421 = vmatprep.subr.bf16.mxu0 %v9215_v27  ;;  %v9261_v26 = vld [vmem:[%s10129_s13 + $0x578] sm:$0xff]  }
 0x100   : > { %8443 = vmatprep.subr.bf16.mxu1 %v9216_v28  ;;  %v795_v27 = vpack.c.bf16 %v524_v25, %v524_v25  ;;  %v9262_v28 = vld [vmem:[%s10129_s13 + $0x5f8] sm:$0xff]  }
 0x101   : > { %v9310_v25 = vld [vmem:[%s10129_s13 + $0x658] sm:$0xff]  }
 0x102   : > { %8422 = vmatpush3.bf16.msra.mxu0 %v9217_v29  ;;  %v9263_v29 = vld [vmem:[%s10129_s13 + $0x538] sm:$0xff]  }
 0x103   : > { %8444 = vmatpush3.bf16.msra.mxu1 %v9218_v30  ;;  %8423 = vmatprep.subr.bf16.mxu0 %v9219_v31  ;;  %v792_v30 = vpack.c.bf16 %v515_v16, %v515_v16  ;;  %v794_v31 = vpack.c.bf16 %v522_v21, %v522_v21  ;;  %v9301_v16 = vld [vmem:[%s10129_s13 + $0x6b0] sm:$0xff]   ;;  %v9306_v21 = vld [vmem:[%s10129_s13 + $0x660] sm:$0xff]  }
 0x104   : > { %8445 = vmatprep.subr.bf16.mxu1 %v9220_v32  ;;  %v9264_v32 = vld [vmem:[%s10129_s13 + $0x5b8] sm:$0xff]  }
 0x106   : > { %8424 = vmatpush3.bf16.msra.mxu0 %v9221_v33  ;;  %v9265_v33 = vld [vmem:[%s10129_s13 + $0x570] sm:$0xff]  }
 0x107   : > { %8446 = vmatpush3.bf16.msra.mxu1 %v9222_v36  ;;  %8425 = vmatprep.subr.bf16.mxu0 %v9223_v39  ;;  %v9267_v36 = vld [vmem:[%s10129_s13 + $0x530] sm:$0xff]   ;;  %v9270_v39 = vld [vmem:[%s10129_s13 + $0x5e8] sm:$0xff]  }
 0x108   : > { %8447 = vmatprep.subr.bf16.mxu1 %v9224_v40  ;;  %v9271_v40 = vld [vmem:[%s10129_s13 + $0x528] sm:$0xff]  }
 0x10a   : > { %8426 = vmatpush3.bf16.msra.mxu0 %v9225_v44  ;;  %v9274_v44 = vld [vmem:[%s10129_s13 + $0x5e0] sm:$0xff]  }
 0x10b   : > { %8448 = vmatpush3.bf16.msra.mxu1 %v9226_v45  ;;  %8455 = vmatprep.subr.bf16.mxu0 %v9228_v48  ;;  %v9275_v45 = vld [vmem:[%s10129_s13 + $0x520] sm:$0xff]   ;;  %v9278_v48 = vld [vmem:[%s10129_s13 + $0x5d8] sm:$0xff]  }
 0x10c   : > { %8477 = vmatprep.subr.bf16.mxu1 %v9229_v50  ;;  %v9280_v50 = vld [vmem:[%s10129_s13 + $0x598] sm:$0xff]  }
 0x10d   : > { %5209 = vmatmul.mubr.bf16.vlgmr.msra.gmra.mxu0 %v788_v52  ;;  %v9282_v52 = vld [vmem:[%s10129_s13 + $0x5d0] sm:$0xff]  }
 0x10e   : > { %5249 = vmatmul.mubr.bf16.vlgmr.msra.gmra.mxu1 %v790_v53  ;;  %8456 = vmatpush3.bf16.msra.mxu0 %v9230_v51  ;;  %v9281_v51 = vld [vmem:[%s10129_s13 + $0x550] sm:$0xff]  }
 0x10f   : > { %8478 = vmatpush3.bf16.msra.mxu1 %v9231_v54  ;;  %8457 = vmatprep.subr.bf16.mxu0 %v9232_v55  ;;  %v9283_v53 = vld [vmem:[%s10129_s13 + $0x510] sm:$0xff]   ;;  %v9285_v55 = vld [vmem:[%s10129_s13 + $0x548] sm:$0xff]  }
 0x110   : > { %8479 = vmatprep.subr.bf16.mxu1 %v9233_v56  ;;  %5288 = vmatprep.mubr.bf16.mxu0 %v793_v24  ;;  %v9284_v54 = vld [vmem:[%s10129_s13 + $0x590] sm:$0xff]   ;;  %v9286_v56 = vld [vmem:[%s10129_s13 + $0x5c8] sm:$0xff]   ;;  %v9309_v24 = vld [vmem:[%s10129_s13 + $0x6a0] sm:$0xff]  }
 0x111   : > { %5328 = vmatprep.mubr.bf16.mxu1 %v795_v27  ;;  %v9312_v27 = vld [vmem:[%s10129_s13 + $0x618] sm:$0xff]  }
 0x112   : > { %8458 = vmatpush3.bf16.msra.mxu0 %v9234_v57  ;;  %v9287_v57 = vld [vmem:[%s10129_s13 + $0x508] sm:$0xff]  }
 0x113   : > { %8480 = vmatpush3.bf16.msra.mxu1 %v9235_v58  ;;  %8459 = vmatprep.subr.bf16.mxu0 %v9236_v59  ;;  %v413_v58 = vld [vmem:[%s10151_s25 + $0x28] sm:$0xff] }
 0x114   : > { %8481 = vmatprep.subr.bf16.mxu1 %v9237_v60  ;;  %v9288_v59 = vld [vmem:[%s10129_s13 + $0x588] sm:$0xff]   ;;  %v532_v60 = vrot.slane %v413_v58, %v10193_v42 }
 0x116   : > { %8460 = vmatpush3.bf16.msra.mxu0 %v9238_v61  ;;  %v525_v61 = vcombine.high %v413_v58, %v413_v58  ;;  %v9332_v58 = vld [vmem:[%s10129_s13 + $0x7f0] sm:$0xff]  }
 0x117   : > { %8482 = vmatpush3.bf16.msra.mxu1 %v9239_v62  ;;  %8461 = vmatprep.subr.bf16.mxu0 %v9240_v63  ;;  %v9289_v62 = vld [vmem:[%s10129_s13 + $0x540] sm:$0xff]  }
 0x118   : > { %8483 = vmatprep.subr.bf16.mxu1 %v9241_v0  ;;  %v9290_v63 = vld [vmem:[%s10129_s13 + $0x5c0] sm:$0xff]   ;;  %v540_v0 = vcombine.high %v532_v60, %v532_v60 }
 0x11a   : > { %8462 = vmatpush3.bf16.msra.mxu0 %v9242_v1  ;;  %v539_v1 = vrot.slane %v525_v61, %v10193_v42 }
 0x11b   : > { %8484 = vmatpush3.bf16.msra.mxu1 %v9243_v2  ;;  %8463 = vmatprep.subr.bf16.mxu0 %v9244_v3  ;;  %v9291_v2 = vld [vmem:[%s10129_s13 + $0x500] sm:$0xff]  }
 0x11c   : > { %8485 = vmatprep.subr.bf16.mxu1 %v9245_v4  ;;  %v9292_v3 = vld [vmem:[%s10129_s13 + $0x580] sm:$0xff]   ;;  %v797_v4 = vpack.c.bf16 %v540_v0, %v540_v0 }
 0x11e   : > { %8464 = vmatpush3.bf16.msra.mxu0 %v9246_v5  ;;  %v541_v5 = vcombine.high %v539_v1, %v539_v1 }
 0x11f   : > { %8486 = vmatpush3.bf16.msra.mxu1 %v9247_v6  ;;  %8465 = vmatprep.subr.bf16.mxu0 %v9248_v7  ;;  %v9294_v6 = vld [vmem:[%s10129_s13 + $0x678] sm:$0xff]  }
 0x120   : > { %8487 = vmatprep.subr.bf16.mxu1 %v9249_v8  ;;  %v799_v7 = vpack.c.bf16 %v541_v5, %v541_v5  ;;  %v9295_v8 = vld [vmem:[%s10129_s13 + $0x6f8] sm:$0xff]   ;;  %v9337_v5 = vld [vmem:[%s10129_s13 + $0x728] sm:$0xff]  }
 0x122   : > { %8466 = vmatpush3.bf16.msra.mxu0 %v9250_v9  ;;  %v9296_v9 = vld [vmem:[%s10129_s13 + $0x638] sm:$0xff]  }
 0x123   : > { %8488 = vmatpush3.bf16.msra.mxu1 %v9251_v10  ;;  %8467 = vmatprep.subr.bf16.mxu0 %v9252_v11  ;;  %v796_v10 = vpack.c.bf16 %v532_v60, %v532_v60  ;;  %v798_v11 = vpack.c.bf16 %v539_v1, %v539_v1 }
 0x124   : > { %8489 = vmatprep.subr.bf16.mxu1 %v9253_v12  ;;  %v9297_v12 = vld [vmem:[%s10129_s13 + $0x6b8] sm:$0xff]  }
 0x126   : > { %8468 = vmatpush3.bf16.msra.mxu0 %v9254_v13  ;;  %v9298_v13 = vld [vmem:[%s10129_s13 + $0x670] sm:$0xff]  }
 0x127   : > { %8490 = vmatpush3.bf16.msra.mxu1 %v9255_v15  ;;  %8469 = vmatprep.subr.bf16.mxu0 %v9256_v18  ;;  %v9300_v15 = vld [vmem:[%s10129_s13 + $0x630] sm:$0xff]   ;;  %v9303_v18 = vld [vmem:[%s10129_s13 + $0x6e8] sm:$0xff]  }
 0x128   : > { %8491 = vmatprep.subr.bf16.mxu1 %v9257_v19  ;;  %v9304_v19 = vld [vmem:[%s10129_s13 + $0x628] sm:$0xff]  }
 0x12a   : > { %8470 = vmatpush3.bf16.msra.mxu0 %v9258_v22  ;;  %v9307_v22 = vld [vmem:[%s10129_s13 + $0x6e0] sm:$0xff]  }
 0x12b   : > { %8492 = vmatpush3.bf16.msra.mxu1 %v9259_v23  ;;  %8499 = vmatprep.subr.bf16.mxu0 %v9261_v26  ;;  %v9308_v23 = vld [vmem:[%s10129_s13 + $0x620] sm:$0xff]   ;;  %v9311_v26 = vld [vmem:[%s10129_s13 + $0x6d8] sm:$0xff]  }
 0x12c   : > { %8521 = vmatprep.subr.bf16.mxu1 %v9262_v28  ;;  %v9313_v28 = vld [vmem:[%s10129_s13 + $0x698] sm:$0xff]  }
 0x12d   : > { %5289 = vmatmul.mubr.bf16.vlgmr.msra.gmra.mxu0 %v792_v30  ;;  %v9315_v30 = vld [vmem:[%s10129_s13 + $0x6d0] sm:$0xff]  }
 0x12e   : > { %5329 = vmatmul.mubr.bf16.vlgmr.msra.gmra.mxu1 %v794_v31  ;;  %8500 = vmatpush3.bf16.msra.mxu0 %v9263_v29  ;;  %v9314_v29 = vld [vmem:[%s10129_s13 + $0x650] sm:$0xff]  }
 0x12f   : > { %8522 = vmatpush3.bf16.msra.mxu1 %v9264_v32  ;;  %8501 = vmatprep.subr.bf16.mxu0 %v9265_v33  ;;  %v9316_v31 = vld [vmem:[%s10129_s13 + $0x610] sm:$0xff]   ;;  %v9318_v33 = vld [vmem:[%s10129_s13 + $0x648] sm:$0xff]  }
 0x130   : > { %8523 = vmatprep.subr.bf16.mxu1 %v9266_v35  ;;  %5368 = vmatprep.mubr.bf16.mxu0 %v797_v4  ;;  %v9317_v32 = vld [vmem:[%s10129_s13 + $0x690] sm:$0xff]   ;;  %v9319_v35 = vld [vmem:[%s10129_s13 + $0x6c8] sm:$0xff]  }
 0x131   : > { %5408 = vmatprep.mubr.bf16.mxu1 %v799_v7 }
 0x132   : > { %8502 = vmatpush3.bf16.msra.mxu0 %v9267_v36  ;;  %v9320_v36 = vld [vmem:[%s10129_s13 + $0x608] sm:$0xff]  }
 0x133   : > { %8524 = vmatpush3.bf16.msra.mxu1 %v9268_v37  ;;  %8503 = vmatprep.subr.bf16.mxu0 %v9269_v38  ;;  %v9321_v37 = vld [vmem:[%s10129_s13 + $0x688] sm:$0xff]   ;;  %v414_v38 = vld [vmem:[%s10151_s25 + $0x30] sm:$0xff] }
 0x134   : > { %8525 = vmatprep.subr.bf16.mxu1 %v9270_v39  ;;  %v9322_v39 = vld [vmem:[%s10129_s13 + $0x640] sm:$0xff]  }
 0x136   : > { %8504 = vmatpush3.bf16.msra.mxu0 %v9271_v40  ;;  %v549_v40 = vrot.slane %v414_v38, %v10193_v42 }
 0x137   : > { %8526 = vmatpush3.bf16.msra.mxu1 %v9272_v41  ;;  %8505 = vmatprep.subr.bf16.mxu0 %v9273_v43  ;;  %v542_v41 = vcombine.high %v414_v38, %v414_v38  ;;  %v9323_v43 = vld [vmem:[%s10129_s13 + $0x6c0] sm:$0xff]  }
 0x138   : > { %8527 = vmatprep.subr.bf16.mxu1 %v9274_v44  ;;  %v9324_v44 = vld [vmem:[%s10129_s13 + $0x600] sm:$0xff]  }
 0x13a   : > { %8506 = vmatpush3.bf16.msra.mxu0 %v9275_v45  ;;  %v557_v45 = vcombine.high %v549_v40, %v549_v40 }
 0x13b   : > { %8528 = vmatpush3.bf16.msra.mxu1 %v9276_v46  ;;  %8507 = vmatprep.subr.bf16.mxu0 %v9277_v47  ;;  %v556_v46 = vrot.slane %v542_v41, %v10193_v42  ;;  %v9325_v47 = vld [vmem:[%s10129_s13 + $0x680] sm:$0xff]   ;;  %v9361_v41 = vld [vmem:[%s10129_s13 + $0x8f8] sm:$0xff]  }
 0x13c   : > { %8529 = vmatprep.subr.bf16.mxu1 %v9278_v48  ;;  %v801_v48 = vpack.c.bf16 %v557_v45, %v557_v45 }
 0x13e   : > { %8508 = vmatpush3.bf16.msra.mxu0 %v9279_v49  ;;  %v558_v49 = vcombine.high %v556_v46, %v556_v46 }
 0x13f   : > { %8530 = vmatpush3.bf16.msra.mxu1 %v9280_v50  ;;  %8509 = vmatprep.subr.bf16.mxu0 %v9281_v51  ;;  %v9327_v50 = vld [vmem:[%s10129_s13 + $0x778] sm:$0xff]  }
 0x140   : > { %8531 = vmatprep.subr.bf16.mxu1 %v9282_v52  ;;  %v9328_v51 = vld [vmem:[%s10129_s13 + $0x7f8] sm:$0xff]   ;;  %v803_v52 = vpack.c.bf16 %v558_v49, %v558_v49  ;;  %v9365_v49 = vld [vmem:[%s10129_s13 + $0x8f0] sm:$0xff]  }
 0x142   : > { %8510 = vmatpush3.bf16.msra.mxu0 %v9283_v53  ;;  %v9329_v53 = vld [vmem:[%s10129_s13 + $0x738] sm:$0xff]  }
 0x143   : > { %8532 = vmatpush3.bf16.msra.mxu1 %v9284_v54  ;;  %8511 = vmatprep.subr.bf16.mxu0 %v9285_v55  ;;  %v800_v54 = vpack.c.bf16 %v549_v40, %v549_v40  ;;  %v802_v55 = vpack.c.bf16 %v556_v46, %v556_v46  ;;  %v9360_v40 = vld [vmem:[%s10129_s13 + $0x878] sm:$0xff]  }
 0x144   : > { %8533 = vmatprep.subr.bf16.mxu1 %v9286_v56  ;;  %v9330_v56 = vld [vmem:[%s10129_s13 + $0x7b8] sm:$0xff]  }
 0x146   : > { %8512 = vmatpush3.bf16.msra.mxu0 %v9287_v57  ;;  %v9331_v57 = vld [vmem:[%s10129_s13 + $0x770] sm:$0xff]  }
 0x147   : > { %8534 = vmatpush3.bf16.msra.mxu1 %v9288_v59  ;;  %8513 = vmatprep.subr.bf16.mxu0 %v9289_v62  ;;  %v9333_v59 = vld [vmem:[%s10129_s13 + $0x730] sm:$0xff]  }
 0x148   : > { %8535 = vmatprep.subr.bf16.mxu1 %v9290_v63  ;;  %v9334_v62 = vld [vmem:[%s10129_s13 + $0x7b0] sm:$0xff]   ;;  %v9335_v63 = vld [vmem:[%s10129_s13 + $0x768] sm:$0xff]  }
 0x14a   : > { %8514 = vmatpush3.bf16.msra.mxu0 %v9291_v2  ;;  %v9336_v2 = vld [vmem:[%s10129_s13 + $0x7e8] sm:$0xff]  }
 0x14b   : > { %8536 = vmatpush3.bf16.msra.mxu1 %v9292_v3  ;;  %8543 = vmatprep.subr.bf16.mxu0 %v9294_v6 }
 0x14c   : > { %8565 = vmatprep.subr.bf16.mxu1 %v9295_v8  ;;  %v9338_v8 = vld [vmem:[%s10129_s13 + $0x7a8] sm:$0xff]  }
 0x14d   : > { %5369 = vmatmul.mubr.bf16.vlgmr.msra.gmra.mxu0 %v796_v10  ;;  %v9339_v10 = vld [vmem:[%s10129_s13 + $0x760] sm:$0xff]  }
 0x14e   : > { %5409 = vmatmul.mubr.bf16.vlgmr.msra.gmra.mxu1 %v798_v11  ;;  %8544 = vmatpush3.bf16.msra.mxu0 %v9296_v9 }
 0x14f   : > { %8566 = vmatpush3.bf16.msra.mxu1 %v9297_v12  ;;  %8545 = vmatprep.subr.bf16.mxu0 %v9298_v13  ;;  %v9340_v13 = vld [vmem:[%s10129_s13 + $0x7e0] sm:$0xff]  }
 0x150   : > { %8567 = vmatprep.subr.bf16.mxu1 %v9299_v14  ;;  %5448 = vmatprep.mubr.bf16.mxu0 %v801_v48  ;;  %v9341_v14 = vld [vmem:[%s10129_s13 + $0x720] sm:$0xff]   ;;  %v9364_v48 = vld [vmem:[%s10129_s13 + $0x870] sm:$0xff]  }
 0x151   : > { %5488 = vmatprep.mubr.bf16.mxu1 %v803_v52 }
 0x152   : > { %8546 = vmatpush3.bf16.msra.mxu0 %v9300_v15  ;;  %v9342_v15 = vld [vmem:[%s10129_s13 + $0x7a0] sm:$0xff]  }
 0x153   : > { %8568 = vmatpush3.bf16.msra.mxu1 %v9301_v16  ;;  %8547 = vmatprep.subr.bf16.mxu0 %v9302_v17  ;;  %v9343_v16 = vld [vmem:[%s10129_s13 + $0x758] sm:$0xff]  }
 0x154   : > { %8569 = vmatprep.subr.bf16.mxu1 %v9303_v18  ;;  %v9344_v17 = vld [vmem:[%s10129_s13 + $0x7d8] sm:$0xff]  }
 0x155   : > { %v9345_v18 = vld [vmem:[%s10129_s13 + $0x718] sm:$0xff]  }
 0x156   : > { %8548 = vmatpush3.bf16.msra.mxu0 %v9304_v19  ;;  %v9346_v19 = vld [vmem:[%s10129_s13 + $0x798] sm:$0xff]  }
 0x157   : > { %8570 = vmatpush3.bf16.msra.mxu1 %v9305_v20  ;;  %8549 = vmatprep.subr.bf16.mxu0 %v9306_v21  ;;  %v9347_v20 = vld [vmem:[%s10129_s13 + $0x750] sm:$0xff]  }
 0x158   : > { %8571 = vmatprep.subr.bf16.mxu1 %v9307_v22  ;;  %v9348_v21 = vld [vmem:[%s10129_s13 + $0x7d0] sm:$0xff]  }
 0x159   : > { %v9349_v22 = vld [vmem:[%s10129_s13 + $0x710] sm:$0xff]  }
 0x15a   : > { %8550 = vmatpush3.bf16.msra.mxu0 %v9308_v23  ;;  %v9350_v23 = vld [vmem:[%s10129_s13 + $0x790] sm:$0xff]  }
 0x15b   : > { %8572 = vmatpush3.bf16.msra.mxu1 %v9309_v24  ;;  %8551 = vmatprep.subr.bf16.mxu0 %v9310_v25  ;;  %v9351_v24 = vld [vmem:[%s10129_s13 + $0x748] sm:$0xff]  }
 0x15c   : > { %8573 = vmatprep.subr.bf16.mxu1 %v9311_v26  ;;  %v9352_v25 = vld [vmem:[%s10129_s13 + $0x7c8] sm:$0xff]  }
 0x15d   : > { %v9353_v26 = vld [vmem:[%s10129_s13 + $0x708] sm:$0xff]  }
 0x15e   : > { %8552 = vmatpush3.bf16.msra.mxu0 %v9312_v27  ;;  %v9354_v27 = vld [vmem:[%s10129_s13 + $0x788] sm:$0xff]  }
 0x15f   : > { %8574 = vmatpush3.bf16.msra.mxu1 %v9313_v28  ;;  %8553 = vmatprep.subr.bf16.mxu0 %v9314_v29  ;;  %v415_v28 = vld [vmem:[%s10151_s25 + $0x38] sm:$0xff]  ;;  %v9355_v29 = vld [vmem:[%s10129_s13 + $0x740] sm:$0xff]  }
 0x160   : > { %8575 = vmatprep.subr.bf16.mxu1 %v9315_v30  ;;  %v566_v30 = vrot.slane %v415_v28, %v10193_v42 }
 0x162   : > { %8554 = vmatpush3.bf16.msra.mxu0 %v9316_v31  ;;  %v559_v31 = vcombine.high %v415_v28, %v415_v28  ;;  %v804_v45 = vpack.c.bf16 %v566_v30, %v566_v30  ;;  %v9391_v28 = vld [vmem:[%s10129_s13 + $0x880] sm:$0xff]  }
 0x163   : > { %8576 = vmatpush3.bf16.msra.mxu1 %v9317_v32  ;;  %8555 = vmatprep.subr.bf16.mxu0 %v9318_v33  ;;  %v9356_v32 = vld [vmem:[%s10129_s13 + $0x7c0] sm:$0xff]  }
 0x164   : > { %8577 = vmatprep.subr.bf16.mxu1 %v9319_v35  ;;  %v9357_v33 = vld [vmem:[%s10129_s13 + $0x700] sm:$0xff]   ;;  %v574_v35 = vcombine.high %v566_v30, %v566_v30 }
 0x166   : > { %8556 = vmatpush3.bf16.msra.mxu0 %v9320_v36  ;;  %v573_v36 = vrot.slane %v559_v31, %v10193_v42  ;;  %v805_v38 = vpack.c.bf16 %v574_v35, %v574_v35  ;;  %v9393_v31 = vld [vmem:[%s10129_s13 + $0x978] sm:$0xff]  }
 0x167   : > { %8578 = vmatpush3.bf16.msra.mxu1 %v9321_v37  ;;  %8557 = vmatprep.subr.bf16.mxu0 %v9322_v39  ;;  %v9358_v37 = vld [vmem:[%s10129_s13 + $0x780] sm:$0xff]   ;;  %v9395_v35 = vld [vmem:[%s10129_s13 + $0x938] sm:$0xff]  }
 0x168   : > { %8579 = vmatprep.subr.bf16.mxu1 %v9323_v43  ;;  %v575_v39 = vcombine.high %v573_v36, %v573_v36  ;;  %v806_v46 = vpack.c.bf16 %v573_v36, %v573_v36 }
 0x16a   : > { %8558 = vmatpush3.bf16.msra.mxu0 %v9324_v44  ;;  %v807_v43 = vpack.c.bf16 %v575_v39, %v575_v39  ;;  %v9362_v44 = vld [vmem:[%s10129_s13 + $0x838] sm:$0xff]   ;;  %v9397_v39 = vld [vmem:[%s10129_s13 + $0x970] sm:$0xff]  }
 0x16b   : > { %8580 = vmatpush3.bf16.msra.mxu1 %v9325_v47  ;;  %8587 = vmatprep.subr.bf16.mxu0 %v9327_v50  ;;  %v9363_v47 = vld [vmem:[%s10129_s13 + $0x8b8] sm:$0xff]   ;;  %v9366_v50 = vld [vmem:[%s10129_s13 + $0x830] sm:$0xff]  }
 0x16c   : > { %8609 = vmatprep.subr.bf16.mxu1 %v9328_v51 }
 0x16d   : > { %v8295_v60 = vpop.f32.mrf.mxu0  ;;  %5449 = vmatmul.mubr.bf16.vlgmr.msra.gmra.mxu0 %v800_v54  ;;  %v9368_v54 = vld [vmem:[%s10129_s13 + $0x868] sm:$0xff]  }
 0x16e   : > { %v8317_v61 = vpop.f32.mrf.mxu1  ;;  %5489 = vmatmul.mubr.bf16.vlgmr.msra.gmra.mxu1 %v802_v55  ;;  %8588 = vmatpush3.bf16.msra.mxu0 %v9329_v53  ;;  %v9367_v53 = vld [vmem:[%s10129_s13 + $0x8b0] sm:$0xff]  }
 0x16f   : > { %8610 = vmatpush3.bf16.msra.mxu1 %v9330_v56  ;;  %v8296_v0 = vpop.f32.mrf.mxu0  ;;  %8589 = vmatprep.subr.bf16.mxu0 %v9331_v57  ;;  %v9369_v57 = vld [vmem:[%s10129_s13 + $0x8e8] sm:$0xff]  }
 0x170   : > { %v8318_v1 = vpop.f32.mrf.mxu1  ;;  %8611 = vmatprep.subr.bf16.mxu1 %v9332_v58  ;;  %v8297_v3 = vadd.f32 %v8296_v0, %v8295_v60  ;;  %5528 = vmatprep.mubr.bf16.mxu0 %v805_v38  ;;  %v9370_v60 = vld [vmem:[%s10129_s13 + $0x828] sm:$0xff]   ;;  %v9396_v38 = vld [vmem:[%s10129_s13 + $0x9b8] sm:$0xff]  }
 0x171   : > { %v8319_v4 = vadd.f32 %v8318_v1, %v8317_v61  ;;  %v8298_v6 = vpop.f32.mrf.mxu0  ;;  %5568 = vmatprep.mubr.bf16.mxu1 %v807_v43  ;;  %v9372_v1 = vld [vmem:[%s10129_s13 + $0x860] sm:$0xff]  }
 0x172   : > { %v8320_v7 = vpop.f32.mrf.mxu1  ;;  %8590 = vmatpush3.bf16.msra.mxu0 %v9333_v59  ;;  %v9374_v6 = vld [vmem:[%s10129_s13 + $0x820] sm:$0xff]  }
 0x173   : > { %v10417_v9 = vadd.f32 %v8319_v4, %v8297_v3  ;;  %8612 = vmatpush3.bf16.msra.mxu1 %v9334_v62  ;;  %v8299_v11 = vpop.f32.mrf.mxu0  ;;  %8591 = vmatprep.subr.bf16.mxu0 %v9335_v63  ;;  %v9371_v63 = vld [vmem:[%s10129_s13 + $0x8a8] sm:$0xff]   ;;  %v9373_v4 = vld [vmem:[%s10129_s13 + $0x8e0] sm:$0xff]  }
 0x174   : > { %v8321_v12 = vpop.f32.mrf.mxu1  ;;  %8613 = vmatprep.subr.bf16.mxu1 %v9336_v2  ;;  %v9375_v7 = vld [vmem:[%s10129_s13 + $0x8a0] sm:$0xff]   ;;  %v9379_v11 = vld [vmem:[%s10129_s13 + $0x898] sm:$0xff]  }
 0x175   : > { %v9380_v12 = vld [vmem:[%s10129_s13 + $0x850] sm:$0xff]  }
 0x176   : > { %8592 = vmatpush3.bf16.msra.mxu0 %v9337_v5 }
 0x177   : > { %8614 = vmatpush3.bf16.msra.mxu1 %v9338_v8  ;;  %8593 = vmatprep.subr.bf16.mxu0 %v9339_v10  ;;  %v9376_v8 = vld [vmem:[%s10129_s13 + $0x858] sm:$0xff]  }
 0x178   : > { %8615 = vmatprep.subr.bf16.mxu1 %v9340_v13  ;;  %v9378_v10 = vld [vmem:[%s10129_s13 + $0x818] sm:$0xff]   ;;  %v9381_v13 = vld [vmem:[%s10129_s13 + $0x8d0] sm:$0xff]  }
 0x17a   : > { %8594 = vmatpush3.bf16.msra.mxu0 %v9341_v14  ;;  %v9382_v14 = vld [vmem:[%s10129_s13 + $0x810] sm:$0xff]  }
 0x17b   : > { %8616 = vmatpush3.bf16.msra.mxu1 %v9342_v15  ;;  %8595 = vmatprep.subr.bf16.mxu0 %v9343_v16  ;;  %v9383_v15 = vld [vmem:[%s10129_s13 + $0x890] sm:$0xff]   ;;  %v9384_v16 = vld [vmem:[%s10129_s13 + $0x848] sm:$0xff]  }
 0x17c   : > { %8617 = vmatprep.subr.bf16.mxu1 %v9344_v17  ;;  %v9385_v17 = vld [vmem:[%s10129_s13 + $0x8c8] sm:$0xff]  }
 0x17e   : > { %8596 = vmatpush3.bf16.msra.mxu0 %v9345_v18  ;;  %v9386_v18 = vld [vmem:[%s10129_s13 + $0x808] sm:$0xff]  }
 0x17f   : > { %8618 = vmatpush3.bf16.msra.mxu1 %v9346_v19  ;;  %8597 = vmatprep.subr.bf16.mxu0 %v9347_v20  ;;  %v9387_v19 = vld [vmem:[%s10129_s13 + $0x888] sm:$0xff]   ;;  %v416_v20 = vld [vmem:[%s10151_s25 + $0x40] sm:$0xff] }
 0x180   : > { %8619 = vmatprep.subr.bf16.mxu1 %v9348_v21  ;;  %v9388_v21 = vld [vmem:[%s10129_s13 + $0x840] sm:$0xff]  }
 0x182   : > { %8598 = vmatpush3.bf16.msra.mxu0 %v9349_v22  ;;  %v583_v22 = vrot.slane %v416_v20, %v10193_v42 }
 0x183   : > { %8620 = vmatpush3.bf16.msra.mxu1 %v9350_v23  ;;  %8599 = vmatprep.subr.bf16.mxu0 %v9351_v24  ;;  %v576_v23 = vcombine.high %v416_v20, %v416_v20  ;;  %v9389_v24 = vld [vmem:[%s10129_s13 + $0x8c0] sm:$0xff]  }
 0x184   : > { %8621 = vmatprep.subr.bf16.mxu1 %v9352_v25  ;;  %v9390_v25 = vld [vmem:[%s10129_s13 + $0x800] sm:$0xff]   ;;  %v808_v36 = vpack.c.bf16 %v583_v22, %v583_v22 }
 0x186   : > { %8600 = vmatpush3.bf16.msra.mxu0 %v9353_v26  ;;  %v591_v26 = vcombine.high %v583_v22, %v583_v22 }
 0x187   : > { %8622 = vmatpush3.bf16.msra.mxu1 %v9354_v27  ;;  %8601 = vmatprep.subr.bf16.mxu0 %v9355_v29  ;;  %v590_v27 = vrot.slane %v576_v23, %v10193_v42 }
 0x188   : > { %8623 = vmatprep.subr.bf16.mxu1 %v9356_v32  ;;  %v809_v29 = vpack.c.bf16 %v591_v26, %v591_v26  ;;  %v9394_v32 = vld [vmem:[%s10129_s13 + $0x9f8] sm:$0xff]  }
 0x189   : > { %v592_v30 = vcombine.high %v590_v27, %v590_v27 }
 0x18a   : > { %8602 = vmatpush3.bf16.msra.mxu0 %v9357_v33 }
 0x18b   : > { %8624 = vmatpush3.bf16.msra.mxu1 %v9358_v37  ;;  %8631 = vmatprep.subr.bf16.mxu0 %v9360_v40  ;;  %v811_v33 = vpack.c.bf16 %v592_v30, %v592_v30  ;;  %v810_v37 = vpack.c.bf16 %v590_v27, %v590_v27  ;;  %v9398_v40 = vld [vmem:[%s10129_s13 + $0x9f0] sm:$0xff]  }
 0x18c   : > { %8653 = vmatprep.subr.bf16.mxu1 %v9361_v41  ;;  %v9399_v41 = vld [vmem:[%s10129_s13 + $0x930] sm:$0xff]  }
 0x18d   : > { %v8339_v51 = vpop.f32.mrf.mxu0  ;;  %5529 = vmatmul.mubr.bf16.vlgmr.msra.gmra.mxu0 %v804_v45  ;;  %v9400_v45 = vld [vmem:[%s10129_s13 + $0x9b0] sm:$0xff]  }
 0x18e   : > { %v8361_v52 = vpop.f32.mrf.mxu1  ;;  %5569 = vmatmul.mubr.bf16.vlgmr.msra.gmra.mxu1 %v806_v46  ;;  %8632 = vmatpush3.bf16.msra.mxu0 %v9362_v44  ;;  %v9401_v46 = vld [vmem:[%s10129_s13 + $0x968] sm:$0xff]   ;;  %v9430_v30 = vld [vmem:[%s10129_s13 + $0xa70] sm:$0xff]  }
 0x18f   : > { %8654 = vmatpush3.bf16.msra.mxu1 %v9363_v47  ;;  %v8340_v55 = vpop.f32.mrf.mxu0  ;;  %8633 = vmatprep.subr.bf16.mxu0 %v9364_v48 }
 0x190   : > { %v8362_v56 = vpop.f32.mrf.mxu1  ;;  %8655 = vmatprep.subr.bf16.mxu1 %v9365_v49  ;;  %v8341_v58 = vadd.f32 %v8340_v55, %v8339_v51  ;;  %5608 = vmatprep.mubr.bf16.mxu0 %v809_v29  ;;  %v9402_v49 = vld [vmem:[%s10129_s13 + $0x9e8] sm:$0xff]   ;;  %v9429_v29 = vld [vmem:[%s10129_s13 + $0xab8] sm:$0xff]  }
 0x191   : > { %v8363_v59 = vadd.f32 %v8362_v56, %v8361_v52  ;;  %v8342_v61 = vpop.f32.mrf.mxu0  ;;  %5648 = vmatprep.mubr.bf16.mxu1 %v811_v33  ;;  %v9403_v52 = vld [vmem:[%s10129_s13 + $0x928] sm:$0xff]  }
 0x192   : > { %v8364_v62 = vpop.f32.mrf.mxu1  ;;  %v5051_v0 = vadd.f32 %v8341_v58, %v10417_v9  ;;  %8634 = vmatpush3.bf16.msra.mxu0 %v9366_v50  ;;  %v9377_v9 = vld [vmem:[%s10129_s13 + $0x8d8] sm:$0xff]   ;;  %v9404_v55 = vld [vmem:[%s10129_s13 + $0x9a8] sm:$0xff]  }
 0x193   : > { %8656 = vmatpush3.bf16.msra.mxu1 %v9367_v53  ;;  %v8343_v2 = vpop.f32.mrf.mxu0  ;;  %8635 = vmatprep.subr.bf16.mxu0 %v9368_v54  ;;  %v9407_v62 = vld [vmem:[%s10129_s13 + $0x920] sm:$0xff]  }
 0x194   : > { %v8365_v3 = vpop.f32.mrf.mxu1  ;;  %8657 = vmatprep.subr.bf16.mxu1 %v9369_v57  ;;  %v10457_v5 = vadd.f32 %v8363_v59, %v5051_v0  ;;  %v9405_v57 = vld [vmem:[%s10129_s13 + $0x960] sm:$0xff]   ;;  %v9409_v0 = vld [vmem:[%s10129_s13 + $0x958] sm:$0xff]  }
 0x195   : > { %v9411_v2 = vld [vmem:[%s10129_s13 + $0x918] sm:$0xff]  }
 0x196   : > { %8636 = vmatpush3.bf16.msra.mxu0 %v9370_v60  ;;  %v9406_v60 = vld [vmem:[%s10129_s13 + $0x9e0] sm:$0xff]   ;;  %v9412_v3 = vld [vmem:[%s10129_s13 + $0x998] sm:$0xff]  }
 0x197   : > { %8658 = vmatpush3.bf16.msra.mxu1 %v9371_v63  ;;  %8637 = vmatprep.subr.bf16.mxu0 %v9372_v1  ;;  %v9408_v63 = vld [vmem:[%s10129_s13 + $0x9a0] sm:$0xff]   ;;  %v9410_v1 = vld [vmem:[%s10129_s13 + $0x9d8] sm:$0xff]  }
 0x198   : > { %8659 = vmatprep.subr.bf16.mxu1 %v9373_v4  ;;  %v9413_v4 = vld [vmem:[%s10129_s13 + $0x950] sm:$0xff]  }
 0x19a   : > { %8638 = vmatpush3.bf16.msra.mxu0 %v9374_v6  ;;  %v9415_v6 = vld [vmem:[%s10129_s13 + $0x910] sm:$0xff]  }
 0x19b   : > { %8660 = vmatpush3.bf16.msra.mxu1 %v9375_v7  ;;  %8639 = vmatprep.subr.bf16.mxu0 %v9376_v8  ;;  %v9416_v7 = vld [vmem:[%s10129_s13 + $0x990] sm:$0xff]   ;;  %v9417_v8 = vld [vmem:[%s10129_s13 + $0x948] sm:$0xff]  }
 0x19c   : > { %8661 = vmatprep.subr.bf16.mxu1 %v9377_v9  ;;  %v9418_v9 = vld [vmem:[%s10129_s13 + $0x9c8] sm:$0xff]  }
 0x19e   : > { %8640 = vmatpush3.bf16.msra.mxu0 %v9378_v10  ;;  %v9419_v10 = vld [vmem:[%s10129_s13 + $0x908] sm:$0xff]  }
 0x19f   : > { %8662 = vmatpush3.bf16.msra.mxu1 %v9379_v11  ;;  %8641 = vmatprep.subr.bf16.mxu0 %v9380_v12  ;;  %v9420_v11 = vld [vmem:[%s10129_s13 + $0x988] sm:$0xff]   ;;  %v9421_v12 = vld [vmem:[%s10129_s13 + $0x940] sm:$0xff]  }
 0x1a0   : > { %8663 = vmatprep.subr.bf16.mxu1 %v9381_v13  ;;  %v417_v13 = vld [vmem:[%s10151_s25 + $0x48] sm:$0xff] }
 0x1a2   : > { %8642 = vmatpush3.bf16.msra.mxu0 %v9382_v14  ;;  %v9422_v14 = vld [vmem:[%s10129_s13 + $0x9c0] sm:$0xff]  }
 0x1a3   : > { %8664 = vmatpush3.bf16.msra.mxu1 %v9383_v15  ;;  %8643 = vmatprep.subr.bf16.mxu0 %v9384_v16  ;;  %v600_v15 = vrot.slane %v417_v13, %v10193_v42  ;;  %v593_v16 = vcombine.high %v417_v13, %v417_v13  ;;  %v9459_v13 = vld [vmem:[%s10129_s13 + $0xb78] sm:$0xff]  }
 0x1a4   : > { %8665 = vmatprep.subr.bf16.mxu1 %v9385_v17  ;;  %v9423_v17 = vld [vmem:[%s10129_s13 + $0x900] sm:$0xff]  }
 0x1a5   : > { %v607_v20 = vrot.slane %v593_v16, %v10193_v42  ;;  %v812_v27 = vpack.c.bf16 %v600_v15, %v600_v15  ;;  %v9460_v16 = vld [vmem:[%s10129_s13 + $0xbf8] sm:$0xff]  }
 0x1a6   : > { %8644 = vmatpush3.bf16.msra.mxu0 %v9386_v18  ;;  %v9424_v18 = vld [vmem:[%s10129_s13 + $0x980] sm:$0xff]  }
 0x1a7   : > { %8666 = vmatpush3.bf16.msra.mxu1 %v9387_v19  ;;  %8645 = vmatprep.subr.bf16.mxu0 %v9388_v21  ;;  %v608_v19 = vcombine.high %v600_v15, %v600_v15  ;;  %v9426_v21 = vld [vmem:[%s10129_s13 + $0xa78] sm:$0xff]   ;;  %v609_v23 = vcombine.high %v607_v20, %v607_v20 }
 0x1a8   : > { %8667 = vmatprep.subr.bf16.mxu1 %v9389_v24  ;;  %v9427_v24 = vld [vmem:[%s10129_s13 + $0xaf8] sm:$0xff]  }
 0x1a9   : > { %v813_v22 = vpack.c.bf16 %v608_v19, %v608_v19  ;;  %v815_v26 = vpack.c.bf16 %v609_v23, %v609_v23  ;;  %v9464_v23 = vld [vmem:[%s10129_s13 + $0xbf0] sm:$0xff]  }
 0x1aa   : > { %8646 = vmatpush3.bf16.msra.mxu0 %v9390_v25  ;;  %v9428_v25 = vld [vmem:[%s10129_s13 + $0xa38] sm:$0xff]  }
 0x1ab   : > { %8668 = vmatpush3.bf16.msra.mxu1 %v9391_v28  ;;  %8675 = vmatprep.subr.bf16.mxu0 %v9393_v31  ;;  %v814_v28 = vpack.c.bf16 %v607_v20, %v607_v20  ;;  %v9431_v31 = vld [vmem:[%s10129_s13 + $0xaf0] sm:$0xff]  }
 0x1ac   : > { %8697 = vmatprep.subr.bf16.mxu1 %v9394_v32  ;;  %v9432_v32 = vld [vmem:[%s10129_s13 + $0xa30] sm:$0xff]  }
 0x1ad   : > { %v8383_v43 = vpop.f32.mrf.mxu0  ;;  %5609 = vmatmul.mubr.bf16.vlgmr.msra.gmra.mxu0 %v808_v36  ;;  %v9433_v36 = vld [vmem:[%s10129_s13 + $0xab0] sm:$0xff]  }
 0x1ae   : > { %v8405_v44 = vpop.f32.mrf.mxu1  ;;  %5649 = vmatmul.mubr.bf16.vlgmr.msra.gmra.mxu1 %v810_v37  ;;  %8676 = vmatpush3.bf16.msra.mxu0 %v9395_v35  ;;  %v9434_v37 = vld [vmem:[%s10129_s13 + $0xa68] sm:$0xff]  }
 0x1af   : > { %8698 = vmatpush3.bf16.msra.mxu1 %v9396_v38  ;;  %v8384_v47 = vpop.f32.mrf.mxu0  ;;  %8677 = vmatprep.subr.bf16.mxu0 %v9397_v39 }
 0x1b0   : > { %v8406_v48 = vpop.f32.mrf.mxu1  ;;  %8699 = vmatprep.subr.bf16.mxu1 %v9398_v40  ;;  %v8385_v50 = vadd.f32 %v8384_v47, %v8383_v43  ;;  %5688 = vmatprep.mubr.bf16.mxu0 %v813_v22  ;;  %v9435_v40 = vld [vmem:[%s10129_s13 + $0xae8] sm:$0xff]   ;;  %v9463_v22 = vld [vmem:[%s10129_s13 + $0xb70] sm:$0xff]  }
 0x1b1   : > { %v8407_v51 = vadd.f32 %v8406_v48, %v8405_v44  ;;  %v8386_v53 = vpop.f32.mrf.mxu0  ;;  %5728 = vmatprep.mubr.bf16.mxu1 %v815_v26  ;;  %v9436_v44 = vld [vmem:[%s10129_s13 + $0xa28] sm:$0xff]  }
 0x1b2   : > { %v8408_v54 = vpop.f32.mrf.mxu1  ;;  %v5131_v56 = vadd.f32 %v8385_v50, %v10457_v5  ;;  %8678 = vmatpush3.bf16.msra.mxu0 %v9399_v41  ;;  %v9414_v5 = vld [vmem:[%s10129_s13 + $0x9d0] sm:$0xff]   ;;  %v9437_v47 = vld [vmem:[%s10129_s13 + $0xaa8] sm:$0xff]  }
 0x1b3   : > { %8700 = vmatpush3.bf16.msra.mxu1 %v9400_v45  ;;  %v8387_v58 = vpop.f32.mrf.mxu0  ;;  %8679 = vmatprep.subr.bf16.mxu0 %v9401_v46  ;;  %v9440_v54 = vld [vmem:[%s10129_s13 + $0xa20] sm:$0xff]  }
 0x1b4   : > { %v8409_v59 = vpop.f32.mrf.mxu1  ;;  %8701 = vmatprep.subr.bf16.mxu1 %v9402_v49  ;;  %v10495_v61 = vadd.f32 %v8407_v51, %v5131_v56  ;;  %v9438_v49 = vld [vmem:[%s10129_s13 + $0xa60] sm:$0xff]   ;;  %v9442_v56 = vld [vmem:[%s10129_s13 + $0xa58] sm:$0xff]  }
 0x1b5   : > { %v9444_v58 = vld [vmem:[%s10129_s13 + $0xa18] sm:$0xff]  }
 0x1b6   : > { %8680 = vmatpush3.bf16.msra.mxu0 %v9403_v52  ;;  %v9439_v52 = vld [vmem:[%s10129_s13 + $0xae0] sm:$0xff]   ;;  %v9445_v59 = vld [vmem:[%s10129_s13 + $0xa98] sm:$0xff]  }
 0x1b7   : > { %8702 = vmatpush3.bf16.msra.mxu1 %v9404_v55  ;;  %8681 = vmatprep.subr.bf16.mxu0 %v9405_v57  ;;  %v9441_v55 = vld [vmem:[%s10129_s13 + $0xaa0] sm:$0xff]   ;;  %v9443_v57 = vld [vmem:[%s10129_s13 + $0xad8] sm:$0xff]  }
 0x1b8   : > { %8703 = vmatprep.subr.bf16.mxu1 %v9406_v60  ;;  %v9446_v60 = vld [vmem:[%s10129_s13 + $0xa50] sm:$0xff]  }
 0x1ba   : > { %8682 = vmatpush3.bf16.msra.mxu0 %v9407_v62  ;;  %v9448_v62 = vld [vmem:[%s10129_s13 + $0xa10] sm:$0xff]  }
 0x1bb   : > { %8704 = vmatpush3.bf16.msra.mxu1 %v9408_v63  ;;  %8683 = vmatprep.subr.bf16.mxu0 %v9409_v0  ;;  %v9449_v63 = vld [vmem:[%s10129_s13 + $0xa90] sm:$0xff]   ;;  %v9450_v0 = vld [vmem:[%s10129_s13 + $0xa48] sm:$0xff]  }
 0x1bc   : > { %8705 = vmatprep.subr.bf16.mxu1 %v9410_v1  ;;  %v9451_v1 = vld [vmem:[%s10129_s13 + $0xac8] sm:$0xff]  }
 0x1be   : > { %8684 = vmatpush3.bf16.msra.mxu0 %v9411_v2  ;;  %v9452_v2 = vld [vmem:[%s10129_s13 + $0xa08] sm:$0xff]  }
 0x1bf   : > { %8706 = vmatpush3.bf16.msra.mxu1 %v9412_v3  ;;  %8685 = vmatprep.subr.bf16.mxu0 %v9413_v4  ;;  %v9453_v3 = vld [vmem:[%s10129_s13 + $0xa88] sm:$0xff]   ;;  %v9454_v4 = vld [vmem:[%s10129_s13 + $0xa40] sm:$0xff]  }
 0x1c0   : > { %8707 = vmatprep.subr.bf16.mxu1 %v9414_v5  ;;  %v418_v5 = vld [vmem:[%s10151_s25 + $0x50] sm:$0xff] }
 0x1c2   : > { %8686 = vmatpush3.bf16.msra.mxu0 %v9415_v6  ;;  %v9455_v6 = vld [vmem:[%s10129_s13 + $0xac0] sm:$0xff]  }
 0x1c3   : > { %8708 = vmatpush3.bf16.msra.mxu1 %v9416_v7  ;;  %8687 = vmatprep.subr.bf16.mxu0 %v9417_v8  ;;  %v617_v7 = vrot.slane %v418_v5, %v10193_v42  ;;  %v610_v8 = vcombine.high %v418_v5, %v418_v5  ;;  %v9492_v5 = vld [vmem:[%s10129_s13 + $0xc78] sm:$0xff]  }
 0x1c4   : > { %8709 = vmatprep.subr.bf16.mxu1 %v9418_v9  ;;  %v9456_v9 = vld [vmem:[%s10129_s13 + $0xa00] sm:$0xff]  }
 0x1c5   : > { %v816_v19 = vpack.c.bf16 %v617_v7, %v617_v7 }
 0x1c6   : > { %8688 = vmatpush3.bf16.msra.mxu0 %v9419_v10  ;;  %v9457_v10 = vld [vmem:[%s10129_s13 + $0xa80] sm:$0xff]  }
 0x1c7   : > { %8710 = vmatpush3.bf16.msra.mxu1 %v9420_v11  ;;  %8689 = vmatprep.subr.bf16.mxu0 %v9421_v12  ;;  %v625_v11 = vcombine.high %v617_v7, %v617_v7  ;;  %v624_v12 = vrot.slane %v610_v8, %v10193_v42  ;;  %v9493_v8 = vld [vmem:[%s10129_s13 + $0xcf8] sm:$0xff]  }
 0x1c8   : > { %8711 = vmatprep.subr.bf16.mxu1 %v9422_v14 }
 0x1c9   : > { %v817_v14 = vpack.c.bf16 %v625_v11, %v625_v11  ;;  %v626_v15 = vcombine.high %v624_v12, %v624_v12  ;;  %v818_v20 = vpack.c.bf16 %v624_v12, %v624_v12 }
 0x1ca   : > { %8690 = vmatpush3.bf16.msra.mxu0 %v9423_v17  ;;  %v9461_v17 = vld [vmem:[%s10129_s13 + $0xb38] sm:$0xff]  }
 0x1cb   : > { %8712 = vmatpush3.bf16.msra.mxu1 %v9424_v18  ;;  %8719 = vmatprep.subr.bf16.mxu0 %v9426_v21  ;;  %v819_v18 = vpack.c.bf16 %v626_v15, %v626_v15  ;;  %v9462_v21 = vld [vmem:[%s10129_s13 + $0xbb8] sm:$0xff]   ;;  %v9497_v15 = vld [vmem:[%s10129_s13 + $0xcf0] sm:$0xff]  }
 0x1cc   : > { %8741 = vmatprep.subr.bf16.mxu1 %v9427_v24  ;;  %v9465_v24 = vld [vmem:[%s10129_s13 + $0xb30] sm:$0xff]  }
 0x1cd   : > { %v8427_v33 = vpop.f32.mrf.mxu0  ;;  %5689 = vmatmul.mubr.bf16.vlgmr.msra.gmra.mxu0 %v812_v27  ;;  %v9466_v27 = vld [vmem:[%s10129_s13 + $0xbb0] sm:$0xff]  }
 0x1ce   : > { %v8449_v35 = vpop.f32.mrf.mxu1  ;;  %5729 = vmatmul.mubr.bf16.vlgmr.msra.gmra.mxu1 %v814_v28  ;;  %8720 = vmatpush3.bf16.msra.mxu0 %v9428_v25  ;;  %v9467_v28 = vld [vmem:[%s10129_s13 + $0xb68] sm:$0xff]  }
 0x1cf   : > { %8742 = vmatpush3.bf16.msra.mxu1 %v9429_v29  ;;  %v8428_v38 = vpop.f32.mrf.mxu0  ;;  %8721 = vmatprep.subr.bf16.mxu0 %v9430_v30 }
 0x1d0   : > { %v8450_v39 = vpop.f32.mrf.mxu1  ;;  %8743 = vmatprep.subr.bf16.mxu1 %v9431_v31  ;;  %v8429_v41 = vadd.f32 %v8428_v38, %v8427_v33  ;;  %5768 = vmatprep.mubr.bf16.mxu0 %v817_v14  ;;  %v9468_v31 = vld [vmem:[%s10129_s13 + $0xbe8] sm:$0xff]   ;;  %v9496_v14 = vld [vmem:[%s10129_s13 + $0xc70] sm:$0xff]  }
 0x1d1   : > { %v8451_v43 = vadd.f32 %v8450_v39, %v8449_v35  ;;  %v8430_v45 = vpop.f32.mrf.mxu0  ;;  %5808 = vmatprep.mubr.bf16.mxu1 %v819_v18  ;;  %v9469_v35 = vld [vmem:[%s10129_s13 + $0xb28] sm:$0xff]  }
 0x1d2   : > { %v8452_v46 = vpop.f32.mrf.mxu1  ;;  %v5211_v48 = vadd.f32 %v8429_v41, %v10495_v61  ;;  %8722 = vmatpush3.bf16.msra.mxu0 %v9432_v32  ;;  %v9447_v61 = vld [vmem:[%s10129_s13 + $0xad0] sm:$0xff]   ;;  %v9470_v38 = vld [vmem:[%s10129_s13 + $0xba8] sm:$0xff]  }
 0x1d3   : > { %8744 = vmatpush3.bf16.msra.mxu1 %v9433_v36  ;;  %v8431_v50 = vpop.f32.mrf.mxu0  ;;  %8723 = vmatprep.subr.bf16.mxu0 %v9434_v37  ;;  %v9473_v46 = vld [vmem:[%s10129_s13 + $0xb20] sm:$0xff]  }
 0x1d4   : > { %v8453_v51 = vpop.f32.mrf.mxu1  ;;  %8745 = vmatprep.subr.bf16.mxu1 %v9435_v40  ;;  %v10533_v53 = vadd.f32 %v8451_v43, %v5211_v48  ;;  %v9471_v40 = vld [vmem:[%s10129_s13 + $0xb60] sm:$0xff]   ;;  %v9475_v48 = vld [vmem:[%s10129_s13 + $0xb58] sm:$0xff]  }
 0x1d5   : > { %v9477_v50 = vld [vmem:[%s10129_s13 + $0xb18] sm:$0xff]  }
 0x1d6   : > { %8724 = vmatpush3.bf16.msra.mxu0 %v9436_v44  ;;  %v9472_v44 = vld [vmem:[%s10129_s13 + $0xbe0] sm:$0xff]   ;;  %v9478_v51 = vld [vmem:[%s10129_s13 + $0xb98] sm:$0xff]  }
 0x1d7   : > { %8746 = vmatpush3.bf16.msra.mxu1 %v9437_v47  ;;  %8725 = vmatprep.subr.bf16.mxu0 %v9438_v49  ;;  %v9474_v47 = vld [vmem:[%s10129_s13 + $0xba0] sm:$0xff]   ;;  %v9476_v49 = vld [vmem:[%s10129_s13 + $0xbd8] sm:$0xff]  }
 0x1d8   : > { %8747 = vmatprep.subr.bf16.mxu1 %v9439_v52  ;;  %v9479_v52 = vld [vmem:[%s10129_s13 + $0xb50] sm:$0xff]  }
 0x1da   : > { %8726 = vmatpush3.bf16.msra.mxu0 %v9440_v54  ;;  %v9481_v54 = vld [vmem:[%s10129_s13 + $0xb10] sm:$0xff]  }
 0x1db   : > { %8748 = vmatpush3.bf16.msra.mxu1 %v9441_v55  ;;  %8727 = vmatprep.subr.bf16.mxu0 %v9442_v56  ;;  %v9482_v55 = vld [vmem:[%s10129_s13 + $0xb90] sm:$0xff]   ;;  %v9483_v56 = vld [vmem:[%s10129_s13 + $0xb48] sm:$0xff]  }
 0x1dc   : > { %8749 = vmatprep.subr.bf16.mxu1 %v9443_v57  ;;  %v9484_v57 = vld [vmem:[%s10129_s13 + $0xbc8] sm:$0xff]  }
 0x1de   : > { %8728 = vmatpush3.bf16.msra.mxu0 %v9444_v58  ;;  %v9485_v58 = vld [vmem:[%s10129_s13 + $0xb08] sm:$0xff]  }
 0x1df   : > { %8750 = vmatpush3.bf16.msra.mxu1 %v9445_v59  ;;  %8729 = vmatprep.subr.bf16.mxu0 %v9446_v60  ;;  %v9486_v59 = vld [vmem:[%s10129_s13 + $0xb88] sm:$0xff]   ;;  %v9487_v60 = vld [vmem:[%s10129_s13 + $0xb40] sm:$0xff]  }
 0x1e0   : > { %8751 = vmatprep.subr.bf16.mxu1 %v9447_v61  ;;  %v419_v61 = vld [vmem:[%s10151_s25 + $0x58] sm:$0xff] }
 0x1e2   : > { %8730 = vmatpush3.bf16.msra.mxu0 %v9448_v62  ;;  %v9488_v62 = vld [vmem:[%s10129_s13 + $0xbc0] sm:$0xff]  }
 0x1e3   : > { %8752 = vmatpush3.bf16.msra.mxu1 %v9449_v63  ;;  %8731 = vmatprep.subr.bf16.mxu0 %v9450_v0  ;;  %v634_v63 = vrot.slane %v419_v61, %v10193_v42  ;;  %v627_v0 = vcombine.high %v419_v61, %v419_v61  ;;  %v9525_v61 = vld [vmem:[%s10129_s13 + $0xd78] sm:$0xff]  }
 0x1e4   : > { %8753 = vmatprep.subr.bf16.mxu1 %v9451_v1  ;;  %v9489_v1 = vld [vmem:[%s10129_s13 + $0xb00] sm:$0xff]  }
 0x1e5   : > { %v820_v11 = vpack.c.bf16 %v634_v63, %v634_v63 }
 0x1e6   : > { %8732 = vmatpush3.bf16.msra.mxu0 %v9452_v2  ;;  %v9490_v2 = vld [vmem:[%s10129_s13 + $0xb80] sm:$0xff]  }
 0x1e7   : > { %8754 = vmatpush3.bf16.msra.mxu1 %v9453_v3  ;;  %8733 = vmatprep.subr.bf16.mxu0 %v9454_v4  ;;  %v642_v3 = vcombine.high %v634_v63, %v634_v63  ;;  %v641_v4 = vrot.slane %v627_v0, %v10193_v42 }
 0x1e8   : > { %8755 = vmatprep.subr.bf16.mxu1 %v9455_v6 }
 0x1e9   : > { %v821_v6 = vpack.c.bf16 %v642_v3, %v642_v3  ;;  %v643_v7 = vcombine.high %v641_v4, %v641_v4  ;;  %v822_v12 = vpack.c.bf16 %v641_v4, %v641_v4  ;;  %v9528_v4 = vld [vmem:[%s10129_s13 + $0xdb8] sm:$0xff]  }
 0x1ea   : > { %8734 = vmatpush3.bf16.msra.mxu0 %v9456_v9  ;;  %v9494_v9 = vld [vmem:[%s10129_s13 + $0xc38] sm:$0xff]  }
 0x1eb   : > { %8756 = vmatpush3.bf16.msra.mxu1 %v9457_v10  ;;  %8763 = vmatprep.subr.bf16.mxu0 %v9459_v13  ;;  %v823_v10 = vpack.c.bf16 %v643_v7, %v643_v7  ;;  %v9495_v13 = vld [vmem:[%s10129_s13 + $0xcb8] sm:$0xff]   ;;  %v9530_v7 = vld [vmem:[%s10129_s13 + $0xdf0] sm:$0xff]  }
 0x1ec   : > { %8785 = vmatprep.subr.bf16.mxu1 %v9460_v16  ;;  %v9498_v16 = vld [vmem:[%s10129_s13 + $0xc30] sm:$0xff]  }
 0x1ed   : > { %v8471_v25 = vpop.f32.mrf.mxu0  ;;  %5769 = vmatmul.mubr.bf16.vlgmr.msra.gmra.mxu0 %v816_v19  ;;  %v9499_v19 = vld [vmem:[%s10129_s13 + $0xcb0] sm:$0xff]  }
 0x1ee   : > { %v8493_v26 = vpop.f32.mrf.mxu1  ;;  %5809 = vmatmul.mubr.bf16.vlgmr.msra.gmra.mxu1 %v818_v20  ;;  %8764 = vmatpush3.bf16.msra.mxu0 %v9461_v17  ;;  %v9500_v20 = vld [vmem:[%s10129_s13 + $0xc68] sm:$0xff]  }
 0x1ef   : > { %8786 = vmatpush3.bf16.msra.mxu1 %v9462_v21  ;;  %v8472_v29 = vpop.f32.mrf.mxu0  ;;  %8765 = vmatprep.subr.bf16.mxu0 %v9463_v22 }
 0x1f0   : > { %v8494_v30 = vpop.f32.mrf.mxu1  ;;  %8787 = vmatprep.subr.bf16.mxu1 %v9464_v23  ;;  %v8473_v32 = vadd.f32 %v8472_v29, %v8471_v25  ;;  %5848 = vmatprep.mubr.bf16.mxu0 %v821_v6  ;;  %v9501_v23 = vld [vmem:[%s10129_s13 + $0xce8] sm:$0xff]   ;;  %v9529_v6 = vld [vmem:[%s10129_s13 + $0xd70] sm:$0xff]  }
 0x1f1   : > { %v8495_v33 = vadd.f32 %v8494_v30, %v8493_v26  ;;  %v8474_v36 = vpop.f32.mrf.mxu0  ;;  %5888 = vmatprep.mubr.bf16.mxu1 %v823_v10  ;;  %v9502_v26 = vld [vmem:[%s10129_s13 + $0xc28] sm:$0xff]  }
 0x1f2   : > { %v8496_v37 = vpop.f32.mrf.mxu1  ;;  %v5291_v39 = vadd.f32 %v8473_v32, %v10533_v53  ;;  %8766 = vmatpush3.bf16.msra.mxu0 %v9465_v24  ;;  %v9480_v53 = vld [vmem:[%s10129_s13 + $0xbd0] sm:$0xff]   ;;  %v9503_v29 = vld [vmem:[%s10129_s13 + $0xca8] sm:$0xff]  }
 0x1f3   : > { %8788 = vmatpush3.bf16.msra.mxu1 %v9466_v27  ;;  %v8475_v41 = vpop.f32.mrf.mxu0  ;;  %8767 = vmatprep.subr.bf16.mxu0 %v9467_v28  ;;  %v9506_v37 = vld [vmem:[%s10129_s13 + $0xc20] sm:$0xff]  }
 0x1f4   : > { %v8497_v43 = vpop.f32.mrf.mxu1  ;;  %8789 = vmatprep.subr.bf16.mxu1 %v9468_v31  ;;  %v10571_v45 = vadd.f32 %v8495_v33, %v5291_v39  ;;  %v9504_v31 = vld [vmem:[%s10129_s13 + $0xc60] sm:$0xff]   ;;  %v9508_v39 = vld [vmem:[%s10129_s13 + $0xc58] sm:$0xff]  }
 0x1f5   : > { %v9510_v41 = vld [vmem:[%s10129_s13 + $0xc18] sm:$0xff]  }
 0x1f6   : > { %8768 = vmatpush3.bf16.msra.mxu0 %v9469_v35  ;;  %v9505_v35 = vld [vmem:[%s10129_s13 + $0xce0] sm:$0xff]   ;;  %v9511_v43 = vld [vmem:[%s10129_s13 + $0xc98] sm:$0xff]  }
 0x1f7   : > { %8790 = vmatpush3.bf16.msra.mxu1 %v9470_v38  ;;  %8769 = vmatprep.subr.bf16.mxu0 %v9471_v40  ;;  %v9507_v38 = vld [vmem:[%s10129_s13 + $0xca0] sm:$0xff]   ;;  %v9509_v40 = vld [vmem:[%s10129_s13 + $0xcd8] sm:$0xff]  }
 0x1f8   : > { %8791 = vmatprep.subr.bf16.mxu1 %v9472_v44  ;;  %v9512_v44 = vld [vmem:[%s10129_s13 + $0xc50] sm:$0xff]  }
 0x1fa   : > { %8770 = vmatpush3.bf16.msra.mxu0 %v9473_v46  ;;  %v9514_v46 = vld [vmem:[%s10129_s13 + $0xc10] sm:$0xff]  }
 0x1fb   : > { %8792 = vmatpush3.bf16.msra.mxu1 %v9474_v47  ;;  %8771 = vmatprep.subr.bf16.mxu0 %v9475_v48  ;;  %v9515_v47 = vld [vmem:[%s10129_s13 + $0xc90] sm:$0xff]   ;;  %v9516_v48 = vld [vmem:[%s10129_s13 + $0xc48] sm:$0xff]  }
 0x1fc   : > { %8793 = vmatprep.subr.bf16.mxu1 %v9476_v49  ;;  %v9517_v49 = vld [vmem:[%s10129_s13 + $0xcc8] sm:$0xff]  }
 0x1fe   : > { %8772 = vmatpush3.bf16.msra.mxu0 %v9477_v50  ;;  %v9518_v50 = vld [vmem:[%s10129_s13 + $0xc08] sm:$0xff]  }
 0x1ff   : > { %8794 = vmatpush3.bf16.msra.mxu1 %v9478_v51  ;;  %8773 = vmatprep.subr.bf16.mxu0 %v9479_v52  ;;  %v9519_v51 = vld [vmem:[%s10129_s13 + $0xc88] sm:$0xff]   ;;  %v9520_v52 = vld [vmem:[%s10129_s13 + $0xc40] sm:$0xff]  }
 0x200   : > { %8795 = vmatprep.subr.bf16.mxu1 %v9480_v53  ;;  %v9521_v53 = vld [vmem:[%s10129_s13 + $0xcc0] sm:$0xff]  }
 0x202   : > { %8774 = vmatpush3.bf16.msra.mxu0 %v9481_v54  ;;  %v420_v54 = vld [vmem:[%s10151_s25 + $0x60] sm:$0xff] }
 0x203   : > { %8796 = vmatpush3.bf16.msra.mxu1 %v9482_v55  ;;  %8775 = vmatprep.subr.bf16.mxu0 %v9483_v56  ;;  %v9522_v55 = vld [vmem:[%s10129_s13 + $0xc00] sm:$0xff]   ;;  %v651_v56 = vrot.slane %v420_v54, %v10193_v42 }
 0x204   : > { %8797 = vmatprep.subr.bf16.mxu1 %v9484_v57  ;;  %v644_v57 = vcombine.high %v420_v54, %v420_v54  ;;  %v9559_v54 = vld [vmem:[%s10129_s13 + $0xef8] sm:$0xff]  }
 0x206   : > { %8776 = vmatpush3.bf16.msra.mxu0 %v9485_v58  ;;  %v9523_v58 = vld [vmem:[%s10129_s13 + $0xc80] sm:$0xff]  }
 0x207   : > { %8798 = vmatpush3.bf16.msra.mxu1 %v9486_v59  ;;  %8777 = vmatprep.subr.bf16.mxu0 %v9487_v60  ;;  %v659_v59 = vcombine.high %v651_v56, %v651_v56  ;;  %v658_v60 = vrot.slane %v644_v57, %v10193_v42  ;;  %v9560_v57 = vld [vmem:[%s10129_s13 + $0xe38] sm:$0xff]  }
 0x208   : > { %8799 = vmatprep.subr.bf16.mxu1 %v9488_v62  ;;  %v9526_v62 = vld [vmem:[%s10129_s13 + $0xdf8] sm:$0xff]  }
 0x209   : > { %v825_v63 = vpack.c.bf16 %v659_v59, %v659_v59  ;;  %v660_v0 = vcombine.high %v658_v60, %v658_v60  ;;  %v826_v3 = vpack.c.bf16 %v658_v60, %v658_v60  ;;  %v9561_v60 = vld [vmem:[%s10129_s13 + $0xeb8] sm:$0xff]  }
 0x20a   : > { %8778 = vmatpush3.bf16.msra.mxu0 %v9489_v1  ;;  %v9527_v1 = vld [vmem:[%s10129_s13 + $0xd38] sm:$0xff]  }
 0x20b   : > { %8800 = vmatpush3.bf16.msra.mxu1 %v9490_v2  ;;  %8807 = vmatprep.subr.bf16.mxu0 %v9492_v5  ;;  %v824_v2 = vpack.c.bf16 %v651_v56, %v651_v56  ;;  %v827_v5 = vpack.c.bf16 %v660_v0, %v660_v0  ;;  %v9564_v0 = vld [vmem:[%s10129_s13 + $0xe30] sm:$0xff]  }
 0x20c   : > { %8829 = vmatprep.subr.bf16.mxu1 %v9493_v8  ;;  %v9531_v8 = vld [vmem:[%s10129_s13 + $0xd30] sm:$0xff]  }
 0x20d   : > { %v8515_v17 = vpop.f32.mrf.mxu0  ;;  %5849 = vmatmul.mubr.bf16.vlgmr.msra.gmra.mxu0 %v820_v11  ;;  %v9532_v11 = vld [vmem:[%s10129_s13 + $0xdb0] sm:$0xff]  }
 0x20e   : > { %v8537_v18 = vpop.f32.mrf.mxu1  ;;  %5889 = vmatmul.mubr.bf16.vlgmr.msra.gmra.mxu1 %v822_v12  ;;  %8808 = vmatpush3.bf16.msra.mxu0 %v9494_v9  ;;  %v9533_v12 = vld [vmem:[%s10129_s13 + $0xd68] sm:$0xff]  }
 0x20f   : > { %8830 = vmatpush3.bf16.msra.mxu1 %v9495_v13  ;;  %v8516_v21 = vpop.f32.mrf.mxu0  ;;  %8809 = vmatprep.subr.bf16.mxu0 %v9496_v14 }
 0x210   : > { %v8538_v22 = vpop.f32.mrf.mxu1  ;;  %8831 = vmatprep.subr.bf16.mxu1 %v9497_v15  ;;  %v8517_v24 = vadd.f32 %v8516_v21, %v8515_v17  ;;  %5928 = vmatprep.mubr.bf16.mxu0 %v825_v63  ;;  %v9534_v15 = vld [vmem:[%s10129_s13 + $0xde8] sm:$0xff]   ;;  %v9563_v63 = vld [vmem:[%s10129_s13 + $0xef0] sm:$0xff]  }
 0x211   : > { %v8539_v25 = vadd.f32 %v8538_v22, %v8537_v18  ;;  %v8518_v27 = vpop.f32.mrf.mxu0  ;;  %5968 = vmatprep.mubr.bf16.mxu1 %v827_v5  ;;  %v9535_v18 = vld [vmem:[%s10129_s13 + $0xd28] sm:$0xff]  }
 0x212   : > { %v8540_v28 = vpop.f32.mrf.mxu1  ;;  %v5371_v30 = vadd.f32 %v8517_v24, %v10571_v45  ;;  %8810 = vmatpush3.bf16.msra.mxu0 %v9498_v16  ;;  %v9513_v45 = vld [vmem:[%s10129_s13 + $0xcd0] sm:$0xff]   ;;  %v9536_v21 = vld [vmem:[%s10129_s13 + $0xda8] sm:$0xff]  }
 0x213   : > { %8832 = vmatpush3.bf16.msra.mxu1 %v9499_v19  ;;  %v8519_v32 = vpop.f32.mrf.mxu0  ;;  %8811 = vmatprep.subr.bf16.mxu0 %v9500_v20  ;;  %v9539_v28 = vld [vmem:[%s10129_s13 + $0xd20] sm:$0xff]  }
 0x214   : > { %v8541_v33 = vpop.f32.mrf.mxu1  ;;  %8833 = vmatprep.subr.bf16.mxu1 %v9501_v23  ;;  %v10609_v36 = vadd.f32 %v8539_v25, %v5371_v30  ;;  %v9537_v23 = vld [vmem:[%s10129_s13 + $0xd60] sm:$0xff]   ;;  %v9541_v30 = vld [vmem:[%s10129_s13 + $0xd58] sm:$0xff]  }
 0x215   : > { %v9543_v32 = vld [vmem:[%s10129_s13 + $0xd18] sm:$0xff]  }
 0x216   : > { %8812 = vmatpush3.bf16.msra.mxu0 %v9502_v26  ;;  %v9538_v26 = vld [vmem:[%s10129_s13 + $0xde0] sm:$0xff]   ;;  %v9544_v33 = vld [vmem:[%s10129_s13 + $0xd98] sm:$0xff]  }
 0x217   : > { %8834 = vmatpush3.bf16.msra.mxu1 %v9503_v29  ;;  %8813 = vmatprep.subr.bf16.mxu0 %v9504_v31  ;;  %v9540_v29 = vld [vmem:[%s10129_s13 + $0xda0] sm:$0xff]   ;;  %v9542_v31 = vld [vmem:[%s10129_s13 + $0xdd8] sm:$0xff]  }
 0x218   : > { %8835 = vmatprep.subr.bf16.mxu1 %v9505_v35  ;;  %v9545_v35 = vld [vmem:[%s10129_s13 + $0xd50] sm:$0xff]  }
 0x21a   : > { %8814 = vmatpush3.bf16.msra.mxu0 %v9506_v37  ;;  %v9547_v37 = vld [vmem:[%s10129_s13 + $0xd10] sm:$0xff]  }
 0x21b   : > { %8836 = vmatpush3.bf16.msra.mxu1 %v9507_v38  ;;  %8815 = vmatprep.subr.bf16.mxu0 %v9508_v39  ;;  %v9548_v38 = vld [vmem:[%s10129_s13 + $0xd90] sm:$0xff]   ;;  %v9549_v39 = vld [vmem:[%s10129_s13 + $0xd48] sm:$0xff]  }
 0x21c   : > { %8837 = vmatprep.subr.bf16.mxu1 %v9509_v40  ;;  %v9550_v40 = vld [vmem:[%s10129_s13 + $0xdc8] sm:$0xff]  }
 0x21e   : > { %8816 = vmatpush3.bf16.msra.mxu0 %v9510_v41  ;;  %v9551_v41 = vld [vmem:[%s10129_s13 + $0xd08] sm:$0xff]  }
 0x21f   : > { %8838 = vmatpush3.bf16.msra.mxu1 %v9511_v43  ;;  %8817 = vmatprep.subr.bf16.mxu0 %v9512_v44  ;;  %v9552_v43 = vld [vmem:[%s10129_s13 + $0xd88] sm:$0xff]   ;;  %v9553_v44 = vld [vmem:[%s10129_s13 + $0xd40] sm:$0xff]  }
 0x220   : > { %8839 = vmatprep.subr.bf16.mxu1 %v9513_v45  ;;  %v9554_v45 = vld [vmem:[%s10129_s13 + $0xdc0] sm:$0xff]  }
 0x222   : > { %8818 = vmatpush3.bf16.msra.mxu0 %v9514_v46  ;;  %v421_v46 = vld [vmem:[%s10151_s25 + $0x68] sm:$0xff] }
 0x223   : > { %8840 = vmatpush3.bf16.msra.mxu1 %v9515_v47  ;;  %8819 = vmatprep.subr.bf16.mxu0 %v9516_v48  ;;  %v9555_v47 = vld [vmem:[%s10129_s13 + $0xd00] sm:$0xff]   ;;  %v668_v48 = vrot.slane %v421_v46, %v10193_v42 }
 0x224   : > { %8841 = vmatprep.subr.bf16.mxu1 %v9517_v49  ;;  %v661_v49 = vcombine.high %v421_v46, %v421_v46  ;;  %v9592_v46 = vld [vmem:[%s10129_s13 + $0xff8] sm:$0xff]  }
 0x226   : > { %8820 = vmatpush3.bf16.msra.mxu0 %v9518_v50  ;;  %v9556_v50 = vld [vmem:[%s10129_s13 + $0xd80] sm:$0xff]  }
 0x227   : > { %8842 = vmatpush3.bf16.msra.mxu1 %v9519_v51  ;;  %8821 = vmatprep.subr.bf16.mxu0 %v9520_v52  ;;  %v676_v51 = vcombine.high %v668_v48, %v668_v48  ;;  %v675_v52 = vrot.slane %v661_v49, %v10193_v42  ;;  %v9593_v49 = vld [vmem:[%s10129_s13 + $0xf38] sm:$0xff]  }
 0x228   : > { %8843 = vmatprep.subr.bf16.mxu1 %v9521_v53  ;;  %v9558_v53 = vld [vmem:[%s10129_s13 + $0xe78] sm:$0xff]  }
 0x229   : > { %v677_v56 = vcombine.high %v675_v52, %v675_v52  ;;  %v830_v59 = vpack.c.bf16 %v675_v52, %v675_v52  ;;  %v9594_v52 = vld [vmem:[%s10129_s13 + $0xfb8] sm:$0xff]  }
 0x22a   : > { %8822 = vmatpush3.bf16.msra.mxu0 %v9522_v55  ;;  %v829_v55 = vpack.c.bf16 %v676_v51, %v676_v51 }
 0x22b   : > { %8844 = vmatpush3.bf16.msra.mxu1 %v9523_v58  ;;  %8851 = vmatprep.subr.bf16.mxu0 %v9525_v61  ;;  %v828_v58 = vpack.c.bf16 %v668_v48, %v668_v48  ;;  %v831_v61 = vpack.c.bf16 %v677_v56, %v677_v56  ;;  %v9597_v56 = vld [vmem:[%s10129_s13 + $0xf30] sm:$0xff]  }
 0x22c   : > { %8873 = vmatprep.subr.bf16.mxu1 %v9526_v62  ;;  %v9562_v62 = vld [vmem:[%s10129_s13 + $0xe70] sm:$0xff]  }
 0x22d   : > { %v8559_v9 = vpop.f32.mrf.mxu0  ;;  %5929 = vmatmul.mubr.bf16.vlgmr.msra.gmra.mxu0 %v824_v2 }
 0x22e   : > { %v8581_v10 = vpop.f32.mrf.mxu1  ;;  %5969 = vmatmul.mubr.bf16.vlgmr.msra.gmra.mxu1 %v826_v3  ;;  %8852 = vmatpush3.bf16.msra.mxu0 %v9527_v1  ;;  %v9565_v3 = vld [vmem:[%s10129_s13 + $0xeb0] sm:$0xff]  }
 0x22f   : > { %8874 = vmatpush3.bf16.msra.mxu1 %v9528_v4  ;;  %v8560_v13 = vpop.f32.mrf.mxu0  ;;  %8853 = vmatprep.subr.bf16.mxu0 %v9529_v6  ;;  %v9566_v4 = vld [vmem:[%s10129_s13 + $0xe68] sm:$0xff]  }
 0x230   : > { %v8582_v14 = vpop.f32.mrf.mxu1  ;;  %8875 = vmatprep.subr.bf16.mxu1 %v9530_v7  ;;  %v8561_v16 = vadd.f32 %v8560_v13, %v8559_v9  ;;  %6008 = vmatprep.mubr.bf16.mxu0 %v829_v55  ;;  %v9567_v7 = vld [vmem:[%s10129_s13 + $0xee8] sm:$0xff]   ;;  %v9596_v55 = vld [vmem:[%s10129_s13 + $0xff0] sm:$0xff]  }
 0x231   : > { %v8583_v17 = vadd.f32 %v8582_v14, %v8581_v10  ;;  %v8562_v19 = vpop.f32.mrf.mxu0  ;;  %6048 = vmatprep.mubr.bf16.mxu1 %v831_v61  ;;  %v9568_v10 = vld [vmem:[%s10129_s13 + $0xe28] sm:$0xff]  }
 0x232   : > { %v8584_v20 = vpop.f32.mrf.mxu1  ;;  %v5451_v22 = vadd.f32 %v8561_v16, %v10609_v36  ;;  %8854 = vmatpush3.bf16.msra.mxu0 %v9531_v8  ;;  %v9546_v36 = vld [vmem:[%s10129_s13 + $0xdd0] sm:$0xff]   ;;  %v9569_v13 = vld [vmem:[%s10129_s13 + $0xea8] sm:$0xff]  }
 0x233   : > { %8876 = vmatpush3.bf16.msra.mxu1 %v9532_v11  ;;  %v8563_v24 = vpop.f32.mrf.mxu0  ;;  %8855 = vmatprep.subr.bf16.mxu0 %v9533_v12  ;;  %v9572_v20 = vld [vmem:[%s10129_s13 + $0xe20] sm:$0xff]  }
 0x234   : > { %v8585_v25 = vpop.f32.mrf.mxu1  ;;  %8877 = vmatprep.subr.bf16.mxu1 %v9534_v15  ;;  %v10647_v27 = vadd.f32 %v8583_v17, %v5451_v22  ;;  %v9570_v15 = vld [vmem:[%s10129_s13 + $0xe60] sm:$0xff]   ;;  %v9574_v22 = vld [vmem:[%s10129_s13 + $0xe58] sm:$0xff]  }
 0x235   : > { %v9576_v24 = vld [vmem:[%s10129_s13 + $0xe18] sm:$0xff]  }
 0x236   : > { %8856 = vmatpush3.bf16.msra.mxu0 %v9535_v18  ;;  %v9571_v18 = vld [vmem:[%s10129_s13 + $0xee0] sm:$0xff]   ;;  %v9577_v25 = vld [vmem:[%s10129_s13 + $0xe98] sm:$0xff]  }
 0x237   : > { %8878 = vmatpush3.bf16.msra.mxu1 %v9536_v21  ;;  %8857 = vmatprep.subr.bf16.mxu0 %v9537_v23  ;;  %v9573_v21 = vld [vmem:[%s10129_s13 + $0xea0] sm:$0xff]   ;;  %v9575_v23 = vld [vmem:[%s10129_s13 + $0xed8] sm:$0xff]  }
 0x238   : > { %8879 = vmatprep.subr.bf16.mxu1 %v9538_v26  ;;  %v9578_v26 = vld [vmem:[%s10129_s13 + $0xe50] sm:$0xff]  }
 0x23a   : > { %8858 = vmatpush3.bf16.msra.mxu0 %v9539_v28  ;;  %v9580_v28 = vld [vmem:[%s10129_s13 + $0xe10] sm:$0xff]  }
 0x23b   : > { %8880 = vmatpush3.bf16.msra.mxu1 %v9540_v29  ;;  %8859 = vmatprep.subr.bf16.mxu0 %v9541_v30  ;;  %v9581_v29 = vld [vmem:[%s10129_s13 + $0xe90] sm:$0xff]   ;;  %v9582_v30 = vld [vmem:[%s10129_s13 + $0xe48] sm:$0xff]  }
 0x23c   : > { %8881 = vmatprep.subr.bf16.mxu1 %v9542_v31  ;;  %v9583_v31 = vld [vmem:[%s10129_s13 + $0xec8] sm:$0xff]  }
 0x23e   : > { %8860 = vmatpush3.bf16.msra.mxu0 %v9543_v32  ;;  %v9584_v32 = vld [vmem:[%s10129_s13 + $0xe08] sm:$0xff]  }
 0x23f   : > { %8882 = vmatpush3.bf16.msra.mxu1 %v9544_v33  ;;  %8861 = vmatprep.subr.bf16.mxu0 %v9545_v35  ;;  %v9585_v33 = vld [vmem:[%s10129_s13 + $0xe88] sm:$0xff]   ;;  %v9586_v35 = vld [vmem:[%s10129_s13 + $0xe40] sm:$0xff]  }
 0x240   : > { %8883 = vmatprep.subr.bf16.mxu1 %v9546_v36  ;;  %v9587_v36 = vld [vmem:[%s10129_s13 + $0xec0] sm:$0xff]  }
 0x242   : > { %8862 = vmatpush3.bf16.msra.mxu0 %v9547_v37  ;;  %v422_v37 = vld [vmem:[%s10151_s25 + $0x70] sm:$0xff] }
 0x243   : > { %8884 = vmatpush3.bf16.msra.mxu1 %v9548_v38  ;;  %8863 = vmatprep.subr.bf16.mxu0 %v9549_v39  ;;  %v9588_v38 = vld [vmem:[%s10129_s13 + $0xe00] sm:$0xff]   ;;  %v685_v39 = vrot.slane %v422_v37, %v10193_v42 }
 0x244   : > { %8885 = vmatprep.subr.bf16.mxu1 %v9550_v40  ;;  %v678_v40 = vcombine.high %v422_v37, %v422_v37 }
 0x246   : > { %8864 = vmatpush3.bf16.msra.mxu0 %v9551_v41  ;;  %v9589_v41 = vld [vmem:[%s10129_s13 + $0xe80] sm:$0xff]  }
 0x247   : > { %8886 = vmatpush3.bf16.msra.mxu1 %v9552_v43  ;;  %8865 = vmatprep.subr.bf16.mxu0 %v9553_v44  ;;  %v693_v43 = vcombine.high %v685_v39, %v685_v39  ;;  %v692_v44 = vrot.slane %v678_v40, %v10193_v42 }
 0x248   : > { %8887 = vmatprep.subr.bf16.mxu1 %v9554_v45  ;;  %v9591_v45 = vld [vmem:[%s10129_s13 + $0xf78] sm:$0xff]  }
 0x249   : > { %v694_v48 = vcombine.high %v692_v44, %v692_v44  ;;  %v834_v51 = vpack.c.bf16 %v692_v44, %v692_v44 }
 0x24a   : > { %8866 = vmatpush3.bf16.msra.mxu0 %v9555_v47  ;;  %v833_v47 = vpack.c.bf16 %v693_v43, %v693_v43 }
 0x24b   : > { %8888 = vmatpush3.bf16.msra.mxu1 %v9556_v50  ;;  %8895 = vmatprep.subr.bf16.mxu0 %v9558_v53  ;;  %v832_v50 = vpack.c.bf16 %v685_v39, %v685_v39  ;;  %v835_v53 = vpack.c.bf16 %v694_v48, %v694_v48 }
 0x24c   : > { %8917 = vmatprep.subr.bf16.mxu1 %v9559_v54  ;;  %v9595_v54 = vld [vmem:[%s10129_s13 + $0xf70] sm:$0xff]  }
 0x24d   : > { %v8603_v1 = vpop.f32.mrf.mxu0  ;;  %6009 = vmatmul.mubr.bf16.vlgmr.msra.gmra.mxu0 %v828_v58 }
 0x24e   : > { %v8625_v2 = vpop.f32.mrf.mxu1  ;;  %6049 = vmatmul.mubr.bf16.vlgmr.msra.gmra.mxu1 %v830_v59  ;;  %8896 = vmatpush3.bf16.msra.mxu0 %v9560_v57  ;;  %v9598_v59 = vld [vmem:[%s10129_s13 + $0xfb0] sm:$0xff]  }
 0x24f   : > { %8918 = vmatpush3.bf16.msra.mxu1 %v9561_v60  ;;  %v8604_v5 = vpop.f32.mrf.mxu0  ;;  %8897 = vmatprep.subr.bf16.mxu0 %v9562_v62  ;;  %v9599_v60 = vld [vmem:[%s10129_s13 + $0xf68] sm:$0xff]  }
 0x250   : > { %v8626_v6 = vpop.f32.mrf.mxu1  ;;  %8919 = vmatprep.subr.bf16.mxu1 %v9563_v63  ;;  %v8605_v8 = vadd.f32 %v8604_v5, %v8603_v1  ;;  %6088 = vmatprep.mubr.bf16.mxu0 %v833_v47  ;;  %v9600_v63 = vld [vmem:[%s10129_s13 + $0xfe8] sm:$0xff]  }
 0x251   : > { %v8627_v9 = vadd.f32 %v8626_v6, %v8625_v2  ;;  %v8606_v11 = vpop.f32.mrf.mxu0  ;;  %6128 = vmatprep.mubr.bf16.mxu1 %v835_v53  ;;  %v9601_v2 = vld [vmem:[%s10129_s13 + $0xf28] sm:$0xff]  }
 0x252   : > { %v8628_v12 = vpop.f32.mrf.mxu1  ;;  %v5531_v14 = vadd.f32 %v8605_v8, %v10647_v27  ;;  %8898 = vmatpush3.bf16.msra.mxu0 %v9564_v0  ;;  %v9579_v27 = vld [vmem:[%s10129_s13 + $0xed0] sm:$0xff]   ;;  %v9602_v5 = vld [vmem:[%s10129_s13 + $0xfa8] sm:$0xff]  }
 0x253   : > { %8920 = vmatpush3.bf16.msra.mxu1 %v9565_v3  ;;  %v8607_v16 = vpop.f32.mrf.mxu0  ;;  %8899 = vmatprep.subr.bf16.mxu0 %v9566_v4  ;;  %v9605_v12 = vld [vmem:[%s10129_s13 + $0xf20] sm:$0xff]  }
 0x254   : > { %v8629_v17 = vpop.f32.mrf.mxu1  ;;  %8921 = vmatprep.subr.bf16.mxu1 %v9567_v7  ;;  %v10685_v19 = vadd.f32 %v8627_v9, %v5531_v14  ;;  %v9603_v7 = vld [vmem:[%s10129_s13 + $0xf60] sm:$0xff]   ;;  %v9607_v14 = vld [vmem:[%s10129_s13 + $0xf58] sm:$0xff]  }
 0x255   : > { %v9609_v16 = vld [vmem:[%s10129_s13 + $0xf18] sm:$0xff]  }
 0x256   : > { %8900 = vmatpush3.bf16.msra.mxu0 %v9568_v10  ;;  %v9604_v10 = vld [vmem:[%s10129_s13 + $0xfe0] sm:$0xff]   ;;  %v9610_v17 = vld [vmem:[%s10129_s13 + $0xf98] sm:$0xff]  }
 0x257   : > { %8922 = vmatpush3.bf16.msra.mxu1 %v9569_v13  ;;  %8901 = vmatprep.subr.bf16.mxu0 %v9570_v15  ;;  %v9606_v13 = vld [vmem:[%s10129_s13 + $0xfa0] sm:$0xff]   ;;  %v9608_v15 = vld [vmem:[%s10129_s13 + $0xfd8] sm:$0xff]  }
 0x258   : > { %8923 = vmatprep.subr.bf16.mxu1 %v9571_v18  ;;  %v9611_v18 = vld [vmem:[%s10129_s13 + $0xf50] sm:$0xff]  }
 0x25a   : > { %8902 = vmatpush3.bf16.msra.mxu0 %v9572_v20  ;;  %v9613_v20 = vld [vmem:[%s10129_s13 + $0xf10] sm:$0xff]  }
 0x25b   : > { %8924 = vmatpush3.bf16.msra.mxu1 %v9573_v21  ;;  %8903 = vmatprep.subr.bf16.mxu0 %v9574_v22  ;;  %v9614_v21 = vld [vmem:[%s10129_s13 + $0xf90] sm:$0xff]   ;;  %v9615_v22 = vld [vmem:[%s10129_s13 + $0xf48] sm:$0xff]  }
 0x25c   : > { %8925 = vmatprep.subr.bf16.mxu1 %v9575_v23  ;;  %v9616_v23 = vld [vmem:[%s10129_s13 + $0xfc8] sm:$0xff]  }
 0x25e   : > { %8904 = vmatpush3.bf16.msra.mxu0 %v9576_v24  ;;  %v9617_v24 = vld [vmem:[%s10129_s13 + $0xf08] sm:$0xff]  }
 0x25f   : > { %8926 = vmatpush3.bf16.msra.mxu1 %v9577_v25  ;;  %8905 = vmatprep.subr.bf16.mxu0 %v9578_v26  ;;  %v9618_v25 = vld [vmem:[%s10129_s13 + $0xf88] sm:$0xff]   ;;  %v9619_v26 = vld [vmem:[%s10129_s13 + $0xf40] sm:$0xff]  }
 0x260   : > { %8927 = vmatprep.subr.bf16.mxu1 %v9579_v27  ;;  %v9620_v27 = vld [vmem:[%s10129_s13 + $0xfc0] sm:$0xff]  }
 0x262   : > { %8906 = vmatpush3.bf16.msra.mxu0 %v9580_v28  ;;  %v423_v28 = vld [vmem:[%s10151_s25 + $0x78] sm:$0xff] }
 0x263   : > { %8928 = vmatpush3.bf16.msra.mxu1 %v9581_v29  ;;  %8907 = vmatprep.subr.bf16.mxu0 %v9582_v30  ;;  %v702_v29 = vrot.slane %v423_v28, %v10193_v42  ;;  %v695_v30 = vcombine.high %v423_v28, %v423_v28 }
 0x264   : > { %8929 = vmatprep.subr.bf16.mxu1 %v9583_v31  ;;  %v9621_v31 = vld [vmem:[%s10129_s13 + $0xf00] sm:$0xff]  }
 0x266   : > { %8908 = vmatpush3.bf16.msra.mxu0 %v9584_v32  ;;  %v9622_v32 = vld [vmem:[%s10129_s13 + $0xf80] sm:$0xff]  }
 0x267   : > { %8930 = vmatpush3.bf16.msra.mxu1 %v9585_v33  ;;  %8909 = vmatprep.subr.bf16.mxu0 %v9586_v35  ;;  %v710_v33 = vcombine.high %v702_v29, %v702_v29  ;;  %v709_v35 = vrot.slane %v695_v30, %v10193_v42 }
 0x268   : > { %8931 = vmatprep.subr.bf16.mxu1 %v9587_v36 }
 0x269   : > { %v837_v36 = vpack.c.bf16 %v710_v33, %v710_v33  ;;  %v711_v37 = vcombine.high %v709_v35, %v709_v35  ;;  %v838_v39 = vpack.c.bf16 %v709_v35, %v709_v35 }
 0x26a   : > { %8910 = vmatpush3.bf16.msra.mxu0 %v9588_v38  ;;  %v836_v38 = vpack.c.bf16 %v702_v29, %v702_v29 }
 0x26b   : > { %8932 = vmatpush3.bf16.msra.mxu1 %v9589_v41  ;;  %8939 = vmatprep.subr.bf16.mxu0 %v9591_v45  ;;  %v839_v40 = vpack.c.bf16 %v711_v37, %v711_v37 }
 0x26c   : > { %8961 = vmatprep.subr.bf16.mxu1 %v9592_v46 }
 0x26d   : > { %v8647_v57 = vpop.f32.mrf.mxu0  ;;  %6089 = vmatmul.mubr.bf16.vlgmr.msra.gmra.mxu0 %v832_v50 }
 0x26e   : > { %v8669_v58 = vpop.f32.mrf.mxu1  ;;  %6129 = vmatmul.mubr.bf16.vlgmr.msra.gmra.mxu1 %v834_v51  ;;  %8940 = vmatpush3.bf16.msra.mxu0 %v9593_v49 }
 0x26f   : > { %8962 = vmatpush3.bf16.msra.mxu1 %v9594_v52  ;;  %v8648_v61 = vpop.f32.mrf.mxu0  ;;  %8941 = vmatprep.subr.bf16.mxu0 %v9595_v54 }
 0x270   : > { %v8670_v62 = vpop.f32.mrf.mxu1  ;;  %8963 = vmatprep.subr.bf16.mxu1 %v9596_v55  ;;  %v8649_v0 = vadd.f32 %v8648_v61, %v8647_v57  ;;  %6168 = vmatprep.mubr.bf16.mxu0 %v837_v36 }
 0x271   : > { %v8671_v1 = vadd.f32 %v8670_v62, %v8669_v58  ;;  %v8650_v3 = vpop.f32.mrf.mxu0  ;;  %6208 = vmatprep.mubr.bf16.mxu1 %v839_v40 }
 0x272   : > { %v8672_v4 = vpop.f32.mrf.mxu1  ;;  %v5611_v6 = vadd.f32 %v8649_v0, %v10685_v19  ;;  %8942 = vmatpush3.bf16.msra.mxu0 %v9597_v56  ;;  %v9612_v19 = vld [vmem:[%s10129_s13 + $0xfd0] sm:$0xff]  }
 0x273   : > { %8964 = vmatpush3.bf16.msra.mxu1 %v9598_v59  ;;  %v8651_v8 = vpop.f32.mrf.mxu0  ;;  %8943 = vmatprep.subr.bf16.mxu0 %v9599_v60 }
 0x274   : > { %v8673_v9 = vpop.f32.mrf.mxu1  ;;  %8965 = vmatprep.subr.bf16.mxu1 %v9600_v63  ;;  %v10723_v11 = vadd.f32 %v8671_v1, %v5611_v6 }
 0x276   : > { %8944 = vmatpush3.bf16.msra.mxu0 %v9601_v2 }
 0x277   : > { %8966 = vmatpush3.bf16.msra.mxu1 %v9602_v5  ;;  %8945 = vmatprep.subr.bf16.mxu0 %v9603_v7 }
 0x278   : > { %8967 = vmatprep.subr.bf16.mxu1 %v9604_v10 }
 0x27a   : > { %8946 = vmatpush3.bf16.msra.mxu0 %v9605_v12 }
 0x27b   : > { %8968 = vmatpush3.bf16.msra.mxu1 %v9606_v13  ;;  %8947 = vmatprep.subr.bf16.mxu0 %v9607_v14 }
 0x27c   : > { %8969 = vmatprep.subr.bf16.mxu1 %v9608_v15 }
 0x27e   : > { %8948 = vmatpush3.bf16.msra.mxu0 %v9609_v16 }
 0x27f   : > { %8970 = vmatpush3.bf16.msra.mxu1 %v9610_v17  ;;  %8949 = vmatprep.subr.bf16.mxu0 %v9611_v18 }
 0x280   : > { %8971 = vmatprep.subr.bf16.mxu1 %v9612_v19 }
 0x282   : > { %8950 = vmatpush3.bf16.msra.mxu0 %v9613_v20 }
 0x283   : > { %8972 = vmatpush3.bf16.msra.mxu1 %v9614_v21  ;;  %8951 = vmatprep.subr.bf16.mxu0 %v9615_v22 }
 0x284   : > { %8973 = vmatprep.subr.bf16.mxu1 %v9616_v23 }
 0x286   : > { %8952 = vmatpush3.bf16.msra.mxu0 %v9617_v24 }
 0x287   : > { %8974 = vmatpush3.bf16.msra.mxu1 %v9618_v25  ;;  %8953 = vmatprep.subr.bf16.mxu0 %v9619_v26 }
 0x288   : > { %8975 = vmatprep.subr.bf16.mxu1 %v9620_v27 }
 0x28a   : > { %8954 = vmatpush3.bf16.msra.mxu0 %v9621_v31 }
 0x28b   : > { %8976 = vmatpush3.bf16.msra.mxu1 %v9622_v32 }
 0x28d   : > { %v8691_v41 = vpop.f32.mrf.mxu0  ;;  %6169 = vmatmul.mubr.bf16.vlgmr.msra.gmra.mxu0 %v836_v38 }
 0x28e   : > { %v8713_v43 = vpop.f32.mrf.mxu1  ;;  %6209 = vmatmul.mubr.bf16.vlgmr.msra.gmra.mxu1 %v838_v39 }
 0x28f   : > { %v8692_v44 = vpop.f32.mrf.mxu0 }
 0x290   : > { %v8714_v45 = vpop.f32.mrf.mxu1  ;;  %v8693_v46 = vadd.f32 %v8692_v44, %v8691_v41 }
 0x291   : > { %v8715_v47 = vadd.f32 %v8714_v45, %v8713_v43  ;;  %v8694_v48 = vpop.f32.mrf.mxu0 }
 0x292   : > { %v8716_v49 = vpop.f32.mrf.mxu1  ;;  %v5691_v50 = vadd.f32 %v8693_v46, %v10723_v11 }
 0x293   : > { %v8695_v51 = vpop.f32.mrf.mxu0 }
 0x294   : > { %v8717_v52 = vpop.f32.mrf.mxu1  ;;  %v5731_v53 = vadd.f32 %v8715_v47, %v5691_v50 }
 0x2ad   : > { %v8735_v54 = vpop.f32.mrf.mxu0 }
 0x2ae   : > { %v8757_v55 = vpop.f32.mrf.mxu1 }
 0x2af   : > { %v8736_v56 = vpop.f32.mrf.mxu0 }
 0x2b0   : > { %v8758_v57 = vpop.f32.mrf.mxu1  ;;  %v8737_v58 = vadd.f32 %v8736_v56, %v8735_v54 }
 0x2b1   : > { %v8759_v59 = vadd.f32 %v8758_v57, %v8757_v55  ;;  %v8738_v60 = vpop.f32.mrf.mxu0 }
 0x2b2   : > { %v8760_v61 = vpop.f32.mrf.mxu1  ;;  %v5771_v62 = vadd.f32 %v8737_v58, %v5731_v53 }
 0x2b3   : > { %v8739_v63 = vpop.f32.mrf.mxu0  ;;  %v407_v61 = vld [vmem:[#allocation13] sm:$0x3] }
 0x2b4   : > { %v8761_v0 = vpop.f32.mrf.mxu1  ;;  %v5811_v1 = vadd.f32 %v8759_v59, %v5771_v62 }
 0x2cd   : > { %v8779_v2 = vpop.f32.mrf.mxu0 }
 0x2ce   : > { %v8801_v3 = vpop.f32.mrf.mxu1 }
 0x2cf   : > { %v8780_v4 = vpop.f32.mrf.mxu0 }
 0x2d0   : > { %v8802_v5 = vpop.f32.mrf.mxu1  ;;  %v8781_v6 = vadd.f32 %v8780_v4, %v8779_v2 }
 0x2d1   : > { %v8803_v7 = vadd.f32 %v8802_v5, %v8801_v3  ;;  %v8782_v8 = vpop.f32.mrf.mxu0 }
 0x2d2   : > { %v8804_v9 = vpop.f32.mrf.mxu1  ;;  %v5851_v10 = vadd.f32 %v8781_v6, %v5811_v1 }
 0x2d3   : > { %v8783_v11 = vpop.f32.mrf.mxu0 }
 0x2d4   : > { %v8805_v12 = vpop.f32.mrf.mxu1  ;;  %v5891_v13 = vadd.f32 %v8803_v7, %v5851_v10 }
 0x2ed   : > { %v8823_v14 = vpop.f32.mrf.mxu0 }
 0x2ee   : > { %v8845_v15 = vpop.f32.mrf.mxu1 }
 0x2ef   : > { %v8824_v16 = vpop.f32.mrf.mxu0 }
 0x2f0   : > { %v8846_v17 = vpop.f32.mrf.mxu1  ;;  %v8825_v18 = vadd.f32 %v8824_v16, %v8823_v14 }
 0x2f1   : > { %v8847_v19 = vadd.f32 %v8846_v17, %v8845_v15  ;;  %v8826_v20 = vpop.f32.mrf.mxu0 }
 0x2f2   : > { %v8848_v21 = vpop.f32.mrf.mxu1  ;;  %v5931_v22 = vadd.f32 %v8825_v18, %v5891_v13 }
 0x2f3   : > { %v8827_v23 = vpop.f32.mrf.mxu0 }
 0x2f4   : > { %v8849_v24 = vpop.f32.mrf.mxu1  ;;  %v5971_v25 = vadd.f32 %v8847_v19, %v5931_v22 }
 0x30d   : > { %v8867_v26 = vpop.f32.mrf.mxu0 }
 0x30e   : > { %v8889_v27 = vpop.f32.mrf.mxu1 }
 0x30f   : > { %v8868_v28 = vpop.f32.mrf.mxu0 }
 0x310   : > { %v8890_v29 = vpop.f32.mrf.mxu1  ;;  %v8869_v44 = vadd.f32 %v8868_v28, %v8867_v26 }
 0x311   : > { %v8870_v30 = vpop.f32.mrf.mxu0  ;;  %v8891_v46 = vadd.f32 %v8890_v29, %v8889_v27 }
 0x312   : > { %v8892_v31 = vpop.f32.mrf.mxu1  ;;  %v6011_v45 = vadd.f32 %v8869_v44, %v5971_v25 }
 0x313   : > { %v8871_v32 = vpop.f32.mrf.mxu0 }
 0x314   : > { %v8893_v33 = vpop.f32.mrf.mxu1  ;;  %v6051_v48 = vadd.f32 %v8891_v46, %v6011_v45 }
 0x32d   : > { %v8911_v35 = vpop.f32.mrf.mxu0 }
 0x32e   : > { %v8933_v36 = vpop.f32.mrf.mxu1 }
 0x32f   : > { %v8912_v37 = vpop.f32.mrf.mxu0 }
 0x330   : > { %v8934_v38 = vpop.f32.mrf.mxu1  ;;  %v8913_v47 = vadd.f32 %v8912_v37, %v8911_v35 }
 0x331   : > { %v8914_v39 = vpop.f32.mrf.mxu0  ;;  %v8935_v50 = vadd.f32 %v8934_v38, %v8933_v36 }
 0x332   : > { %v8936_v40 = vpop.f32.mrf.mxu1  ;;  %v6091_v49 = vadd.f32 %v8913_v47, %v6051_v48 }
 0x333   : > { %v8915_v41 = vpop.f32.mrf.mxu0 }
 0x334   : > { %v8937_v43 = vpop.f32.mrf.mxu1  ;;  %v6131_v54 = vadd.f32 %v8935_v50, %v6091_v49 }
 0x34d   : > { %v8955_v51 = vpop.f32.mrf.mxu0 }
 0x34e   : > { %v8977_v52 = vpop.f32.mrf.mxu1 }
 0x34f   : > { %v8956_v53 = vpop.f32.mrf.mxu0 }
 0x350   : > { %v8957_v55 = vadd.f32 %v8956_v53, %v8955_v51  ;;  %v8978_v56 = vpop.f32.mrf.mxu1 }
 0x351   : > { %v8958_v57 = vpop.f32.mrf.mxu0  ;;  %v8979_v59 = vadd.f32 %v8978_v56, %v8977_v52 }
 0x352   : > { %v6171_v58 = vadd.f32 %v8957_v55, %v6131_v54  ;;  %v8980_v60 = vpop.f32.mrf.mxu1 }
 0x353   : > { %v8959_v62 = vpop.f32.mrf.mxu0 }
 0x354   : > { %v6211_v63 = vadd.f32 %v8979_v59, %v6171_v58  ;;  %v8981_v0 = vpop.f32.mrf.mxu1  ;;  %6221 = sbr.rel (%p8134_p11) target bundleno = 1693 (0x69d), region = 80 }
 0x356   : > { %v6216_v1 = vadd.f32 %v6211_v63, %v407_v61 }
 0x358   : > { %6217 = vst [vmem:[#allocation13] sm:$0x3] %v6216_v1 }
 0x359   : > { %v8135_v3 = vld [vmem:[#allocation5] ss:$0 sm:$0xff]  ;;  %v6270_v6 = vld [vmem:[#allocation7 + $0xf0] sm:$0xff]  ;;  %v6269_v7 = vld [vmem:[#allocation7 + $0xe8] sm:$0xff]  ;;  %vm6232_vm0 = vcmask 1041408   ;;  %v9936_v28 = vmov 0.0  }
 0x35a   : > { %v6271_v4 = vld [vmem:[#allocation7 + $0xf8] sm:$0xff]  ;;  %v6268_v8 = vld [vmem:[#allocation7 + $0xe0] sm:$0xff]  ;;  %v6266_v11 = vld [vmem:[#allocation7 + $0xd0] sm:$0xff]  ;;  %6348 = vmatprep.mubr.f32.mxu0 %v9936_v28 }
 0x35b   : > { %6284 = vmatprep.subr.mxu0 %v6271_v4  ;;  %v6267_v9 = vld [vmem:[#allocation7 + $0xd8] sm:$0xff]  ;;  %v6265_v12 = vld [vmem:[#allocation7 + $0xc8] sm:$0xff]  ;;  %v6264_v14 = vld [vmem:[#allocation7 + $0xc0] sm:$0xff] }
 0x35c   : > { %6285 = vmatpush1.msra.mxu0 %v6270_v6  ;;  %v6263_v15 = vld [vmem:[#allocation7 + $0xb8] sm:$0xff]  ;;  %v6262_v16 = vld [vmem:[#allocation7 + $0xb0] sm:$0xff]  ;;  %v6261_v17 = vld [vmem:[#allocation7 + $0xa8] sm:$0xff] }
 0x35d   : > { %6286 = vmatprep.subr.mxu0 %v6269_v7  ;;  %v6260_v18 = vld [vmem:[#allocation7 + $0xa0] sm:$0xff]  ;;  %v6259_v19 = vld [vmem:[#allocation7 + $0x98] sm:$0xff]  ;;  %v6258_v20 = vld [vmem:[#allocation7 + $0x90] sm:$0xff] }
 0x35e   : > { %6287 = vmatpush1.msra.mxu0 %v6268_v8  ;;  %v6257_v21 = vld [vmem:[#allocation7 + $0x88] sm:$0xff]  ;;  %v6256_v22 = vld [vmem:[#allocation7 + $0x80] sm:$0xff]  ;;  %v6255_v23 = vld [vmem:[#allocation7 + $0x78] sm:$0xff] }
 0x35f   : > { %v6222_v2 = vld [vmem:[#allocation13] sm:$0x3]  ;;  %6288 = vmatprep.subr.mxu0 %v6267_v9  ;;  %v6254_v24 = vld [vmem:[#allocation7 + $0x70] sm:$0xff]  ;;  %v6252_v26 = vld [vmem:[#allocation7 + $0x60] sm:$0xff] }
 0x360   : > { %v10748_v5 = vadd.f32 %v8135_v3, %v6222_v2  ;;  %6289 = vmatpush1.msra.mxu0 %v6266_v11  ;;  %v6253_v25 = vld [vmem:[#allocation7 + $0x68] sm:$0xff]  ;;  %v6251_v27 = vld [vmem:[#allocation7 + $0x58] sm:$0xff]  ;;  %v6250_v29 = vld [vmem:[#allocation7 + $0x50] sm:$0xff] }
 0x361   : > { %6290 = vmatprep.subr.mxu0 %v6265_v12  ;;  %v6249_v30 = vld [vmem:[#allocation7 + $0x48] sm:$0xff]  ;;  %v6248_v31 = vld [vmem:[#allocation7 + $0x40] sm:$0xff]  ;;  %v6247_v32 = vld [vmem:[#allocation7 + $0x38] sm:$0xff] }
 0x362   : > { %v6231_v10 = vmul.f32 %v10748_v5, %v10748_v5  ;;  %6291 = vmatpush1.msra.mxu0 %v6264_v14  ;;  %v6246_v33 = vld [vmem:[#allocation7 + $0x30] sm:$0xff]  ;;  %v6245_v35 = vld [vmem:[#allocation7 + $0x28] sm:$0xff]  ;;  %v6244_v36 = vld [vmem:[#allocation7 + $0x20] sm:$0xff] }
 0x363   : > { %6292 = vmatprep.subr.mxu0 %v6263_v15  ;;  %v6243_v37 = vld [vmem:[#allocation7 + $0x18] sm:$0xff]  ;;  %v6242_v38 = vld [vmem:[#allocation7 + $0x10] sm:$0xff]  ;;  %v6241_v39 = vld [vmem:[#allocation7 + $0x8] sm:$0xff] }
 0x364   : > { %v6233_v13 = vsel %vm6232_vm0, %v6231_v10, 0.0  ;;  %6293 = vmatpush1.msra.mxu0 %v6262_v16  ;;  %v6240_v40 = vld [vmem:[#allocation7] sm:$0xff]  ;;  %v10753_v44 = vld [vmem:[#allocation10 + $0x1c8] sm:$0xff] }
 0x365   : > { %6234 = vadd.xlane.f32.xlu0 %v6233_v13  ;;  %6294 = vmatprep.subr.mxu0 %v6261_v17  ;;  %v6415_v41 = vld [vmem:[#allocation10 + $0x1c0] sm:$0xff]  ;;  %v10755_v46 = vld [vmem:[#allocation10 + $0x1e8] sm:$0xff] }
 0x366   : > { %6295 = vmatpush1.msra.mxu0 %v6260_v18  ;;  %v6419_v43 = vld [vmem:[#allocation10 + $0x1e0] sm:$0xff]  ;;  %v8194_v50 = vcombine.low %v10753_v44, %v10755_v46  ;;  %v8195_v51 = vcombine.high %v10753_v44, %v10755_v46 }
 0x367   : > { %6296 = vmatprep.subr.mxu0 %v6259_v19  ;;  %v8193_v45 = vcombine.high %v6415_v41, %v6419_v43  ;;  %v8192_v47 = vcombine.low %v6415_v41, %v6419_v43  ;;  %v6407_v48 = vld [vmem:[#allocation10 + $0x180] sm:$0xff]  ;;  %v6408_v43 = vld [vmem:[#allocation10 + $0x188] sm:$0xff] }
 0x368   : > { %6297 = vmatpush1.msra.mxu0 %v6258_v20  ;;  %v6411_v49 = vld [vmem:[#allocation10 + $0x1a0] sm:$0xff] }
 0x369   : > { %6298 = vmatprep.subr.mxu0 %v6257_v21  ;;  %v8185_v52 = vcombine.high %v6407_v48, %v6411_v49  ;;  %7169 = vmatprep.subr.bf16.mxu1 %v8193_v45  ;;  %v8184_v53 = vcombine.low %v6407_v48, %v6411_v49  ;;  %v6399_v54 = vld [vmem:[#allocation10 + $0x140] sm:$0xff]  ;;  %v6412_v45 = vld [vmem:[#allocation10 + $0x1a8] sm:$0xff] }
 0x36a   : > { %6299 = vmatpush1.msra.mxu0 %v6256_v22  ;;  %7170 = vmatpush1.bf16.msra.mxu1 %v8192_v47  ;;  %v6403_v55 = vld [vmem:[#allocation10 + $0x160] sm:$0xff]  ;;  %v8187_v49 = vcombine.high %v6408_v43, %v6412_v45 }
 0x36b   : > { %6300 = vmatprep.subr.mxu0 %v6255_v23  ;;  %7171 = vmatprep.subr.bf16.mxu1 %v8185_v52  ;;  %v8177_v56 = vcombine.high %v6399_v54, %v6403_v55  ;;  %v8176_v57 = vcombine.low %v6399_v54, %v6403_v55  ;;  %v6391_v58 = vld [vmem:[#allocation10 + $0x100] sm:$0xff]  ;;  %v6404_v52 = vld [vmem:[#allocation10 + $0x168] sm:$0xff] }
 0x36c   : > { %6301 = vmatpush1.msra.mxu0 %v6254_v24  ;;  %v6395_v59 = vld [vmem:[#allocation10 + $0x120] sm:$0xff]  ;;  %v6392_v55 = vld [vmem:[#allocation10 + $0x108] sm:$0xff] }
 0x36d   : > { %6302 = vmatprep.subr.mxu0 %v6253_v25  ;;  %v8169_v60 = vcombine.high %v6391_v58, %v6395_v59  ;;  %v8168_v61 = vcombine.low %v6391_v58, %v6395_v59  ;;  %v6383_v62 = vld [vmem:[#allocation10 + $0xc0] sm:$0xff]  ;;  %v6384_v59 = vld [vmem:[#allocation10 + $0xc8] sm:$0xff] }
 0x36e   : > { %6303 = vmatpush1.msra.mxu0 %v6252_v26  ;;  %7172 = vmatpush1.bf16.msra.mxu1 %v8184_v53  ;;  %v6387_v63 = vld [vmem:[#allocation10 + $0xe0] sm:$0xff]  ;;  %v8186_v53 = vcombine.low %v6408_v43, %v6412_v45 }
 0x36f   : > { %6304 = vmatprep.subr.mxu0 %v6251_v27  ;;  %7173 = vmatprep.subr.bf16.mxu1 %v8177_v56  ;;  %v8161_v0 = vcombine.high %v6383_v62, %v6387_v63  ;;  %v8160_v1 = vcombine.low %v6383_v62, %v6387_v63  ;;  %v6375_v2 = vld [vmem:[#allocation10 + $0x80] sm:$0xff]  ;;  %v6396_v56 = vld [vmem:[#allocation10 + $0x128] sm:$0xff] }
 0x370   : > { %6305 = vmatpush1.msra.mxu0 %v6250_v29  ;;  %v6379_v3 = vld [vmem:[#allocation10 + $0xa0] sm:$0xff]  ;;  %v8171_v58 = vcombine.high %v6392_v55, %v6396_v56  ;;  %v6376_v62 = vld [vmem:[#allocation10 + $0x88] sm:$0xff] }
 0x371   : > { %6306 = vmatprep.subr.mxu0 %v6249_v30  ;;  %v8153_v4 = vcombine.high %v6375_v2, %v6379_v3  ;;  %v8152_v6 = vcombine.low %v6375_v2, %v6379_v3  ;;  %v6367_v7 = vld [vmem:[#allocation10 + $0x40] sm:$0xff]  ;;  %v6380_v63 = vld [vmem:[#allocation10 + $0xa8] sm:$0xff] }
 0x372   : > { %6307 = vmatpush1.msra.mxu0 %v6248_v31  ;;  %7174 = vmatpush1.bf16.msra.mxu1 %v8176_v57  ;;  %v6371_v8 = vld [vmem:[#allocation10 + $0x60] sm:$0xff]  ;;  %v8155_v46 = vcombine.high %v6376_v62, %v6380_v63  ;;  %v6360_v3 = vld [vmem:[#allocation10 + $0x8] sm:$0xff] }
 0x373   : > { %6308 = vmatprep.subr.mxu0 %v6247_v32  ;;  %7175 = vmatprep.subr.bf16.mxu1 %v8169_v60  ;;  %v8145_v9 = vcombine.high %v6367_v7, %v6371_v8  ;;  %v8144_v10 = vcombine.low %v6367_v7, %v6371_v8  ;;  %v6359_v11 = vld [vmem:[#allocation10] sm:$0xff]  ;;  %v8170_v60 = vcombine.low %v6392_v55, %v6396_v56  ;;  %v6480_v8 = vld [vmem:[#allocation10 + $0x3c8] sm:$0xff]  ;;  %v6421_v55 = vld [vmem:[#allocation10 + $0x1f0] sm:$0xff] }
 0x374   : > { %6309 = vmatpush1.msra.mxu0 %v6246_v33  ;;  %v6363_v12 = vld [vmem:[#allocation10 + $0x20] sm:$0xff]  ;;  %v6418_v56 = vld [vmem:[#allocation10 + $0x1d8] sm:$0xff] }
 0x375   : > { %6310 = vmatprep.subr.mxu0 %v6245_v35  ;;  %v8137_v13 = vcombine.high %v6359_v11, %v6363_v12  ;;  %v8136_v14 = vcombine.low %v6359_v11, %v6363_v12  ;;  %v6479_v15 = vld [vmem:[#allocation10 + $0x3c0] sm:$0xff]  ;;  %v6472_v12 = vld [vmem:[#allocation10 + $0x388] sm:$0xff] }
 0x376   : > { %6311 = vmatpush1.msra.mxu0 %v6244_v36  ;;  %7176 = vmatpush1.bf16.msra.mxu1 %v8168_v61  ;;  %v6483_v16 = vld [vmem:[#allocation10 + $0x3e0] sm:$0xff] }
 0x377   : > { %6312 = vmatprep.subr.mxu0 %v6243_v37  ;;  %7177 = vmatprep.subr.bf16.mxu1 %v8161_v0  ;;  %v8257_v17 = vcombine.high %v6479_v15, %v6483_v16  ;;  %v8256_v18 = vcombine.low %v6479_v15, %v6483_v16  ;;  %v6471_v19 = vld [vmem:[#allocation10 + $0x380] sm:$0xff]  ;;  %v6372_v0 = vld [vmem:[#allocation10 + $0x68] sm:$0xff] }
 0x378   : > { %6313 = vmatpush1.msra.mxu0 %v6242_v38  ;;  %v6475_v20 = vld [vmem:[#allocation10 + $0x3a0] sm:$0xff]  ;;  %v6464_v16 = vld [vmem:[#allocation10 + $0x348] sm:$0xff] }
 0x379   : > { %6314 = vmatprep.subr.mxu0 %v6241_v39  ;;  %v8249_v21 = vcombine.high %v6471_v19, %v6475_v20  ;;  %v8248_v22 = vcombine.low %v6471_v19, %v6475_v20  ;;  %v6463_v23 = vld [vmem:[#allocation10 + $0x340] sm:$0xff]  ;;  %v6456_v20 = vld [vmem:[#allocation10 + $0x308] sm:$0xff] }
 0x37a   : > { %6315 = vmatpush1.msra.mxu0 %v6240_v40  ;;  %7178 = vmatpush1.bf16.msra.mxu1 %v8160_v1  ;;  %v6467_v24 = vld [vmem:[#allocation10 + $0x360] sm:$0xff]  ;;  %v8154_v1 = vcombine.low %v6376_v62, %v6380_v63  ;;  %v6272_v62 = vld [vmem:[#allocation8] sm:$0x3]  ;;  %v6280_v63 = vsub.s32 1, %v10187_v34 }
 0x37b   : > { %7210 = vmatprep.subr.bf16.mxu0 %v8195_v51  ;;  %7179 = vmatprep.subr.bf16.mxu1 %v8153_v4  ;;  %v8241_v25 = vcombine.high %v6463_v23, %v6467_v24  ;;  %v8240_v26 = vcombine.low %v6463_v23, %v6467_v24  ;;  %v6455_v27 = vld [vmem:[#allocation10 + $0x300] sm:$0xff]  ;;  %v6400_v51 = vld [vmem:[#allocation10 + $0x148] sm:$0xff] }
 0x37c   : > { %v6459_v28 = vld [vmem:[#allocation10 + $0x320] sm:$0xff]  ;;  %v8179_v54 = vcombine.high %v6400_v51, %v6404_v52  ;;  %v8178_v57 = vcombine.low %v6400_v51, %v6404_v52  ;;  %v6364_v4 = vld [vmem:[#allocation10 + $0x28] sm:$0xff] }
 0x37d   : > { %v8233_v29 = vcombine.high %v6455_v27, %v6459_v28  ;;  %v8232_v30 = vcombine.low %v6455_v27, %v6459_v28  ;;  %v6447_v31 = vld [vmem:[#allocation10 + $0x2c0] sm:$0xff]  ;;  %v8139_v7 = vcombine.high %v6360_v3, %v6364_v4  ;;  %v6448_v24 = vld [vmem:[#allocation10 + $0x2c8] sm:$0xff] }
 0x37e   : > { %7180 = vmatpush1.bf16.msra.mxu1 %v8152_v6  ;;  %v6451_v32 = vld [vmem:[#allocation10 + $0x2e0] sm:$0xff]  ;;  %v6440_v28 = vld [vmem:[#allocation10 + $0x288] sm:$0xff] }
 0x37f   : > { %7181 = vmatprep.subr.bf16.mxu1 %v8145_v9  ;;  %v8225_v33 = vcombine.high %v6447_v31, %v6451_v32  ;;  %v8224_v35 = vcombine.low %v6447_v31, %v6451_v32  ;;  %v6439_v36 = vld [vmem:[#allocation10 + $0x280] sm:$0xff]  ;;  %v6484_v9 = vld [vmem:[#allocation10 + $0x3e8] sm:$0xff] }
 0x380   : > { %v6443_v37 = vld [vmem:[#allocation10 + $0x2a0] sm:$0xff]  ;;  %v8259_v11 = vcombine.high %v6480_v8, %v6484_v9 }
 0x381   : > { %v8217_v38 = vcombine.high %v6439_v36, %v6443_v37  ;;  %v8216_v39 = vcombine.low %v6439_v36, %v6443_v37  ;;  %v6432_v36 = vld [vmem:[#allocation10 + $0x248] sm:$0xff]  ;;  %v6423_v43 = vld [vmem:[#allocation10 + $0x200] sm:$0xff] }
 0x382   : > { %7182 = vmatpush1.bf16.msra.mxu1 %v8144_v10  ;;  %v8138_v10 = vcombine.low %v6360_v3, %v6364_v4  ;;  %v6427_v45 = vld [vmem:[#allocation10 + $0x220] sm:$0xff] }
 0x383   : > { %7183 = vmatprep.subr.bf16.mxu1 %v8137_v13  ;;  %v6476_v13 = vld [vmem:[#allocation10 + $0x3a8] sm:$0xff] }
 0x384   : > { %v8251_v15 = vcombine.high %v6472_v12, %v6476_v13 }
 0x386   : > { %7184 = vmatpush1.bf16.msra.mxu1 %v8136_v14  ;;  %v8258_v14 = vcombine.low %v6480_v8, %v6484_v9  ;;  %v6410_v8 = vld [vmem:[#allocation10 + $0x198] sm:$0xff] }
 0x387   : > { %7185 = vmatprep.subr.bf16.mxu1 %v8257_v17  ;;  %v6468_v17 = vld [vmem:[#allocation10 + $0x368] sm:$0xff]  ;;  %v6414_v9 = vld [vmem:[#allocation10 + $0x1b8] sm:$0xff] }
 0x388   : > { %v8243_v19 = vcombine.high %v6464_v16, %v6468_v17 }
 0x38a   : > { %7186 = vmatpush2.bf16.msra.mxu1 %v8256_v18  ;;  %v8250_v18 = vcombine.low %v6472_v12, %v6476_v13  ;;  %v6401_v12 = vld [vmem:[#allocation10 + $0x150] sm:$0xff] }
 0x38b   : > { %7187 = vmatprep.subr.bf16.mxu1 %v8249_v21  ;;  %v6460_v21 = vld [vmem:[#allocation10 + $0x328] sm:$0xff] }
 0x38c   : > { %v8235_v23 = vcombine.high %v6456_v20, %v6460_v21 }
 0x38e   : > { %7188 = vmatpush2.bf16.msra.mxu1 %v8248_v22  ;;  %v8242_v22 = vcombine.low %v6464_v16, %v6468_v17  ;;  %v6402_v16 = vld [vmem:[#allocation10 + $0x158] sm:$0xff] }
 0x38f   : > { %7189 = vmatprep.subr.bf16.mxu1 %v8241_v25  ;;  %v6452_v25 = vld [vmem:[#allocation10 + $0x2e8] sm:$0xff]  ;;  %v6406_v17 = vld [vmem:[#allocation10 + $0x178] sm:$0xff] }
 0x390   : > { %v8227_v27 = vcombine.high %v6448_v24, %v6452_v25 }
 0x392   : > { %7190 = vmatpush2.bf16.msra.mxu1 %v8240_v26  ;;  %v8234_v26 = vcombine.low %v6456_v20, %v6460_v21  ;;  %v8183_v21 = vcombine.high %v6402_v16, %v6406_v17 }
 0x393   : > { %7191 = vmatprep.subr.bf16.mxu1 %v8233_v29  ;;  %v6444_v29 = vld [vmem:[#allocation10 + $0x2a8] sm:$0xff] }
 0x394   : > { %v8219_v31 = vcombine.high %v6440_v28, %v6444_v29  ;;  %v8218_v32 = vcombine.low %v6440_v28, %v6444_v29 }
 0x396   : > { %7192 = vmatpush2.bf16.msra.mxu1 %v8232_v30  ;;  %v8226_v30 = vcombine.low %v6448_v24, %v6452_v25  ;;  %v6394_v24 = vld [vmem:[#allocation10 + $0x118] sm:$0xff] }
 0x397   : > { %7193 = vmatprep.subr.bf16.mxu1 %v8225_v33  ;;  %v6431_v33 = vld [vmem:[#allocation10 + $0x240] sm:$0xff]  ;;  %v6398_v25 = vld [vmem:[#allocation10 + $0x138] sm:$0xff] }
 0x398   : > { %v8175_v29 = vcombine.high %v6394_v24, %v6398_v25 }
 0x39a   : > { %7194 = vmatpush2.bf16.msra.mxu1 %v8224_v35  ;;  %v6435_v35 = vld [vmem:[#allocation10 + $0x260] sm:$0xff] }
 0x39b   : > { %7195 = vmatprep.subr.bf16.mxu1 %v8217_v38  ;;  %v8209_v37 = vcombine.high %v6431_v33, %v6435_v35  ;;  %v6436_v38 = vld [vmem:[#allocation10 + $0x268] sm:$0xff] }
 0x39e   : > { %7196 = vmatpush2.bf16.msra.mxu1 %v8216_v39  ;;  %v8210_v39 = vcombine.low %v6432_v36, %v6436_v38 }
 0x39f   : > { %7197 = vmatprep.subr.bf16.mxu1 %v8209_v37 }
 0x3ee   : > { %v6235_v40 = vpop.xlane.xlu0 %6234 }
 0x3ef   : > { %v6236_v41 = vadd.f32 1e-12, %v6235_v40  ;;  %v8211_v40 = vcombine.high %v6432_v36, %v6436_v38  ;;  %v8174_v36 = vcombine.low %v6394_v24, %v6398_v25 }
 0x3f1   : > { %9624 = vrsqrt.f32 %v6236_v41  ;;  %v8208_v41 = vcombine.low %v6431_v33, %v6435_v35  ;;  %v6390_v33 = vld [vmem:[#allocation10 + $0xf8] sm:$0xff] }
 0x3f3   : > { %7198 = vmatpush2.bf16.msra.mxu1 %v8208_v41  ;;  %v6378_v41 = vld [vmem:[#allocation10 + $0x98] sm:$0xff] }
 0x3fe   : > { %v9625_v47 = vpop.eup %9624 }
 0x3ff   : > { %v6238_v48 = vmul.f32 %v9625_v47, %v10748_v5  ;;  %v6388_v5 = vld [vmem:[#allocation10 + $0xe8] sm:$0xff] }
 0x400   : > { %v8163_v61 = vcombine.high %v6384_v59, %v6388_v5  ;;  %v8162_v44 = vcombine.low %v6384_v59, %v6388_v5  ;;  %v6424_v47 = vld [vmem:[#allocation10 + $0x208] sm:$0xff] }
 0x401   : > { %6239 = vst [vmem:[#allocation13] sm:$0x3] %v6238_v48  ;;  %6349 = vmatmul.mubr.f32.vlgmr.msra.gmra.mxu0 %v6238_v48  ;;  %v8201_v48 = vcombine.high %v6423_v43, %v6427_v45 }
 0x402   : > { %7211 = vmatpush1.bf16.msra.mxu0 %v8194_v50  ;;  %v6368_v50 = vld [vmem:[#allocation10 + $0x48] sm:$0xff] }
 0x403   : > { %7212 = vmatprep.subr.bf16.mxu0 %v8187_v49  ;;  %v8147_v2 = vcombine.high %v6368_v50, %v6372_v0  ;;  %v8146_v6 = vcombine.low %v6368_v50, %v6372_v0  ;;  %v6428_v49 = vld [vmem:[#allocation10 + $0x228] sm:$0xff]  ;;  %7199 = vmatprep.subr.bf16.mxu1 %v8201_v48 }
 0x404   : > { %v8202_v51 = vcombine.low %v6424_v47, %v6428_v49  ;;  %v8203_v52 = vcombine.high %v6424_v47, %v6428_v49 }
 0x406   : > { %7213 = vmatpush1.bf16.msra.mxu0 %v8186_v53  ;;  %v8200_v53 = vcombine.low %v6423_v43, %v6427_v45  ;;  %v6382_v43 = vld [vmem:[#allocation10 + $0xb8] sm:$0xff] }
 0x407   : > { %7214 = vmatprep.subr.bf16.mxu0 %v8179_v54  ;;  %v6417_v54 = vld [vmem:[#allocation10 + $0x1d0] sm:$0xff]  ;;  %v8159_v49 = vcombine.high %v6378_v41, %v6382_v43 }
 0x408   : > { %7200 = vmatpush2.bf16.msra.mxu1 %v8200_v53  ;;  %v8196_v59 = vcombine.low %v6417_v54, %v6421_v55  ;;  %v6370_v53 = vld [vmem:[#allocation10 + $0x58] sm:$0xff] }
 0x40a   : > { %7215 = vmatpush1.bf16.msra.mxu0 %v8178_v57  ;;  %v8197_v57 = vcombine.high %v6417_v54, %v6421_v55  ;;  %v6374_v54 = vld [vmem:[#allocation10 + $0x78] sm:$0xff] }
 0x40b   : > { %7216 = vmatprep.subr.bf16.mxu0 %v8171_v58  ;;  %v6422_v58 = vld [vmem:[#allocation10 + $0x1f8] sm:$0xff] }
 0x40c   : > { %v8198_v5 = vcombine.low %v6418_v56, %v6422_v58  ;;  %7251 = vmatprep.subr.bf16.mxu1 %v8197_v57 }
 0x40e   : > { %7217 = vmatpush1.bf16.msra.mxu0 %v8170_v60  ;;  %v8199_v60 = vcombine.high %v6418_v56, %v6422_v58  ;;  %v8158_v56 = vcombine.low %v6378_v41, %v6382_v43  ;;  %v8151_v58 = vcombine.high %v6370_v53, %v6374_v54 }
 0x40f   : > { %7218 = vmatprep.subr.bf16.mxu0 %v8163_v61  ;;  %v6276_v61 = vsub.s32 0, %v10187_v34 }
 0x412   : > { %7219 = vmatpush1.bf16.msra.mxu0 %v8162_v44  ;;  %v6277_v44 = vrot.slane %v6272_v62, %v6276_v61 }
 0x413   : > { %7220 = vmatprep.subr.bf16.mxu0 %v8155_v46  ;;  %v6281_v46 = vrot.slane %v6272_v62, %v6280_v63  ;;  %v6366_v62 = vld [vmem:[#allocation10 + $0x38] sm:$0xff] }
 0x416   : > { %7221 = vmatpush1.bf16.msra.mxu0 %v8154_v1 }
 0x417   : > { %7222 = vmatprep.subr.bf16.mxu0 %v8147_v2 }
 0x41a   : > { %7223 = vmatpush1.bf16.msra.mxu0 %v8146_v6  ;;  %v6409_v6 = vld [vmem:[#allocation10 + $0x190] sm:$0xff] }
 0x41b   : > { %7224 = vmatprep.subr.bf16.mxu0 %v8139_v7  ;;  %v6413_v7 = vld [vmem:[#allocation10 + $0x1b0] sm:$0xff] }
 0x41c   : > { %v8189_v13 = vcombine.high %v6409_v6, %v6413_v7 }
 0x41e   : > { %7225 = vmatpush1.bf16.msra.mxu0 %v8138_v10 }
 0x41f   : > { %7226 = vmatprep.subr.bf16.mxu0 %v8259_v11 }
 0x422   : > { %7227 = vmatpush2.bf16.msra.mxu0 %v8258_v14  ;;  %v8191_v14 = vcombine.high %v6410_v8, %v6414_v9 }
 0x423   : > { %7228 = vmatprep.subr.bf16.mxu0 %v8251_v15  ;;  %v6405_v15 = vld [vmem:[#allocation10 + $0x170] sm:$0xff] }
 0x424   : > { %v8181_v20 = vcombine.high %v6401_v12, %v6405_v15 }
 0x426   : > { %7229 = vmatpush2.bf16.msra.mxu0 %v8250_v18  ;;  %v8188_v18 = vcombine.low %v6409_v6, %v6413_v7 }
 0x427   : > { %7230 = vmatprep.subr.bf16.mxu0 %v8243_v19  ;;  %v8190_v19 = vcombine.low %v6410_v8, %v6414_v9 }
 0x42a   : > { %7231 = vmatpush2.bf16.msra.mxu0 %v8242_v22  ;;  %v6393_v22 = vld [vmem:[#allocation10 + $0x110] sm:$0xff] }
 0x42b   : > { %7232 = vmatprep.subr.bf16.mxu0 %v8235_v23  ;;  %v6397_v23 = vld [vmem:[#allocation10 + $0x130] sm:$0xff] }
 0x42c   : > { %v8173_v28 = vcombine.high %v6393_v22, %v6397_v23  ;;  %v8172_v35 = vcombine.low %v6393_v22, %v6397_v23  ;;  %v6470_v22 = vld [vmem:[#allocation10 + $0x378] sm:$0xff] }
 0x42e   : > { %7233 = vmatpush2.bf16.msra.mxu0 %v8234_v26  ;;  %v8180_v26 = vcombine.low %v6401_v12, %v6405_v15  ;;  %v6477_v12 = vld [vmem:[#allocation10 + $0x3b0] sm:$0xff] }
 0x42f   : > { %7234 = vmatprep.subr.bf16.mxu0 %v8227_v27  ;;  %v8182_v27 = vcombine.low %v6402_v16, %v6406_v17 }
 0x432   : > { %7235 = vmatpush2.bf16.msra.mxu0 %v8226_v30  ;;  %v6385_v30 = vld [vmem:[#allocation10 + $0xd0] sm:$0xff] }
 0x433   : > { %7236 = vmatprep.subr.bf16.mxu0 %v8219_v31  ;;  %v6389_v31 = vld [vmem:[#allocation10 + $0xf0] sm:$0xff] }
 0x434   : > { %v8165_v37 = vcombine.high %v6385_v30, %v6389_v31  ;;  %v8164_v45 = vcombine.low %v6385_v30, %v6389_v31  ;;  %v6462_v30 = vld [vmem:[#allocation10 + $0x338] sm:$0xff] }
 0x436   : > { %7237 = vmatpush2.bf16.msra.mxu0 %v8218_v32  ;;  %v6386_v32 = vld [vmem:[#allocation10 + $0xd8] sm:$0xff] }
 0x437   : > { %7238 = vmatprep.subr.bf16.mxu0 %v8211_v40  ;;  %v8167_v38 = vcombine.high %v6386_v32, %v6390_v33  ;;  %v6381_v40 = vld [vmem:[#allocation10 + $0xb0] sm:$0xff]  ;;  %v8166_v47 = vcombine.low %v6386_v32, %v6390_v33 }
 0x43a   : > { %7239 = vmatpush2.bf16.msra.mxu0 %v8210_v39  ;;  %v6377_v39 = vld [vmem:[#allocation10 + $0x90] sm:$0xff] }
 0x43b   : > { %7240 = vmatprep.subr.bf16.mxu0 %v8203_v52  ;;  %v8157_v48 = vcombine.high %v6377_v39, %v6381_v40  ;;  %v6373_v52 = vld [vmem:[#allocation10 + $0x70] sm:$0xff]  ;;  %v8156_v55 = vcombine.low %v6377_v39, %v6381_v40  ;;  %v6454_v39 = vld [vmem:[#allocation10 + $0x2f8] sm:$0xff] }
 0x43e   : > { %7241 = vmatpush2.bf16.msra.mxu0 %v8202_v51  ;;  %v6369_v51 = vld [vmem:[#allocation10 + $0x50] sm:$0xff] }
 0x43f   : > { %7292 = vmatprep.subr.bf16.mxu0 %v8199_v60  ;;  %v8149_v57 = vcombine.high %v6369_v51, %v6373_v52  ;;  %v6362_v60 = vld [vmem:[#allocation10 + $0x18] sm:$0xff] }
 0x440   : > { %v8142_v7 = vcombine.low %v6362_v60, %v6366_v62 }
 0x4c1   : > { %v6350_v50 = vpop.f32.mrf.mxu0 }
 0x4c2   : > { %v6351_v0 = vadd.f32 %v6350_v50, %v6277_v44  ;;  %v8148_v44 = vcombine.low %v6369_v51, %v6373_v52  ;;  %v6446_v51 = vld [vmem:[#allocation10 + $0x2b8] sm:$0xff] }
 0x4c3   : > { %v6352_v1 = vpop.f32.mrf.mxu0 }
 0x4c4   : > { %v6353_v2 = vadd.f32 %v6352_v1, %v6281_v46  ;;  %v6355_v3 = vmax.f32 %v6351_v0, 0.0  ;;  %v8150_v46 = vcombine.low %v6370_v53, %v6374_v54  ;;  %v8143_v0 = vcombine.high %v6362_v60, %v6366_v62  ;;  %v6481_v1 = vld [vmem:[#allocation10 + $0x3d0] sm:$0xff] }
 0x4c6   : > { %v6356_v4 = vmax.f32 %v6353_v2, 0.0  ;;  %v10771_v11 = vpack.c.bf16 %v6355_v3, %v6355_v3  ;;  %v6485_v2 = vld [vmem:[#allocation10 + $0x3f0] sm:$0xff]  ;;  %v6482_v3 = vld [vmem:[#allocation10 + $0x3d8] sm:$0xff] }
 0x4c7   : > { %v8261_v8 = vcombine.high %v6481_v1, %v6485_v2  ;;  %v8260_v15 = vcombine.low %v6481_v1, %v6485_v2  ;;  %v6430_v1 = vld [vmem:[#allocation10 + $0x238] sm:$0xff] }
 0x4c8   : > { %v6358_v10 = vpack.c.bf16 %v6356_v4, %v6356_v4  ;;  %v6486_v4 = vld [vmem:[#allocation10 + $0x3f8] sm:$0xff] }
 0x4c9   : > { %v8263_v9 = vcombine.high %v6482_v3, %v6486_v4  ;;  %v8262_v16 = vcombine.low %v6482_v3, %v6486_v4 }
 0x4ca   : > { %7201 = vmatprep.mubr.bf16.mxu1 %v6358_v10  ;;  %7242 = vmatprep.mubr.bf16.mxu0 %v6358_v10 }
 0x4cb   : > { %7202 = vmatmul.mubr.bf16.vlgmr.msra.gmra.mxu1 %v10771_v11  ;;  %7243 = vmatmul.mubr.bf16.vlgmr.msra.gmra.mxu0 %v10771_v11 }
 0x4cc   : > { %7252 = vmatpush1.bf16.msra.mxu1 %v8196_v59  ;;  %7293 = vmatpush1.bf16.msra.mxu0 %v8198_v5  ;;  %v6361_v59 = vld [vmem:[#allocation10 + $0x10] sm:$0xff] }
 0x4cd   : > { %7283 = vmatprep.mubr.bf16.mxu1 %v6358_v10  ;;  %7324 = vmatprep.mubr.bf16.mxu0 %v6358_v10  ;;  %v6365_v5 = vld [vmem:[#allocation10 + $0x30] sm:$0xff] }
 0x4ce   : > { %7253 = vmatprep.subr.bf16.mxu1 %v8189_v13  ;;  %7294 = vmatprep.subr.bf16.mxu0 %v8191_v14  ;;  %v8141_v50 = vcombine.high %v6361_v59, %v6365_v5  ;;  %v8140_v6 = vcombine.low %v6361_v59, %v6365_v5  ;;  %v6473_v10 = vld [vmem:[#allocation10 + $0x390] sm:$0xff]  ;;  %v6474_v13 = vld [vmem:[#allocation10 + $0x398] sm:$0xff] }
 0x4cf   : > { %v6478_v14 = vld [vmem:[#allocation10 + $0x3b8] sm:$0xff]  ;;  %v8253_v17 = vcombine.high %v6473_v10, %v6477_v12  ;;  %v8252_v23 = vcombine.low %v6473_v10, %v6477_v12 }
 0x4d0   : > { %7254 = vmatpush1.bf16.msra.mxu1 %v8188_v18  ;;  %7295 = vmatpush1.bf16.msra.mxu0 %v8190_v19  ;;  %v8255_v18 = vcombine.high %v6474_v13, %v6478_v14  ;;  %v6465_v19 = vld [vmem:[#allocation10 + $0x350] sm:$0xff]  ;;  %v8254_v24 = vcombine.low %v6474_v13, %v6478_v14  ;;  %v6438_v59 = vld [vmem:[#allocation10 + $0x278] sm:$0xff] }
 0x4d1   : > { %7255 = vmatprep.subr.bf16.mxu1 %v8181_v20  ;;  %7296 = vmatprep.subr.bf16.mxu0 %v8183_v21  ;;  %v6469_v20 = vld [vmem:[#allocation10 + $0x370] sm:$0xff]  ;;  %v6466_v21 = vld [vmem:[#allocation10 + $0x358] sm:$0xff] }
 0x4d2   : > { %v8245_v25 = vcombine.high %v6465_v19, %v6469_v20  ;;  %v8244_v31 = vcombine.low %v6465_v19, %v6469_v20  ;;  %v8246_v32 = vcombine.low %v6466_v21, %v6470_v22 }
 0x4d4   : > { %7256 = vmatpush1.bf16.msra.mxu1 %v8180_v26  ;;  %7297 = vmatpush1.bf16.msra.mxu0 %v8182_v27  ;;  %v8247_v26 = vcombine.high %v6466_v21, %v6470_v22  ;;  %v6457_v27 = vld [vmem:[#allocation10 + $0x310] sm:$0xff]  ;;  %v6499_v22 = vsub.s32 2, %v10187_v34 }
 0x4d5   : > { %7257 = vmatprep.subr.bf16.mxu1 %v8173_v28  ;;  %7298 = vmatprep.subr.bf16.mxu0 %v8175_v29  ;;  %v6461_v28 = vld [vmem:[#allocation10 + $0x330] sm:$0xff]  ;;  %v6458_v29 = vld [vmem:[#allocation10 + $0x318] sm:$0xff] }
 0x4d6   : > { %v8237_v33 = vcombine.high %v6457_v27, %v6461_v28  ;;  %v8236_v40 = vcombine.low %v6457_v27, %v6461_v28  ;;  %v8238_v41 = vcombine.low %v6458_v29, %v6462_v30 }
 0x4d8   : > { %7258 = vmatpush1.bf16.msra.mxu1 %v8172_v35  ;;  %7299 = vmatpush1.bf16.msra.mxu0 %v8174_v36  ;;  %v8239_v35 = vcombine.high %v6458_v29, %v6462_v30  ;;  %v6449_v36 = vld [vmem:[#allocation10 + $0x2d0] sm:$0xff] }
 0x4d9   : > { %7259 = vmatprep.subr.bf16.mxu1 %v8165_v37  ;;  %7300 = vmatprep.subr.bf16.mxu0 %v8167_v38  ;;  %v6453_v37 = vld [vmem:[#allocation10 + $0x2f0] sm:$0xff]  ;;  %v6450_v38 = vld [vmem:[#allocation10 + $0x2d8] sm:$0xff] }
 0x4da   : > { %v8229_v43 = vcombine.high %v6449_v36, %v6453_v37  ;;  %v8228_v52 = vcombine.low %v6449_v36, %v6453_v37  ;;  %v8230_v53 = vcombine.low %v6450_v38, %v6454_v39 }
 0x4dc   : > { %7260 = vmatpush1.bf16.msra.mxu1 %v8164_v45  ;;  %7301 = vmatpush1.bf16.msra.mxu0 %v8166_v47  ;;  %v8231_v45 = vcombine.high %v6450_v38, %v6454_v39  ;;  %v6441_v47 = vld [vmem:[#allocation10 + $0x290] sm:$0xff] }
 0x4dd   : > { %7261 = vmatprep.subr.bf16.mxu1 %v8157_v48  ;;  %7302 = vmatprep.subr.bf16.mxu0 %v8159_v49  ;;  %v6445_v48 = vld [vmem:[#allocation10 + $0x2b0] sm:$0xff]  ;;  %v6442_v49 = vld [vmem:[#allocation10 + $0x298] sm:$0xff] }
 0x4de   : > { %v8221_v54 = vcombine.high %v6441_v47, %v6445_v48  ;;  %v8220_v5 = vcombine.low %v6441_v47, %v6445_v48  ;;  %v8222_v60 = vcombine.low %v6442_v49, %v6446_v51 }
 0x4e0   : > { %7262 = vmatpush1.bf16.msra.mxu1 %v8156_v55  ;;  %7303 = vmatpush1.bf16.msra.mxu0 %v8158_v56  ;;  %v8223_v55 = vcombine.high %v6442_v49, %v6446_v51  ;;  %v6433_v56 = vld [vmem:[#allocation10 + $0x250] sm:$0xff] }
 0x4e1   : > { %7263 = vmatprep.subr.bf16.mxu1 %v8149_v57  ;;  %7304 = vmatprep.subr.bf16.mxu0 %v8151_v58  ;;  %v6437_v57 = vld [vmem:[#allocation10 + $0x270] sm:$0xff]  ;;  %v6434_v58 = vld [vmem:[#allocation10 + $0x258] sm:$0xff] }
 0x4e2   : > { %v8213_v62 = vcombine.high %v6433_v56, %v6437_v57  ;;  %v8212_v2 = vcombine.low %v6433_v56, %v6437_v57  ;;  %v8214_v3 = vcombine.low %v6434_v58, %v6438_v59 }
 0x4e4   : > { %7264 = vmatpush1.bf16.msra.mxu1 %v8148_v44  ;;  %7305 = vmatpush1.bf16.msra.mxu0 %v8150_v46  ;;  %v8215_v44 = vcombine.high %v6434_v58, %v6438_v59  ;;  %v6425_v46 = vld [vmem:[#allocation10 + $0x210] sm:$0xff] }
 0x4e5   : > { %7265 = vmatprep.subr.bf16.mxu1 %v8141_v50  ;;  %7306 = vmatprep.subr.bf16.mxu0 %v8143_v0  ;;  %v6429_v50 = vld [vmem:[#allocation10 + $0x230] sm:$0xff]  ;;  %v6426_v0 = vld [vmem:[#allocation10 + $0x218] sm:$0xff] }
 0x4e6   : > { %v8205_v4 = vcombine.high %v6425_v46, %v6429_v50 }
 0x4e8   : > { %7266 = vmatpush1.bf16.msra.mxu1 %v8140_v6  ;;  %7307 = vmatpush1.bf16.msra.mxu0 %v8142_v7  ;;  %v8207_v6 = vcombine.high %v6426_v0, %v6430_v1  ;;  %v8204_v7 = vcombine.low %v6425_v46, %v6429_v50 }
 0x4e9   : > { %7267 = vmatprep.subr.bf16.mxu1 %v8261_v8  ;;  %7308 = vmatprep.subr.bf16.mxu0 %v8263_v9  ;;  %v8206_v8 = vcombine.low %v6426_v0, %v6430_v1 }
 0x4ec   : > { %7268 = vmatpush2.bf16.msra.mxu1 %v8260_v15  ;;  %7309 = vmatpush2.bf16.msra.mxu0 %v8262_v16 }
 0x4ed   : > { %7269 = vmatprep.subr.bf16.mxu1 %v8253_v17  ;;  %7310 = vmatprep.subr.bf16.mxu0 %v8255_v18  ;;  %v6487_v18 = vld [vmem:[#allocation11] sm:$0xff] }
 0x4ee   : > { %v6492_v19 = vrot.slane %v6487_v18, %v6276_v61  ;;  %v6496_v20 = vrot.slane %v6487_v18, %v6280_v63  ;;  %v6515_v63 = vsub.s32 6, %v10187_v34 }
 0x4f0   : > { %7270 = vmatpush2.bf16.msra.mxu1 %v8252_v23  ;;  %7311 = vmatpush2.bf16.msra.mxu0 %v8254_v24  ;;  %v6500_v24 = vrot.slane %v6487_v18, %v6499_v22  ;;  %v6516_v38 = vrot.slane %v6487_v18, %v6515_v63 }
 0x4f1   : > { %7271 = vmatprep.subr.bf16.mxu1 %v8245_v25  ;;  %7312 = vmatprep.subr.bf16.mxu0 %v8247_v26  ;;  %v6503_v25 = vsub.s32 3, %v10187_v34 }
 0x4f3   : > { %v6504_v28 = vrot.slane %v6487_v18, %v6503_v25 }
 0x4f4   : > { %7272 = vmatpush2.bf16.msra.mxu1 %v8244_v31  ;;  %7313 = vmatpush2.bf16.msra.mxu0 %v8246_v32  ;;  %v6507_v31 = vsub.s32 4, %v10187_v34 }
 0x4f5   : > { %7273 = vmatprep.subr.bf16.mxu1 %v8237_v33  ;;  %7314 = vmatprep.subr.bf16.mxu0 %v8239_v35  ;;  %v6511_v33 = vsub.s32 5, %v10187_v34  ;;  %v6519_v35 = vsub.s32 7, %v10187_v34 }
 0x4f6   : > { %v6508_v37 = vrot.slane %v6487_v18, %v6507_v31 }
 0x4f8   : > { %7274 = vmatpush2.bf16.msra.mxu1 %v8236_v40  ;;  %7315 = vmatpush2.bf16.msra.mxu0 %v8238_v41  ;;  %v6512_v40 = vrot.slane %v6487_v18, %v6511_v33  ;;  %v6520_v41 = vrot.slane %v6487_v18, %v6519_v35 }
 0x4f9   : > { %7275 = vmatprep.subr.bf16.mxu1 %v8229_v43  ;;  %7316 = vmatprep.subr.bf16.mxu0 %v8231_v45 }
 0x4fc   : > { %7276 = vmatpush2.bf16.msra.mxu1 %v8228_v52  ;;  %7317 = vmatpush2.bf16.msra.mxu0 %v8230_v53 }
 0x4fd   : > { %7277 = vmatprep.subr.bf16.mxu1 %v8221_v54  ;;  %7318 = vmatprep.subr.bf16.mxu0 %v8223_v55 }
 0x500   : > { %7278 = vmatpush2.bf16.msra.mxu1 %v8220_v5  ;;  %7319 = vmatpush2.bf16.msra.mxu0 %v8222_v60 }
 0x501   : > { %7279 = vmatprep.subr.bf16.mxu1 %v8213_v62  ;;  %7320 = vmatprep.subr.bf16.mxu0 %v8215_v44 }
 0x504   : > { %7280 = vmatpush2.bf16.msra.mxu1 %v8212_v2  ;;  %7321 = vmatpush2.bf16.msra.mxu0 %v8214_v3 }
 0x505   : > { %7281 = vmatprep.subr.bf16.mxu1 %v8205_v4  ;;  %7322 = vmatprep.subr.bf16.mxu0 %v8207_v6 }
 0x508   : > { %7282 = vmatpush2.bf16.msra.mxu1 %v8204_v7  ;;  %7323 = vmatpush2.bf16.msra.mxu0 %v8206_v8 }
 0x50b   : > { %7284 = vmatmul.mubr.bf16.vlgmr.msra.gmra.mxu1 %v10771_v11  ;;  %7325 = vmatmul.mubr.bf16.vlgmr.msra.gmra.mxu0 %v10771_v11 }
 0x58b   : > { %v7203_v9 = vpop.f32.mrf.mxu1  ;;  %v7244_v10 = vpop.f32.mrf.mxu0 }
 0x58c   : > { %v7204_v21 = vadd.f32 %v7203_v9, %v6492_v19  ;;  %v7245_v27 = vadd.f32 %v7244_v10, %v6500_v24 }
 0x58d   : > { %v7205_v12 = vpop.f32.mrf.mxu1  ;;  %v7246_v13 = vpop.f32.mrf.mxu0 }
 0x58e   : > { %v7206_v23 = vadd.f32 %v7205_v12, %v6496_v20  ;;  %v8264_v11 = vmul.f32 -1.442695, %v7204_v21  ;;  %v8266_v29 = vmul.f32 -1.442695, %v7245_v27  ;;  %v7247_v30 = vadd.f32 %v7246_v13, %v6504_v28 }
 0x58f   : > { %v7207_v14 = vpop.f32.mrf.mxu1  ;;  %v7248_v15 = vpop.f32.mrf.mxu0 }
 0x590   : > { %v8265_v26 = vmul.f32 -1.442695, %v7206_v23  ;;  %9626 = vpow2.f32 %v8264_v11  ;;  %v8267_v61 = vmul.f32 -1.442695, %v7247_v30 }
 0x591   : > { %v7208_v16 = vpop.f32.mrf.mxu1  ;;  %v7249_v17 = vpop.f32.mrf.mxu0 }
 0x592   : > { %9628 = vpow2.f32 %v8265_v26 }
 0x593   : > { %9630 = vpow2.f32 %v8266_v29 }
 0x594   : > { %9632 = vpow2.f32 %v8267_v61 }
 0x59d   : > { %v9627_v32 = vpop.eup %9626 }
 0x59e   : > { %v7357_v39 = vadd.f32 1.0, %v9627_v32 }
 0x59f   : > { %v9629_v36 = vpop.eup %9628 }
 0x5a0   : > { %v7358_v43 = vadd.f32 1.0, %v9629_v36  ;;  %9634 = vrcp.f32 %v7357_v39  ;;  %v9631_v57 = vpop.eup %9630 }
 0x5a1   : > { %v7359_v44 = vadd.f32 1.0, %v9631_v57  ;;  %v9633_v46 = vpop.eup %9632 }
 0x5a2   : > { %9636 = vrcp.f32 %v7358_v43  ;;  %v7360_v50 = vadd.f32 1.0, %v9633_v46 }
 0x5ad   : > { %v9635_v0 = vpop.eup %9634 }
 0x5ae   : > { %v7381_v13 = vmul.f32 %v9635_v0, %v9635_v0 }
 0x5af   : > { %v9637_v1 = vpop.eup %9636 }
 0x5b0   : > { %v7382_v10 = vmul.f32 %v9637_v1, %v9637_v1  ;;  %v7389_v17 = vsel %vm6232_vm0, %v7381_v13, 0.0 }
 0x5b2   : > { %v7390_v15 = vsel %vm6232_vm0, %v7382_v10, 0.0 }
 0x5b3   : > { %v7391_v19 = vadd.f32 %v7390_v15, %v7389_v17 }
 0x5cb   : > { %v7285_v45 = vpop.f32.mrf.mxu1  ;;  %v7326_v47 = vpop.f32.mrf.mxu0 }
 0x5cc   : > { %v7286_v48 = vadd.f32 %v7285_v45, %v6508_v37  ;;  %v7327_v49 = vadd.f32 %v7326_v47, %v6516_v38 }
 0x5cd   : > { %v7287_v51 = vpop.f32.mrf.mxu1  ;;  %v7328_v52 = vpop.f32.mrf.mxu0 }
 0x5ce   : > { %v8268_v53 = vmul.f32 -1.442695, %v7286_v48  ;;  %v8270_v54 = vmul.f32 -1.442695, %v7327_v49  ;;  %v7288_v55 = vadd.f32 %v7287_v51, %v6512_v40  ;;  %v7329_v56 = vadd.f32 %v7328_v52, %v6520_v41 }
 0x5cf   : > { %v7289_v34 = vpop.f32.mrf.mxu1  ;;  %v7330_v58 = vpop.f32.mrf.mxu0 }
 0x5d0   : > { %9638 = vpow2.f32 %v8268_v53  ;;  %v8269_v59 = vmul.f32 -1.442695, %v7288_v55  ;;  %v8271_v5 = vmul.f32 -1.442695, %v7329_v56 }
 0x5d1   : > { %9640 = vpow2.f32 %v8270_v54  ;;  %v7290_v60 = vpop.f32.mrf.mxu1  ;;  %v7331_v62 = vpop.f32.mrf.mxu0 }
 0x5d2   : > { %9642 = vpow2.f32 %v8269_v59 }
 0x5d3   : > { %9644 = vpow2.f32 %v8271_v5 }
 0x5d4   : > { %9646 = vrcp.f32 %v7359_v44 }
 0x5d5   : > { %9648 = vrcp.f32 %v7360_v50 }
 0x5dd   : > { %v9639_v2 = vpop.eup %9638 }
 0x5de   : > { %v9641_v3 = vpop.eup %9640  ;;  %v7361_v4 = vadd.f32 1.0, %v9639_v2 }
 0x5df   : > { %v9643_v6 = vpop.eup %9642  ;;  %v7363_v7 = vadd.f32 1.0, %v9641_v3 }
 0x5e0   : > { %v9645_v8 = vpop.eup %9644  ;;  %9650 = vrcp.f32 %v7361_v4  ;;  %v7362_v9 = vadd.f32 1.0, %v9643_v6 }
 0x5e1   : > { %9652 = vrcp.f32 %v7363_v7  ;;  %v7364_v12 = vadd.f32 1.0, %v9645_v8  ;;  %v9647_v14 = vpop.eup %9646 }
 0x5e2   : > { %9654 = vrcp.f32 %v7362_v9  ;;  %v7383_v16 = vmul.f32 %v9647_v14, %v9647_v14  ;;  %v9649_v18 = vpop.eup %9648 }
 0x5e3   : > { %9656 = vrcp.f32 %v7364_v12  ;;  %v7384_v20 = vmul.f32 %v9649_v18, %v9649_v18 }
 0x5e4   : > { %v7392_v21 = vsel %vm6232_vm0, %v7383_v16, 0.0 }
 0x5e5   : > { %v7393_v22 = vadd.f32 %v7392_v21, %v7391_v19  ;;  %v7394_v25 = vsel %vm6232_vm0, %v7384_v20, 0.0 }
 0x5e7   : > { %v7395_v27 = vadd.f32 %v7394_v25, %v7393_v22 }
 0x5ed   : > { %v9651_v23 = vpop.eup %9650 }
 0x5ee   : > { %v9653_v11 = vpop.eup %9652  ;;  %v7385_v24 = vmul.f32 %v9651_v23, %v9651_v23 }
 0x5ef   : > { %v9655_v26 = vpop.eup %9654  ;;  %v7387_v30 = vmul.f32 %v9653_v11, %v9653_v11 }
 0x5f0   : > { %v9657_v28 = vpop.eup %9656  ;;  %v7386_v29 = vmul.f32 %v9655_v26, %v9655_v26  ;;  %v7396_v61 = vsel %vm6232_vm0, %v7385_v24, 0.0 }
 0x5f1   : > { %v7397_v31 = vadd.f32 %v7396_v61, %v7395_v27  ;;  %v7388_v63 = vmul.f32 %v9657_v28, %v9657_v28  ;;  %v7400_v35 = vsel %vm6232_vm0, %v7387_v30, 0.0 }
 0x5f2   : > { %v7398_v32 = vsel %vm6232_vm0, %v7386_v29, 0.0 }
 0x5f3   : > { %v7399_v33 = vadd.f32 %v7398_v32, %v7397_v31  ;;  %v7402_v37 = vsel %vm6232_vm0, %v7388_v63, 0.0 }
 0x5f5   : > { %v7401_v36 = vadd.f32 %v7400_v35, %v7399_v33 }
 0x5f7   : > { %v7403_v38 = vadd.f32 %v7402_v37, %v7401_v36 }
 0x5f9   : > { %7404 = vadd.xlane.f32.xlu0 %v7403_v38 }
 0x682   : > { %v7405_v39 = vpop.xlane.xlu0 %7404 }
 0x683   : > { %v7406_v40 = vadd.f32 1e-12, %v7405_v39 }
 0x685   : > { %9658 = vrsqrt.f32 %v7406_v40 }
 0x692   : > { %v9659_v41 = vpop.eup %9658 }
 0x693   : > { %v7408_v43 = vmul.f32 %v9659_v41, %v9635_v0  ;;  %v7409_v45 = vmul.f32 %v9659_v41, %v9637_v1  ;;  %v7410_v47 = vmul.f32 %v9659_v41, %v9647_v14  ;;  %v7411_v48 = vmul.f32 %v9659_v41, %v9649_v18 }
 0x694   : > { %v7412_v49 = vmul.f32 %v9659_v41, %v9651_v23  ;;  %v7413_v51 = vmul.f32 %v9659_v41, %v9655_v26  ;;  %v7414_v52 = vmul.f32 %v9659_v41, %v9653_v11  ;;  %v7415_v53 = vmul.f32 %v9659_v41, %v9657_v28 }
 0x695   : > { %v7424_v54 = vcombine.low %v7408_v43, %v7409_v45  ;;  %v7425_v55 = vcombine.low %v7410_v47, %v7411_v48 }
 0x696   : > { %v7441_v56 = vcombine.low %v7412_v49, %v7413_v51  ;;  %v7442_v57 = vcombine.low %v7414_v52, %v7415_v53 }
 0x697   : > { %v7432_v34 = vrot.slane %v7424_v54, %v10193_v42  ;;  %v7439_v58 = vrot.slane %v7425_v55, %v10193_v42 }
 0x698   : > { %v7449_v59 = vrot.slane %v7441_v56, %v10193_v42  ;;  %v7456_v5 = vrot.slane %v7442_v57, %v10193_v42 }
 0x699   : > { %v7440_v60 = vcombine.low %v7432_v34, %v7439_v58 }
 0x69a   : > { %v7457_v62 = vcombine.low %v7449_v59, %v7456_v5 }
 0x69b   : > { %7460 = vst [vmem:[#allocation14] sm:$0xff] %v7440_v60 }
 0x69c   : > { %7461 = vst [vmem:[#allocation14 + $0x8] sm:$0xff] %v7457_v62 }
 0x69d PF: > { %p9044_p13 = scmp.eq.s32.totalorder %s10005_s11, 1  ;;  %s9937_s26 = smov [#allocation13]  }
 0x69e   : > { %s7469_s20 = sshll.u32 %s9937_s26, 4  ;;  %s9938_s19 = smov [#allocation14]   ;;  %s7470_s20 = int_to_ptr.vmem [resolvable:$true] %s7469_s20 }
 0x69f   : > { %s7480_s21 = sshll.u32 %s9938_s19, 4  ;;  %s9818_s22 = scalar_lea.vmem %s7470_s20, 32  ;;  %s7481_s21 = int_to_ptr.vmem [resolvable:$true] %s7480_s21 }
 0x6a0   : > { %p9819_p0 = scmp.ne.s32.totalorder %s7470_s20, %s9818_s22  ;;  %p9825_p4 = scmp.lt.s32.totalorder %s7470_s20, %s7470_s20 }
 0x6a1   : > { %p9826_p12 = scmp.lt.s32.totalorder %s9818_s22, %s9818_s22 }
 0x6a2   : > { %p9820_p3 = pnand %p9819_p0, %p9044_p13 }
 0x6a3   : > { %p9827_p6 = por %p9826_p12, %p9825_p4 }
 0x6a4   : > { %p9821_p1 = pneg %p9820_p3 }
 0x6a6   : > { %p9828_p2 = pnand %p9827_p6, %p9821_p1 }
 0x6a8   : > { %9831 = shalt.err (!%p9828_p2)
}
 0x6a9   : > { %9006 = dma.vmem_to_hbm [thread:$0]  (%p9044_p13), %s7470_s20, 32, %s10842_s7, [#allocation4]  }
 0x6aa   : > { %s9842_s30 = scalar_lea.vmem %s7481_s21, 256  ;;  %p9849_p9 = scmp.lt.s32.totalorder %s7481_s21, %s7481_s21 }
 0x6ab   : > { %p9843_p7 = scmp.ne.s32.totalorder %s7481_s21, %s9842_s30  ;;  %p9850_p10 = scmp.lt.s32.totalorder %s9842_s30, %s9842_s30 }
 0x6ad   : > { %p9844_p5 = pnand %p9843_p7, %p9044_p13  ;;  %p9851_p11 = por %p9850_p10, %p9849_p9 }
 0x6af   : > { %p9845_p8 = pneg %p9844_p5 }
 0x6b1   : > { %p9852_p0 = pnand %p9851_p11, %p9845_p8 }
 0x6b3   : > { %9855 = shalt.err (!%p9852_p0)
}
 0x6b4   : > { %9008 = dma.vmem_to_hbm [thread:$0]  (%p9044_p13), %s7481_s21, 256, %s10843_s8, [#allocation15]  }
 0x6b5   : > { %9899 = dma.done.wait (%p9044_p13), [#allocation4], 32  }
 0x6b6   : > { %9901 = vsyncadd (%p9044_p13), [#allocation4], 4294967264 }
 0x6b7   : > { %9903 = dma.done.wait (%p9044_p13), [#allocation15], 256  }
 0x6b8   : > { %9905 = vsyncadd (%p9044_p13), [#allocation15], 4294967040 }
 0x6b9 PF: > { %p24_p3 = scmp.ge.s32.totalorder %s10072_s18, 4   ;;  %s10862_s27 = smov %s9912_s28 }
 0x6ba   : > { %s10863_s28 = smov %s9916_s29  ;;  %s10864_s29 = smov %s10083_s15 }
 0x6bb   : > { %s10865_s30 = smov %s10072_s18  ;;  %26 = sbr.rel (!%p24_p3) target bundleno = 8 (0x8), region = 124 }
 0x6c0   :  { %7497 = vsyncpa [#allocation3], 1 }
 0x6c1   :  { %7499 = vsyncpa [#allocation3 + $0x1], 1 }
 0x6c2   :  { %7500 = vsyncpa [#allocation6], 1 }
 0x6c3   :  { %7501 = vsyncpa [#allocation9], 1 }
 0x6c4   :  { %7502 = vsyncpa [#allocation12], 1 }
 0x6c5   :  { %7503 = vsyncpa [#allocation4], 1 }
 0x6c6   :  { %7505 = vsyncpa [#allocation4 + $0x1], 1 }
 0x6c7   :  { %7506 = vsyncpa [#allocation15], 1 }

</bundles_post_ra>
